<compile_context>
chip_gen: v7x
topology: tpu7x:2x2x1
jax: 0.10.0
libtpu: 0.0.40
codegen_flags: <defaults>
</compile_context>

<pallas_src>
import numpy as np
import jax
import jax.numpy as jnp
from jax.experimental import pallas as pl
from jax.experimental.pallas import tpu as pltpu


# ---------------------------------------------------------------------------
# Host-side helpers (align_corners=True bilinear taps / matrices, all static)
# ---------------------------------------------------------------------------
def _ac_taps(n_in, n_out):
    """PyTorch Upsample(align_corners=True) source indices + fractions (numpy)."""
    if n_in == 1:
        z = np.zeros(n_out, np.int32)
        return z, z, np.zeros(n_out, np.float32)
    src = np.arange(n_out, dtype=np.float64) * (n_in - 1) / (n_out - 1)
    i0 = np.clip(np.floor(src), 0, n_in - 1).astype(np.int32)
    i1 = np.minimum(i0 + 1, n_in - 1).astype(np.int32)
    frac = (src - i0).astype(np.float32)
    return i0, i1, frac


def _width_matrix(w, wo):
    """(W, Wo) interpolation matrix so that up_w = x(..., W) @ M."""
    i0, i1, f = _ac_taps(w, wo)
    m = np.zeros((w, wo), np.float32)
    cols = np.arange(wo)
    m[i0, cols] += (1.0 - f)
    m[i1, cols] += f
    return jnp.asarray(m)


# ---------------------------------------------------------------------------
# Fused kernel factory: width upsample (MXU) -> height upsample (2 static taps)
# -> depthwise 3x3 (flat shifted slices + masks, VPU) -> 1x1 conv (MXU).
# One grid step == one batch element.
# ---------------------------------------------------------------------------
def _make_kernel(c, h, w, ho, wo, h0, h1, hf):
    flat_pad = (ho + 2) * wo + 2           # 1-row halo top/bottom + 1-elem guards
    pow2 = (wo & (wo - 1)) == 0

    # Group output rows by their lower source row so each source row pair is loaded once.
    rows_by_src = {}
    for yo in range(ho):
        rows_by_src.setdefault(int(h0[yo]), []).append((yo, float(hf[yo])))

    def kernel(x_ref,      # (C*H, W)            NCHW pixels (free host reshape)
               uw_ref,     # (W, Wo)             width interpolation matrix
               dwk_ref,    # (C, 9)              depthwise taps, t = 3*i + j
               pww_ref,    # (C_out, C)          1x1 conv weight
               bias_ref,   # (C_out, 1)          folded bias (W_pw @ b_dw + b_pw)
               out_ref,    # (C_out, Ho*Wo)
               yw_ref,     # VMEM scratch (C, H, Wo)
               up_ref):    # VMEM scratch (C, (Ho+2)*Wo + 2)  flat row-padded upsample
        # --- 1) width upsample: one MXU matmul (default precision, f32 accumulate)
        yw = jnp.dot(x_ref[...], uw_ref[...], preferred_element_type=jnp.float32)
        yw_ref[...] = yw.reshape(c, h, wo)          # leading-dim split: layout no-op

        # --- 2) zero only the thin halo (top/bottom padded rows + 1-elem guards);
        #        the interior is fully rewritten every step, so nothing else is cleared.
        zrow = jnp.zeros((c, wo + 1), jnp.float32)
        up_ref[:, 0:wo + 1] = zrow
        up_ref[:, (ho + 1) * wo + 1:flat_pad] = zrow

        # --- 3) height upsample: 2 static taps per output row; each row is stored at
        #        its lane offset inside the flat padded buffer (channel-major).
        for src in sorted(rows_by_src):
            r0 = yw_ref[:, src, :]                               # (C, Wo)
            r1 = yw_ref[:, min(src + 1, h - 1), :]               # (C, Wo)
            for yo, f in rows_by_src[src]:
                row = r0 if f == 0.0 else (1.0 - f) * r0 + f * r1
                s = 1 + (yo + 1) * wo
                up_ref[:, s:s + wo] = row

        # --- 4) depthwise 3x3 (groups=C, pad 1): 9 static lane-offset slices of the
        #        padded buffer; row edges handled by the zero halo, column edges by masks.
        lane = jax.lax.broadcasted_iota(jnp.int32, (c, ho * wo), 1)
        xo = (lane & (wo - 1)) if pow2 else (lane % wo)
        not_left = xo > 0
        not_right = xo < (wo - 1)
        acc = jnp.zeros((c, ho * wo), jnp.float32)
        for t in range(9):
            di, dj = divmod(t, 3)
            di -= 1
            dj -= 1
            s = 1 + (1 + di) * wo + dj
            shifted = up_ref[:, s:s + ho * wo]                   # (C, Ho*Wo)
            if dj == -1:
                shifted = jnp.where(not_left, shifted, 0.0)
            elif dj == 1:
                shifted = jnp.where(not_right, shifted, 0.0)
            acc = acc + dwk_ref[:, t:t + 1] * shifted            # per-channel weight

        # --- 5) 1x1 channel reduction + folded biases on the MXU; lane-dense store.
        out = jnp.dot(pww_ref[...], acc, preferred_element_type=jnp.float32)
        out_ref[...] = (out + bias_ref[...]).astype(out_ref.dtype)

    return kernel


# ---------------------------------------------------------------------------
# Wrapper
# ---------------------------------------------------------------------------
def upsample_forward(x, dw_w, dw_b, pw_w, pw_b, scale_factor=2):
    """Fused Pallas forward of the `upsample` module (NCHW in, NCHW out)."""
    n, c, h, w = x.shape
    c_out = pw_w.shape[0]
    ho, wo = h * scale_factor, w * scale_factor

    uw = _width_matrix(w, wo)                         # (W, Wo)
    h0, h1, hf = _ac_taps(h, ho)                      # static numpy taps for height pass
    dwk = dw_w.reshape(c, 9)                          # (C, 9), tap t = 3*i + j
    b_eff = (pw_w @ dw_b + pw_b)[:, None]             # fold depthwise bias through 1x1
    x2 = x.reshape(n, c * h, w)                       # pure reshape of NCHW (free)

    kernel = _make_kernel(c, h, w, ho, wo, h0, h1, hf)

    out = pl.pallas_call(
        kernel,
        out_shape=jax.ShapeDtypeStruct((n, c_out, ho * wo), jnp.float32),
        grid_spec=pltpu.PrefetchScalarGridSpec(
            num_scalar_prefetch=0,
            grid=(n,),
            in_specs=[
                pl.BlockSpec((None, c * h, w), lambda b: (b, 0, 0)),   # pixels / batch
                pl.BlockSpec((w, wo), lambda b: (0, 0)),               # width matrix
                pl.BlockSpec((c, 9), lambda b: (0, 0)),                # depthwise taps
                pl.BlockSpec((c_out, c), lambda b: (0, 0)),            # 1x1 weight
                pl.BlockSpec((c_out, 1), lambda b: (0, 0)),            # folded bias
            ],
            out_specs=pl.BlockSpec((None, c_out, ho * wo), lambda b: (b, 0, 0)),
            scratch_shapes=[
                pltpu.VMEM((c, h, wo), jnp.float32),                   # width-pass result
                pltpu.VMEM((c, (ho + 2) * wo + 2), jnp.float32),       # padded upsample
            ],
        ),
        compiler_params=pltpu.CompilerParams(
            dimension_semantics=("parallel",)),
    )(x2, uw, dwk, pw_w, b_eff)

    return out.reshape(n, c_out, ho, wo)               # pure reshape, already NCHW


# ---------------------------------------------------------------------------
# Pure-JAX reference (mirrors the torch module; independent gather/conv path)
# ---------------------------------------------------------------------------
def _bilinear_upsample_ref(x, h_out, w_out):
    n, c, h, w = x.shape

    def idx_frac(n_out, n_in):
        if n_in == 1:
            z = jnp.zeros((n_out,), jnp.int32)
            return z, z, jnp.zeros((n_out,), jnp.float32)
        src = jnp.arange(n_out, dtype=jnp.float32) * (n_in - 1) / (n_out - 1)
        i0 = jnp.clip(jnp.floor(src), 0, n_in - 1).astype(jnp.int32)
        i1 = jnp.minimum(i0 + 1, n_in - 1)
        return i0, i1, src - i0.astype(jnp.float32)

    h0, h1, fh = idx_frac(h_out, h)
    w0, w1, fw = idx_frac(w_out, w)
    xh = (1.0 - fh)[None, None, :, None] * x[:, :, h0, :] \
        + fh[None, None, :, None] * x[:, :, h1, :]
    return (1.0 - fw)[None, None, None, :] * xh[:, :, :, w0] \
        + fw[None, None, None, :] * xh[:, :, :, w1]


def ref_forward(x, dw_w, dw_b, pw_w, pw_b, scale_factor=2):
    n, c, h, w = x.shape
    up = _bilinear_upsample_ref(x, h * scale_factor, w * scale_factor)
    dw = jax.lax.conv_general_dilated(
        up, dw_w.reshape(c, 1, 3, 3), window_strides=(1, 1),
        padding=((1, 1), (1, 1)), feature_group_count=c,
        dimension_numbers=("NCHW", "OIHW", "NCHW"),
        precision=jax.lax.Precision.HIGHEST)
    dw = dw + dw_b[None, :, None, None]
    out = jax.lax.conv_general_dilated(
        dw, pw_w[:, :, None, None], window_strides=(1, 1),
        padding=((0, 0), (0, 0)),
        dimension_numbers=("NCHW", "OIHW", "NCHW"),
        precision=jax.lax.Precision.HIGHEST)
    return out + pw_b[None, :, None, None]


if __name__ == "__main__":
    key = jax.random.PRNGKey(0)
    N, C_IN, C_OUT, H, W, SCALE = 2, 18, 12, 16, 16, 2   # module defaults: 18 -> 12
    k1, k2, k3, k4, k5 = jax.random.split(key, 5)
    x = jax.random.normal(k1, (N, C_IN, H, W), jnp.float32)
    dw_w = 0.2 * jax.random.normal(k2, (C_IN, 3, 3), jnp.float32)   # Conv2d(C,C,3,groups=C)
    dw_b = 0.1 * jax.random.normal(k3, (C_IN,), jnp.float32)
    pw_w = 0.2 * jax.random.normal(k4, (C_OUT, C_IN), jnp.float32)  # Conv2d(C,C_out,1)
    pw_b = 0.1 * jax.random.normal(k5, (C_OUT,), jnp.float32)

    out = upsample_forward(x, dw_w, dw_b, pw_w, pw_b, scale_factor=SCALE)
    out = jax.block_until_ready(out)

    ref = ref_forward(x, dw_w, dw_b, pw_w, pw_b, scale_factor=SCALE)
    assert out.shape == ref.shape, (out.shape, ref.shape)
    # Kernel matmuls run at default (single-pass) MXU precision; typical max-abs error
    # vs. the HIGHEST-precision reference is ~5e-3.
    err = float(jnp.max(jnp.abs(out - ref)))
    assert err < 3e-2, f"max abs err {err}"
    print("KERNEL_OK")
</pallas_src>

<mosaic_0001>
module attributes {stable_mosaic.version = 11 : i64} {
  func.func @kernel(%arg0: i32, %arg1: memref<1x288x16xf32, #tpu.memory_space<vmem>>, %arg2: memref<16x32xf32, #tpu.memory_space<vmem>>, %arg3: memref<18x9xf32, #tpu.memory_space<vmem>>, %arg4: memref<12x18xf32, #tpu.memory_space<vmem>>, %arg5: memref<12x1xf32, #tpu.memory_space<vmem>>, %arg6: memref<1x12x1024xf32, #tpu.memory_space<vmem>>, %arg7: memref<18x16x32xf32, #tpu.memory_space<vmem>>, %arg8: memref<18x1090xf32, #tpu.memory_space<vmem>>) attributes {dimension_semantics = [#tpu.dimension_semantics<parallel>], iteration_bounds = array<i64: 2>, scalar_prefetch = 0 : i64, scratch_operands = 2 : i64, tpu.core_type = #tpu.core_type<tc>, window_params = [{transform_indices = @transform_0, window_bounds = array<i64: 1, 288, 16>}, {pipeline_mode = #tpu.pipeline_mode<synchronous>, transform_indices = @transform_1, window_bounds = array<i64: 16, 32>}, {pipeline_mode = #tpu.pipeline_mode<synchronous>, transform_indices = @transform_2, window_bounds = array<i64: 18, 9>}, {pipeline_mode = #tpu.pipeline_mode<synchronous>, transform_indices = @transform_3, window_bounds = array<i64: 12, 18>}, {pipeline_mode = #tpu.pipeline_mode<synchronous>, transform_indices = @transform_4, window_bounds = array<i64: 12, 1>}, {transform_indices = @transform_5, window_bounds = array<i64: 1, 12, 1024>}]} {
    %c0 = arith.constant 0 : index
    %c0_0 = arith.constant 0 : index
    %c0_1 = arith.constant 0 : index
    %0 = vector.load %arg1[%c0, %c0_0, %c0_1] : memref<1x288x16xf32, #tpu.memory_space<vmem>>, vector<1x288x16xf32>
    %1 = vector.shape_cast %0 : vector<1x288x16xf32> to vector<288x16xf32>
    %c0_2 = arith.constant 0 : index
    %c0_3 = arith.constant 0 : index
    %2 = vector.load %arg2[%c0_2, %c0_3] : memref<16x32xf32, #tpu.memory_space<vmem>>, vector<16x32xf32>
    %cst = arith.constant dense<0.000000e+00> : vector<288x32xf32>
    %3 = tpu.matmul %1, %2, %cst {dimension_numbers = #tpu.dot_dimension_numbers<[1], [0], [0], [1], [0, 0, 1, 1], [], []>} : vector<288x16xf32>, vector<16x32xf32>, vector<288x32xf32> -> vector<288x32xf32>
    %4 = vector.shape_cast %3 : vector<288x32xf32> to vector<18x16x32xf32>
    %c0_4 = arith.constant 0 : index
    %c0_5 = arith.constant 0 : index
    %c0_6 = arith.constant 0 : index
    %5 = vector.load %arg7[%c0_4, %c0_5, %c0_6] : memref<18x16x32xf32, #tpu.memory_space<vmem>>, vector<18x16x32xf32>
    tpu.vector_store %arg7[%c0_4, %c0_5, %c0_6], %4 {strides = array<i32>} : memref<18x16x32xf32, #tpu.memory_space<vmem>>, vector<18x16x32xf32>,
    %cst_7 = arith.constant 0.000000e+00 : f32
    %6 = vector.broadcast %cst_7 : f32 to vector<18x33xf32>
    %c0_8 = arith.constant 0 : index
    %c0_9 = arith.constant 0 : index
    %7 = vector.load %arg8[%c0_8, %c0_9] : memref<18x1090xf32, #tpu.memory_space<vmem>>, vector<18x33xf32>
    tpu.vector_store %arg8[%c0_8, %c0_9], %6 {strides = array<i32>} : memref<18x1090xf32, #tpu.memory_space<vmem>>, vector<18x33xf32>,
    %c0_10 = arith.constant 0 : index
    %c1057 = arith.constant 1057 : index
    %8 = vector.load %arg8[%c0_10, %c1057] : memref<18x1090xf32, #tpu.memory_space<vmem>>, vector<18x33xf32>
    tpu.vector_store %arg8[%c0_10, %c1057], %6 {strides = array<i32>} : memref<18x1090xf32, #tpu.memory_space<vmem>>, vector<18x33xf32>,
    %c0_11 = arith.constant 0 : index
    %c0_12 = arith.constant 0 : index
    %c0_13 = arith.constant 0 : index
    %9 = vector.load %arg7[%c0_11, %c0_12, %c0_13] : memref<18x16x32xf32, #tpu.memory_space<vmem>>, vector<18x1x32xf32>
    %10 = vector.shape_cast %9 : vector<18x1x32xf32> to vector<18x32xf32>
    %c0_14 = arith.constant 0 : index
    %c1 = arith.constant 1 : index
    %c0_15 = arith.constant 0 : index
    %11 = vector.load %arg7[%c0_14, %c1, %c0_15] : memref<18x16x32xf32, #tpu.memory_space<vmem>>, vector<18x1x32xf32>
    %12 = vector.shape_cast %11 : vector<18x1x32xf32> to vector<18x32xf32>
    %c0_16 = arith.constant 0 : index
    %c33 = arith.constant 33 : index
    %13 = vector.load %arg8[%c0_16, %c33] : memref<18x1090xf32, #tpu.memory_space<vmem>>, vector<18x32xf32>
    tpu.vector_store %arg8[%c0_16, %c33], %10 {strides = array<i32>} : memref<18x1090xf32, #tpu.memory_space<vmem>>, vector<18x32xf32>,
    %cst_17 = arith.constant 5.161290e-01 : f32
    %14 = vector.broadcast %cst_17 : f32 to vector<18x32xf32>
    %15 = arith.mulf %14, %10 : vector<18x32xf32>
    %cst_18 = arith.constant 0.483870953 : f32
    %16 = vector.broadcast %cst_18 : f32 to vector<18x32xf32>
    %17 = arith.mulf %16, %12 : vector<18x32xf32>
    %18 = arith.addf %15, %17 : vector<18x32xf32>
    %c0_19 = arith.constant 0 : index
    %c65 = arith.constant 65 : index
    %19 = vector.load %arg8[%c0_19, %c65] : memref<18x1090xf32, #tpu.memory_space<vmem>>, vector<18x32xf32>
    tpu.vector_store %arg8[%c0_19, %c65], %18 {strides = array<i32>} : memref<18x1090xf32, #tpu.memory_space<vmem>>, vector<18x32xf32>,
    %cst_20 = arith.constant 0.0322580934 : f32
    %20 = vector.broadcast %cst_20 : f32 to vector<18x32xf32>
    %21 = arith.mulf %20, %10 : vector<18x32xf32>
    %cst_21 = arith.constant 0.967741906 : f32
    %22 = vector.broadcast %cst_21 : f32 to vector<18x32xf32>
    %23 = arith.mulf %22, %12 : vector<18x32xf32>
    %24 = arith.addf %21, %23 : vector<18x32xf32>
    %c0_22 = arith.constant 0 : index
    %c97 = arith.constant 97 : index
    %25 = vector.load %arg8[%c0_22, %c97] : memref<18x1090xf32, #tpu.memory_space<vmem>>, vector<18x32xf32>
    tpu.vector_store %arg8[%c0_22, %c97], %24 {strides = array<i32>} : memref<18x1090xf32, #tpu.memory_space<vmem>>, vector<18x32xf32>,
    %c0_23 = arith.constant 0 : index
    %c1_24 = arith.constant 1 : index
    %c0_25 = arith.constant 0 : index
    %26 = vector.load %arg7[%c0_23, %c1_24, %c0_25] : memref<18x16x32xf32, #tpu.memory_space<vmem>>, vector<18x1x32xf32>
    %27 = vector.shape_cast %26 : vector<18x1x32xf32> to vector<18x32xf32>
    %c0_26 = arith.constant 0 : index
    %c2 = arith.constant 2 : index
    %c0_27 = arith.constant 0 : index
    %28 = vector.load %arg7[%c0_26, %c2, %c0_27] : memref<18x16x32xf32, #tpu.memory_space<vmem>>, vector<18x1x32xf32>
    %29 = vector.shape_cast %28 : vector<18x1x32xf32> to vector<18x32xf32>
    %cst_28 = arith.constant 0.54838711 : f32
    %30 = vector.broadcast %cst_28 : f32 to vector<18x32xf32>
    %31 = arith.mulf %30, %27 : vector<18x32xf32>
    %cst_29 = arith.constant 0.45161289 : f32
    %32 = vector.broadcast %cst_29 : f32 to vector<18x32xf32>
    %33 = arith.mulf %32, %29 : vector<18x32xf32>
    %34 = arith.addf %31, %33 : vector<18x32xf32>
    %c0_30 = arith.constant 0 : index
    %c129 = arith.constant 129 : index
    %35 = vector.load %arg8[%c0_30, %c129] : memref<18x1090xf32, #tpu.memory_space<vmem>>, vector<18x32xf32>
    tpu.vector_store %arg8[%c0_30, %c129], %34 {strides = array<i32>} : memref<18x1090xf32, #tpu.memory_space<vmem>>, vector<18x32xf32>,
    %cst_31 = arith.constant 0.0645161271 : f32
    %36 = vector.broadcast %cst_31 : f32 to vector<18x32xf32>
    %37 = arith.mulf %36, %27 : vector<18x32xf32>
    %cst_32 = arith.constant 0.935483872 : f32
    %38 = vector.broadcast %cst_32 : f32 to vector<18x32xf32>
    %39 = arith.mulf %38, %29 : vector<18x32xf32>
    %40 = arith.addf %37, %39 : vector<18x32xf32>
    %c0_33 = arith.constant 0 : index
    %c161 = arith.constant 161 : index
    %41 = vector.load %arg8[%c0_33, %c161] : memref<18x1090xf32, #tpu.memory_space<vmem>>, vector<18x32xf32>
    tpu.vector_store %arg8[%c0_33, %c161], %40 {strides = array<i32>} : memref<18x1090xf32, #tpu.memory_space<vmem>>, vector<18x32xf32>,
    %c0_34 = arith.constant 0 : index
    %c2_35 = arith.constant 2 : index
    %c0_36 = arith.constant 0 : index
    %42 = vector.load %arg7[%c0_34, %c2_35, %c0_36] : memref<18x16x32xf32, #tpu.memory_space<vmem>>, vector<18x1x32xf32>
    %43 = vector.shape_cast %42 : vector<18x1x32xf32> to vector<18x32xf32>
    %c0_37 = arith.constant 0 : index
    %c3 = arith.constant 3 : index
    %c0_38 = arith.constant 0 : index
    %44 = vector.load %arg7[%c0_37, %c3, %c0_38] : memref<18x16x32xf32, #tpu.memory_space<vmem>>, vector<18x1x32xf32>
    %45 = vector.shape_cast %44 : vector<18x1x32xf32> to vector<18x32xf32>
    %cst_39 = arith.constant 0.580645204 : f32
    %46 = vector.broadcast %cst_39 : f32 to vector<18x32xf32>
    %47 = arith.mulf %46, %43 : vector<18x32xf32>
    %cst_40 = arith.constant 0.419354826 : f32
    %48 = vector.broadcast %cst_40 : f32 to vector<18x32xf32>
    %49 = arith.mulf %48, %45 : vector<18x32xf32>
    %50 = arith.addf %47, %49 : vector<18x32xf32>
    %c0_41 = arith.constant 0 : index
    %c193 = arith.constant 193 : index
    %51 = vector.load %arg8[%c0_41, %c193] : memref<18x1090xf32, #tpu.memory_space<vmem>>, vector<18x32xf32>
    tpu.vector_store %arg8[%c0_41, %c193], %50 {strides = array<i32>} : memref<18x1090xf32, #tpu.memory_space<vmem>>, vector<18x32xf32>,
    %cst_42 = arith.constant 0.0967742204 : f32
    %52 = vector.broadcast %cst_42 : f32 to vector<18x32xf32>
    %53 = arith.mulf %52, %43 : vector<18x32xf32>
    %cst_43 = arith.constant 0.903225779 : f32
    %54 = vector.broadcast %cst_43 : f32 to vector<18x32xf32>
    %55 = arith.mulf %54, %45 : vector<18x32xf32>
    %56 = arith.addf %53, %55 : vector<18x32xf32>
    %c0_44 = arith.constant 0 : index
    %c225 = arith.constant 225 : index
    %57 = vector.load %arg8[%c0_44, %c225] : memref<18x1090xf32, #tpu.memory_space<vmem>>, vector<18x32xf32>
    tpu.vector_store %arg8[%c0_44, %c225], %56 {strides = array<i32>} : memref<18x1090xf32, #tpu.memory_space<vmem>>, vector<18x32xf32>,
    %c0_45 = arith.constant 0 : index
    %c3_46 = arith.constant 3 : index
    %c0_47 = arith.constant 0 : index
    %58 = vector.load %arg7[%c0_45, %c3_46, %c0_47] : memref<18x16x32xf32, #tpu.memory_space<vmem>>, vector<18x1x32xf32>
    %59 = vector.shape_cast %58 : vector<18x1x32xf32> to vector<18x32xf32>
    %c0_48 = arith.constant 0 : index
    %c4 = arith.constant 4 : index
    %c0_49 = arith.constant 0 : index
    %60 = vector.load %arg7[%c0_48, %c4, %c0_49] : memref<18x16x32xf32, #tpu.memory_space<vmem>>, vector<18x1x32xf32>
    %61 = vector.shape_cast %60 : vector<18x1x32xf32> to vector<18x32xf32>
    %cst_50 = arith.constant 0.612903237 : f32
    %62 = vector.broadcast %cst_50 : f32 to vector<18x32xf32>
    %63 = arith.mulf %62, %59 : vector<18x32xf32>
    %cst_51 = arith.constant 0.387096763 : f32
    %64 = vector.broadcast %cst_51 : f32 to vector<18x32xf32>
    %65 = arith.mulf %64, %61 : vector<18x32xf32>
    %66 = arith.addf %63, %65 : vector<18x32xf32>
    %c0_52 = arith.constant 0 : index
    %c257 = arith.constant 257 : index
    %67 = vector.load %arg8[%c0_52, %c257] : memref<18x1090xf32, #tpu.memory_space<vmem>>, vector<18x32xf32>
    tpu.vector_store %arg8[%c0_52, %c257], %66 {strides = array<i32>} : memref<18x1090xf32, #tpu.memory_space<vmem>>, vector<18x32xf32>,
    %cst_53 = arith.constant 0.129032254 : f32
    %68 = vector.broadcast %cst_53 : f32 to vector<18x32xf32>
    %69 = arith.mulf %68, %59 : vector<18x32xf32>
    %cst_54 = arith.constant 0.870967745 : f32
    %70 = vector.broadcast %cst_54 : f32 to vector<18x32xf32>
    %71 = arith.mulf %70, %61 : vector<18x32xf32>
    %72 = arith.addf %69, %71 : vector<18x32xf32>
    %c0_55 = arith.constant 0 : index
    %c289 = arith.constant 289 : index
    %73 = vector.load %arg8[%c0_55, %c289] : memref<18x1090xf32, #tpu.memory_space<vmem>>, vector<18x32xf32>
    tpu.vector_store %arg8[%c0_55, %c289], %72 {strides = array<i32>} : memref<18x1090xf32, #tpu.memory_space<vmem>>, vector<18x32xf32>,
    %c0_56 = arith.constant 0 : index
    %c4_57 = arith.constant 4 : index
    %c0_58 = arith.constant 0 : index
    %74 = vector.load %arg7[%c0_56, %c4_57, %c0_58] : memref<18x16x32xf32, #tpu.memory_space<vmem>>, vector<18x1x32xf32>
    %75 = vector.shape_cast %74 : vector<18x1x32xf32> to vector<18x32xf32>
    %c0_59 = arith.constant 0 : index
    %c5 = arith.constant 5 : index
    %c0_60 = arith.constant 0 : index
    %76 = vector.load %arg7[%c0_59, %c5, %c0_60] : memref<18x16x32xf32, #tpu.memory_space<vmem>>, vector<18x1x32xf32>
    %77 = vector.shape_cast %76 : vector<18x1x32xf32> to vector<18x32xf32>
    %cst_61 = arith.constant 0.645161271 : f32
    %78 = vector.broadcast %cst_61 : f32 to vector<18x32xf32>
    %79 = arith.mulf %78, %75 : vector<18x32xf32>
    %cst_62 = arith.constant 0.354838699 : f32
    %80 = vector.broadcast %cst_62 : f32 to vector<18x32xf32>
    %81 = arith.mulf %80, %77 : vector<18x32xf32>
    %82 = arith.addf %79, %81 : vector<18x32xf32>
    %c0_63 = arith.constant 0 : index
    %c321 = arith.constant 321 : index
    %83 = vector.load %arg8[%c0_63, %c321] : memref<18x1090xf32, #tpu.memory_space<vmem>>, vector<18x32xf32>
    tpu.vector_store %arg8[%c0_63, %c321], %82 {strides = array<i32>} : memref<18x1090xf32, #tpu.memory_space<vmem>>, vector<18x32xf32>,
    %cst_64 = arith.constant 0.161290348 : f32
    %84 = vector.broadcast %cst_64 : f32 to vector<18x32xf32>
    %85 = arith.mulf %84, %75 : vector<18x32xf32>
    %cst_65 = arith.constant 0.838709652 : f32
    %86 = vector.broadcast %cst_65 : f32 to vector<18x32xf32>
    %87 = arith.mulf %86, %77 : vector<18x32xf32>
    %88 = arith.addf %85, %87 : vector<18x32xf32>
    %c0_66 = arith.constant 0 : index
    %c353 = arith.constant 353 : index
    %89 = vector.load %arg8[%c0_66, %c353] : memref<18x1090xf32, #tpu.memory_space<vmem>>, vector<18x32xf32>
    tpu.vector_store %arg8[%c0_66, %c353], %88 {strides = array<i32>} : memref<18x1090xf32, #tpu.memory_space<vmem>>, vector<18x32xf32>,
    %c0_67 = arith.constant 0 : index
    %c5_68 = arith.constant 5 : index
    %c0_69 = arith.constant 0 : index
    %90 = vector.load %arg7[%c0_67, %c5_68, %c0_69] : memref<18x16x32xf32, #tpu.memory_space<vmem>>, vector<18x1x32xf32>
    %91 = vector.shape_cast %90 : vector<18x1x32xf32> to vector<18x32xf32>
    %c0_70 = arith.constant 0 : index
    %c6 = arith.constant 6 : index
    %c0_71 = arith.constant 0 : index
    %92 = vector.load %arg7[%c0_70, %c6, %c0_71] : memref<18x16x32xf32, #tpu.memory_space<vmem>>, vector<18x1x32xf32>
    %93 = vector.shape_cast %92 : vector<18x1x32xf32> to vector<18x32xf32>
    %cst_72 = arith.constant 0.677419364 : f32
    %94 = vector.broadcast %cst_72 : f32 to vector<18x32xf32>
    %95 = arith.mulf %94, %91 : vector<18x32xf32>
    %cst_73 = arith.constant 0.322580636 : f32
    %96 = vector.broadcast %cst_73 : f32 to vector<18x32xf32>
    %97 = arith.mulf %96, %93 : vector<18x32xf32>
    %98 = arith.addf %95, %97 : vector<18x32xf32>
    %c0_74 = arith.constant 0 : index
    %c385 = arith.constant 385 : index
    %99 = vector.load %arg8[%c0_74, %c385] : memref<18x1090xf32, #tpu.memory_space<vmem>>, vector<18x32xf32>
    tpu.vector_store %arg8[%c0_74, %c385], %98 {strides = array<i32>} : memref<18x1090xf32, #tpu.memory_space<vmem>>, vector<18x32xf32>,
    %cst_75 = arith.constant 0.193548381 : f32
    %100 = vector.broadcast %cst_75 : f32 to vector<18x32xf32>
    %101 = arith.mulf %100, %91 : vector<18x32xf32>
    %cst_76 = arith.constant 0.806451618 : f32
    %102 = vector.broadcast %cst_76 : f32 to vector<18x32xf32>
    %103 = arith.mulf %102, %93 : vector<18x32xf32>
    %104 = arith.addf %101, %103 : vector<18x32xf32>
    %c0_77 = arith.constant 0 : index
    %c417 = arith.constant 417 : index
    %105 = vector.load %arg8[%c0_77, %c417] : memref<18x1090xf32, #tpu.memory_space<vmem>>, vector<18x32xf32>
    tpu.vector_store %arg8[%c0_77, %c417], %104 {strides = array<i32>} : memref<18x1090xf32, #tpu.memory_space<vmem>>, vector<18x32xf32>,
    %c0_78 = arith.constant 0 : index
    %c6_79 = arith.constant 6 : index
    %c0_80 = arith.constant 0 : index
    %106 = vector.load %arg7[%c0_78, %c6_79, %c0_80] : memref<18x16x32xf32, #tpu.memory_space<vmem>>, vector<18x1x32xf32>
    %107 = vector.shape_cast %106 : vector<18x1x32xf32> to vector<18x32xf32>
    %c0_81 = arith.constant 0 : index
    %c7 = arith.constant 7 : index
    %c0_82 = arith.constant 0 : index
    %108 = vector.load %arg7[%c0_81, %c7, %c0_82] : memref<18x16x32xf32, #tpu.memory_space<vmem>>, vector<18x1x32xf32>
    %109 = vector.shape_cast %108 : vector<18x1x32xf32> to vector<18x32xf32>
    %cst_83 = arith.constant 0.709677458 : f32
    %110 = vector.broadcast %cst_83 : f32 to vector<18x32xf32>
    %111 = arith.mulf %110, %107 : vector<18x32xf32>
    %cst_84 = arith.constant 0.290322572 : f32
    %112 = vector.broadcast %cst_84 : f32 to vector<18x32xf32>
    %113 = arith.mulf %112, %109 : vector<18x32xf32>
    %114 = arith.addf %111, %113 : vector<18x32xf32>
    %c0_85 = arith.constant 0 : index
    %c449 = arith.constant 449 : index
    %115 = vector.load %arg8[%c0_85, %c449] : memref<18x1090xf32, #tpu.memory_space<vmem>>, vector<18x32xf32>
    tpu.vector_store %arg8[%c0_85, %c449], %114 {strides = array<i32>} : memref<18x1090xf32, #tpu.memory_space<vmem>>, vector<18x32xf32>,
    %cst_86 = arith.constant 0.225806475 : f32
    %116 = vector.broadcast %cst_86 : f32 to vector<18x32xf32>
    %117 = arith.mulf %116, %107 : vector<18x32xf32>
    %cst_87 = arith.constant 0.774193525 : f32
    %118 = vector.broadcast %cst_87 : f32 to vector<18x32xf32>
    %119 = arith.mulf %118, %109 : vector<18x32xf32>
    %120 = arith.addf %117, %119 : vector<18x32xf32>
    %c0_88 = arith.constant 0 : index
    %c481 = arith.constant 481 : index
    %121 = vector.load %arg8[%c0_88, %c481] : memref<18x1090xf32, #tpu.memory_space<vmem>>, vector<18x32xf32>
    tpu.vector_store %arg8[%c0_88, %c481], %120 {strides = array<i32>} : memref<18x1090xf32, #tpu.memory_space<vmem>>, vector<18x32xf32>,
    %c0_89 = arith.constant 0 : index
    %c7_90 = arith.constant 7 : index
    %c0_91 = arith.constant 0 : index
    %122 = vector.load %arg7[%c0_89, %c7_90, %c0_91] : memref<18x16x32xf32, #tpu.memory_space<vmem>>, vector<18x1x32xf32>
    %123 = vector.shape_cast %122 : vector<18x1x32xf32> to vector<18x32xf32>
    %c0_92 = arith.constant 0 : index
    %c8 = arith.constant 8 : index
    %c0_93 = arith.constant 0 : index
    %124 = vector.load %arg7[%c0_92, %c8, %c0_93] : memref<18x16x32xf32, #tpu.memory_space<vmem>>, vector<18x1x32xf32>
    %125 = vector.shape_cast %124 : vector<18x1x32xf32> to vector<18x32xf32>
    %cst_94 = arith.constant 0.741935492 : f32
    %126 = vector.broadcast %cst_94 : f32 to vector<18x32xf32>
    %127 = arith.mulf %126, %123 : vector<18x32xf32>
    %cst_95 = arith.constant 0.258064508 : f32
    %128 = vector.broadcast %cst_95 : f32 to vector<18x32xf32>
    %129 = arith.mulf %128, %125 : vector<18x32xf32>
    %130 = arith.addf %127, %129 : vector<18x32xf32>
    %c0_96 = arith.constant 0 : index
    %c513 = arith.constant 513 : index
    %131 = vector.load %arg8[%c0_96, %c513] : memref<18x1090xf32, #tpu.memory_space<vmem>>, vector<18x32xf32>
    tpu.vector_store %arg8[%c0_96, %c513], %130 {strides = array<i32>} : memref<18x1090xf32, #tpu.memory_space<vmem>>, vector<18x32xf32>,
    %cst_97 = arith.constant 0.258064508 : f32
    %132 = vector.broadcast %cst_97 : f32 to vector<18x32xf32>
    %133 = arith.mulf %132, %123 : vector<18x32xf32>
    %cst_98 = arith.constant 0.741935492 : f32
    %134 = vector.broadcast %cst_98 : f32 to vector<18x32xf32>
    %135 = arith.mulf %134, %125 : vector<18x32xf32>
    %136 = arith.addf %133, %135 : vector<18x32xf32>
    %c0_99 = arith.constant 0 : index
    %c545 = arith.constant 545 : index
    %137 = vector.load %arg8[%c0_99, %c545] : memref<18x1090xf32, #tpu.memory_space<vmem>>, vector<18x32xf32>
    tpu.vector_store %arg8[%c0_99, %c545], %136 {strides = array<i32>} : memref<18x1090xf32, #tpu.memory_space<vmem>>, vector<18x32xf32>,
    %c0_100 = arith.constant 0 : index
    %c8_101 = arith.constant 8 : index
    %c0_102 = arith.constant 0 : index
    %138 = vector.load %arg7[%c0_100, %c8_101, %c0_102] : memref<18x16x32xf32, #tpu.memory_space<vmem>>, vector<18x1x32xf32>
    %139 = vector.shape_cast %138 : vector<18x1x32xf32> to vector<18x32xf32>
    %c0_103 = arith.constant 0 : index
    %c9 = arith.constant 9 : index
    %c0_104 = arith.constant 0 : index
    %140 = vector.load %arg7[%c0_103, %c9, %c0_104] : memref<18x16x32xf32, #tpu.memory_space<vmem>>, vector<18x1x32xf32>
    %141 = vector.shape_cast %140 : vector<18x1x32xf32> to vector<18x32xf32>
    %cst_105 = arith.constant 0.774193525 : f32
    %142 = vector.broadcast %cst_105 : f32 to vector<18x32xf32>
    %143 = arith.mulf %142, %139 : vector<18x32xf32>
    %cst_106 = arith.constant 0.225806445 : f32
    %144 = vector.broadcast %cst_106 : f32 to vector<18x32xf32>
    %145 = arith.mulf %144, %141 : vector<18x32xf32>
    %146 = arith.addf %143, %145 : vector<18x32xf32>
    %c0_107 = arith.constant 0 : index
    %c577 = arith.constant 577 : index
    %147 = vector.load %arg8[%c0_107, %c577] : memref<18x1090xf32, #tpu.memory_space<vmem>>, vector<18x32xf32>
    tpu.vector_store %arg8[%c0_107, %c577], %146 {strides = array<i32>} : memref<18x1090xf32, #tpu.memory_space<vmem>>, vector<18x32xf32>,
    %cst_108 = arith.constant 0.290322602 : f32
    %148 = vector.broadcast %cst_108 : f32 to vector<18x32xf32>
    %149 = arith.mulf %148, %139 : vector<18x32xf32>
    %cst_109 = arith.constant 0.709677398 : f32
    %150 = vector.broadcast %cst_109 : f32 to vector<18x32xf32>
    %151 = arith.mulf %150, %141 : vector<18x32xf32>
    %152 = arith.addf %149, %151 : vector<18x32xf32>
    %c0_110 = arith.constant 0 : index
    %c609 = arith.constant 609 : index
    %153 = vector.load %arg8[%c0_110, %c609] : memref<18x1090xf32, #tpu.memory_space<vmem>>, vector<18x32xf32>
    tpu.vector_store %arg8[%c0_110, %c609], %152 {strides = array<i32>} : memref<18x1090xf32, #tpu.memory_space<vmem>>, vector<18x32xf32>,
    %c0_111 = arith.constant 0 : index
    %c9_112 = arith.constant 9 : index
    %c0_113 = arith.constant 0 : index
    %154 = vector.load %arg7[%c0_111, %c9_112, %c0_113] : memref<18x16x32xf32, #tpu.memory_space<vmem>>, vector<18x1x32xf32>
    %155 = vector.shape_cast %154 : vector<18x1x32xf32> to vector<18x32xf32>
    %c0_114 = arith.constant 0 : index
    %c10 = arith.constant 10 : index
    %c0_115 = arith.constant 0 : index
    %156 = vector.load %arg7[%c0_114, %c10, %c0_115] : memref<18x16x32xf32, #tpu.memory_space<vmem>>, vector<18x1x32xf32>
    %157 = vector.shape_cast %156 : vector<18x1x32xf32> to vector<18x32xf32>
    %cst_116 = arith.constant 0.806451618 : f32
    %158 = vector.broadcast %cst_116 : f32 to vector<18x32xf32>
    %159 = arith.mulf %158, %155 : vector<18x32xf32>
    %cst_117 = arith.constant 0.193548381 : f32
    %160 = vector.broadcast %cst_117 : f32 to vector<18x32xf32>
    %161 = arith.mulf %160, %157 : vector<18x32xf32>
    %162 = arith.addf %159, %161 : vector<18x32xf32>
    %c0_118 = arith.constant 0 : index
    %c641 = arith.constant 641 : index
    %163 = vector.load %arg8[%c0_118, %c641] : memref<18x1090xf32, #tpu.memory_space<vmem>>, vector<18x32xf32>
    tpu.vector_store %arg8[%c0_118, %c641], %162 {strides = array<i32>} : memref<18x1090xf32, #tpu.memory_space<vmem>>, vector<18x32xf32>,
    %cst_119 = arith.constant 0.322580636 : f32
    %164 = vector.broadcast %cst_119 : f32 to vector<18x32xf32>
    %165 = arith.mulf %164, %155 : vector<18x32xf32>
    %cst_120 = arith.constant 0.677419364 : f32
    %166 = vector.broadcast %cst_120 : f32 to vector<18x32xf32>
    %167 = arith.mulf %166, %157 : vector<18x32xf32>
    %168 = arith.addf %165, %167 : vector<18x32xf32>
    %c0_121 = arith.constant 0 : index
    %c673 = arith.constant 673 : index
    %169 = vector.load %arg8[%c0_121, %c673] : memref<18x1090xf32, #tpu.memory_space<vmem>>, vector<18x32xf32>
    tpu.vector_store %arg8[%c0_121, %c673], %168 {strides = array<i32>} : memref<18x1090xf32, #tpu.memory_space<vmem>>, vector<18x32xf32>,
    %c0_122 = arith.constant 0 : index
    %c10_123 = arith.constant 10 : index
    %c0_124 = arith.constant 0 : index
    %170 = vector.load %arg7[%c0_122, %c10_123, %c0_124] : memref<18x16x32xf32, #tpu.memory_space<vmem>>, vector<18x1x32xf32>
    %171 = vector.shape_cast %170 : vector<18x1x32xf32> to vector<18x32xf32>
    %c0_125 = arith.constant 0 : index
    %c11 = arith.constant 11 : index
    %c0_126 = arith.constant 0 : index
    %172 = vector.load %arg7[%c0_125, %c11, %c0_126] : memref<18x16x32xf32, #tpu.memory_space<vmem>>, vector<18x1x32xf32>
    %173 = vector.shape_cast %172 : vector<18x1x32xf32> to vector<18x32xf32>
    %cst_127 = arith.constant 0.838709712 : f32
    %174 = vector.broadcast %cst_127 : f32 to vector<18x32xf32>
    %175 = arith.mulf %174, %171 : vector<18x32xf32>
    %cst_128 = arith.constant 0.161290318 : f32
    %176 = vector.broadcast %cst_128 : f32 to vector<18x32xf32>
    %177 = arith.mulf %176, %173 : vector<18x32xf32>
    %178 = arith.addf %175, %177 : vector<18x32xf32>
    %c0_129 = arith.constant 0 : index
    %c705 = arith.constant 705 : index
    %179 = vector.load %arg8[%c0_129, %c705] : memref<18x1090xf32, #tpu.memory_space<vmem>>, vector<18x32xf32>
    tpu.vector_store %arg8[%c0_129, %c705], %178 {strides = array<i32>} : memref<18x1090xf32, #tpu.memory_space<vmem>>, vector<18x32xf32>,
    %cst_130 = arith.constant 0.354838729 : f32
    %180 = vector.broadcast %cst_130 : f32 to vector<18x32xf32>
    %181 = arith.mulf %180, %171 : vector<18x32xf32>
    %cst_131 = arith.constant 0.645161271 : f32
    %182 = vector.broadcast %cst_131 : f32 to vector<18x32xf32>
    %183 = arith.mulf %182, %173 : vector<18x32xf32>
    %184 = arith.addf %181, %183 : vector<18x32xf32>
    %c0_132 = arith.constant 0 : index
    %c737 = arith.constant 737 : index
    %185 = vector.load %arg8[%c0_132, %c737] : memref<18x1090xf32, #tpu.memory_space<vmem>>, vector<18x32xf32>
    tpu.vector_store %arg8[%c0_132, %c737], %184 {strides = array<i32>} : memref<18x1090xf32, #tpu.memory_space<vmem>>, vector<18x32xf32>,
    %c0_133 = arith.constant 0 : index
    %c11_134 = arith.constant 11 : index
    %c0_135 = arith.constant 0 : index
    %186 = vector.load %arg7[%c0_133, %c11_134, %c0_135] : memref<18x16x32xf32, #tpu.memory_space<vmem>>, vector<18x1x32xf32>
    %187 = vector.shape_cast %186 : vector<18x1x32xf32> to vector<18x32xf32>
    %c0_136 = arith.constant 0 : index
    %c12 = arith.constant 12 : index
    %c0_137 = arith.constant 0 : index
    %188 = vector.load %arg7[%c0_136, %c12, %c0_137] : memref<18x16x32xf32, #tpu.memory_space<vmem>>, vector<18x1x32xf32>
    %189 = vector.shape_cast %188 : vector<18x1x32xf32> to vector<18x32xf32>
    %cst_138 = arith.constant 0.870967745 : f32
    %190 = vector.broadcast %cst_138 : f32 to vector<18x32xf32>
    %191 = arith.mulf %190, %187 : vector<18x32xf32>
    %cst_139 = arith.constant 0.129032254 : f32
    %192 = vector.broadcast %cst_139 : f32 to vector<18x32xf32>
    %193 = arith.mulf %192, %189 : vector<18x32xf32>
    %194 = arith.addf %191, %193 : vector<18x32xf32>
    %c0_140 = arith.constant 0 : index
    %c769 = arith.constant 769 : index
    %195 = vector.load %arg8[%c0_140, %c769] : memref<18x1090xf32, #tpu.memory_space<vmem>>, vector<18x32xf32>
    tpu.vector_store %arg8[%c0_140, %c769], %194 {strides = array<i32>} : memref<18x1090xf32, #tpu.memory_space<vmem>>, vector<18x32xf32>,
    %cst_141 = arith.constant 0.387096763 : f32
    %196 = vector.broadcast %cst_141 : f32 to vector<18x32xf32>
    %197 = arith.mulf %196, %187 : vector<18x32xf32>
    %cst_142 = arith.constant 0.612903237 : f32
    %198 = vector.broadcast %cst_142 : f32 to vector<18x32xf32>
    %199 = arith.mulf %198, %189 : vector<18x32xf32>
    %200 = arith.addf %197, %199 : vector<18x32xf32>
    %c0_143 = arith.constant 0 : index
    %c801 = arith.constant 801 : index
    %201 = vector.load %arg8[%c0_143, %c801] : memref<18x1090xf32, #tpu.memory_space<vmem>>, vector<18x32xf32>
    tpu.vector_store %arg8[%c0_143, %c801], %200 {strides = array<i32>} : memref<18x1090xf32, #tpu.memory_space<vmem>>, vector<18x32xf32>,
    %c0_144 = arith.constant 0 : index
    %c12_145 = arith.constant 12 : index
    %c0_146 = arith.constant 0 : index
    %202 = vector.load %arg7[%c0_144, %c12_145, %c0_146] : memref<18x16x32xf32, #tpu.memory_space<vmem>>, vector<18x1x32xf32>
    %203 = vector.shape_cast %202 : vector<18x1x32xf32> to vector<18x32xf32>
    %c0_147 = arith.constant 0 : index
    %c13 = arith.constant 13 : index
    %c0_148 = arith.constant 0 : index
    %204 = vector.load %arg7[%c0_147, %c13, %c0_148] : memref<18x16x32xf32, #tpu.memory_space<vmem>>, vector<18x1x32xf32>
    %205 = vector.shape_cast %204 : vector<18x1x32xf32> to vector<18x32xf32>
    %cst_149 = arith.constant 0.903225779 : f32
    %206 = vector.broadcast %cst_149 : f32 to vector<18x32xf32>
    %207 = arith.mulf %206, %203 : vector<18x32xf32>
    %cst_150 = arith.constant 0.0967741906 : f32
    %208 = vector.broadcast %cst_150 : f32 to vector<18x32xf32>
    %209 = arith.mulf %208, %205 : vector<18x32xf32>
    %210 = arith.addf %207, %209 : vector<18x32xf32>
    %c0_151 = arith.constant 0 : index
    %c833 = arith.constant 833 : index
    %211 = vector.load %arg8[%c0_151, %c833] : memref<18x1090xf32, #tpu.memory_space<vmem>>, vector<18x32xf32>
    tpu.vector_store %arg8[%c0_151, %c833], %210 {strides = array<i32>} : memref<18x1090xf32, #tpu.memory_space<vmem>>, vector<18x32xf32>,
    %cst_152 = arith.constant 0.419354856 : f32
    %212 = vector.broadcast %cst_152 : f32 to vector<18x32xf32>
    %213 = arith.mulf %212, %203 : vector<18x32xf32>
    %cst_153 = arith.constant 0.580645144 : f32
    %214 = vector.broadcast %cst_153 : f32 to vector<18x32xf32>
    %215 = arith.mulf %214, %205 : vector<18x32xf32>
    %216 = arith.addf %213, %215 : vector<18x32xf32>
    %c0_154 = arith.constant 0 : index
    %c865 = arith.constant 865 : index
    %217 = vector.load %arg8[%c0_154, %c865] : memref<18x1090xf32, #tpu.memory_space<vmem>>, vector<18x32xf32>
    tpu.vector_store %arg8[%c0_154, %c865], %216 {strides = array<i32>} : memref<18x1090xf32, #tpu.memory_space<vmem>>, vector<18x32xf32>,
    %c0_155 = arith.constant 0 : index
    %c13_156 = arith.constant 13 : index
    %c0_157 = arith.constant 0 : index
    %218 = vector.load %arg7[%c0_155, %c13_156, %c0_157] : memref<18x16x32xf32, #tpu.memory_space<vmem>>, vector<18x1x32xf32>
    %219 = vector.shape_cast %218 : vector<18x1x32xf32> to vector<18x32xf32>
    %c0_158 = arith.constant 0 : index
    %c14 = arith.constant 14 : index
    %c0_159 = arith.constant 0 : index
    %220 = vector.load %arg7[%c0_158, %c14, %c0_159] : memref<18x16x32xf32, #tpu.memory_space<vmem>>, vector<18x1x32xf32>
    %221 = vector.shape_cast %220 : vector<18x1x32xf32> to vector<18x32xf32>
    %cst_160 = arith.constant 0.935483872 : f32
    %222 = vector.broadcast %cst_160 : f32 to vector<18x32xf32>
    %223 = arith.mulf %222, %219 : vector<18x32xf32>
    %cst_161 = arith.constant 0.0645161271 : f32
    %224 = vector.broadcast %cst_161 : f32 to vector<18x32xf32>
    %225 = arith.mulf %224, %221 : vector<18x32xf32>
    %226 = arith.addf %223, %225 : vector<18x32xf32>
    %c0_162 = arith.constant 0 : index
    %c897 = arith.constant 897 : index
    %227 = vector.load %arg8[%c0_162, %c897] : memref<18x1090xf32, #tpu.memory_space<vmem>>, vector<18x32xf32>
    tpu.vector_store %arg8[%c0_162, %c897], %226 {strides = array<i32>} : memref<18x1090xf32, #tpu.memory_space<vmem>>, vector<18x32xf32>,
    %cst_163 = arith.constant 0.45161289 : f32
    %228 = vector.broadcast %cst_163 : f32 to vector<18x32xf32>
    %229 = arith.mulf %228, %219 : vector<18x32xf32>
    %cst_164 = arith.constant 0.54838711 : f32
    %230 = vector.broadcast %cst_164 : f32 to vector<18x32xf32>
    %231 = arith.mulf %230, %221 : vector<18x32xf32>
    %232 = arith.addf %229, %231 : vector<18x32xf32>
    %c0_165 = arith.constant 0 : index
    %c929 = arith.constant 929 : index
    %233 = vector.load %arg8[%c0_165, %c929] : memref<18x1090xf32, #tpu.memory_space<vmem>>, vector<18x32xf32>
    tpu.vector_store %arg8[%c0_165, %c929], %232 {strides = array<i32>} : memref<18x1090xf32, #tpu.memory_space<vmem>>, vector<18x32xf32>,
    %c0_166 = arith.constant 0 : index
    %c14_167 = arith.constant 14 : index
    %c0_168 = arith.constant 0 : index
    %234 = vector.load %arg7[%c0_166, %c14_167, %c0_168] : memref<18x16x32xf32, #tpu.memory_space<vmem>>, vector<18x1x32xf32>
    %235 = vector.shape_cast %234 : vector<18x1x32xf32> to vector<18x32xf32>
    %c0_169 = arith.constant 0 : index
    %c15 = arith.constant 15 : index
    %c0_170 = arith.constant 0 : index
    %236 = vector.load %arg7[%c0_169, %c15, %c0_170] : memref<18x16x32xf32, #tpu.memory_space<vmem>>, vector<18x1x32xf32>
    %237 = vector.shape_cast %236 : vector<18x1x32xf32> to vector<18x32xf32>
    %cst_171 = arith.constant 0.967741966 : f32
    %238 = vector.broadcast %cst_171 : f32 to vector<18x32xf32>
    %239 = arith.mulf %238, %235 : vector<18x32xf32>
    %cst_172 = arith.constant 0.0322580636 : f32
    %240 = vector.broadcast %cst_172 : f32 to vector<18x32xf32>
    %241 = arith.mulf %240, %237 : vector<18x32xf32>
    %242 = arith.addf %239, %241 : vector<18x32xf32>
    %c0_173 = arith.constant 0 : index
    %c961 = arith.constant 961 : index
    %243 = vector.load %arg8[%c0_173, %c961] : memref<18x1090xf32, #tpu.memory_space<vmem>>, vector<18x32xf32>
    tpu.vector_store %arg8[%c0_173, %c961], %242 {strides = array<i32>} : memref<18x1090xf32, #tpu.memory_space<vmem>>, vector<18x32xf32>,
    %cst_174 = arith.constant 0.483870983 : f32
    %244 = vector.broadcast %cst_174 : f32 to vector<18x32xf32>
    %245 = arith.mulf %244, %235 : vector<18x32xf32>
    %cst_175 = arith.constant 5.161290e-01 : f32
    %246 = vector.broadcast %cst_175 : f32 to vector<18x32xf32>
    %247 = arith.mulf %246, %237 : vector<18x32xf32>
    %248 = arith.addf %245, %247 : vector<18x32xf32>
    %c0_176 = arith.constant 0 : index
    %c993 = arith.constant 993 : index
    %249 = vector.load %arg8[%c0_176, %c993] : memref<18x1090xf32, #tpu.memory_space<vmem>>, vector<18x32xf32>
    tpu.vector_store %arg8[%c0_176, %c993], %248 {strides = array<i32>} : memref<18x1090xf32, #tpu.memory_space<vmem>>, vector<18x32xf32>,
    %c0_177 = arith.constant 0 : index
    %c15_178 = arith.constant 15 : index
    %c0_179 = arith.constant 0 : index
    %250 = vector.load %arg7[%c0_177, %c15_178, %c0_179] : memref<18x16x32xf32, #tpu.memory_space<vmem>>, vector<18x1x32xf32>
    %251 = vector.shape_cast %250 : vector<18x1x32xf32> to vector<18x32xf32>
    %c0_180 = arith.constant 0 : index
    %c1025 = arith.constant 1025 : index
    %252 = vector.load %arg8[%c0_180, %c1025] : memref<18x1090xf32, #tpu.memory_space<vmem>>, vector<18x32xf32>
    tpu.vector_store %arg8[%c0_180, %c1025], %251 {strides = array<i32>} : memref<18x1090xf32, #tpu.memory_space<vmem>>, vector<18x32xf32>,
    %253 = tpu.iota {dimensions = array<i32: 1>} : vector<18x1024xi32>
    %c31_i32 = arith.constant 31 : i32
    %254 = vector.broadcast %c31_i32 : i32 to vector<18x1024xi32>
    %255 = arith.andi %253, %254 : vector<18x1024xi32>
    %c0_i32 = arith.constant 0 : i32
    %256 = vector.broadcast %c0_i32 : i32 to vector<18x1024xi32>
    %257 = arith.cmpi sgt, %255, %256 : vector<18x1024xi32>
    %c31_i32_181 = arith.constant 31 : i32
    %258 = vector.broadcast %c31_i32_181 : i32 to vector<18x1024xi32>
    %259 = arith.cmpi slt, %255, %258 : vector<18x1024xi32>
    %cst_182 = arith.constant 0.000000e+00 : f32
    %260 = vector.broadcast %cst_182 : f32 to vector<18x1024xf32>
    %c0_183 = arith.constant 0 : index
    %c0_184 = arith.constant 0 : index
    %261 = vector.load %arg8[%c0_183, %c0_184] : memref<18x1090xf32, #tpu.memory_space<vmem>>, vector<18x1024xf32>
    %cst_185 = arith.constant 0.000000e+00 : f32
    %262 = vector.broadcast %cst_185 : f32 to vector<18x1024xf32>
    %263 = arith.select %257, %261, %262 : vector<18x1024xi1>, vector<18x1024xf32>
    %c0_186 = arith.constant 0 : index
    %c0_187 = arith.constant 0 : index
    %264 = vector.load %arg3[%c0_186, %c0_187] : memref<18x9xf32, #tpu.memory_space<vmem>>, vector<18x1xf32>
    %265 = vector.broadcast %264 : vector<18x1xf32> to vector<18x1024xf32>
    %266 = arith.mulf %265, %263 : vector<18x1024xf32>
    %267 = arith.addf %260, %266 : vector<18x1024xf32>
    %c0_188 = arith.constant 0 : index
    %c1_189 = arith.constant 1 : index
    %268 = vector.load %arg8[%c0_188, %c1_189] : memref<18x1090xf32, #tpu.memory_space<vmem>>, vector<18x1024xf32>
    %c0_190 = arith.constant 0 : index
    %c1_191 = arith.constant 1 : index
    %269 = vector.load %arg3[%c0_190, %c1_191] : memref<18x9xf32, #tpu.memory_space<vmem>>, vector<18x1xf32>
    %270 = vector.broadcast %269 : vector<18x1xf32> to vector<18x1024xf32>
    %271 = arith.mulf %270, %268 : vector<18x1024xf32>
    %272 = arith.addf %267, %271 : vector<18x1024xf32>
    %c0_192 = arith.constant 0 : index
    %c2_193 = arith.constant 2 : index
    %273 = vector.load %arg8[%c0_192, %c2_193] : memref<18x1090xf32, #tpu.memory_space<vmem>>, vector<18x1024xf32>
    %cst_194 = arith.constant 0.000000e+00 : f32
    %274 = vector.broadcast %cst_194 : f32 to vector<18x1024xf32>
    %275 = arith.select %259, %273, %274 : vector<18x1024xi1>, vector<18x1024xf32>
    %c0_195 = arith.constant 0 : index
    %c2_196 = arith.constant 2 : index
    %276 = vector.load %arg3[%c0_195, %c2_196] : memref<18x9xf32, #tpu.memory_space<vmem>>, vector<18x1xf32>
    %277 = vector.broadcast %276 : vector<18x1xf32> to vector<18x1024xf32>
    %278 = arith.mulf %277, %275 : vector<18x1024xf32>
    %279 = arith.addf %272, %278 : vector<18x1024xf32>
    %c0_197 = arith.constant 0 : index
    %c32 = arith.constant 32 : index
    %280 = vector.load %arg8[%c0_197, %c32] : memref<18x1090xf32, #tpu.memory_space<vmem>>, vector<18x1024xf32>
    %cst_198 = arith.constant 0.000000e+00 : f32
    %281 = vector.broadcast %cst_198 : f32 to vector<18x1024xf32>
    %282 = arith.select %257, %280, %281 : vector<18x1024xi1>, vector<18x1024xf32>
    %c0_199 = arith.constant 0 : index
    %c3_200 = arith.constant 3 : index
    %283 = vector.load %arg3[%c0_199, %c3_200] : memref<18x9xf32, #tpu.memory_space<vmem>>, vector<18x1xf32>
    %284 = vector.broadcast %283 : vector<18x1xf32> to vector<18x1024xf32>
    %285 = arith.mulf %284, %282 : vector<18x1024xf32>
    %286 = arith.addf %279, %285 : vector<18x1024xf32>
    %c0_201 = arith.constant 0 : index
    %c33_202 = arith.constant 33 : index
    %287 = vector.load %arg8[%c0_201, %c33_202] : memref<18x1090xf32, #tpu.memory_space<vmem>>, vector<18x1024xf32>
    %c0_203 = arith.constant 0 : index
    %c4_204 = arith.constant 4 : index
    %288 = vector.load %arg3[%c0_203, %c4_204] : memref<18x9xf32, #tpu.memory_space<vmem>>, vector<18x1xf32>
    %289 = vector.broadcast %288 : vector<18x1xf32> to vector<18x1024xf32>
    %290 = arith.mulf %289, %287 : vector<18x1024xf32>
    %291 = arith.addf %286, %290 : vector<18x1024xf32>
    %c0_205 = arith.constant 0 : index
    %c34 = arith.constant 34 : index
    %292 = vector.load %arg8[%c0_205, %c34] : memref<18x1090xf32, #tpu.memory_space<vmem>>, vector<18x1024xf32>
    %cst_206 = arith.constant 0.000000e+00 : f32
    %293 = vector.broadcast %cst_206 : f32 to vector<18x1024xf32>
    %294 = arith.select %259, %292, %293 : vector<18x1024xi1>, vector<18x1024xf32>
    %c0_207 = arith.constant 0 : index
    %c5_208 = arith.constant 5 : index
    %295 = vector.load %arg3[%c0_207, %c5_208] : memref<18x9xf32, #tpu.memory_space<vmem>>, vector<18x1xf32>
    %296 = vector.broadcast %295 : vector<18x1xf32> to vector<18x1024xf32>
    %297 = arith.mulf %296, %294 : vector<18x1024xf32>
    %298 = arith.addf %291, %297 : vector<18x1024xf32>
    %c0_209 = arith.constant 0 : index
    %c64 = arith.constant 64 : index
    %299 = vector.load %arg8[%c0_209, %c64] : memref<18x1090xf32, #tpu.memory_space<vmem>>, vector<18x1024xf32>
    %cst_210 = arith.constant 0.000000e+00 : f32
    %300 = vector.broadcast %cst_210 : f32 to vector<18x1024xf32>
    %301 = arith.select %257, %299, %300 : vector<18x1024xi1>, vector<18x1024xf32>
    %c0_211 = arith.constant 0 : index
    %c6_212 = arith.constant 6 : index
    %302 = vector.load %arg3[%c0_211, %c6_212] : memref<18x9xf32, #tpu.memory_space<vmem>>, vector<18x1xf32>
    %303 = vector.broadcast %302 : vector<18x1xf32> to vector<18x1024xf32>
    %304 = arith.mulf %303, %301 : vector<18x1024xf32>
    %305 = arith.addf %298, %304 : vector<18x1024xf32>
    %c0_213 = arith.constant 0 : index
    %c65_214 = arith.constant 65 : index
    %306 = vector.load %arg8[%c0_213, %c65_214] : memref<18x1090xf32, #tpu.memory_space<vmem>>, vector<18x1024xf32>
    %c0_215 = arith.constant 0 : index
    %c7_216 = arith.constant 7 : index
    %307 = vector.load %arg3[%c0_215, %c7_216] : memref<18x9xf32, #tpu.memory_space<vmem>>, vector<18x1xf32>
    %308 = vector.broadcast %307 : vector<18x1xf32> to vector<18x1024xf32>
    %309 = arith.mulf %308, %306 : vector<18x1024xf32>
    %310 = arith.addf %305, %309 : vector<18x1024xf32>
    %c0_217 = arith.constant 0 : index
    %c66 = arith.constant 66 : index
    %311 = vector.load %arg8[%c0_217, %c66] : memref<18x1090xf32, #tpu.memory_space<vmem>>, vector<18x1024xf32>
    %cst_218 = arith.constant 0.000000e+00 : f32
    %312 = vector.broadcast %cst_218 : f32 to vector<18x1024xf32>
    %313 = arith.select %259, %311, %312 : vector<18x1024xi1>, vector<18x1024xf32>
    %c0_219 = arith.constant 0 : index
    %c8_220 = arith.constant 8 : index
    %314 = vector.load %arg3[%c0_219, %c8_220] : memref<18x9xf32, #tpu.memory_space<vmem>>, vector<18x1xf32>
    %315 = vector.broadcast %314 : vector<18x1xf32> to vector<18x1024xf32>
    %316 = arith.mulf %315, %313 : vector<18x1024xf32>
    %317 = arith.addf %310, %316 : vector<18x1024xf32>
    %c0_221 = arith.constant 0 : index
    %c0_222 = arith.constant 0 : index
    %318 = vector.load %arg4[%c0_221, %c0_222] : memref<12x18xf32, #tpu.memory_space<vmem>>, vector<12x18xf32>
    %cst_223 = arith.constant dense<0.000000e+00> : vector<12x1024xf32>
    %319 = tpu.matmul %318, %317, %cst_223 {dimension_numbers = #tpu.dot_dimension_numbers<[1], [0], [0], [1], [0, 0, 1, 1], [], []>} : vector<12x18xf32>, vector<18x1024xf32>, vector<12x1024xf32> -> vector<12x1024xf32>
    %c0_224 = arith.constant 0 : index
    %c0_225 = arith.constant 0 : index
    %320 = vector.load %arg5[%c0_224, %c0_225] : memref<12x1xf32, #tpu.memory_space<vmem>>, vector<12x1xf32>
    %321 = vector.broadcast %320 : vector<12x1xf32> to vector<12x1024xf32>
    %322 = arith.addf %319, %321 : vector<12x1024xf32>
    %c0_226 = arith.constant 0 : index
    %c0_227 = arith.constant 0 : index
    %c0_228 = arith.constant 0 : index
    %323 = vector.load %arg6[%c0_226, %c0_227, %c0_228] : memref<1x12x1024xf32, #tpu.memory_space<vmem>>, vector<1x12x1024xf32>
    %324 = vector.shape_cast %323 : vector<1x12x1024xf32> to vector<12x1024xf32>
    %325 = vector.shape_cast %322 : vector<12x1024xf32> to vector<1x12x1024xf32>
    tpu.vector_store %arg6[%c0_226, %c0_227, %c0_228], %325 {strides = array<i32>} : memref<1x12x1024xf32, #tpu.memory_space<vmem>>, vector<1x12x1024xf32>,
    return
  }
  func.func @transform_0(%arg0: i32) -> (i32, i32, i32) {
    %c0_i32 = arith.constant 0 : i32
    %c0_i32_0 = arith.constant 0 : i32
    %c0_i32_1 = arith.constant 0 : i32
    return %arg0, %c0_i32, %c0_i32_0 : i32, i32, i32
  }
  func.func @transform_1(%arg0: i32) -> (i32, i32) {
    %c0_i32 = arith.constant 0 : i32
    %c0_i32_0 = arith.constant 0 : i32
    %c0_i32_1 = arith.constant 0 : i32
    return %c0_i32, %c0_i32_0 : i32, i32
  }
  func.func @transform_2(%arg0: i32) -> (i32, i32) {
    %c0_i32 = arith.constant 0 : i32
    %c0_i32_0 = arith.constant 0 : i32
    %c0_i32_1 = arith.constant 0 : i32
    return %c0_i32, %c0_i32_0 : i32, i32
  }
  func.func @transform_3(%arg0: i32) -> (i32, i32) {
    %c0_i32 = arith.constant 0 : i32
    %c0_i32_0 = arith.constant 0 : i32
    %c0_i32_1 = arith.constant 0 : i32
    return %c0_i32, %c0_i32_0 : i32, i32
  }
  func.func @transform_4(%arg0: i32) -> (i32, i32) {
    %c0_i32 = arith.constant 0 : i32
    %c0_i32_0 = arith.constant 0 : i32
    %c0_i32_1 = arith.constant 0 : i32
    return %c0_i32, %c0_i32_0 : i32, i32
  }
  func.func @transform_5(%arg0: i32) -> (i32, i32, i32) {
    %c0_i32 = arith.constant 0 : i32
    %c0_i32_0 = arith.constant 0 : i32
    %c0_i32_1 = arith.constant 0 : i32
    return %arg0, %c0_i32, %c0_i32_0 : i32, i32, i32
  }
}

</mosaic_0001>

<bundles_post_ra>
// kernel: tpu_custom_call.1
= control target key start
LH: loop header
LB: loop body
LE: loop exit
PB: predicated region body
PF: predicated region fallthrough
CT: control target
= control target key end

     0   :  { %s7265_s18 = smov 0   ;;  %s12302_s0 = inlined_call_operand.vmem [shape: f32[2,288,16], index: 0, kind: input, shape index: {}]   ;;  %s12303_s1 = inlined_call_operand.vmem [shape: f32[16,32], index: 1, kind: input, shape index: {}]   ;;  %s12304_s2 = inlined_call_operand.vmem [shape: f32[18,9], index: 2, kind: input, shape index: {}]   ;;  %s12305_s3 = inlined_call_operand.vmem [shape: f32[12,18], index: 3, kind: input, shape index: {}]   ;;  %s12306_s4 = inlined_call_operand.vmem [shape: f32[12,1], index: 4, kind: input, shape index: {}]   ;;  %s12307_s5 = inlined_call_operand.vmem [shape: f32[2,12,1024], index: 5, kind: output, shape index: {}]  }
   0x1 LB: > { %s6943_s19 = sadd.s32 4294967295, %s7211_s18   ;;  %p6947_p0 = scmp.ge.s32.totalorder %s7211_s18, 1  ;;  %s7211_s18 = sphi %s7265_s18, %s15_s18  }
   0x2   : > { %p187_p1 = scmp.lt.s32.totalorder %s7211_s18, 3 }
   0x4   : > { %p188_p2 = pnand %p6947_p0, %p187_p1 }
   0x6   : > { %191 = sbr.rel (%p188_p2) target bundleno = 1771 (0x6eb), region = 40 }
   0xd   : > { %v261_v0 = vld [vmem:[%s12303_s1] sm:$0xff]  ;;  %v262_v1 = vld [vmem:[%s12303_s1 + $0x8] sm:$0xff]  ;;  %p215_p3 = scmp.lt.s32.totalorder %s6943_s19, 1  ;;  %v12308_v4 = vmov 0   ;;  %v7214_v5 = vmov 1   ;;  %vm263_vm0 = vcmask 130048  }
   0xe   : > { %v7282_v2 = vld [vmem:[%s12304_s2 + $0x8] sm:$0xff]  ;;  %v7102_v3 = vpack.c.bf16 %v262_v1, %v261_v0  ;;  %7155 = vset.pattern.permute.xlu1 %v12308_v4  ;;  %7156 = vset.pattern.permute.xlu0 %v7214_v5  ;;  %v7291_v6 = vld [vmem:[%s12304_s2 + $0x10] sm:$0x3]  ;;  %v7297_v7 = vld [vmem:[%s12304_s2] sm:$0xff]  ;;  %v7215_v18 = vmov 2   ;;  %v7216_v23 = vmov 4  }
   0xf   : > { %s13054_s19 = smov (!%p215_p3, %s6943_s19), 1  ;;  %4894 = vperm.xlu1 %7155, %v7282_v2   ;;  %4978 = vperm.xlu0 %7156, %v7297_v7   ;;  %v7217_v31 = vmov 7   ;;  %v7218_v34 = vmov 3   ;;  %v7219_v48 = vmov 5   ;;  %v12310_v49 = vmov 6   ;;  %s7221_s9 = smov 1  }
  0x10   : > { %7103 = vmatprep.subr.bf16.mxu0 %v7102_v3  ;;  %7122 = vmatprep.subr.bf16.mxu1 %v7102_v3  ;;  %s7124_s28 = smul.u32 288, %s13054_s19  ;;  %vm617_vm1 = vcmask 261120   ;;  %vm719_vm2 = vcmask 1041409   ;;  %s7222_s10 = smov 97   ;;  %vm722_vm3 = vcmask 1042434   ;;  %vm725_vm4 = vcmask 1043459  }
  0x11   : > { %7105 = vmatpush3.bf16.msra.mxu0 %v7102_v3  ;;  %7123 = vmatpush3.bf16.msra.mxu1 %v7102_v3  ;;  %s7223_s11 = smov 33   ;;  %s7224_s12 = smov 65   ;;  %vm728_vm5 = vcmask 1044484   ;;  %vm731_vm6 = vcmask 1045509   ;;  %vm734_vm7 = vcmask 1046534   ;;  %vm737_vm8 = vcmask 1047559  }
  0x12   : > { %s7303_s8 = scalar_lea.vmem %s12302_s0, %s7124_s28  ;;  %vm1004_vm9 = vcmask 1024   ;;  %vm657_vm10 = vcmask 263168   ;;  %vm767_vm11 = vcmask 525576   ;;  %vm1156_vm12 = vcmask 263176   ;;  %s7226_s13 = smov 126  }
  0x13   : > { %4899 = vperm.xlu1 %7155, %v7291_v6   ;;  %v225_v8 = vld [vmem:[%s7303_s8] sm:$0xff]  ;;  %v251_v9 = vld [vmem:[%s7303_s8 + $0xd0] sm:$0xff]  ;;  %v226_v10 = vld [vmem:[%s7303_s8 + $0x8] sm:$0xff]  ;;  %7158 = vset.pattern.permute.xlu0 %v7215_v18  ;;  %vm883_vm13 = vcmask 787976   ;;  %vm1002_vm14 = vcmask 1042184   ;;  %vm662_vm15 = vcmask 533768  }
  0x14   : > { %7048 = vmatprep.mubr.msk.f32.mxu0 %vm263_vm0, %v225_v8  ;;  %7087 = vmatprep.mubr.msk.f32.mxu1 %vm263_vm0, %v251_v9  ;;  %v252_v11 = vld [vmem:[%s7303_s8 + $0xd8] sm:$0xff]  ;;  %v227_v12 = vld [vmem:[%s7303_s8 + $0x10] sm:$0xff]  ;;  %v253_v13 = vld [vmem:[%s7303_s8 + $0xe0] sm:$0xff]  ;;  %s7227_s14 = smov 96   ;;  %s7228_s15 = smov 127  }
  0x15   : > { %7049 = vmatmul.mubr.msk.f32.vlgmr.msra.gmra.mrb[0].mxu0 %vm263_vm0, %v226_v10  ;;  %7088 = vmatmul.mubr.msk.f32.vlgmr.msra.gmra.mrb[0].mxu1 %vm263_vm0, %v252_v11  ;;  %v228_v14 = vld [vmem:[%s7303_s8 + $0x18] sm:$0xff]  ;;  %v254_v15 = vld [vmem:[%s7303_s8 + $0xe8] sm:$0xff]  ;;  %v229_v16 = vld [vmem:[%s7303_s8 + $0x20] sm:$0xff]  ;;  %s7230_s16 = smov 94   ;;  %s7231_s17 = smov 95  }
  0x16   : > { %7051 = vmatprep.mubr.msk.f32.mxu0 %vm263_vm0, %v227_v12  ;;  %7090 = vmatprep.mubr.msk.f32.mxu1 %vm263_vm0, %v253_v13  ;;  %v255_v17 = vld [vmem:[%s7303_s8 + $0xf0] sm:$0xff]  ;;  %v230_v19 = vld [vmem:[%s7303_s8 + $0x28] sm:$0xff]  ;;  %v256_v20 = vld [vmem:[%s7303_s8 + $0xf8] sm:$0xff]  ;;  %s7232_s24 = smov 64   ;;  %s7233_s27 = smov 62  }
  0x17   : > { %7157 = vset.pattern.permute.xlu1 %v7214_v5  ;;  %5325 = vperm.xlu0 %7158, %v7297_v7   ;;  %v231_v21 = vld [vmem:[%s7303_s8 + $0x30] sm:$0xff]  ;;  %v257_v22 = vld [vmem:[%s7303_s8 + $0x100] sm:$0xff]  ;;  %v232_v24 = vld [vmem:[%s7303_s8 + $0x38] sm:$0xff]  ;;  %s7234_s28 = smov 63  }
  0x18   : > { %4982 = vperm.xlu1 %7157, %v7282_v2   ;;  %v258_v25 = vld [vmem:[%s7303_s8 + $0x108] sm:$0xff]  ;;  %v233_v26 = vld [vmem:[%s7303_s8 + $0x40] sm:$0xff]  ;;  %v259_v27 = vld [vmem:[%s7303_s8 + $0x110] sm:$0xff] }
  0x19   : > { %7052 = vmatmul.mubr.msk.f32.gmra.mrb[2].mxu0 %vm263_vm0, %v228_v14  ;;  %7091 = vmatmul.mubr.msk.f32.gmra.mrb[2].mxu1 %vm263_vm0, %v254_v15  ;;  %v234_v28 = vld [vmem:[%s7303_s8 + $0x48] sm:$0xff]  ;;  %v260_v29 = vld [vmem:[%s7303_s8 + $0x118] sm:$0xff]  ;;  %v235_v30 = vld [vmem:[%s7303_s8 + $0x50] sm:$0xff] }
  0x1a   : > { %7054 = vmatprep.mubr.msk.f32.mxu0 %vm263_vm0, %v229_v16  ;;  %7093 = vmatprep.mubr.msk.f32.mxu1 %vm263_vm0, %v255_v17  ;;  %v236_v32 = vld [vmem:[%s7303_s8 + $0x58] sm:$0xff]  ;;  %v237_v33 = vld [vmem:[%s7303_s8 + $0x60] sm:$0xff]  ;;  %v238_v35 = vld [vmem:[%s7303_s8 + $0x68] sm:$0xff] }
  0x1b   : > { %7161 = vset.pattern.permute.xlu0 %v7216_v23  ;;  %v239_v36 = vld [vmem:[%s7303_s8 + $0x70] sm:$0xff]  ;;  %v240_v37 = vld [vmem:[%s7303_s8 + $0x78] sm:$0xff]  ;;  %v241_v38 = vld [vmem:[%s7303_s8 + $0x80] sm:$0xff] }
  0x1c   : > { %4986 = vperm.xlu1 %7157, %v7291_v6   ;;  %5576 = vperm.xlu0 %7161, %v7282_v2   ;;  %v242_v39 = vld [vmem:[%s7303_s8 + $0x88] sm:$0xff]  ;;  %v243_v40 = vld [vmem:[%s7303_s8 + $0x90] sm:$0xff]  ;;  %v244_v41 = vld [vmem:[%s7303_s8 + $0x98] sm:$0xff] }
  0x1d   : > { %7055 = vmatmul.mubr.msk.f32.gmra.mrb[4].mxu0 %vm263_vm0, %v230_v19  ;;  %7094 = vmatmul.mubr.msk.f32.gmra.mrb[4].mxu1 %vm263_vm0, %v256_v20  ;;  %v245_v42 = vld [vmem:[%s7303_s8 + $0xa0] sm:$0xff]  ;;  %v246_v43 = vld [vmem:[%s7303_s8 + $0xa8] sm:$0xff]  ;;  %v247_v44 = vld [vmem:[%s7303_s8 + $0xb0] sm:$0xff] }
  0x1e   : > { %7057 = vmatprep.mubr.msk.f32.mxu0 %vm263_vm0, %v231_v21  ;;  %7096 = vmatprep.mubr.msk.f32.mxu1 %vm263_vm0, %v257_v22  ;;  %v248_v45 = vld [vmem:[%s7303_s8 + $0xb8] sm:$0xff]  ;;  %v249_v46 = vld [vmem:[%s7303_s8 + $0xc0] sm:$0xff]  ;;  %v250_v47 = vld [vmem:[%s7303_s8 + $0xc8] sm:$0xff] }
  0x20   : > { %7159 = vset.pattern.permute.xlu1 %v7215_v18  ;;  %7163 = vset.pattern.permute.xlu0 %v7217_v31 }
  0x21   : > { %7058 = vmatmul.mubr.msk.f32.gmra.mrb[6].mxu0 %vm263_vm0, %v232_v24  ;;  %7097 = vmatmul.mubr.msk.f32.gmra.mrb[6].mxu1 %vm263_vm0, %v258_v25 }
  0x22   : > { %7060 = vmatprep.mubr.msk.f32.mxu0 %vm263_vm0, %v233_v26  ;;  %7099 = vmatprep.mubr.msk.f32.mxu1 %vm263_vm0, %v259_v27 }
  0x23   : > { %5329 = vperm.xlu1 %7159, %v7282_v2   ;;  %6143 = vperm.xlu0 %7163, %v7282_v2  }
  0x25   : > { %7061 = vmatmul.mubr.msk.f32.gmra.mrb[8].mxu0 %vm263_vm0, %v234_v28  ;;  %7100 = vmatmul.mubr.msk.f32.gmra.mrb[8].mxu1 %vm263_vm0, %v260_v29 }
  0x26   : > { %7063 = vmatprep.mubr.msk.f32.mxu0 %vm263_vm0, %v235_v30 }
  0x27   : > { %5333 = vperm.xlu1 %7159, %v7291_v6   ;;  %7165 = vset.pattern.permute.xlu0 %v7218_v34 }
  0x28   : > { %5516 = vperm.xlu0 %7165, %v7282_v2  }
  0x29   : > { %7064 = vmatmul.mubr.msk.f32.gmra.mrb[10].mxu0 %vm263_vm0, %v236_v32 }
  0x2a   : > { %7066 = vmatprep.mubr.msk.f32.mxu0 %vm263_vm0, %v237_v33 }
  0x2b   : > { %7160 = vset.pattern.permute.xlu1 %v7216_v23 }
  0x2c   : > { %5572 = vperm.xlu1 %7160, %v7297_v7   ;;  %5520 = vperm.xlu0 %7165, %v7291_v6  }
  0x2d   : > { %7067 = vmatmul.mubr.msk.f32.gmra.mrb[12].mxu0 %vm263_vm0, %v238_v35 }
  0x2e   : > { %7069 = vmatprep.mubr.msk.f32.mxu0 %vm263_vm0, %v239_v36 }
  0x30   : > { %5580 = vperm.xlu1 %7160, %v7291_v6   ;;  %7168 = vset.pattern.permute.xlu0 %v7219_v48 }
  0x31   : > { %7070 = vmatmul.mubr.msk.f32.gmra.mrb[14].mxu0 %vm263_vm0, %v240_v37 }
  0x32   : > { %7072 = vmatprep.mubr.msk.f32.mxu0 %vm263_vm0, %v241_v38 }
  0x34   : > { %7162 = vset.pattern.permute.xlu1 %v7217_v31 }
  0x35   : > { %7073 = vmatmul.mubr.msk.f32.gmra.mrb[16].mxu0 %vm263_vm0, %v242_v39  ;;  %6139 = vperm.xlu1 %7162, %v7297_v7  }
  0x36   : > { %7075 = vmatprep.mubr.msk.f32.mxu0 %vm263_vm0, %v243_v40 }
  0x39   : > { %7076 = vmatmul.mubr.msk.f32.gmra.mrb[18].mxu0 %vm263_vm0, %v244_v41  ;;  %6147 = vperm.xlu1 %7162, %v7291_v6  }
  0x3a   : > { %7078 = vmatprep.mubr.msk.f32.mxu0 %vm263_vm0, %v245_v42 }
  0x3d   : > { %7079 = vmatmul.mubr.msk.f32.gmra.mrb[20].mxu0 %vm263_vm0, %v246_v43  ;;  %7164 = vset.pattern.permute.xlu1 %v7218_v34 }
  0x3e   : > { %7081 = vmatprep.mubr.msk.f32.mxu0 %vm263_vm0, %v247_v44  ;;  %5512 = vperm.xlu1 %7164, %v7297_v7  }
  0x41   : > { %7082 = vmatmul.mubr.msk.f32.gmra.mrb[22].mxu0 %vm263_vm0, %v248_v45 }
  0x42   : > { %7084 = vmatprep.mubr.msk.f32.mxu0 %vm263_vm0, %v249_v46  ;;  %7166 = vset.pattern.permute.xlu1 %v7219_v48 }
  0x43   : > { %5892 = vperm.xlu1 %7166, %v7297_v7  }
  0x45   : > { %7085 = vmatmul.mubr.msk.f32.gmra.mrb[24].mxu0 %vm263_vm0, %v250_v47  ;;  %vm654_vm0 = vcmask 269312  }
  0x47   : > { %5896 = vperm.xlu1 %7166, %v7282_v2  }
  0x4b   : > { %7167 = vset.pattern.permute.xlu1 %v12310_v49 }
  0x4c   : > { %6079 = vperm.xlu1 %7167, %v7297_v7  }
  0xe8   : > { %v7089_v50 = vpop.f32.mrb[0].mxu1  ;;  %v7050_v51 = vpop.f32.mrb[0].mxu0 }
  0xe9   : > { %645 = vst.msk [vmem:[#allocation2 + $0xd8] sm:$0xff] %vm617_vm1, %v7089_v50  ;;  %v568_v52 = vpop.f32.mrb[1].mxu1  ;;  %619 = vst.msk [vmem:[#allocation2 + $0x8] sm:$0xff] %vm617_vm1, %v7050_v51  ;;  %v438_v53 = vpop.f32.mrb[1].mxu0 }
  0xea   : > { %644 = vst.msk [vmem:[#allocation2 + $0xd0] sm:$0xff] %vm617_vm1, %v568_v52  ;;  %618 = vst.msk [vmem:[#allocation2] sm:$0xff] %vm617_vm1, %v438_v53 }
  0xec   : > { %v7092_v54 = vpop.f32.mrb[2].mxu1  ;;  %v7053_v55 = vpop.f32.mrb[2].mxu0 }
  0xed   : > { %647 = vst.msk [vmem:[#allocation2 + $0xe8] sm:$0xff] %vm617_vm1, %v7092_v54  ;;  %v578_v56 = vpop.f32.mrb[3].mxu1  ;;  %621 = vst.msk [vmem:[#allocation2 + $0x18] sm:$0xff] %vm617_vm1, %v7053_v55  ;;  %v448_v57 = vpop.f32.mrb[3].mxu0 }
  0xee   : > { %646 = vst.msk [vmem:[#allocation2 + $0xe0] sm:$0xff] %vm617_vm1, %v578_v56  ;;  %620 = vst.msk [vmem:[#allocation2 + $0x10] sm:$0xff] %vm617_vm1, %v448_v57 }
  0xf0   : > { %v7095_v58 = vpop.f32.mrb[4].mxu1  ;;  %v7056_v59 = vpop.f32.mrb[4].mxu0  ;;  %v2865_v1 = vld [vmem:[#allocation2 + $0x8] sm:$0x1]  ;;  %v2883_v2 = vld [vmem:[#allocation2 + $0x9] sm:$0x1] }
  0xf1   : > { %649 = vst.msk [vmem:[#allocation2 + $0xf8] sm:$0xff] %vm617_vm1, %v7095_v58  ;;  %v588_v60 = vpop.f32.mrb[5].mxu1  ;;  %623 = vst.msk [vmem:[#allocation2 + $0x28] sm:$0xff] %vm617_vm1, %v7056_v59  ;;  %v458_v61 = vpop.f32.mrb[5].mxu0  ;;  %v7408_v62 = vld [vmem:[#allocation2] sm:$0x1] }
  0xf2   : > { %648 = vst.msk [vmem:[#allocation2 + $0xf0] sm:$0xff] %vm617_vm1, %v588_v60  ;;  %622 = vst.msk [vmem:[#allocation2 + $0x20] sm:$0xff] %vm617_vm1, %v458_v61  ;;  %v7415_v6 = vmul.f32 0.516129, %v7408_v62  ;;  %v7418_v7 = vmul.f32 0.032258093, %v7408_v62 }
  0xf3   : > { %v7420_v10 = vmul.f32 0.2903226, %v2865_v1  ;;  %v7422_v11 = vmul.f32 0.7096774, %v2883_v2  ;;  %v7424_v15 = vmul.f32 0.7741935, %v2865_v1 }
  0xf4   : > { %v7098_v63 = vpop.f32.mrb[6].mxu1  ;;  %v7059_v0 = vpop.f32.mrb[6].mxu0  ;;  %v2866_v8 = vld [vmem:[#allocation2 + $0x18] sm:$0x1]  ;;  %v2884_v9 = vld [vmem:[#allocation2 + $0x19] sm:$0x1] }
  0xf5   : > { %651 = vst.msk [vmem:[#allocation2 + $0x108] sm:$0xff] %vm617_vm1, %v7098_v63  ;;  %v598_v3 = vpop.f32.mrb[7].mxu1  ;;  %625 = vst.msk [vmem:[#allocation2 + $0x38] sm:$0xff] %vm617_vm1, %v7059_v0  ;;  %v468_v5 = vpop.f32.mrb[7].mxu0  ;;  %v7428_v18 = vmul.f32 0.2903226, %v2866_v8 }
  0xf6   : > { %650 = vst.msk [vmem:[#allocation2 + $0x100] sm:$0xff] %vm617_vm1, %v598_v3  ;;  %624 = vst.msk [vmem:[#allocation2 + $0x30] sm:$0xff] %vm617_vm1, %v468_v5  ;;  %v7430_v19 = vmul.f32 0.22580644, %v2883_v2  ;;  %v7436_v21 = vmul.f32 0.7096774, %v2884_v9 }
  0xf7   : > { %v7438_v22 = vmul.f32 0.7741935, %v2866_v8  ;;  %v7445_v25 = vmul.f32 0.22580644, %v2884_v9 }
  0xf8   : > { %v7101_v12 = vpop.f32.mrb[8].mxu1  ;;  %v7062_v13 = vpop.f32.mrb[8].mxu0  ;;  %v2867_v14 = vld [vmem:[#allocation2 + $0x28] sm:$0x1]  ;;  %v7434_v20 = vld [vmem:[#allocation2 + $0x29] sm:$0x1] }
  0xf9   : > { %653 = vst.msk [vmem:[#allocation2 + $0x118] sm:$0xff] %vm617_vm1, %v7101_v12  ;;  %v608_v16 = vpop.f32.mrb[9].mxu1  ;;  %627 = vst.msk [vmem:[#allocation2 + $0x48] sm:$0xff] %vm617_vm1, %v7062_v13  ;;  %v478_v17 = vpop.f32.mrb[9].mxu0  ;;  %v7440_v23 = vmul.f32 0.2903226, %v2867_v14 }
  0xfa   : > { %652 = vst.msk [vmem:[#allocation2 + $0x110] sm:$0xff] %vm617_vm1, %v608_v16  ;;  %626 = vst.msk [vmem:[#allocation2 + $0x40] sm:$0xff] %vm617_vm1, %v478_v17  ;;  %v7443_v24 = vmul.f32 0.7096774, %v7434_v20  ;;  %v7447_v28 = vmul.f32 0.7741935, %v2867_v14 }
  0xfc   : > { %v2881_v26 = vld [vmem:[#allocation2 + $0x108] sm:$0x1]  ;;  %v2899_v27 = vld [vmem:[#allocation2 + $0x109] sm:$0x1]  ;;  %v7065_v34 = vpop.f32.mrb[10].mxu0 }
  0xfd   : > { %v3031_v29 = vmul.f32 0.2903226, %v2881_v26  ;;  %v3049_v30 = vmul.f32 0.7096774, %v2899_v27  ;;  %v680_v31 = vld [vmem:[#allocation2 + $0x100] sm:$0x1] }
  0xfe   : > { %v7449_v32 = vmul.f32 0.516129, %v680_v31  ;;  %v7451_v33 = vmul.f32 0.032258093, %v680_v31  ;;  %629 = vst.msk [vmem:[#allocation2 + $0x58] sm:$0xff] %vm617_vm1, %v7065_v34 }
  0xff   : > { %v488_v35 = vpop.f32.mrb[11].mxu0  ;;  %v3148_v36 = vld [vmem:[#allocation2 + $0x109] sm:$0x1]  ;;  %v7454_v37 = vld [vmem:[#allocation2 + $0x10a] sm:$0x1]  ;;  %v3067_v59 = vadd.f32 %v3049_v30, %v3031_v29 }
 0x100   : > { %v4741_v38 = vld [vmem:[#allocation2 + $0x10f] sm:$0x1]  ;;  %v4742_v39 = vld [vmem:[#allocation2 + $0x11f] sm:$0x1]  ;;  %v2882_v40 = vld [vmem:[#allocation2 + $0x118] sm:$0x1] }
 0x101   : > { %v2900_v41 = vld [vmem:[#allocation2 + $0x119] sm:$0x1]  ;;  %628 = vst.msk [vmem:[#allocation2 + $0x50] sm:$0xff] %vm617_vm1, %v488_v35  ;;  %v4789_v42 = vrot.slane %v4742_v39, 7  ;;  %v3032_v43 = vmul.f32 0.2903226, %v2882_v40 }
 0x102   : > { %v3050_v44 = vmul.f32 0.7096774, %v2900_v41  ;;  %v7068_v45 = vpop.f32.mrb[12].mxu0  ;;  %v7457_v46 = vld [vmem:[#allocation2 + $0x110] sm:$0x1] }
 0x103   : > { %v3149_v47 = vld [vmem:[#allocation2 + $0x119] sm:$0x1]  ;;  %v3167_v48 = vld [vmem:[#allocation2 + $0x11a] sm:$0x1]  ;;  %631 = vst.msk [vmem:[#allocation2 + $0x68] sm:$0xff] %vm617_vm1, %v7068_v45  ;;  %v4790_v50 = vsel %vm719_vm2, %v4789_v42, %v4741_v38  ;;  %v753_v52 = vrot.slane %v7457_v46, 7 }
 0x104   : > { %v3068_v51 = vadd.f32 %v3050_v44, %v3032_v43  ;;  %v3298_v53 = vmul.f32 0.32258064, %v3148_v36  ;;  %v498_v54 = vpop.f32.mrb[13].mxu0  ;;  %v7462_v55 = vld [vmem:[#allocation2 + $0x10a] sm:$0x1]  ;;  %4795 = vrot.lane.b32.xlu1 %v4790_v50, %s7221_s9 }
 0x105   : > { %v3299_v56 = vmul.f32 0.32258064, %v3149_v47  ;;  %v3316_v57 = vmul.f32 0.67741936, %v7454_v37  ;;  %v3317_v58 = vmul.f32 0.67741936, %v3167_v48  ;;  %v754_v9 = vsel %vm719_vm2, %v753_v52, %v680_v31 }
 0x106   : > { %630 = vst.msk [vmem:[#allocation2 + $0x60] sm:$0xff] %vm617_vm1, %v498_v54  ;;  %v3115_v60 = vrot.slane %v3068_v51, 7  ;;  %v2917_v61 = vmul.f32 0.7741935, %v2881_v26  ;;  %v2918_v63 = vmul.f32 0.7741935, %v2882_v40 }
 0x107   : > { %v7071_v0 = vpop.f32.mrb[14].mxu0  ;;  %v3335_v1 = vadd.f32 %v3317_v58, %v3299_v56  ;;  %v2935_v2 = vmul.f32 0.22580644, %v2899_v27  ;;  %v2936_v3 = vmul.f32 0.22580644, %v2900_v41  ;;  %v3334_v30 = vadd.f32 %v3316_v57, %v3298_v53 }
 0x108   : > { %633 = vst.msk [vmem:[#allocation2 + $0x78] sm:$0xff] %vm617_vm1, %v7071_v0  ;;  %v508_v5 = vpop.f32.mrb[15].mxu0  ;;  %v3116_v8 = vsel %vm719_vm2, %v3115_v60, %v3067_v59  ;;  %v3413_v12 = vld [vmem:[#allocation2 + $0x11a] sm:$0x1]  ;;  %v3430_v13 = vld [vmem:[#allocation2 + $0x10b] sm:$0x1]  ;;  %759 = vrot.lane.b32.xlu1 %v754_v9, %s7223_s11 }
 0x109   : > { %632 = vst.msk [vmem:[#allocation2 + $0x70] sm:$0xff] %vm617_vm1, %v508_v5  ;;  %v3431_v14 = vld [vmem:[#allocation2 + $0x11b] sm:$0x1]  ;;  %3121 = vrot.lane.b32.xlu0 %v3116_v8, %s7222_s10  ;;  %v3382_v16 = vrot.slane %v3335_v1, 7  ;;  %v2954_v17 = vadd.f32 %v2936_v3, %v2918_v63  ;;  %v3562_v26 = vmul.f32 0.35483873, %v7462_v55  ;;  %v2953_v38 = vadd.f32 %v2935_v2, %v2917_v61 }
 0x10a   : > { %v7074_v27 = vpop.f32.mrb[16].mxu0  ;;  %v7474_v29 = vld [vmem:[#allocation2 + $0x10b] sm:$0x1]  ;;  %v3563_v31 = vmul.f32 0.35483873, %v3413_v12 }
 0x10b   : > { %v3580_v34 = vmul.f32 0.6451613, %v3430_v13  ;;  %v3581_v35 = vmul.f32 0.6451613, %v3431_v14  ;;  %635 = vst.msk [vmem:[#allocation2 + $0x88] sm:$0xff] %vm617_vm1, %v7074_v27  ;;  %v3001_v39 = vrot.slane %v2954_v17, 7  ;;  %v3383_v43 = vsel %vm719_vm2, %v3382_v16, %v3334_v30 }
 0x10c   : > { %v3184_v40 = vmul.f32 0.8064516, %v3148_v36  ;;  %v3185_v41 = vmul.f32 0.8064516, %v3149_v47  ;;  %v518_v42 = vpop.f32.mrb[17].mxu0 }
 0x10d   : > { %v3599_v44 = vadd.f32 %v3581_v35, %v3563_v31  ;;  %v3202_v45 = vmul.f32 0.19354838, %v7454_v37  ;;  %v3203_v50 = vmul.f32 0.19354838, %v3167_v48  ;;  %634 = vst.msk [vmem:[#allocation2 + $0x80] sm:$0xff] %vm617_vm1, %v518_v42  ;;  %3388 = vrot.lane.b32.xlu0 %v3383_v43, %s7223_s11  ;;  %v3002_v52 = vsel %vm719_vm2, %v3001_v39, %v2953_v38  ;;  %v7077_v53 = vpop.f32.mrb[18].mxu0 }
 0x10e   : > { %v3680_v51 = vld [vmem:[#allocation2 + $0x11b] sm:$0x1]  ;;  %v3697_v54 = vld [vmem:[#allocation2 + $0x10c] sm:$0x1]  ;;  %v3698_v56 = vld [vmem:[#allocation2 + $0x11c] sm:$0x1]  ;;  %3007 = vrot.lane.b32.xlu1 %v3002_v52, %s7224_s12  ;;  %v3598_v36 = vadd.f32 %v3580_v34, %v3562_v26 }
 0x10f   : > { %v3646_v47 = vrot.slane %v3599_v44, 7  ;;  %v3221_v57 = vadd.f32 %v3203_v50, %v3185_v41  ;;  %637 = vst.msk [vmem:[#allocation2 + $0x98] sm:$0xff] %vm617_vm1, %v7077_v53  ;;  %v528_v37 = vpop.f32.mrb[19].mxu0  ;;  %v3829_v48 = vmul.f32 0.38709676, %v7474_v29  ;;  %v3220_v59 = vadd.f32 %v3202_v45, %v3184_v40 }
 0x110   : > { %v7485_v58 = vld [vmem:[#allocation2 + $0x10c] sm:$0x1]  ;;  %636 = vst.msk [vmem:[#allocation2 + $0x90] sm:$0xff] %vm617_vm1, %v528_v37  ;;  %v3830_v60 = vmul.f32 0.38709676, %v3680_v51  ;;  %v7080_v16 = vpop.f32.mrb[20].mxu0 }
 0x111   : > { %v3847_v61 = vmul.f32 0.61290324, %v3697_v54  ;;  %v3848_v63 = vmul.f32 0.61290324, %v3698_v56  ;;  %v3647_v0 = vsel %vm719_vm2, %v3646_v47, %v3598_v36  ;;  %v3268_v1 = vrot.slane %v3221_v57, 7  ;;  %639 = vst.msk [vmem:[#allocation2 + $0xa8] sm:$0xff] %vm617_vm1, %v7080_v16 }
 0x112   : > { %v3448_v2 = vmul.f32 0.8387097, %v7462_v55  ;;  %v3449_v3 = vmul.f32 0.8387097, %v3413_v12  ;;  %3652 = vrot.lane.b32.xlu0 %v3647_v0, %s7222_s10  ;;  %v3466_v8 = vmul.f32 0.16129032, %v3430_v13 }
 0x113   : > { %v3866_v5 = vadd.f32 %v3848_v63, %v3830_v60  ;;  %v3467_v9 = vmul.f32 0.16129032, %v3431_v14  ;;  %v3269_v17 = vsel %vm719_vm2, %v3268_v1, %v3220_v59  ;;  %v538_v26 = vpop.f32.mrb[21].mxu0  ;;  %v3944_v27 = vld [vmem:[#allocation2 + $0x11c] sm:$0x1]  ;;  %v3865_v31 = vadd.f32 %v3847_v61, %v3829_v48 }
 0x114   : > { %v3961_v30 = vld [vmem:[#allocation2 + $0x10d] sm:$0x1]  ;;  %3274 = vrot.lane.b32.xlu1 %v3269_v17, %s7221_s9  ;;  %638 = vst.msk [vmem:[#allocation2 + $0xa0] sm:$0xff] %vm617_vm1, %v538_v26  ;;  %v3962_v55 = vld [vmem:[#allocation2 + $0x11d] sm:$0x1]  ;;  %v3484_v13 = vadd.f32 %v3466_v8, %v3448_v2  ;;  %v7083_v43 = vpop.f32.mrb[22].mxu0 }
 0x115   : > { %v3913_v34 = vrot.slane %v3866_v5, 7  ;;  %v3485_v35 = vadd.f32 %v3467_v9, %v3449_v3  ;;  %v4093_v12 = vmul.f32 0.41935486, %v7485_v58  ;;  %v4094_v14 = vmul.f32 0.41935486, %v3944_v27  ;;  %641 = vst.msk [vmem:[#allocation2 + $0xb8] sm:$0xff] %vm617_vm1, %v7083_v43 }
 0x116   : > { %v4111_v38 = vmul.f32 0.58064514, %v3961_v30  ;;  %v4112_v39 = vmul.f32 0.58064514, %v3962_v55  ;;  %v7496_v40 = vld [vmem:[#allocation2 + $0x1f] sm:$0x1] }
 0x117   : > { %v3914_v41 = vsel %vm719_vm2, %v3913_v34, %v3865_v31  ;;  %v3532_v42 = vrot.slane %v3485_v35, 7  ;;  %v3715_v44 = vmul.f32 0.87096775, %v7474_v29  ;;  %v3716_v45 = vmul.f32 0.87096775, %v3680_v51  ;;  %v548_v50 = vpop.f32.mrb[23].mxu0 }
 0x118   : > { %3919 = vrot.lane.b32.xlu0 %v3914_v41, %s7223_s11  ;;  %v4130_v52 = vadd.f32 %v4112_v39, %v4094_v14  ;;  %v3733_v53 = vmul.f32 0.12903225, %v3697_v54  ;;  %v3734_v36 = vmul.f32 0.12903225, %v3698_v56  ;;  %640 = vst.msk [vmem:[#allocation2 + $0xb0] sm:$0xff] %vm617_vm1, %v548_v50  ;;  %v4129_v59 = vadd.f32 %v4111_v38, %v4093_v12  ;;  %v7086_v0 = vpop.f32.mrb[24].mxu0 }
 0x119   : > { %v3533_v47 = vsel %vm719_vm2, %v3532_v42, %v3484_v13  ;;  %v4210_v57 = vld [vmem:[#allocation2 + $0x10d] sm:$0x1]  ;;  %v4211_v37 = vld [vmem:[#allocation2 + $0x11d] sm:$0x1]  ;;  %v4228_v48 = vld [vmem:[#allocation2 + $0x10e] sm:$0x1] }
 0x11a   : > { %3538 = vrot.lane.b32.xlu1 %v3533_v47, %s7224_s12  ;;  %v4177_v29 = vrot.slane %v4130_v52, 7  ;;  %v3752_v51 = vadd.f32 %v3734_v36, %v3716_v45  ;;  %v4229_v60 = vld [vmem:[#allocation2 + $0x11e] sm:$0x1]  ;;  %v4360_v61 = vmul.f32 0.4516129, %v4210_v57  ;;  %v3751_v63 = vadd.f32 %v3733_v53, %v3715_v44  ;;  %643 = vst.msk [vmem:[#allocation2 + $0xc8] sm:$0xff] %vm617_vm1, %v7086_v0 }
 0x11b   : > { %v4361_v1 = vmul.f32 0.4516129, %v4211_v37  ;;  %v4378_v2 = vmul.f32 0.5483871, %v4228_v48  ;;  %v4761_v54 = vrot.slane %v7496_v40, 7  ;;  %v558_v5 = vpop.f32.mrb[25].mxu0 }
 0x11c   : > { %v4178_v56 = vsel %vm719_vm2, %v4177_v29, %v4129_v59  ;;  %v3799_v3 = vrot.slane %v3752_v51, 7  ;;  %v4379_v8 = vmul.f32 0.5483871, %v4229_v60  ;;  %v3979_v9 = vmul.f32 0.9032258, %v7485_v58  ;;  %642 = vst.msk [vmem:[#allocation2 + $0xc0] sm:$0xff] %vm617_vm1, %v558_v5 }
 0x11d   : > { %4183 = vrot.lane.b32.xlu0 %v4178_v56, %s7222_s10  ;;  %v3980_v16 = vmul.f32 0.9032258, %v3944_v27  ;;  %v3997_v17 = vmul.f32 0.09677419, %v3961_v30  ;;  %v3998_v26 = vmul.f32 0.09677419, %v3962_v55  ;;  %v4396_v58 = vadd.f32 %v4378_v2, %v4360_v61 }
 0x11e   : > { %v3800_v31 = vsel %vm719_vm2, %v3799_v3, %v3751_v63  ;;  %v4397_v34 = vadd.f32 %v4379_v8, %v4361_v1  ;;  %v4474_v35 = vld [vmem:[#allocation2 + $0x10e] sm:$0x1]  ;;  %v4475_v12 = vld [vmem:[#allocation2 + $0x11e] sm:$0x1]  ;;  %v4492_v13 = vld [vmem:[#allocation2 + $0x10f] sm:$0x1] }
 0x11f   : > { %3805 = vrot.lane.b32.xlu1 %v3800_v31, %s7221_s9  ;;  %v4016_v14 = vadd.f32 %v3998_v26, %v3980_v16  ;;  %v4493_v38 = vld [vmem:[#allocation2 + $0x11f] sm:$0x1]  ;;  %v4624_v39 = vmul.f32 0.48387098, %v4474_v35  ;;  %v4625_v41 = vmul.f32 0.48387098, %v4475_v12  ;;  %v4015_v45 = vadd.f32 %v3997_v17, %v3979_v9 }
 0x120   : > { %v4444_v42 = vrot.slane %v4397_v34, 7  ;;  %v4642_v43 = vmul.f32 0.516129, %v4492_v13  ;;  %v4643_v44 = vmul.f32 0.516129, %v4493_v38  ;;  %vm764_vm1 = vcmask 531720  }
 0x121   : > { %v4063_v27 = vrot.slane %v4016_v14, 7  ;;  %v4246_v30 = vmul.f32 0.9354839, %v4210_v57  ;;  %v4247_v55 = vmul.f32 0.9354839, %v4211_v37 }
 0x122   : > { %v4445_v50 = vsel %vm719_vm2, %v4444_v42, %v4396_v58  ;;  %v4661_v52 = vadd.f32 %v4643_v44, %v4625_v41  ;;  %v4264_v53 = vmul.f32 0.06451613, %v4228_v48  ;;  %v698_v36 = vld [vmem:[#allocation2 + $0x101] sm:$0x1]  ;;  %v699_v47 = vld [vmem:[#allocation2 + $0x111] sm:$0x1]  ;;  %v4660_v63 = vadd.f32 %v4642_v43, %v4624_v39 }
 0x123   : > { %4450 = vrot.lane.b32.xlu0 %v4445_v50, %s7223_s11  ;;  %v4064_v59 = vsel %vm719_vm2, %v4063_v27, %v4015_v45  ;;  %v4265_v29 = vmul.f32 0.06451613, %v4229_v60  ;;  %v902_v51 = vmul.f32 0.032258093, %v7457_v46  ;;  %v919_v61 = vmul.f32 0.9677419, %v698_v36 }
 0x124   : > { %4069 = vrot.lane.b32.xlu1 %v4064_v59, %s7224_s12  ;;  %v4708_v0 = vrot.slane %v4661_v52, 7  ;;  %v920_v57 = vmul.f32 0.9677419, %v699_v47  ;;  %v4510_v37 = vmul.f32 0.96774197, %v4474_v35  ;;  %v4282_v17 = vadd.f32 %v4264_v53, %v4246_v30 }
 0x125   : > { %v4283_v1 = vadd.f32 %v4265_v29, %v4247_v55  ;;  %v4511_v2 = vmul.f32 0.96774197, %v4475_v12  ;;  %v4528_v56 = vmul.f32 0.032258064, %v4492_v13  ;;  %v1022_v48 = vld [vmem:[#allocation2 + $0x101] sm:$0x1]  ;;  %v937_v31 = vadd.f32 %v919_v61, %v7451_v33 }
 0x126   : > { %v7518_v3 = vld [vmem:[#allocation2 + $0x10] sm:$0x1]  ;;  %v4709_v5 = vsel %vm719_vm2, %v4708_v0, %v4660_v63  ;;  %v938_v8 = vadd.f32 %v920_v57, %v902_v51  ;;  %v4529_v9 = vmul.f32 0.032258064, %v4493_v38  ;;  %v1023_v60 = vld [vmem:[#allocation2 + $0x111] sm:$0x1] }
 0x127   : > { %v1040_v16 = vld [vmem:[#allocation2 + $0x102] sm:$0x1]  ;;  %4714 = vrot.lane.b32.xlu0 %v4709_v5, %s7222_s10  ;;  %v4330_v26 = vrot.slane %v4283_v1, 7  ;;  %v1041_v34 = vld [vmem:[#allocation2 + $0x112] sm:$0x1]  ;;  %v718_v30 = vrot.slane %v7518_v3, 7  ;;  %v4546_v55 = vadd.f32 %v4528_v56, %v4510_v37 }
 0x128   : > { %v1174_v35 = vmul.f32 0.06451613, %v1022_v48  ;;  %v985_v14 = vrot.slane %v938_v8, 7  ;;  %v4547_v12 = vadd.f32 %v4529_v9, %v4511_v2  ;;  %v1175_v13 = vmul.f32 0.06451613, %v1023_v60 }
 0x129   : > { %v1192_v39 = vmul.f32 0.9354839, %v1040_v16  ;;  %v4331_v41 = vsel %vm719_vm2, %v4330_v26, %v4282_v17  ;;  %v1193_v58 = vmul.f32 0.9354839, %v1041_v34  ;;  %v786_v42 = vmul.f32 0.516129, %v7457_v46 }
 0x12a   : > { %v803_v38 = vmul.f32 0.48387095, %v698_v36  ;;  %v7525_v43 = vld [vmem:[#allocation2 + $0x2f] sm:$0x1]  ;;  %4336 = vrot.lane.b32.xlu1 %v4331_v41, %s7221_s9  ;;  %v986_v44 = vsel %vm719_vm2, %v985_v14, %v937_v31  ;;  %v4594_v45 = vrot.slane %v4547_v12, 7 }
 0x12b   : > { %v804_v33 = vmul.f32 0.48387095, %v699_v47  ;;  %v1288_v27 = vld [vmem:[#allocation2 + $0x102] sm:$0x1]  ;;  %991 = vrot.lane.b32.xlu0 %v986_v44, %s7222_s10  ;;  %v1211_v50 = vadd.f32 %v1193_v58, %v1175_v13  ;;  %v1289_v52 = vld [vmem:[#allocation2 + $0x112] sm:$0x1]  ;;  %v1210_v46 = vadd.f32 %v1192_v39, %v1174_v35 }
 0x12c   : > { %v1306_v53 = vld [vmem:[#allocation2 + $0x103] sm:$0x1]  ;;  %v1307_v59 = vld [vmem:[#allocation2 + $0x113] sm:$0x1]  ;;  %v1438_v29 = vmul.f32 0.09677422, %v1288_v27  ;;  %v4595_v63 = vsel %vm719_vm2, %v4594_v45, %v4546_v55  ;;  %v821_v8 = vadd.f32 %v803_v38, %v7449_v32 }
 0x12d   : > { %v822_v36 = vadd.f32 %v804_v33, %v786_v42  ;;  %v1439_v51 = vmul.f32 0.09677422, %v1289_v52  ;;  %v1555_v61 = vld [vmem:[#allocation2 + $0x103] sm:$0x1]  ;;  %v1258_v0 = vrot.slane %v1211_v50, 7  ;;  %v4763_v37 = vrot.slane %v7525_v43, 6 }
 0x12e   : > { %v1456_v57 = vmul.f32 0.9032258, %v1306_v53  ;;  %v1457_v47 = vmul.f32 0.9032258, %v1307_v59  ;;  %4600 = vrot.lane.b32.xlu1 %v4595_v63, %s7224_s12  ;;  %v1058_v2 = vmul.f32 0.5483871, %v1022_v48 }
 0x12f   : > { %v869_v1 = vrot.slane %v822_v36, 7  ;;  %v1059_v5 = vmul.f32 0.5483871, %v1023_v60  ;;  %v1259_v56 = vsel %vm719_vm2, %v1258_v0, %v1210_v46  ;;  %v1076_v17 = vmul.f32 0.4516129, %v1040_v16 }
 0x130   : > { %v1475_v9 = vadd.f32 %v1457_v47, %v1439_v51  ;;  %v1556_v26 = vld [vmem:[#allocation2 + $0x113] sm:$0x1]  ;;  %v1573_v31 = vld [vmem:[#allocation2 + $0x104] sm:$0x1]  ;;  %v7536_v35 = vld [vmem:[#allocation2 + $0x20] sm:$0x1]  ;;  %1264 = vrot.lane.b32.xlu0 %v1259_v56, %s7223_s11  ;;  %v1474_v14 = vadd.f32 %v1456_v57, %v1438_v29 }
 0x131   : > { %v1077_v12 = vmul.f32 0.4516129, %v1041_v34  ;;  %v1574_v13 = vld [vmem:[#allocation2 + $0x114] sm:$0x1]  ;;  %v1705_v39 = vmul.f32 0.12903225, %v1555_v61  ;;  %v870_v48 = vsel %vm719_vm2, %v869_v1, %v821_v8  ;;  %v7544_v34 = vadd.f32 %v7436_v21, %v7428_v18 }
 0x132   : > { %v1522_v60 = vrot.slane %v1475_v9, 7  ;;  %v1706_v41 = vmul.f32 0.12903225, %v1556_v26  ;;  %v1723_v58 = vmul.f32 0.87096775, %v1573_v31  ;;  %875 = vrot.lane.b32.xlu1 %v870_v48, %s7224_s12  ;;  %v1094_v50 = vadd.f32 %v1076_v17, %v1058_v2 }
 0x133   : > { %v1095_v32 = vadd.f32 %v1077_v12, %v1059_v5  ;;  %v1724_v42 = vmul.f32 0.87096775, %v1574_v13  ;;  %v1324_v16 = vmul.f32 0.5806452, %v1288_v27  ;;  %v1325_v38 = vmul.f32 0.5806452, %v1289_v52 }
 0x134   : > { %v1523_v44 = vsel %vm719_vm2, %v1522_v60, %v1474_v14  ;;  %v1342_v45 = vmul.f32 0.41935483, %v1306_v53  ;;  %v1343_v33 = vmul.f32 0.41935483, %v1307_v59  ;;  %v1819_v55 = vld [vmem:[#allocation2 + $0x104] sm:$0x1]  ;;  %v1741_v27 = vadd.f32 %v1723_v58, %v1705_v39 }
 0x135   : > { %1528 = vrot.lane.b32.xlu0 %v1523_v44, %s7222_s10  ;;  %v1142_v46 = vrot.slane %v1095_v32, 7  ;;  %v1742_v36 = vadd.f32 %v1724_v42, %v1706_v41  ;;  %v1820_v29 = vld [vmem:[#allocation2 + $0x114] sm:$0x1]  ;;  %v1837_v51 = vld [vmem:[#allocation2 + $0x105] sm:$0x1]  ;;  %v721_v63 = vrot.slane %v7536_v35, 6  ;;  %v7555_v32 = vadd.f32 %v7443_v24, %v7440_v23 }
 0x136   : > { %v1361_v52 = vadd.f32 %v1343_v33, %v1325_v38  ;;  %v1838_v0 = vld [vmem:[#allocation2 + $0x115] sm:$0x1]  ;;  %v1969_v57 = vmul.f32 0.16129035, %v1819_v55  ;;  %v1970_v53 = vmul.f32 0.16129035, %v1820_v29  ;;  %v1360_v9 = vadd.f32 %v1342_v45, %v1324_v16 }
 0x137   : > { %v1143_v59 = vsel %vm719_vm2, %v1142_v46, %v1094_v50  ;;  %v1789_v47 = vrot.slane %v1742_v36, 7  ;;  %v1987_v1 = vmul.f32 0.83870965, %v1837_v51  ;;  %v1988_v18 = vmul.f32 0.83870965, %v1838_v0 }
 0x138   : > { %1148 = vrot.lane.b32.xlu1 %v1143_v59, %s7221_s9  ;;  %v1408_v21 = vrot.slane %v1361_v52, 7  ;;  %v1591_v2 = vmul.f32 0.61290324, %v1555_v61  ;;  %v1592_v5 = vmul.f32 0.61290324, %v1556_v26  ;;  %v3087_v56 = vrot.slane %v7544_v34, 7 }
 0x139   : > { %v1790_v8 = vsel %vm719_vm2, %v1789_v47, %v1741_v27  ;;  %v2006_v17 = vadd.f32 %v1988_v18, %v1970_v53  ;;  %v1609_v14 = vmul.f32 0.38709676, %v1573_v31  ;;  %v2086_v12 = vld [vmem:[#allocation2 + $0x105] sm:$0x1]  ;;  %v2087_v39 = vld [vmem:[#allocation2 + $0x115] sm:$0x1]  ;;  %v2005_v48 = vadd.f32 %v1987_v1, %v1969_v57 }
 0x13a   : > { %1795 = vrot.lane.b32.xlu0 %v1790_v8, %s7223_s11  ;;  %v1610_v60 = vmul.f32 0.38709676, %v1574_v13  ;;  %v2104_v41 = vld [vmem:[#allocation2 + $0x106] sm:$0x1]  ;;  %v2105_v58 = vld [vmem:[#allocation2 + $0x116] sm:$0x1]  ;;  %v7559_v61 = vadd.f32 %v7445_v25, %v7438_v22  ;;  %v1409_v26 = vsel %vm719_vm2, %v1408_v21, %v1360_v9 }
 0x13b   : > { %v2053_v42 = vrot.slane %v2006_v17, 7  ;;  %v2236_v31 = vmul.f32 0.19354838, %v2086_v12  ;;  %v2237_v16 = vmul.f32 0.19354838, %v2087_v39  ;;  %v1627_v22 = vadd.f32 %v1609_v14, %v1591_v2 }
 0x13c   : > { %1414 = vrot.lane.b32.xlu1 %v1409_v26, %s7224_s12  ;;  %v1628_v38 = vadd.f32 %v1610_v60, %v1592_v5  ;;  %v2254_v44 = vmul.f32 0.8064516, %v2104_v41  ;;  %v2255_v13 = vmul.f32 0.8064516, %v2105_v58  ;;  %v1855_v45 = vmul.f32 0.6451613, %v1819_v55 }
 0x13d   : > { %v2054_v33 = vsel %vm719_vm2, %v2053_v42, %v2005_v48  ;;  %v1856_v50 = vmul.f32 0.6451613, %v1820_v29  ;;  %v1873_v23 = vmul.f32 0.3548387, %v1837_v51  ;;  %v1874_v24 = vmul.f32 0.3548387, %v1838_v0 }
 0x13e   : > { %2059 = vrot.lane.b32.xlu0 %v2054_v33, %s7222_s10  ;;  %v1675_v25 = vrot.slane %v1628_v38, 7  ;;  %v2273_v46 = vadd.f32 %v2255_v13, %v2237_v16  ;;  %v2350_v36 = vld [vmem:[#allocation2 + $0x106] sm:$0x1]  ;;  %v2351_v27 = vld [vmem:[#allocation2 + $0x116] sm:$0x1]  ;;  %v2973_v52 = vrot.slane %v7559_v61, 7  ;;  %v2272_v57 = vadd.f32 %v2254_v44, %v2236_v31 }
 0x13f   : > { %v1892_v53 = vadd.f32 %v1874_v24, %v1856_v50  ;;  %v2368_v59 = vld [vmem:[#allocation2 + $0x107] sm:$0x1]  ;;  %v2369_v47 = vld [vmem:[#allocation2 + $0x117] sm:$0x1]  ;;  %v2500_v1 = vmul.f32 0.22580647, %v2350_v36  ;;  %v1891_v9 = vadd.f32 %v1873_v23, %v1855_v45  ;;  %v7573_v16 = vadd.f32 %v7422_v11, %v7420_v10 }
 0x140   : > { %v1676_v55 = vsel %vm719_vm2, %v1675_v25, %v1627_v22  ;;  %v2320_v18 = vrot.slane %v2273_v46, 7  ;;  %v2501_v29 = vmul.f32 0.22580647, %v2351_v27  ;;  %v2518_v51 = vmul.f32 0.7741935, %v2368_v59 }
 0x141   : > { %1681 = vrot.lane.b32.xlu1 %v1676_v55, %s7221_s9  ;;  %v1939_v0 = vrot.slane %v1892_v53, 7  ;;  %v2519_v21 = vmul.f32 0.7741935, %v2369_v47  ;;  %v2122_v2 = vmul.f32 0.67741936, %v2086_v12  ;;  %v3089_v5 = vrot.slane %v7555_v32, 6 }
 0x142   : > { %v2321_v8 = vsel %vm719_vm2, %v2320_v18, %v2272_v57  ;;  %v2123_v17 = vmul.f32 0.67741936, %v2087_v39  ;;  %v2140_v14 = vmul.f32 0.32258064, %v2104_v41  ;;  %v2617_v48 = vld [vmem:[#allocation2 + $0x107] sm:$0x1]  ;;  %v2536_v38 = vadd.f32 %v2518_v51, %v2500_v1 }
 0x143   : > { %2326 = vrot.lane.b32.xlu0 %v2321_v8, %s7223_s11  ;;  %v2537_v60 = vadd.f32 %v2519_v21, %v2501_v29  ;;  %v2141_v26 = vmul.f32 0.32258064, %v2105_v58  ;;  %v2618_v42 = vld [vmem:[#allocation2 + $0x117] sm:$0x1]  ;;  %v2635_v31 = vld [vmem:[#allocation2 + $0x108] sm:$0x1]  ;;  %v1940_v12 = vsel %vm719_vm2, %v1939_v0, %v1891_v9  ;;  %v720_v10 = vsel %vm719_vm2, %v718_v30, %v7408_v62 }
 0x144   : > { %v2636_v44 = vld [vmem:[#allocation2 + $0x118] sm:$0x1]  ;;  %v2767_v13 = vmul.f32 0.2580645, %v2617_v48  ;;  %v2768_v33 = vmul.f32 0.2580645, %v2618_v42  ;;  %v2158_v25 = vadd.f32 %v2140_v14, %v2122_v2  ;;  %v723_v2 = vsel %vm722_vm3, %v721_v63, %v720_v10 }
 0x145   : > { %1945 = vrot.lane.b32.xlu1 %v1940_v12, %s7224_s12  ;;  %v2584_v39 = vrot.slane %v2537_v60, 7  ;;  %v2159_v41 = vadd.f32 %v2141_v26, %v2123_v17  ;;  %v2785_v45 = vmul.f32 0.7419355, %v2635_v31  ;;  %v2786_v50 = vmul.f32 0.7419355, %v2636_v44 }
 0x146   : > { %v4725_v58 = vld [vmem:[#allocation2 + $0xf] sm:$0x1]  ;;  %v2386_v23 = vmul.f32 0.70967746, %v2350_v36  ;;  %v2387_v24 = vmul.f32 0.70967746, %v2351_v27  ;;  %v2937_v8 = vadd.f32 %v7430_v19, %v7424_v15 }
 0x147   : > { %v2404_v22 = vmul.f32 0.29032257, %v2368_v59  ;;  %v2585_v11 = vsel %vm719_vm2, %v2584_v39, %v2536_v38  ;;  %v2206_v46 = vrot.slane %v2159_v41, 7  ;;  %v2804_v57 = vadd.f32 %v2786_v50, %v2768_v33  ;;  %v667_v53 = vld [vmem:[#allocation2 + $0x30] sm:$0x1] }
 0x148   : > { %v668_v1 = vld [vmem:[#allocation2 + $0x40] sm:$0x1]  ;;  %2590 = vrot.lane.b32.xlu0 %v2585_v11, %s7222_s10  ;;  %v2803_v55 = vadd.f32 %v2785_v45, %v2767_v13  ;;  %v2405_v36 = vmul.f32 0.29032257, %v2369_v47  ;;  %v2653_v27 = vmul.f32 0.7419355, %v2617_v48  ;;  %v4762_v47 = vsel %vm719_vm2, %v4761_v54, %v4725_v58 }
 0x149   : > { %v2654_v59 = vmul.f32 0.7419355, %v2618_v42  ;;  %v2207_v3 = vsel %vm719_vm2, %v2206_v46, %v2158_v25  ;;  %v2851_v18 = vrot.slane %v2804_v57, 7  ;;  %v2671_v62 = vmul.f32 0.2580645, %v2635_v31 }
 0x14a   : > { %v2672_v30 = vmul.f32 0.2580645, %v2636_v44  ;;  %2212 = vrot.lane.b32.xlu1 %v2207_v3, %s7221_s9  ;;  %v2423_v29 = vadd.f32 %v2405_v36, %v2387_v24  ;;  %v669_v51 = vld [vmem:[#allocation2 + $0x50] sm:$0x1]  ;;  %v670_v0 = vld [vmem:[#allocation2 + $0x60] sm:$0x1]  ;;  %v2422_v17 = vadd.f32 %v2404_v22, %v2386_v23  ;;  %v4764_v19 = vsel %vm722_vm3, %v4763_v37, %v4762_v47 }
 0x14b   : > { %v671_v21 = vld [vmem:[#allocation2 + $0x70] sm:$0x1]  ;;  %v2852_v9 = vsel %vm719_vm2, %v2851_v18, %v2803_v55  ;;  %v724_v48 = vrot.slane %v667_v53, 5  ;;  %v4728_v60 = vld [vmem:[#allocation2 + $0x3f] sm:$0x1]  ;;  %v727_v35 = vrot.slane %v668_v1, 4  ;;  %v2689_v11 = vadd.f32 %v2671_v62, %v2653_v27 }
 0x14c   : > { %v2690_v14 = vadd.f32 %v2672_v30, %v2654_v59  ;;  %v4729_v26 = vld [vmem:[#allocation2 + $0x4f] sm:$0x1]  ;;  %2857 = vrot.lane.b32.xlu0 %v2852_v9, %s7223_s11  ;;  %v2470_v42 = vrot.slane %v2423_v29, 7  ;;  %v730_v31 = vrot.slane %v669_v51, 3  ;;  %v733_v63 = vrot.slane %v670_v0, 2 }
 0x14d   : > { %v4730_v12 = vld [vmem:[#allocation2 + $0x5f] sm:$0x1]  ;;  %v726_v54 = vsel %vm725_vm4, %v724_v48, %v723_v2  ;;  %v736_v38 = vrot.slane %v671_v21, 1  ;;  %v4731_v44 = vld [vmem:[#allocation2 + $0x6f] sm:$0x1]  ;;  %v4765_v39 = vrot.slane %v4728_v60, 5  ;;  %v3088_v3 = vsel %vm719_vm2, %v3087_v56, %v7573_v16 }
 0x14e   : > { %v2737_v40 = vrot.slane %v2690_v14, 7  ;;  %v4732_v15 = vld [vmem:[#allocation2 + $0x7f] sm:$0x1]  ;;  %v2471_v13 = vsel %vm719_vm2, %v2470_v42, %v2422_v17  ;;  %v729_v33 = vsel %vm728_vm5, %v727_v35, %v726_v54  ;;  %v4767_v41 = vrot.slane %v4729_v26, 4  ;;  %v2868_v45 = vld [vmem:[#allocation2 + $0x38] sm:$0x1] }
 0x14f   : > { %v2869_v50 = vld [vmem:[#allocation2 + $0x48] sm:$0x1]  ;;  %2476 = vrot.lane.b32.xlu1 %v2471_v13, %s7224_s12  ;;  %v732_v58 = vsel %vm731_vm6, %v730_v31, %v729_v33  ;;  %v4769_v23 = vrot.slane %v4730_v12, 3  ;;  %v4771_v24 = vrot.slane %v4731_v44, 2  ;;  %v2870_v22 = vld [vmem:[#allocation2 + $0x58] sm:$0x1]  ;;  %v4766_v37 = vsel %vm725_vm4, %v4765_v39, %v4764_v19 }
 0x150   : > { %v2871_v10 = vld [vmem:[#allocation2 + $0x68] sm:$0x1]  ;;  %v735_v43 = vsel %vm734_vm7, %v733_v63, %v732_v58  ;;  %v4773_v25 = vrot.slane %v4732_v15, 1  ;;  %v2872_v46 = vld [vmem:[#allocation2 + $0x78] sm:$0x1]  ;;  %v4768_v1 = vsel %vm728_vm5, %v4767_v41, %v4766_v37  ;;  %v7614_v27 = vsel %vm719_vm2, %v2973_v52, %v2937_v8 }
 0x151   : > { %v2886_v57 = vld [vmem:[#allocation2 + $0x39] sm:$0x1]  ;;  %v738_v53 = vsel %vm737_vm8, %v736_v38, %v735_v43  ;;  %v2887_v55 = vld [vmem:[#allocation2 + $0x49] sm:$0x1]  ;;  %v2738_v18 = vsel %vm719_vm2, %v2737_v40, %v2689_v11  ;;  %v4770_v62 = vsel %vm731_vm6, %v4769_v23, %v4768_v1  ;;  %v3018_v29 = vmul.f32 0.2903226, %v2868_v45 }
 0x152   : > { %v2888_v36 = vld [vmem:[#allocation2 + $0x59] sm:$0x1]  ;;  %v2889_v59 = vld [vmem:[#allocation2 + $0x69] sm:$0x1]  ;;  %755 = vrot.lane.b32.xlu0 %v738_v53, %s7223_s11  ;;  %v3019_v51 = vmul.f32 0.2903226, %v2869_v50  ;;  %v4772_v34 = vsel %vm734_vm7, %v4771_v24, %v4770_v62  ;;  %v3090_v2 = vsel %vm722_vm3, %v3089_v5, %v3088_v3 }
 0x153   : > { %v2890_v30 = vld [vmem:[#allocation2 + $0x79] sm:$0x1]  ;;  %2743 = vrot.lane.b32.xlu1 %v2738_v18, %s7221_s9  ;;  %v3020_v0 = vmul.f32 0.2903226, %v2870_v22  ;;  %v3021_v56 = vmul.f32 0.2903226, %v2871_v10  ;;  %v4774_v47 = vsel %vm737_vm8, %v4773_v25, %v4772_v34 }
 0x154   : > { %v3022_v16 = vmul.f32 0.2903226, %v2872_v46  ;;  %v3036_v61 = vmul.f32 0.7096774, %v2886_v57  ;;  %v3037_v21 = vmul.f32 0.7096774, %v2887_v55 }
 0x155   : > { %v3038_v52 = vmul.f32 0.7096774, %v2888_v36  ;;  %v3039_v8 = vmul.f32 0.7096774, %v2889_v59  ;;  %v3040_v9 = vmul.f32 0.7096774, %v2890_v30 }
 0x156   : > { %v2904_v17 = vmul.f32 0.7741935, %v2868_v45  ;;  %v3054_v14 = vadd.f32 %v3036_v61, %v3018_v29  ;;  %v3055_v48 = vadd.f32 %v3037_v21, %v3019_v51  ;;  %v2905_v26 = vmul.f32 0.7741935, %v2869_v50  ;;  %v3132_v11 = vld [vmem:[#allocation2 + $0x9] sm:$0x1] }
 0x157   : > { %v3056_v60 = vadd.f32 %v3038_v52, %v3020_v0  ;;  %4791 = vrot.lane.b32.xlu1 %v4774_v47, %s7221_s9  ;;  %v3057_v42 = vadd.f32 %v3039_v8, %v3021_v56  ;;  %v3058_v35 = vadd.f32 %v3040_v9, %v3022_v16  ;;  %v2906_v31 = vmul.f32 0.7741935, %v2870_v22  ;;  %v3133_v43 = vld [vmem:[#allocation2 + $0x19] sm:$0x1]  ;;  %v7634_v1 = vld [vmem:[#allocation2 + $0x49] sm:$0x1] }
 0x158   : > { %v2907_v63 = vmul.f32 0.7741935, %v2871_v10  ;;  %v3091_v12 = vrot.slane %v3054_v14, 5  ;;  %v3093_v40 = vrot.slane %v3055_v48, 4  ;;  %v2908_v54 = vmul.f32 0.7741935, %v2872_v46 }
 0x159   : > { %v3095_v32 = vrot.slane %v3056_v60, 3  ;;  %v3097_v5 = vrot.slane %v3057_v42, 2  ;;  %v3099_v38 = vrot.slane %v3058_v35, 1  ;;  %v2921_v44 = vmul.f32 0.22580644, %v7434_v20 }
 0x15a   : > { %v2922_v15 = vmul.f32 0.22580644, %v2886_v57  ;;  %v3092_v19 = vsel %vm725_vm4, %v3091_v12, %v3090_v2  ;;  %v2923_v13 = vmul.f32 0.22580644, %v2887_v55  ;;  %v2924_v33 = vmul.f32 0.22580644, %v2888_v36 }
 0x15b   : > { %v2925_v39 = vmul.f32 0.22580644, %v2889_v59  ;;  %v3094_v41 = vsel %vm728_vm5, %v3093_v40, %v3092_v19  ;;  %v2926_v45 = vmul.f32 0.22580644, %v2890_v30  ;;  %v2939_v50 = vadd.f32 %v2921_v44, %v7447_v28  ;;  %v7631_v20 = vld [vmem:[#allocation2 + $0x29] sm:$0x1] }
 0x15c   : > { %v2940_v58 = vadd.f32 %v2922_v15, %v2904_v17  ;;  %v3096_v23 = vsel %vm731_vm6, %v3095_v32, %v3094_v41  ;;  %v2941_v24 = vadd.f32 %v2923_v13, %v2905_v26  ;;  %v2942_v22 = vadd.f32 %v2924_v33, %v2906_v31  ;;  %v3135_v53 = vld [vmem:[#allocation2 + $0x39] sm:$0x1]  ;;  %v3138_v3 = vld [vmem:[#allocation2 + $0x69] sm:$0x1]  ;;  %v3150_v62 = vld [vmem:[#allocation2 + $0xa] sm:$0x1] }
 0x15d   : > { %v2943_v10 = vadd.f32 %v2925_v39, %v2907_v63  ;;  %v3098_v37 = vsel %vm734_vm7, %v3097_v5, %v3096_v23  ;;  %v2944_v25 = vadd.f32 %v2926_v45, %v2908_v54  ;;  %v2975_v46 = vrot.slane %v2939_v50, 6  ;;  %v3137_v55 = vld [vmem:[#allocation2 + $0x59] sm:$0x1]  ;;  %v3151_v34 = vld [vmem:[#allocation2 + $0x1a] sm:$0x1] }
 0x15e   : > { %v2977_v57 = vrot.slane %v2940_v58, 5  ;;  %v3100_v28 = vsel %vm737_vm8, %v3099_v38, %v3098_v37  ;;  %v2979_v36 = vrot.slane %v2941_v24, 4  ;;  %v2981_v59 = vrot.slane %v2942_v22, 3  ;;  %v3139_v18 = vld [vmem:[#allocation2 + $0x79] sm:$0x1] }
 0x15f   : > { %3117 = vrot.lane.b32.xlu0 %v3100_v28, %s7222_s10  ;;  %v2976_v30 = vsel %vm722_vm3, %v2975_v46, %v7614_v27  ;;  %v2983_v29 = vrot.slane %v2943_v10, 2  ;;  %v2985_v51 = vrot.slane %v2944_v25, 1  ;;  %v3152_v0 = vld [vmem:[#allocation2 + $0x2a] sm:$0x1]  ;;  %v3153_v56 = vld [vmem:[#allocation2 + $0x3a] sm:$0x1] }
 0x160   : > { %v2978_v16 = vsel %vm725_vm4, %v2977_v57, %v2976_v30  ;;  %v3154_v61 = vld [vmem:[#allocation2 + $0x4a] sm:$0x1]  ;;  %v3155_v21 = vld [vmem:[#allocation2 + $0x5a] sm:$0x1]  ;;  %v3282_v8 = vmul.f32 0.32258064, %v3132_v11 }
 0x161   : > { %v3156_v52 = vld [vmem:[#allocation2 + $0x6a] sm:$0x1]  ;;  %v2980_v2 = vsel %vm728_vm5, %v2979_v36, %v2978_v16  ;;  %v3157_v47 = vld [vmem:[#allocation2 + $0x7a] sm:$0x1]  ;;  %v3283_v9 = vmul.f32 0.32258064, %v3133_v43 }
 0x162   : > { %v3284_v17 = vmul.f32 0.32258064, %v7631_v20  ;;  %v2982_v14 = vsel %vm731_vm6, %v2981_v59, %v2980_v2  ;;  %v3285_v27 = vmul.f32 0.32258064, %v3135_v53  ;;  %v3286_v48 = vmul.f32 0.32258064, %v7634_v1 }
 0x163   : > { %v3287_v60 = vmul.f32 0.32258064, %v3137_v55  ;;  %v2984_v26 = vsel %vm734_vm7, %v2983_v29, %v2982_v14  ;;  %v3288_v42 = vmul.f32 0.32258064, %v3138_v3  ;;  %v3289_v35 = vmul.f32 0.32258064, %v3139_v18 }
 0x164   : > { %v3300_v31 = vmul.f32 0.67741936, %v3150_v62  ;;  %v2986_v63 = vsel %vm737_vm8, %v2985_v51, %v2984_v26  ;;  %v3301_v12 = vmul.f32 0.67741936, %v3151_v34  ;;  %v3302_v40 = vmul.f32 0.67741936, %v3152_v0 }
 0x165   : > { %v3303_v32 = vmul.f32 0.67741936, %v3153_v56  ;;  %3003 = vrot.lane.b32.xlu1 %v2986_v63, %s7224_s12  ;;  %v3304_v54 = vmul.f32 0.67741936, %v3154_v61  ;;  %v3305_v5 = vmul.f32 0.67741936, %v3155_v21 }
 0x166   : > { %v3306_v38 = vmul.f32 0.67741936, %v3156_v52  ;;  %v3318_v44 = vadd.f32 %v3300_v31, %v3282_v8  ;;  %v3307_v15 = vmul.f32 0.67741936, %v3157_v47  ;;  %v3319_v19 = vadd.f32 %v3301_v12, %v3283_v9 }
 0x167   : > { %v3320_v13 = vadd.f32 %v3302_v40, %v3284_v17  ;;  %v3321_v33 = vadd.f32 %v3303_v32, %v3285_v27  ;;  %v3322_v39 = vadd.f32 %v3304_v54, %v3286_v48  ;;  %v3323_v41 = vadd.f32 %v3305_v5, %v3287_v60  ;;  %v7668_v40 = vld [vmem:[#allocation2 + $0x6a] sm:$0x1]  ;;  %v3403_v32 = vld [vmem:[#allocation2 + $0x7a] sm:$0x1]  ;;  %v7670_v54 = vld [vmem:[#allocation2 + $0xb] sm:$0x1] }
 0x168   : > { %v3324_v45 = vadd.f32 %v3306_v38, %v3288_v42  ;;  %v3168_v50 = vmul.f32 0.8064516, %v3132_v11  ;;  %v3325_v58 = vadd.f32 %v3307_v15, %v3289_v35  ;;  %v3354_v23 = vrot.slane %v3319_v19, 7  ;;  %v3396_v42 = vld [vmem:[#allocation2 + $0xa] sm:$0x1] }
 0x169   : > { %v3356_v24 = vrot.slane %v3320_v13, 6  ;;  %v3358_v22 = vrot.slane %v3321_v33, 5  ;;  %v3360_v10 = vrot.slane %v3322_v39, 4  ;;  %v3362_v37 = vrot.slane %v3323_v41, 3  ;;  %v7656_v35 = vld [vmem:[#allocation2 + $0x1a] sm:$0x1] }
 0x16a   : > { %v3364_v25 = vrot.slane %v3324_v45, 2  ;;  %v3169_v46 = vmul.f32 0.8064516, %v3133_v43  ;;  %v3355_v57 = vsel %vm719_vm2, %v3354_v23, %v3318_v44  ;;  %v3366_v28 = vrot.slane %v3325_v58, 1  ;;  %v3415_v15 = vld [vmem:[#allocation2 + $0x1b] sm:$0x1] }
 0x16b   : > { %v3170_v36 = vmul.f32 0.8064516, %v7631_v20  ;;  %v3171_v59 = vmul.f32 0.8064516, %v3135_v53  ;;  %v3357_v30 = vsel %vm722_vm3, %v3356_v24, %v3355_v57  ;;  %v3172_v29 = vmul.f32 0.8064516, %v7634_v1 }
 0x16c   : > { %v3173_v51 = vmul.f32 0.8064516, %v3137_v55  ;;  %v3174_v11 = vmul.f32 0.8064516, %v3138_v3  ;;  %v3359_v16 = vsel %vm725_vm4, %v3358_v22, %v3357_v30  ;;  %v3175_v2 = vmul.f32 0.8064516, %v3139_v18 }
 0x16d   : > { %v3186_v8 = vmul.f32 0.19354838, %v3150_v62  ;;  %v3187_v9 = vmul.f32 0.19354838, %v3151_v34  ;;  %v3361_v17 = vsel %vm728_vm5, %v3360_v10, %v3359_v16  ;;  %v3188_v43 = vmul.f32 0.19354838, %v3152_v0 }
 0x16e   : > { %v3189_v14 = vmul.f32 0.19354838, %v3153_v56  ;;  %v3190_v27 = vmul.f32 0.19354838, %v3154_v61  ;;  %v3363_v48 = vsel %vm731_vm6, %v3362_v37, %v3361_v17  ;;  %v3191_v20 = vmul.f32 0.19354838, %v3155_v21 }
 0x16f   : > { %v3192_v53 = vmul.f32 0.19354838, %v3156_v52  ;;  %v3193_v60 = vmul.f32 0.19354838, %v3157_v47  ;;  %v3365_v26 = vsel %vm734_vm7, %v3364_v25, %v3363_v48  ;;  %v3204_v1 = vadd.f32 %v3186_v8, %v3168_v50  ;;  %v7658_v18 = vld [vmem:[#allocation2 + $0x2a] sm:$0x1] }
 0x170   : > { %v3205_v55 = vadd.f32 %v3187_v9, %v3169_v46  ;;  %v3206_v3 = vadd.f32 %v3188_v43, %v3170_v36  ;;  %v3367_v62 = vsel %vm737_vm8, %v3366_v28, %v3365_v26  ;;  %v3207_v34 = vadd.f32 %v3189_v14, %v3171_v59  ;;  %v7661_v61 = vld [vmem:[#allocation2 + $0x3a] sm:$0x1]  ;;  %v7663_v21 = vld [vmem:[#allocation2 + $0x4a] sm:$0x1]  ;;  %v3416_v19 = vld [vmem:[#allocation2 + $0x2b] sm:$0x1] }
 0x171   : > { %v3208_v0 = vadd.f32 %v3190_v27, %v3172_v29  ;;  %v3209_v56 = vadd.f32 %v3191_v20, %v3173_v51  ;;  %v7665_v52 = vld [vmem:[#allocation2 + $0x5a] sm:$0x1]  ;;  %3384 = vrot.lane.b32.xlu0 %v3367_v62, %s7223_s11  ;;  %v3210_v47 = vadd.f32 %v3192_v53, %v3174_v11  ;;  %v3211_v31 = vadd.f32 %v3193_v60, %v3175_v2  ;;  %v7672_v13 = vld [vmem:[#allocation2 + $0x3b] sm:$0x1]  ;;  %v3418_v45 = vld [vmem:[#allocation2 + $0x4b] sm:$0x1] }
 0x172   : > { %v3240_v63 = vrot.slane %v3205_v55, 7  ;;  %v3242_v12 = vrot.slane %v3206_v3, 6  ;;  %v3244_v5 = vrot.slane %v3207_v34, 5  ;;  %v3419_v50 = vld [vmem:[#allocation2 + $0x5b] sm:$0x1] }
 0x173   : > { %v3246_v38 = vrot.slane %v3208_v0, 4  ;;  %v3248_v44 = vrot.slane %v3209_v56, 3  ;;  %v3250_v39 = vrot.slane %v3210_v47, 2  ;;  %v3252_v41 = vrot.slane %v3211_v31, 1  ;;  %v3420_v58 = vld [vmem:[#allocation2 + $0x6b] sm:$0x1] }
 0x174   : > { %v3241_v33 = vsel %vm719_vm2, %v3240_v63, %v3204_v1  ;;  %v3421_v24 = vld [vmem:[#allocation2 + $0x7b] sm:$0x1]  ;;  %v3546_v22 = vmul.f32 0.35483873, %v3396_v42  ;;  %v3547_v10 = vmul.f32 0.35483873, %v7656_v35 }
 0x175   : > { %v3243_v23 = vsel %vm722_vm3, %v3242_v12, %v3241_v33  ;;  %v3548_v37 = vmul.f32 0.35483873, %v7658_v18  ;;  %v3549_v46 = vmul.f32 0.35483873, %v7661_v61  ;;  %v3550_v57 = vmul.f32 0.35483873, %v7663_v21 }
 0x176   : > { %v3245_v25 = vsel %vm725_vm4, %v3244_v5, %v3243_v23  ;;  %v3551_v28 = vmul.f32 0.35483873, %v7665_v52  ;;  %v3552_v59 = vmul.f32 0.35483873, %v7668_v40  ;;  %v3553_v30 = vmul.f32 0.35483873, %v3403_v32 }
 0x177   : > { %v3247_v36 = vsel %vm728_vm5, %v3246_v38, %v3245_v25  ;;  %v3564_v29 = vmul.f32 0.6451613, %v7670_v54  ;;  %v3565_v11 = vmul.f32 0.6451613, %v3415_v15  ;;  %v3566_v16 = vmul.f32 0.6451613, %v3416_v19 }
 0x178   : > { %v3249_v51 = vsel %vm731_vm6, %v3248_v44, %v3247_v36  ;;  %v3567_v2 = vmul.f32 0.6451613, %v7672_v13  ;;  %v3568_v9 = vmul.f32 0.6451613, %v3418_v45  ;;  %v3569_v17 = vmul.f32 0.6451613, %v3419_v50 }
 0x179   : > { %v3251_v8 = vsel %vm734_vm7, %v3250_v39, %v3249_v51  ;;  %v3570_v43 = vmul.f32 0.6451613, %v3420_v58  ;;  %v3571_v27 = vmul.f32 0.6451613, %v3421_v24  ;;  %v3582_v48 = vadd.f32 %v3564_v29, %v3546_v22  ;;  %v7711_v51 = vld [vmem:[#allocation2 + $0x3b] sm:$0x1] }
 0x17a   : > { %v3253_v14 = vsel %vm737_vm8, %v3252_v41, %v3251_v8  ;;  %v3583_v20 = vadd.f32 %v3565_v11, %v3547_v10  ;;  %v3584_v53 = vadd.f32 %v3566_v16, %v3548_v37  ;;  %v3585_v60 = vadd.f32 %v3567_v2, %v3549_v46  ;;  %v7718_v16 = vld [vmem:[#allocation2 + $0x6b] sm:$0x1]  ;;  %v7720_v2 = vld [vmem:[#allocation2 + $0x7b] sm:$0x1]  ;;  %v7722_v8 = vld [vmem:[#allocation2 + $0xc] sm:$0x1] }
 0x17b   : > { %3270 = vrot.lane.b32.xlu1 %v3253_v14, %s7221_s9  ;;  %v3586_v26 = vadd.f32 %v3568_v9, %v3550_v57  ;;  %v3587_v1 = vadd.f32 %v3569_v17, %v3551_v28  ;;  %v3588_v55 = vadd.f32 %v3570_v43, %v3552_v59  ;;  %v3589_v3 = vadd.f32 %v3571_v27, %v3553_v30  ;;  %v7704_v30 = vld [vmem:[#allocation2 + $0xb] sm:$0x1]  ;;  %v3682_v14 = vld [vmem:[#allocation2 + $0x1c] sm:$0x1]  ;;  %v7724_v27 = vld [vmem:[#allocation2 + $0x2c] sm:$0x1] }
 0x17c   : > { %v3618_v62 = vrot.slane %v3583_v20, 7  ;;  %v3432_v34 = vmul.f32 0.8387097, %v3396_v42  ;;  %v3620_v0 = vrot.slane %v3584_v53, 6  ;;  %v3622_v56 = vrot.slane %v3585_v60, 5 }
 0x17d   : > { %v3624_v47 = vrot.slane %v3586_v26, 4  ;;  %v3626_v31 = vrot.slane %v3587_v1, 3  ;;  %v3628_v12 = vrot.slane %v3588_v55, 2  ;;  %v3630_v5 = vrot.slane %v3589_v3, 1  ;;  %v3685_v1 = vld [vmem:[#allocation2 + $0x4c] sm:$0x1] }
 0x17e   : > { %v3619_v63 = vsel %vm719_vm2, %v3618_v62, %v3582_v48  ;;  %v3433_v38 = vmul.f32 0.8387097, %v7656_v35  ;;  %v3434_v33 = vmul.f32 0.8387097, %v7658_v18  ;;  %v3435_v39 = vmul.f32 0.8387097, %v7661_v61 }
 0x17f   : > { %v3621_v44 = vsel %vm722_vm3, %v3620_v0, %v3619_v63  ;;  %v3436_v41 = vmul.f32 0.8387097, %v7663_v21  ;;  %v3437_v23 = vmul.f32 0.8387097, %v7665_v52  ;;  %v3438_v22 = vmul.f32 0.8387097, %v7668_v40 }
 0x180   : > { %v3623_v42 = vsel %vm725_vm4, %v3622_v56, %v3621_v44  ;;  %v3439_v10 = vmul.f32 0.8387097, %v3403_v32  ;;  %v3450_v25 = vmul.f32 0.16129032, %v7670_v54  ;;  %v3451_v35 = vmul.f32 0.16129032, %v3415_v15 }
 0x181   : > { %v3625_v37 = vsel %vm728_vm5, %v3624_v47, %v3623_v42  ;;  %v3452_v46 = vmul.f32 0.16129032, %v3416_v19  ;;  %v3453_v18 = vmul.f32 0.16129032, %v7672_v13  ;;  %v3454_v61 = vmul.f32 0.16129032, %v3418_v45 }
 0x182   : > { %v3627_v57 = vsel %vm731_vm6, %v3626_v31, %v3625_v37  ;;  %v3455_v28 = vmul.f32 0.16129032, %v3419_v50  ;;  %v3456_v36 = vmul.f32 0.16129032, %v3420_v58  ;;  %v3457_v59 = vmul.f32 0.16129032, %v3421_v24 }
 0x183   : > { %v3629_v21 = vsel %vm734_vm7, %v3628_v12, %v3627_v57  ;;  %v3468_v52 = vadd.f32 %v3450_v25, %v3432_v34  ;;  %v7706_v40 = vld [vmem:[#allocation2 + $0x1b] sm:$0x1]  ;;  %v7708_v32 = vld [vmem:[#allocation2 + $0x2b] sm:$0x1]  ;;  %v3469_v15 = vadd.f32 %v3451_v35, %v3433_v38  ;;  %v3470_v19 = vadd.f32 %v3452_v46, %v3434_v33  ;;  %v7726_v48 = vld [vmem:[#allocation2 + $0x3c] sm:$0x1] }
 0x184   : > { %v3631_v54 = vsel %vm737_vm8, %v3630_v5, %v3629_v21  ;;  %v3471_v29 = vadd.f32 %v3453_v18, %v3435_v39  ;;  %v7713_v13 = vld [vmem:[#allocation2 + $0x4b] sm:$0x1]  ;;  %v7715_v45 = vld [vmem:[#allocation2 + $0x5b] sm:$0x1]  ;;  %v3472_v50 = vadd.f32 %v3454_v61, %v3436_v41  ;;  %v3473_v58 = vadd.f32 %v3455_v28, %v3437_v23  ;;  %v7728_v55 = vld [vmem:[#allocation2 + $0x5c] sm:$0x1] }
 0x185   : > { %3648 = vrot.lane.b32.xlu0 %v3631_v54, %s7222_s10  ;;  %v3474_v24 = vadd.f32 %v3456_v36, %v3438_v22  ;;  %v3475_v11 = vadd.f32 %v3457_v59, %v3439_v10  ;;  %v3504_v9 = vrot.slane %v3469_v15, 7  ;;  %v3506_v17 = vrot.slane %v3470_v19, 6  ;;  %v3687_v3 = vld [vmem:[#allocation2 + $0x6c] sm:$0x1]  ;;  %v3688_v34 = vld [vmem:[#allocation2 + $0x7c] sm:$0x1] }
 0x186   : > { %v3508_v43 = vrot.slane %v3471_v29, 5  ;;  %v3510_v20 = vrot.slane %v3472_v50, 4  ;;  %v3512_v53 = vrot.slane %v3473_v58, 3  ;;  %v3813_v0 = vmul.f32 0.38709676, %v7704_v30 }
 0x187   : > { %v3514_v60 = vrot.slane %v3474_v24, 2  ;;  %v3516_v26 = vrot.slane %v3475_v11, 1  ;;  %v3505_v62 = vsel %vm719_vm2, %v3504_v9, %v3468_v52  ;;  %v3814_v56 = vmul.f32 0.38709676, %v7706_v40 }
 0x188   : > { %v3815_v47 = vmul.f32 0.38709676, %v7708_v32  ;;  %v3507_v31 = vsel %vm722_vm3, %v3506_v17, %v3505_v62  ;;  %v3816_v63 = vmul.f32 0.38709676, %v7711_v51  ;;  %v3817_v12 = vmul.f32 0.38709676, %v7713_v13 }
 0x189   : > { %v3818_v5 = vmul.f32 0.38709676, %v7715_v45  ;;  %v3509_v38 = vsel %vm725_vm4, %v3508_v43, %v3507_v31  ;;  %v3819_v44 = vmul.f32 0.38709676, %v7718_v16  ;;  %v3820_v33 = vmul.f32 0.38709676, %v7720_v2 }
 0x18a   : > { %v3831_v39 = vmul.f32 0.61290324, %v7722_v8  ;;  %v3511_v41 = vsel %vm728_vm5, %v3510_v20, %v3509_v38  ;;  %v3832_v42 = vmul.f32 0.61290324, %v3682_v14  ;;  %v3833_v23 = vmul.f32 0.61290324, %v7724_v27 }
 0x18b   : > { %v3834_v22 = vmul.f32 0.61290324, %v7726_v48  ;;  %v3513_v10 = vsel %vm731_vm6, %v3512_v53, %v3511_v41  ;;  %v3835_v37 = vmul.f32 0.61290324, %v3685_v1  ;;  %v3836_v25 = vmul.f32 0.61290324, %v7728_v55 }
 0x18c   : > { %v3837_v35 = vmul.f32 0.61290324, %v3687_v3  ;;  %v3515_v46 = vsel %vm734_vm7, %v3514_v60, %v3513_v10  ;;  %v3838_v57 = vmul.f32 0.61290324, %v3688_v34  ;;  %v3849_v18 = vadd.f32 %v3831_v39, %v3813_v0  ;;  %v7786_v10 = vld [vmem:[#allocation2 + $0xd] sm:$0x1] }
 0x18d   : > { %v3850_v61 = vadd.f32 %v3832_v42, %v3814_v56  ;;  %v3517_v28 = vsel %vm737_vm8, %v3516_v26, %v3515_v46  ;;  %v3851_v21 = vadd.f32 %v3833_v23, %v3815_v47  ;;  %v3852_v36 = vadd.f32 %v3834_v22, %v3816_v63  ;;  %v7775_v42 = vld [vmem:[#allocation2 + $0x3c] sm:$0x1]  ;;  %v7782_v23 = vld [vmem:[#allocation2 + $0x6c] sm:$0x1]  ;;  %v7788_v46 = vld [vmem:[#allocation2 + $0x1d] sm:$0x1] }
 0x18e   : > { %v3853_v59 = vadd.f32 %v3835_v37, %v3817_v12  ;;  %3534 = vrot.lane.b32.xlu1 %v3517_v28, %s7224_s12  ;;  %v3854_v52 = vadd.f32 %v3836_v25, %v3818_v5  ;;  %v3855_v54 = vadd.f32 %v3837_v35, %v3819_v44  ;;  %v3856_v15 = vadd.f32 %v3838_v57, %v3820_v33  ;;  %v7770_v33 = vld [vmem:[#allocation2 + $0x1c] sm:$0x1]  ;;  %v7790_v57 = vld [vmem:[#allocation2 + $0x2d] sm:$0x1] }
 0x18f   : > { %v3885_v19 = vrot.slane %v3850_v61, 7  ;;  %v3887_v29 = vrot.slane %v3851_v21, 6  ;;  %v3889_v50 = vrot.slane %v3852_v36, 5  ;;  %v3699_v24 = vmul.f32 0.87096775, %v7704_v30 }
 0x190   : > { %v3891_v58 = vrot.slane %v3853_v59, 4  ;;  %v3893_v9 = vrot.slane %v3854_v52, 3  ;;  %v3895_v17 = vrot.slane %v3855_v54, 2  ;;  %v3897_v43 = vrot.slane %v3856_v15, 1  ;;  %v7784_v22 = vld [vmem:[#allocation2 + $0x7c] sm:$0x1] }
 0x191   : > { %v3886_v11 = vsel %vm719_vm2, %v3885_v19, %v3849_v18  ;;  %v3700_v53 = vmul.f32 0.87096775, %v7706_v40  ;;  %v3701_v60 = vmul.f32 0.87096775, %v7708_v32  ;;  %v3702_v26 = vmul.f32 0.87096775, %v7711_v51 }
 0x192   : > { %v3888_v20 = vsel %vm722_vm3, %v3887_v29, %v3886_v11  ;;  %v3703_v0 = vmul.f32 0.87096775, %v7713_v13  ;;  %v3704_v56 = vmul.f32 0.87096775, %v7715_v45  ;;  %v3705_v30 = vmul.f32 0.87096775, %v7718_v16 }
 0x193   : > { %v3890_v62 = vsel %vm725_vm4, %v3889_v50, %v3888_v20  ;;  %v3706_v31 = vmul.f32 0.87096775, %v7720_v2  ;;  %v3717_v63 = vmul.f32 0.12903225, %v7722_v8  ;;  %v3718_v12 = vmul.f32 0.12903225, %v3682_v14 }
 0x194   : > { %v3892_v47 = vsel %vm728_vm5, %v3891_v58, %v3890_v62  ;;  %v7763_v40 = vld [vmem:[#allocation2 + $0xc] sm:$0x1]  ;;  %v3719_v51 = vmul.f32 0.12903225, %v7724_v27  ;;  %v3720_v5 = vmul.f32 0.12903225, %v7726_v48 }
 0x195   : > { %v3894_v32 = vsel %vm731_vm6, %v3893_v9, %v3892_v47  ;;  %v3721_v13 = vmul.f32 0.12903225, %v3685_v1  ;;  %v3722_v16 = vmul.f32 0.12903225, %v7728_v55  ;;  %v3723_v38 = vmul.f32 0.12903225, %v3687_v3 }
 0x196   : > { %v3896_v45 = vsel %vm734_vm7, %v3895_v17, %v3894_v32  ;;  %v3724_v44 = vmul.f32 0.12903225, %v3688_v34  ;;  %v7772_v2 = vld [vmem:[#allocation2 + $0x2c] sm:$0x1]  ;;  %v3735_v14 = vadd.f32 %v3717_v63, %v3699_v24  ;;  %v3736_v39 = vadd.f32 %v3718_v12, %v3700_v53  ;;  %v7779_v48 = vld [vmem:[#allocation2 + $0x5c] sm:$0x1] }
 0x197   : > { %v3898_v8 = vsel %vm737_vm8, %v3897_v43, %v3896_v45  ;;  %v3737_v41 = vadd.f32 %v3719_v51, %v3701_v60  ;;  %v7777_v27 = vld [vmem:[#allocation2 + $0x4c] sm:$0x1]  ;;  %v3738_v1 = vadd.f32 %v3720_v5, %v3702_v26  ;;  %v3739_v55 = vadd.f32 %v3721_v13, %v3703_v0  ;;  %v7792_v18 = vld [vmem:[#allocation2 + $0x3d] sm:$0x1]  ;;  %v3949_v52 = vld [vmem:[#allocation2 + $0x4d] sm:$0x1] }
 0x198   : > { %3915 = vrot.lane.b32.xlu0 %v3898_v8, %s7223_s11  ;;  %v3740_v3 = vadd.f32 %v3722_v16, %v3704_v56  ;;  %v3741_v34 = vadd.f32 %v3723_v38, %v3705_v30  ;;  %v3742_v37 = vadd.f32 %v3724_v44, %v3706_v31  ;;  %v3771_v25 = vrot.slane %v3736_v39, 7  ;;  %v7795_v54 = vld [vmem:[#allocation2 + $0x5d] sm:$0x1]  ;;  %v3951_v15 = vld [vmem:[#allocation2 + $0x6d] sm:$0x1] }
 0x199   : > { %v3773_v35 = vrot.slane %v3737_v41, 6  ;;  %v4077_v61 = vmul.f32 0.41935486, %v7763_v40  ;;  %v3775_v28 = vrot.slane %v3738_v1, 5  ;;  %v3777_v21 = vrot.slane %v3739_v55, 4 }
 0x19a   : > { %v3779_v36 = vrot.slane %v3740_v3, 3  ;;  %v3781_v59 = vrot.slane %v3741_v34, 2  ;;  %v3772_v19 = vsel %vm719_vm2, %v3771_v25, %v3735_v14  ;;  %v3783_v29 = vrot.slane %v3742_v37, 1  ;;  %v3952_v50 = vld [vmem:[#allocation2 + $0x7d] sm:$0x1] }
 0x19b   : > { %v4078_v58 = vmul.f32 0.41935486, %v7770_v33  ;;  %v4079_v24 = vmul.f32 0.41935486, %v7772_v2  ;;  %v3774_v11 = vsel %vm722_vm3, %v3773_v35, %v3772_v19  ;;  %v4080_v9 = vmul.f32 0.41935486, %v7775_v42 }
 0x19c   : > { %v4081_v17 = vmul.f32 0.41935486, %v7777_v27  ;;  %v4082_v43 = vmul.f32 0.41935486, %v7779_v48  ;;  %v3776_v20 = vsel %vm725_vm4, %v3775_v28, %v3774_v11  ;;  %v4083_v53 = vmul.f32 0.41935486, %v7782_v23 }
 0x19d   : > { %v4084_v60 = vmul.f32 0.41935486, %v7784_v22  ;;  %v4095_v26 = vmul.f32 0.58064514, %v7786_v10  ;;  %v3778_v62 = vsel %vm728_vm5, %v3777_v21, %v3776_v20  ;;  %v4096_v0 = vmul.f32 0.58064514, %v7788_v46 }
 0x19e   : > { %v4097_v56 = vmul.f32 0.58064514, %v7790_v57  ;;  %v4098_v30 = vmul.f32 0.58064514, %v7792_v18  ;;  %v3780_v47 = vsel %vm731_vm6, %v3779_v36, %v3778_v62  ;;  %v4099_v31 = vmul.f32 0.58064514, %v3949_v52 }
 0x19f   : > { %v4100_v63 = vmul.f32 0.58064514, %v7795_v54  ;;  %v4101_v12 = vmul.f32 0.58064514, %v3951_v15  ;;  %v3782_v32 = vsel %vm734_vm7, %v3781_v59, %v3780_v47  ;;  %v4102_v51 = vmul.f32 0.58064514, %v3952_v50 }
 0x1a0   : > { %v4113_v5 = vadd.f32 %v4095_v26, %v4077_v61  ;;  %v4114_v13 = vadd.f32 %v4096_v0, %v4078_v58  ;;  %v3784_v45 = vsel %vm737_vm8, %v3783_v29, %v3782_v32  ;;  %v4115_v16 = vadd.f32 %v4097_v56, %v4079_v24  ;;  %v7843_v0 = vld [vmem:[#allocation2 + $0x3d] sm:$0x1]  ;;  %v7850_v56 = vld [vmem:[#allocation2 + $0x6d] sm:$0x1]  ;;  %v7854_v47 = vld [vmem:[#allocation2 + $0xe] sm:$0x1] }
 0x1a1   : > { %v4116_v38 = vadd.f32 %v4098_v30, %v4080_v9  ;;  %v4117_v44 = vadd.f32 %v4099_v31, %v4081_v17  ;;  %3801 = vrot.lane.b32.xlu1 %v3784_v45, %s7221_s9  ;;  %v4118_v8 = vadd.f32 %v4100_v63, %v4082_v43  ;;  %v4119_v14 = vadd.f32 %v4101_v12, %v4083_v53  ;;  %v7831_v17 = vld [vmem:[#allocation2 + $0xd] sm:$0x1]  ;;  %v7852_v30 = vld [vmem:[#allocation2 + $0x7d] sm:$0x1]  ;;  %v7856_v32 = vld [vmem:[#allocation2 + $0x1e] sm:$0x1] }
 0x1a2   : > { %v4120_v39 = vadd.f32 %v4102_v51, %v4084_v60  ;;  %v4149_v41 = vrot.slane %v4114_v13, 7  ;;  %v4151_v1 = vrot.slane %v4115_v16, 6  ;;  %v3963_v34 = vmul.f32 0.9032258, %v7763_v40  ;;  %v7858_v51 = vld [vmem:[#allocation2 + $0x2e] sm:$0x1] }
 0x1a3   : > { %v4153_v55 = vrot.slane %v4116_v38, 5  ;;  %v4155_v3 = vrot.slane %v4117_v44, 4  ;;  %v4157_v25 = vrot.slane %v4118_v8, 3  ;;  %v4159_v35 = vrot.slane %v4119_v14, 2  ;;  %v4216_v8 = vld [vmem:[#allocation2 + $0x4e] sm:$0x1] }
 0x1a4   : > { %v4150_v37 = vsel %vm719_vm2, %v4149_v41, %v4113_v5  ;;  %v4161_v61 = vrot.slane %v4120_v39, 1  ;;  %v3964_v21 = vmul.f32 0.9032258, %v7770_v33  ;;  %v3965_v36 = vmul.f32 0.9032258, %v7772_v2 }
 0x1a5   : > { %v4152_v28 = vsel %vm722_vm3, %v4151_v1, %v4150_v37  ;;  %v3966_v59 = vmul.f32 0.9032258, %v7775_v42  ;;  %v3967_v29 = vmul.f32 0.9032258, %v7777_v27  ;;  %v3968_v58 = vmul.f32 0.9032258, %v7779_v48 }
 0x1a6   : > { %v4154_v19 = vsel %vm725_vm4, %v4153_v55, %v4152_v28  ;;  %v3969_v40 = vmul.f32 0.9032258, %v7782_v23  ;;  %v3970_v11 = vmul.f32 0.9032258, %v7784_v22  ;;  %v3981_v9 = vmul.f32 0.09677419, %v7786_v10 }
 0x1a7   : > { %v4156_v24 = vsel %vm728_vm5, %v4155_v3, %v4154_v19  ;;  %v3982_v33 = vmul.f32 0.09677419, %v7788_v46  ;;  %v3983_v42 = vmul.f32 0.09677419, %v7790_v57  ;;  %v3984_v27 = vmul.f32 0.09677419, %v7792_v18 }
 0x1a8   : > { %v4158_v2 = vsel %vm731_vm6, %v4157_v25, %v4156_v24  ;;  %v3985_v43 = vmul.f32 0.09677419, %v3949_v52  ;;  %v3986_v23 = vmul.f32 0.09677419, %v7795_v54  ;;  %v3987_v20 = vmul.f32 0.09677419, %v3951_v15 }
 0x1a9   : > { %v4160_v48 = vsel %vm734_vm7, %v4159_v35, %v4158_v2  ;;  %v3988_v53 = vmul.f32 0.09677419, %v3952_v50  ;;  %v7838_v22 = vld [vmem:[#allocation2 + $0x1d] sm:$0x1]  ;;  %v7840_v10 = vld [vmem:[#allocation2 + $0x2d] sm:$0x1]  ;;  %v3999_v60 = vadd.f32 %v3981_v9, %v3963_v34  ;;  %v4000_v26 = vadd.f32 %v3982_v33, %v3964_v21 }
 0x1aa   : > { %v4162_v46 = vsel %vm737_vm8, %v4161_v61, %v4160_v48  ;;  %v4001_v62 = vadd.f32 %v3983_v42, %v3965_v36  ;;  %v7845_v57 = vld [vmem:[#allocation2 + $0x4d] sm:$0x1]  ;;  %v7847_v18 = vld [vmem:[#allocation2 + $0x5d] sm:$0x1]  ;;  %v4002_v52 = vadd.f32 %v3984_v27, %v3966_v59  ;;  %v4003_v54 = vadd.f32 %v3985_v43, %v3967_v29  ;;  %v7860_v5 = vld [vmem:[#allocation2 + $0x3e] sm:$0x1] }
 0x1ab   : > { %4179 = vrot.lane.b32.xlu0 %v4162_v46, %s7222_s10  ;;  %v4004_v15 = vadd.f32 %v3986_v23, %v3968_v58  ;;  %v4005_v50 = vadd.f32 %v3987_v20, %v3969_v40  ;;  %v4006_v31 = vadd.f32 %v3988_v53, %v3970_v11  ;;  %v4035_v63 = vrot.slane %v4000_v26, 7  ;;  %v7863_v14 = vld [vmem:[#allocation2 + $0x5e] sm:$0x1]  ;;  %v4218_v39 = vld [vmem:[#allocation2 + $0x6e] sm:$0x1] }
 0x1ac   : > { %v4037_v12 = vrot.slane %v4001_v62, 6  ;;  %v4344_v13 = vmul.f32 0.4516129, %v7831_v17  ;;  %v4039_v45 = vrot.slane %v4002_v52, 5  ;;  %v4041_v16 = vrot.slane %v4003_v54, 4 }
 0x1ad   : > { %v4043_v38 = vrot.slane %v4004_v15, 3  ;;  %v4045_v44 = vrot.slane %v4005_v50, 2  ;;  %v4036_v41 = vsel %vm719_vm2, %v4035_v63, %v3999_v60  ;;  %v4047_v1 = vrot.slane %v4006_v31, 1  ;;  %v4219_v55 = vld [vmem:[#allocation2 + $0x7e] sm:$0x1] }
 0x1ae   : > { %v4345_v3 = vmul.f32 0.4516129, %v7838_v22  ;;  %v4346_v34 = vmul.f32 0.4516129, %v7840_v10  ;;  %v4038_v37 = vsel %vm722_vm3, %v4037_v12, %v4036_v41  ;;  %v4347_v25 = vmul.f32 0.4516129, %v7843_v0 }
 0x1af   : > { %v4348_v35 = vmul.f32 0.4516129, %v7845_v57  ;;  %v4349_v61 = vmul.f32 0.4516129, %v7847_v18  ;;  %v4040_v28 = vsel %vm725_vm4, %v4039_v45, %v4038_v37  ;;  %v4350_v21 = vmul.f32 0.4516129, %v7850_v56 }
 0x1b0   : > { %v4351_v36 = vmul.f32 0.4516129, %v7852_v30  ;;  %v4362_v59 = vmul.f32 0.5483871, %v7854_v47  ;;  %v4042_v19 = vsel %vm728_vm5, %v4041_v16, %v4040_v28  ;;  %v4363_v29 = vmul.f32 0.5483871, %v7856_v32 }
 0x1b1   : > { %v4364_v58 = vmul.f32 0.5483871, %v7858_v51  ;;  %v4365_v40 = vmul.f32 0.5483871, %v7860_v5  ;;  %v4044_v24 = vsel %vm731_vm6, %v4043_v38, %v4042_v19  ;;  %v4366_v11 = vmul.f32 0.5483871, %v4216_v8 }
 0x1b2   : > { %v4367_v9 = vmul.f32 0.5483871, %v7863_v14  ;;  %v4368_v33 = vmul.f32 0.5483871, %v4218_v39  ;;  %v4046_v2 = vsel %vm734_vm7, %v4045_v44, %v4044_v24  ;;  %v4369_v42 = vmul.f32 0.5483871, %v4219_v55 }
 0x1b3   : > { %v4380_v27 = vadd.f32 %v4362_v59, %v4344_v13  ;;  %v4381_v43 = vadd.f32 %v4363_v29, %v4345_v3  ;;  %v4048_v48 = vsel %vm737_vm8, %v4047_v1, %v4046_v2  ;;  %v4382_v23 = vadd.f32 %v4364_v58, %v4346_v34  ;;  %v7911_v29 = vld [vmem:[#allocation2 + $0x3e] sm:$0x1]  ;;  %v7918_v58 = vld [vmem:[#allocation2 + $0x6e] sm:$0x1]  ;;  %v7922_v24 = vld [vmem:[#allocation2 + $0xf] sm:$0x1] }
 0x1b4   : > { %v4383_v20 = vadd.f32 %v4365_v40, %v4347_v25  ;;  %v4384_v53 = vadd.f32 %v4366_v11, %v4348_v35  ;;  %4065 = vrot.lane.b32.xlu1 %v4048_v48, %s7224_s12  ;;  %v4385_v46 = vadd.f32 %v4367_v9, %v4349_v61  ;;  %v4386_v60 = vadd.f32 %v4368_v33, %v4350_v21  ;;  %v7899_v35 = vld [vmem:[#allocation2 + $0xe] sm:$0x1]  ;;  %v7920_v40 = vld [vmem:[#allocation2 + $0x7e] sm:$0x1]  ;;  %v7924_v2 = vld [vmem:[#allocation2 + $0x1f] sm:$0x1] }
 0x1b5   : > { %v4387_v26 = vadd.f32 %v4369_v42, %v4351_v36  ;;  %v4416_v62 = vrot.slane %v4381_v43, 7  ;;  %v4418_v52 = vrot.slane %v4382_v23, 6  ;;  %v4230_v50 = vmul.f32 0.9354839, %v7831_v17  ;;  %v7926_v42 = vld [vmem:[#allocation2 + $0x2f] sm:$0x1] }
 0x1b6   : > { %v4420_v54 = vrot.slane %v4383_v20, 5  ;;  %v4422_v15 = vrot.slane %v4384_v53, 4  ;;  %v4424_v63 = vrot.slane %v4385_v46, 3  ;;  %v4426_v12 = vrot.slane %v4386_v60, 2  ;;  %v4480_v46 = vld [vmem:[#allocation2 + $0x4f] sm:$0x1] }
 0x1b7   : > { %v4417_v31 = vsel %vm719_vm2, %v4416_v62, %v4380_v27  ;;  %v4428_v13 = vrot.slane %v4387_v26, 1  ;;  %v4231_v16 = vmul.f32 0.9354839, %v7838_v22  ;;  %v4232_v38 = vmul.f32 0.9354839, %v7840_v10 }
 0x1b8   : > { %v4419_v45 = vsel %vm722_vm3, %v4418_v52, %v4417_v31  ;;  %v4233_v44 = vmul.f32 0.9354839, %v7843_v0  ;;  %v4234_v1 = vmul.f32 0.9354839, %v7845_v57  ;;  %v4235_v3 = vmul.f32 0.9354839, %v7847_v18 }
 0x1b9   : > { %v4421_v41 = vsel %vm725_vm4, %v4420_v54, %v4419_v45  ;;  %v4236_v17 = vmul.f32 0.9354839, %v7850_v56  ;;  %v4237_v37 = vmul.f32 0.9354839, %v7852_v30  ;;  %v4248_v25 = vmul.f32 0.06451613, %v7854_v47 }
 0x1ba   : > { %v4423_v34 = vsel %vm728_vm5, %v4422_v15, %v4421_v41  ;;  %v4249_v22 = vmul.f32 0.06451613, %v7856_v32  ;;  %v4250_v0 = vmul.f32 0.06451613, %v7858_v51  ;;  %v4251_v57 = vmul.f32 0.06451613, %v7860_v5 }
 0x1bb   : > { %v4425_v10 = vsel %vm731_vm6, %v4424_v63, %v4423_v34  ;;  %v4252_v61 = vmul.f32 0.06451613, %v4216_v8  ;;  %v4253_v56 = vmul.f32 0.06451613, %v7863_v14  ;;  %v4254_v28 = vmul.f32 0.06451613, %v4218_v39 }
 0x1bc   : > { %v4427_v18 = vsel %vm734_vm7, %v4426_v12, %v4425_v10  ;;  %v4255_v21 = vmul.f32 0.06451613, %v4219_v55  ;;  %v7906_v30 = vld [vmem:[#allocation2 + $0x1e] sm:$0x1]  ;;  %v7908_v47 = vld [vmem:[#allocation2 + $0x2e] sm:$0x1]  ;;  %v4266_v36 = vadd.f32 %v4248_v25, %v4230_v50  ;;  %v4267_v59 = vadd.f32 %v4249_v22, %v4231_v16 }
 0x1bd   : > { %v4429_v32 = vsel %vm737_vm8, %v4428_v13, %v4427_v18  ;;  %v4268_v19 = vadd.f32 %v4250_v0, %v4232_v38  ;;  %v7913_v51 = vld [vmem:[#allocation2 + $0x4e] sm:$0x1]  ;;  %v7915_v5 = vld [vmem:[#allocation2 + $0x5e] sm:$0x1]  ;;  %v4269_v8 = vadd.f32 %v4251_v57, %v4233_v44  ;;  %v4270_v14 = vadd.f32 %v4252_v61, %v4234_v1  ;;  %v7928_v27 = vld [vmem:[#allocation2 + $0x3f] sm:$0x1] }
 0x1be   : > { %4446 = vrot.lane.b32.xlu0 %v4429_v32, %s7223_s11  ;;  %v4271_v39 = vadd.f32 %v4253_v56, %v4235_v3  ;;  %v4272_v55 = vadd.f32 %v4254_v28, %v4236_v17  ;;  %v4273_v11 = vadd.f32 %v4255_v21, %v4237_v37  ;;  %v4302_v9 = vrot.slane %v4267_v59, 7  ;;  %v4481_v60 = vld [vmem:[#allocation2 + $0x5f] sm:$0x1]  ;;  %v4482_v26 = vld [vmem:[#allocation2 + $0x6f] sm:$0x1] }
 0x1bf   : > { %v4304_v33 = vrot.slane %v4268_v19, 6  ;;  %v4608_v43 = vmul.f32 0.48387098, %v7899_v35  ;;  %v4306_v48 = vrot.slane %v4269_v8, 5  ;;  %v4308_v23 = vrot.slane %v4270_v14, 4 }
 0x1c0   : > { %v4310_v20 = vrot.slane %v4271_v39, 3  ;;  %v4312_v53 = vrot.slane %v4272_v55, 2  ;;  %v4303_v62 = vsel %vm719_vm2, %v4302_v9, %v4266_v36  ;;  %v4314_v52 = vrot.slane %v4273_v11, 1  ;;  %v4483_v54 = vld [vmem:[#allocation2 + $0x7f] sm:$0x1] }
 0x1c1   : > { %v4609_v15 = vmul.f32 0.48387098, %v7906_v30  ;;  %v4610_v50 = vmul.f32 0.48387098, %v7908_v47  ;;  %v4305_v31 = vsel %vm722_vm3, %v4304_v33, %v4303_v62  ;;  %v4611_v63 = vmul.f32 0.48387098, %v7911_v29 }
 0x1c2   : > { %v4612_v12 = vmul.f32 0.48387098, %v7913_v51  ;;  %v4613_v13 = vmul.f32 0.48387098, %v7915_v5  ;;  %v4307_v45 = vsel %vm725_vm4, %v4306_v48, %v4305_v31  ;;  %v4614_v16 = vmul.f32 0.48387098, %v7918_v58 }
 0x1c3   : > { %v4615_v38 = vmul.f32 0.48387098, %v7920_v40  ;;  %v4626_v44 = vmul.f32 0.516129, %v7922_v24  ;;  %v4309_v41 = vsel %vm728_vm5, %v4308_v23, %v4307_v45  ;;  %v4627_v1 = vmul.f32 0.516129, %v7924_v2 }
 0x1c4   : > { %v4628_v3 = vmul.f32 0.516129, %v7926_v42  ;;  %v4629_v17 = vmul.f32 0.516129, %v7928_v27  ;;  %v4311_v34 = vsel %vm731_vm6, %v4310_v20, %v4309_v41  ;;  %v4630_v37 = vmul.f32 0.516129, %v4480_v46 }
 0x1c5   : > { %v4631_v25 = vmul.f32 0.516129, %v4481_v60  ;;  %v4632_v22 = vmul.f32 0.516129, %v4482_v26  ;;  %v4313_v10 = vsel %vm734_vm7, %v4312_v53, %v4311_v34  ;;  %v4633_v0 = vmul.f32 0.516129, %v4483_v54 }
 0x1c6   : > { %v4644_v57 = vadd.f32 %v4626_v44, %v4608_v43  ;;  %v4645_v61 = vadd.f32 %v4627_v1, %v4609_v15  ;;  %v4315_v18 = vsel %vm737_vm8, %v4314_v52, %v4313_v10  ;;  %v4646_v56 = vadd.f32 %v4628_v3, %v4610_v50  ;;  %v7173_v34 = vld [vmem:[#allocation2 + $0x10] sm:$0x1] }
 0x1c7   : > { %v4647_v28 = vadd.f32 %v4629_v17, %v4611_v63  ;;  %v4648_v21 = vadd.f32 %v4630_v37, %v4612_v12  ;;  %4332 = vrot.lane.b32.xlu1 %v4315_v18, %s7221_s9  ;;  %v4649_v32 = vadd.f32 %v4631_v25, %v4613_v13  ;;  %v4650_v36 = vadd.f32 %v4632_v22, %v4614_v16  ;;  %v7978_v17 = vld [vmem:[#allocation2 + $0x41] sm:$0x1]  ;;  %v7984_v18 = vld [vmem:[#allocation2 + $0x71] sm:$0x1] }
 0x1c8   : > { %v4651_v59 = vadd.f32 %v4633_v0, %v4615_v38  ;;  %v4680_v19 = vrot.slane %v4645_v61, 7  ;;  %v4682_v8 = vrot.slane %v4646_v56, 6  ;;  %v4494_v55 = vmul.f32 0.96774197, %v7899_v35  ;;  %v7982_v61 = vld [vmem:[#allocation2 + $0x61] sm:$0x1] }
 0x1c9   : > { %v4684_v14 = vrot.slane %v4647_v28, 5  ;;  %v4686_v39 = vrot.slane %v4648_v21, 4  ;;  %v4688_v9 = vrot.slane %v4649_v32, 3  ;;  %v4690_v33 = vrot.slane %v4650_v36, 2  ;;  %v7174_v21 = vld [vmem:[#allocation2 + $0x20] sm:$0x1] }
 0x1ca   : > { %v4681_v11 = vsel %vm719_vm2, %v4680_v19, %v4644_v57  ;;  %v4692_v43 = vrot.slane %v4651_v59, 1  ;;  %v4495_v23 = vmul.f32 0.96774197, %v7906_v30  ;;  %v4496_v20 = vmul.f32 0.96774197, %v7908_v47  ;;  %v7987_v19 = vpop.permute.xlu1 %4894 }
 0x1cb   : > { %v4683_v48 = vsel %vm722_vm3, %v4682_v8, %v4681_v11  ;;  %v4497_v53 = vmul.f32 0.96774197, %v7911_v29  ;;  %v4498_v52 = vmul.f32 0.96774197, %v7913_v51  ;;  %v4499_v15 = vmul.f32 0.96774197, %v7915_v5 }
 0x1cc   : > { %v4685_v62 = vsel %vm725_vm4, %v4684_v14, %v4683_v48  ;;  %v4500_v35 = vmul.f32 0.96774197, %v7918_v58  ;;  %v4501_v31 = vmul.f32 0.96774197, %v7920_v40  ;;  %v4512_v63 = vmul.f32 0.032258064, %v7922_v24 }
 0x1cd   : > { %v4687_v50 = vsel %vm728_vm5, %v4686_v39, %v4685_v62  ;;  %v4513_v30 = vmul.f32 0.032258064, %v7924_v2  ;;  %v4514_v29 = vmul.f32 0.032258064, %v7926_v42  ;;  %v4515_v12 = vmul.f32 0.032258064, %v7928_v27 }
 0x1ce   : > { %v4689_v47 = vsel %vm731_vm6, %v4688_v9, %v4687_v50  ;;  %v4516_v13 = vmul.f32 0.032258064, %v4480_v46  ;;  %v4517_v5 = vmul.f32 0.032258064, %v4481_v60  ;;  %v4518_v45 = vmul.f32 0.032258064, %v4482_v26 }
 0x1cf   : > { %v4691_v51 = vsel %vm734_vm7, %v4690_v33, %v4689_v47  ;;  %v4519_v58 = vmul.f32 0.032258064, %v4483_v54  ;;  %v4530_v38 = vadd.f32 %v4512_v63, %v4494_v55  ;;  %v4531_v40 = vadd.f32 %v4513_v30, %v4495_v23  ;;  %v7970_v42 = vld [vmem:[#allocation2 + $0x1] sm:$0x1]  ;;  %v7972_v27 = vld [vmem:[#allocation2 + $0x11] sm:$0x1] }
 0x1d0   : > { %v4693_v16 = vsel %vm737_vm8, %v4692_v43, %v4691_v51  ;;  %v4532_v44 = vadd.f32 %v4514_v29, %v4496_v20  ;;  %v4533_v24 = vadd.f32 %v4515_v12, %v4497_v53  ;;  %v4534_v2 = vadd.f32 %v4516_v13, %v4498_v52  ;;  %v7974_v26 = vld [vmem:[#allocation2 + $0x21] sm:$0x1]  ;;  %v7976_v54 = vld [vmem:[#allocation2 + $0x31] sm:$0x1]  ;;  %v7175_v36 = vld [vmem:[#allocation2 + $0x30] sm:$0x1] }
 0x1d1   : > { %4710 = vrot.lane.b32.xlu0 %v4693_v16, %s7222_s10  ;;  %v4535_v41 = vadd.f32 %v4517_v5, %v4499_v15  ;;  %v4536_v1 = vadd.f32 %v4518_v45, %v4500_v35  ;;  %v4537_v46 = vadd.f32 %v4519_v58, %v4501_v31  ;;  %v4566_v3 = vrot.slane %v4531_v40, 7  ;;  %v7980_v57 = vld [vmem:[#allocation2 + $0x51] sm:$0x1]  ;;  %12512 = vst [vmem:[#allocation4_spill] sm:$0xff] %v7987_v19  ;;  %v7176_v14 = vld [vmem:[#allocation2 + $0x40] sm:$0x1]  ;;  %v8004_v16 = vpop.permute.xlu1 %4899 }
 0x1d2   : > { %v4568_v60 = vrot.slane %v4532_v44, 6  ;;  %v886_v37 = vmul.f32 0.032258093, %v7173_v34  ;;  %v4570_v25 = vrot.slane %v4533_v24, 5  ;;  %v4572_v22 = vrot.slane %v4534_v2, 4  ;;  %12513 = vst [vmem:[#allocation5_spill] sm:$0xff] %v8004_v16 }
 0x1d3   : > { %v4574_v10 = vrot.slane %v4535_v41, 3  ;;  %v4576_v0 = vrot.slane %v4536_v1, 2  ;;  %v4567_v56 = vsel %vm719_vm2, %v4566_v3, %v4530_v38  ;;  %v4578_v28 = vrot.slane %v4537_v46, 1  ;;  %v7177_v55 = vld [vmem:[#allocation2 + $0x50] sm:$0x1] }
 0x1d4   : > { %v887_v32 = vmul.f32 0.032258093, %v7174_v21  ;;  %v888_v59 = vmul.f32 0.032258093, %v7175_v36  ;;  %v4569_v8 = vsel %vm722_vm3, %v4568_v60, %v4567_v56  ;;  %v889_v39 = vmul.f32 0.032258093, %v7176_v14 }
 0x1d5   : > { %v890_v11 = vmul.f32 0.032258093, %v7177_v55  ;;  %v7178_v9 = vld [vmem:[#allocation2 + $0x60] sm:$0x1]  ;;  %v4571_v43 = vsel %vm725_vm4, %v4570_v25, %v4569_v8  ;;  %v7179_v48 = vld [vmem:[#allocation2 + $0x70] sm:$0x1] }
 0x1d6   : > { %v891_v33 = vmul.f32 0.032258093, %v7178_v9  ;;  %v892_v23 = vmul.f32 0.032258093, %v7179_v48  ;;  %v903_v20 = vmul.f32 0.9677419, %v7970_v42  ;;  %v4573_v62 = vsel %vm728_vm5, %v4572_v22, %v4571_v43 }
 0x1d7   : > { %v904_v53 = vmul.f32 0.9677419, %v7972_v27  ;;  %v905_v52 = vmul.f32 0.9677419, %v7974_v26  ;;  %v906_v15 = vmul.f32 0.9677419, %v7976_v54  ;;  %v4575_v50 = vsel %vm731_vm6, %v4574_v10, %v4573_v62 }
 0x1d8   : > { %v907_v35 = vmul.f32 0.9677419, %v7978_v17  ;;  %v908_v31 = vmul.f32 0.9677419, %v7980_v57  ;;  %v909_v63 = vmul.f32 0.9677419, %v7982_v61  ;;  %v4577_v47 = vsel %vm734_vm7, %v4576_v0, %v4575_v50 }
 0x1d9   : > { %v910_v30 = vmul.f32 0.9677419, %v7984_v18  ;;  %v921_v29 = vadd.f32 %v903_v20, %v7418_v7  ;;  %v922_v12 = vadd.f32 %v904_v53, %v886_v37  ;;  %v923_v13 = vadd.f32 %v905_v52, %v887_v32  ;;  %v8033_v62 = vld [vmem:[#allocation2 + $0x41] sm:$0x1]  ;;  %v8040_v50 = vld [vmem:[#allocation2 + $0x71] sm:$0x1] }
 0x1da   : > { %v4579_v51 = vsel %vm737_vm8, %v4578_v28, %v4577_v47  ;;  %v924_v5 = vadd.f32 %v906_v15, %v888_v59  ;;  %v925_v45 = vadd.f32 %v907_v35, %v889_v39  ;;  %v926_v58 = vadd.f32 %v908_v31, %v890_v11  ;;  %v8037_v52 = vld [vmem:[#allocation2 + $0x61] sm:$0x1]  ;;  %v8042_v31 = vld [vmem:[#allocation2 + $0x2] sm:$0x1] }
 0x1db   : > { %4596 = vrot.lane.b32.xlu1 %v4579_v51, %s7224_s12  ;;  %v927_v38 = vadd.f32 %v909_v63, %v891_v33  ;;  %v928_v40 = vadd.f32 %v910_v30, %v892_v23  ;;  %v957_v44 = vrot.slane %v922_v12, 7  ;;  %v959_v24 = vrot.slane %v923_v13, 6  ;;  %v8017_v33 = vpop.permute.xlu1 %4982  ;;  %v8030_v23 = vld [vmem:[#allocation2 + $0x31] sm:$0x1]  ;;  %v8044_v63 = vld [vmem:[#allocation2 + $0x12] sm:$0x1] }
 0x1dc   : > { %v961_v2 = vrot.slane %v924_v5, 5  ;;  %v963_v41 = vrot.slane %v925_v45, 4  ;;  %v965_v1 = vrot.slane %v926_v58, 3  ;;  %v770_v46 = vmul.f32 0.516129, %v7173_v34  ;;  %12514 = vst [vmem:[#allocation6_spill] sm:$0xff] %v8017_v33 }
 0x1dd   : > { %v958_v7 = vsel %vm719_vm2, %v957_v44, %v921_v29  ;;  %v967_v3 = vrot.slane %v927_v38, 2  ;;  %v969_v60 = vrot.slane %v928_v40, 1  ;;  %v771_v37 = vmul.f32 0.516129, %v7174_v21  ;;  %v8015_v21 = vld [vmem:[#allocation2 + $0x1] sm:$0x1] }
 0x1de   : > { %v960_v25 = vsel %vm722_vm3, %v959_v24, %v958_v7  ;;  %v772_v22 = vmul.f32 0.516129, %v7175_v36  ;;  %v773_v10 = vmul.f32 0.516129, %v7176_v14  ;;  %v774_v0 = vmul.f32 0.516129, %v7177_v55 }
 0x1df   : > { %v962_v56 = vsel %vm725_vm4, %v961_v2, %v960_v25  ;;  %v775_v28 = vmul.f32 0.516129, %v7178_v9  ;;  %v776_v32 = vmul.f32 0.516129, %v7179_v48  ;;  %v787_v59 = vmul.f32 0.48387095, %v7970_v42 }
 0x1e0   : > { %v964_v8 = vsel %vm728_vm5, %v963_v41, %v962_v56  ;;  %v788_v34 = vmul.f32 0.48387095, %v7972_v27  ;;  %v789_v39 = vmul.f32 0.48387095, %v7974_v26  ;;  %v790_v11 = vmul.f32 0.48387095, %v7976_v54  ;;  %v8058_v41 = vpop.permute.xlu1 %4986 }
 0x1e1   : > { %v966_v36 = vsel %vm731_vm6, %v965_v1, %v964_v8  ;;  %v791_v14 = vmul.f32 0.48387095, %v7978_v17  ;;  %v792_v55 = vmul.f32 0.48387095, %v7980_v57  ;;  %v793_v42 = vmul.f32 0.48387095, %v7982_v61 }
 0x1e2   : > { %v968_v9 = vsel %vm734_vm7, %v967_v3, %v966_v36  ;;  %v794_v27 = vmul.f32 0.48387095, %v7984_v18  ;;  %v805_v26 = vadd.f32 %v787_v59, %v7415_v6  ;;  %v806_v43 = vadd.f32 %v788_v34, %v770_v46  ;;  %v8026_v54 = vld [vmem:[#allocation2 + $0x11] sm:$0x1]  ;;  %v8028_v48 = vld [vmem:[#allocation2 + $0x21] sm:$0x1] }
 0x1e3   : > { %v970_v20 = vsel %vm737_vm8, %v969_v60, %v968_v9  ;;  %v807_v17 = vadd.f32 %v789_v39, %v771_v37  ;;  %v808_v53 = vadd.f32 %v790_v11, %v772_v22  ;;  %v809_v57 = vadd.f32 %v791_v14, %v773_v10  ;;  %v8035_v61 = vld [vmem:[#allocation2 + $0x51] sm:$0x1]  ;;  %v8046_v12 = vld [vmem:[#allocation2 + $0x22] sm:$0x1]  ;;  %v8048_v13 = vld [vmem:[#allocation2 + $0x32] sm:$0x1] }
 0x1e4   : > { %987 = vrot.lane.b32.xlu0 %v970_v20, %s7222_s10  ;;  %v810_v6 = vadd.f32 %v792_v55, %v774_v0  ;;  %v811_v18 = vadd.f32 %v793_v42, %v775_v28  ;;  %v812_v15 = vadd.f32 %v794_v27, %v776_v32  ;;  %v841_v35 = vrot.slane %v806_v43, 7  ;;  %v8050_v51 = vld [vmem:[#allocation2 + $0x42] sm:$0x1]  ;;  %v8054_v44 = vld [vmem:[#allocation2 + $0x52] sm:$0x1]  ;;  %12515 = vst [vmem:[#allocation7_spill] sm:$0xff] %v8058_v41 }
 0x1e5   : > { %v843_v30 = vrot.slane %v807_v17, 6  ;;  %v845_v47 = vrot.slane %v808_v53, 5  ;;  %v847_v29 = vrot.slane %v809_v57, 4  ;;  %v1158_v5 = vmul.f32 0.06451613, %v8015_v21 }
 0x1e6   : > { %v842_v45 = vsel %vm719_vm2, %v841_v35, %v805_v26  ;;  %v849_v58 = vrot.slane %v810_v6, 3  ;;  %v851_v38 = vrot.slane %v811_v18, 2  ;;  %v853_v40 = vrot.slane %v812_v15, 1  ;;  %v1030_v24 = vld [vmem:[#allocation2 + $0x62] sm:$0x1]  ;;  %v8080_v26 = vpop.permute.xlu1 %5329 }
 0x1e7   : > { %v8056_v2 = vld [vmem:[#allocation2 + $0x72] sm:$0x1]  ;;  %v844_v1 = vsel %vm722_vm3, %v843_v30, %v842_v45  ;;  %v1159_v46 = vmul.f32 0.06451613, %v8026_v54  ;;  %v1160_v7 = vmul.f32 0.06451613, %v8028_v48 }
 0x1e8   : > { %v1161_v3 = vmul.f32 0.06451613, %v8030_v23  ;;  %v846_v60 = vsel %vm725_vm4, %v845_v47, %v844_v1  ;;  %v1162_v37 = vmul.f32 0.06451613, %v8033_v62  ;;  %v1163_v25 = vmul.f32 0.06451613, %v8035_v61 }
 0x1e9   : > { %v1164_v22 = vmul.f32 0.06451613, %v8037_v52  ;;  %v848_v10 = vsel %vm728_vm5, %v847_v29, %v846_v60  ;;  %v1165_v0 = vmul.f32 0.06451613, %v8040_v50  ;;  %v1176_v56 = vmul.f32 0.9354839, %v8042_v31 }
 0x1ea   : > { %v1177_v28 = vmul.f32 0.9354839, %v8044_v63  ;;  %v850_v32 = vsel %vm731_vm6, %v849_v58, %v848_v10  ;;  %v1178_v59 = vmul.f32 0.9354839, %v8046_v12  ;;  %v1179_v8 = vmul.f32 0.9354839, %v8048_v13 }
 0x1eb   : > { %v1180_v34 = vmul.f32 0.9354839, %v8050_v51  ;;  %v852_v39 = vsel %vm734_vm7, %v851_v38, %v850_v32  ;;  %v1181_v11 = vmul.f32 0.9354839, %v8054_v44  ;;  %v1182_v36 = vmul.f32 0.9354839, %v1030_v24 }
 0x1ec   : > { %v1183_v14 = vmul.f32 0.9354839, %v8056_v2  ;;  %v854_v55 = vsel %vm737_vm8, %v853_v40, %v852_v39  ;;  %v1194_v42 = vadd.f32 %v1176_v56, %v1158_v5  ;;  %v1195_v9 = vadd.f32 %v1177_v28, %v1159_v46  ;;  %12516 = vst [vmem:[#allocation8_spill] sm:$0xff] %v8080_v26  ;;  %v8087_v40 = vpop.permute.xlu0 %4978  ;;  %v8103_v10 = vld [vmem:[#allocation2 + $0x2] sm:$0x1] }
 0x1ed   : > { %v1196_v27 = vadd.f32 %v1178_v59, %v1160_v7  ;;  %871 = vrot.lane.b32.xlu1 %v854_v55, %s7224_s12  ;;  %v1197_v43 = vadd.f32 %v1179_v8, %v1161_v3  ;;  %v1198_v20 = vadd.f32 %v1180_v34, %v1162_v37  ;;  %v1199_v17 = vadd.f32 %v1181_v11, %v1163_v25  ;;  %v8097_v25 = vpop.permute.xlu1 %5333  ;;  %v8117_v39 = vld [vmem:[#allocation2 + $0x42] sm:$0x1] }
 0x1ee   : > { %v1200_v53 = vadd.f32 %v1182_v36, %v1164_v22  ;;  %v1201_v57 = vadd.f32 %v1183_v14, %v1165_v0  ;;  %v1230_v6 = vrot.slane %v1195_v9, 7  ;;  %v1042_v15 = vmul.f32 0.5483871, %v8015_v21  ;;  %12517 = vst [vmem:[#allocation9_spill] sm:$0xff] %v8087_v40  ;;  %12518 = vst [vmem:[#allocation10_spill] sm:$0xff] %v8097_v25 }
 0x1ef   : > { %v1232_v18 = vrot.slane %v1196_v27, 6  ;;  %v1234_v35 = vrot.slane %v1197_v43, 5  ;;  %v1236_v30 = vrot.slane %v1198_v20, 4  ;;  %v1238_v47 = vrot.slane %v1199_v17, 3  ;;  %v8128_v9 = vld [vmem:[#allocation2 + $0x3] sm:$0x1] }
 0x1f0   : > { %v1240_v29 = vrot.slane %v1200_v53, 2  ;;  %v1231_v5 = vsel %vm719_vm2, %v1230_v6, %v1194_v42  ;;  %v1242_v45 = vrot.slane %v1201_v57, 1  ;;  %v1043_v58 = vmul.f32 0.5483871, %v8026_v54  ;;  %v8126_v42 = vld [vmem:[#allocation2 + $0x72] sm:$0x1] }
 0x1f1   : > { %v1044_v38 = vmul.f32 0.5483871, %v8028_v48  ;;  %v1233_v1 = vsel %vm722_vm3, %v1232_v18, %v1231_v5  ;;  %v1045_v46 = vmul.f32 0.5483871, %v8030_v23  ;;  %v1046_v7 = vmul.f32 0.5483871, %v8033_v62 }
 0x1f2   : > { %v1047_v21 = vmul.f32 0.5483871, %v8035_v61  ;;  %v1235_v3 = vsel %vm725_vm4, %v1234_v35, %v1233_v1  ;;  %v1048_v60 = vmul.f32 0.5483871, %v8037_v52  ;;  %v1049_v37 = vmul.f32 0.5483871, %v8040_v50 }
 0x1f3   : > { %v1060_v54 = vmul.f32 0.4516129, %v8042_v31  ;;  %v1237_v48 = vsel %vm728_vm5, %v1236_v30, %v1235_v3  ;;  %v1061_v22 = vmul.f32 0.4516129, %v8044_v63  ;;  %v1062_v23 = vmul.f32 0.4516129, %v8046_v12 }
 0x1f4   : > { %v1063_v62 = vmul.f32 0.4516129, %v8048_v13  ;;  %v1239_v61 = vsel %vm731_vm6, %v1238_v47, %v1237_v48  ;;  %v1064_v52 = vmul.f32 0.4516129, %v8050_v51  ;;  %v1065_v50 = vmul.f32 0.4516129, %v8054_v44 }
 0x1f5   : > { %v1066_v0 = vmul.f32 0.4516129, %v1030_v24  ;;  %v1241_v31 = vsel %vm734_vm7, %v1240_v29, %v1239_v61  ;;  %v1067_v56 = vmul.f32 0.4516129, %v8056_v2  ;;  %v1078_v28 = vadd.f32 %v1060_v54, %v1042_v15  ;;  %v8110_v63 = vld [vmem:[#allocation2 + $0x12] sm:$0x1]  ;;  %v8123_v2 = vpop.permute.xlu0 %5325  ;;  %v8139_v15 = vpop.permute.xlu1 %5572 }
 0x1f6   : > { %v1079_v32 = vadd.f32 %v1061_v22, %v1043_v58  ;;  %v8112_v12 = vld [vmem:[#allocation2 + $0x22] sm:$0x1]  ;;  %v8114_v13 = vld [vmem:[#allocation2 + $0x32] sm:$0x1]  ;;  %v1243_v59 = vsel %vm737_vm8, %v1242_v45, %v1241_v31  ;;  %v1080_v8 = vadd.f32 %v1062_v23, %v1044_v38  ;;  %v1081_v34 = vadd.f32 %v1063_v62, %v1045_v46  ;;  %12519 = vst [vmem:[#allocation11_spill] sm:$0xff] %v8123_v2 }
 0x1f7   : > { %v1082_v51 = vadd.f32 %v1064_v52, %v1046_v7  ;;  %v8119_v44 = vld [vmem:[#allocation2 + $0x52] sm:$0x1]  ;;  %v8121_v24 = vld [vmem:[#allocation2 + $0x62] sm:$0x1]  ;;  %1260 = vrot.lane.b32.xlu0 %v1243_v59, %s7223_s11  ;;  %v1083_v11 = vadd.f32 %v1065_v50, %v1047_v21  ;;  %v1084_v36 = vadd.f32 %v1066_v0, %v1048_v60  ;;  %v1085_v14 = vadd.f32 %v1067_v56, %v1049_v37  ;;  %v8130_v27 = vld [vmem:[#allocation2 + $0x13] sm:$0x1] }
 0x1f8   : > { %v1114_v55 = vrot.slane %v1079_v32, 7  ;;  %v1116_v43 = vrot.slane %v1080_v8, 6  ;;  %v1118_v20 = vrot.slane %v1081_v34, 5  ;;  %v8132_v53 = vld [vmem:[#allocation2 + $0x23] sm:$0x1]  ;;  %12520 = vst [vmem:[#allocation12_spill] sm:$0xff] %v8139_v15 }
 0x1f9   : > { %v1120_v17 = vrot.slane %v1082_v51, 4  ;;  %v8134_v57 = vld [vmem:[#allocation2 + $0x33] sm:$0x1]  ;;  %v8136_v6 = vld [vmem:[#allocation2 + $0x43] sm:$0x1]  ;;  %v1122_v30 = vrot.slane %v1083_v11, 3  ;;  %v8158_v62 = vpop.permute.xlu0 %5576  ;;  %v8167_v59 = vpop.permute.xlu1 %5580 }
 0x1fa   : > { %v1422_v18 = vmul.f32 0.09677422, %v8103_v10  ;;  %v1115_v35 = vsel %vm719_vm2, %v1114_v55, %v1078_v28  ;;  %v1124_v47 = vrot.slane %v1084_v36, 2  ;;  %v1126_v29 = vrot.slane %v1085_v14, 1  ;;  %v8142_v5 = vld [vmem:[#allocation2 + $0x53] sm:$0x1] }
 0x1fb   : > { %v1296_v45 = vld [vmem:[#allocation2 + $0x63] sm:$0x1]  ;;  %v8144_v58 = vld [vmem:[#allocation2 + $0x73] sm:$0x1]  ;;  %v1117_v38 = vsel %vm722_vm3, %v1116_v43, %v1115_v35  ;;  %v1423_v1 = vmul.f32 0.09677422, %v8110_v63 }
 0x1fc   : > { %v1424_v46 = vmul.f32 0.09677422, %v8112_v12  ;;  %v1425_v7 = vmul.f32 0.09677422, %v8114_v13  ;;  %v1119_v21 = vsel %vm725_vm4, %v1118_v20, %v1117_v38  ;;  %v1426_v3 = vmul.f32 0.09677422, %v8117_v39 }
 0x1fd   : > { %v1427_v60 = vmul.f32 0.09677422, %v8119_v44  ;;  %v1428_v37 = vmul.f32 0.09677422, %v8121_v24  ;;  %v1121_v54 = vsel %vm728_vm5, %v1120_v17, %v1119_v21  ;;  %v1429_v48 = vmul.f32 0.09677422, %v8126_v42 }
 0x1fe   : > { %v1440_v22 = vmul.f32 0.9032258, %v8128_v9  ;;  %v1441_v23 = vmul.f32 0.9032258, %v8130_v27  ;;  %12521 = vst [vmem:[#allocation13_spill] sm:$0xff] %v8158_v62  ;;  %v1123_v61 = vsel %vm731_vm6, %v1122_v30, %v1121_v54  ;;  %12522 = vst [vmem:[#allocation14_spill] sm:$0xff] %v8167_v59 }
 0x1ff   : > { %v1442_v52 = vmul.f32 0.9032258, %v8132_v53  ;;  %v1443_v50 = vmul.f32 0.9032258, %v8134_v57  ;;  %v1444_v0 = vmul.f32 0.9032258, %v8136_v6  ;;  %v1125_v31 = vsel %vm734_vm7, %v1124_v47, %v1123_v61 }
 0x200   : > { %v1445_v56 = vmul.f32 0.9032258, %v8142_v5  ;;  %v1446_v28 = vmul.f32 0.9032258, %v1296_v45  ;;  %v1447_v32 = vmul.f32 0.9032258, %v8144_v58  ;;  %v1127_v8 = vsel %vm737_vm8, %v1126_v29, %v1125_v31 }
 0x201   : > { %v1458_v34 = vadd.f32 %v1440_v22, %v1422_v18  ;;  %v1459_v51 = vadd.f32 %v1441_v23, %v1423_v1  ;;  %v1460_v11 = vadd.f32 %v1442_v52, %v1424_v46  ;;  %1144 = vrot.lane.b32.xlu1 %v1127_v8, %s7221_s9  ;;  %v1461_v36 = vadd.f32 %v1443_v50, %v1425_v7  ;;  %v8173_v1 = vpop.permute.xlu0 %6143  ;;  %v8191_v50 = vld [vmem:[#allocation2 + $0x3] sm:$0x1] }
 0x202   : > { %v1462_v14 = vadd.f32 %v1444_v0, %v1426_v3  ;;  %v1463_v55 = vadd.f32 %v1445_v56, %v1427_v60  ;;  %v1464_v43 = vadd.f32 %v1446_v28, %v1428_v37  ;;  %v1465_v20 = vadd.f32 %v1447_v32, %v1429_v48  ;;  %12523 = vst [vmem:[#allocation15_spill] sm:$0xff] %v8173_v1  ;;  %v8181_v48 = vpop.permute.xlu1 %6139 }
 0x203   : > { %v1494_v17 = vrot.slane %v1459_v51, 7  ;;  %v1496_v35 = vrot.slane %v1460_v11, 6  ;;  %v1308_v30 = vmul.f32 0.5806452, %v8103_v10  ;;  %v1498_v47 = vrot.slane %v1461_v36, 5  ;;  %12524 = vst [vmem:[#allocation16_spill] sm:$0xff] %v8181_v48 }
 0x204   : > { %v1500_v38 = vrot.slane %v1462_v14, 4  ;;  %v1502_v21 = vrot.slane %v1463_v55, 3  ;;  %v1504_v54 = vrot.slane %v1464_v43, 2  ;;  %v1506_v18 = vrot.slane %v1465_v20, 1  ;;  %v8205_v51 = vld [vmem:[#allocation2 + $0x43] sm:$0x1] }
 0x205   : > { %v1495_v29 = vsel %vm719_vm2, %v1494_v17, %v1458_v34  ;;  %v1309_v46 = vmul.f32 0.5806452, %v8110_v63  ;;  %v1310_v7 = vmul.f32 0.5806452, %v8112_v12  ;;  %v1311_v60 = vmul.f32 0.5806452, %v8114_v13 }
 0x206   : > { %v1497_v3 = vsel %vm722_vm3, %v1496_v35, %v1495_v29  ;;  %v1312_v37 = vmul.f32 0.5806452, %v8117_v39  ;;  %v1313_v10 = vmul.f32 0.5806452, %v8119_v44  ;;  %v1314_v23 = vmul.f32 0.5806452, %v8121_v24  ;;  %v8220_v35 = vpop.permute.xlu1 %6147 }
 0x207   : > { %v1499_v22 = vsel %vm725_vm4, %v1498_v47, %v1497_v3  ;;  %v1315_v61 = vmul.f32 0.5806452, %v8126_v42  ;;  %v1326_v63 = vmul.f32 0.41935483, %v8128_v9  ;;  %v1327_v52 = vmul.f32 0.41935483, %v8130_v27 }
 0x208   : > { %v1501_v12 = vsel %vm728_vm5, %v1500_v38, %v1499_v22  ;;  %v1328_v13 = vmul.f32 0.41935483, %v8132_v53  ;;  %v1329_v39 = vmul.f32 0.41935483, %v8134_v57  ;;  %v1330_v0 = vmul.f32 0.41935483, %v8136_v6 }
 0x209   : > { %v1503_v44 = vsel %vm731_vm6, %v1502_v21, %v1501_v12  ;;  %v1331_v24 = vmul.f32 0.41935483, %v8142_v5  ;;  %v1332_v31 = vmul.f32 0.41935483, %v1296_v45  ;;  %v1333_v9 = vmul.f32 0.41935483, %v8144_v58  ;;  %v8211_v58 = vpop.permute.xlu0 %5516 }
 0x20a   : > { %v1505_v42 = vsel %vm734_vm7, %v1504_v54, %v1503_v44  ;;  %v1344_v56 = vadd.f32 %v1326_v63, %v1308_v30  ;;  %v1345_v28 = vadd.f32 %v1327_v52, %v1309_v46  ;;  %v8198_v27 = vld [vmem:[#allocation2 + $0x13] sm:$0x1]  ;;  %v8200_v53 = vld [vmem:[#allocation2 + $0x23] sm:$0x1]  ;;  %v1346_v8 = vadd.f32 %v1328_v13, %v1310_v7  ;;  %12525 = vst [vmem:[#allocation17_spill] sm:$0xff] %v8211_v58 }
 0x20b   : > { %v8202_v57 = vld [vmem:[#allocation2 + $0x33] sm:$0x1]  ;;  %v1507_v32 = vsel %vm737_vm8, %v1506_v18, %v1505_v42  ;;  %v1347_v34 = vadd.f32 %v1329_v39, %v1311_v60  ;;  %v1348_v6 = vadd.f32 %v1330_v0, %v1312_v37  ;;  %v8209_v45 = vld [vmem:[#allocation2 + $0x63] sm:$0x1]  ;;  %v1349_v11 = vadd.f32 %v1331_v24, %v1313_v10  ;;  %v8216_v20 = vld [vmem:[#allocation2 + $0x4] sm:$0x1] }
 0x20c   : > { %v8207_v5 = vld [vmem:[#allocation2 + $0x53] sm:$0x1]  ;;  %1524 = vrot.lane.b32.xlu0 %v1507_v32, %s7222_s10  ;;  %v1350_v36 = vadd.f32 %v1332_v31, %v1314_v23  ;;  %v1351_v14 = vadd.f32 %v1333_v9, %v1315_v61  ;;  %v1380_v55 = vrot.slane %v1345_v28, 7  ;;  %v8218_v17 = vld [vmem:[#allocation2 + $0x14] sm:$0x1]  ;;  %12526 = vst [vmem:[#allocation18_spill] sm:$0xff] %v8220_v35 }
 0x20d   : > { %v8214_v43 = vld [vmem:[#allocation2 + $0x73] sm:$0x1]  ;;  %v1382_v30 = vrot.slane %v1346_v8, 6  ;;  %v1384_v47 = vrot.slane %v1347_v34, 5  ;;  %v1386_v38 = vrot.slane %v1348_v6, 4  ;;  %v1388_v7 = vrot.slane %v1349_v11, 3  ;;  %v8246_v9 = vpop.permute.xlu0 %5520  ;;  %v8252_v34 = vpop.permute.xlu1 %5512 }
 0x20e   : > { %v8222_v21 = vld [vmem:[#allocation2 + $0x24] sm:$0x1]  ;;  %v8224_v54 = vld [vmem:[#allocation2 + $0x34] sm:$0x1]  ;;  %v1689_v18 = vmul.f32 0.12903225, %v8191_v50  ;;  %v1381_v46 = vsel %vm719_vm2, %v1380_v55, %v1344_v56 }
 0x20f   : > { %v8226_v29 = vld [vmem:[#allocation2 + $0x44] sm:$0x1]  ;;  %v1390_v3 = vrot.slane %v1350_v36, 2  ;;  %v1392_v60 = vrot.slane %v1351_v14, 1  ;;  %v8230_v37 = vld [vmem:[#allocation2 + $0x54] sm:$0x1]  ;;  %v1383_v23 = vsel %vm722_vm3, %v1382_v30, %v1381_v46 }
 0x210   : > { %v1563_v10 = vld [vmem:[#allocation2 + $0x64] sm:$0x1]  ;;  %v8232_v22 = vld [vmem:[#allocation2 + $0x74] sm:$0x1]  ;;  %v1690_v61 = vmul.f32 0.12903225, %v8198_v27  ;;  %v1385_v52 = vsel %vm725_vm4, %v1384_v47, %v1383_v23 }
 0x211   : > { %v1691_v63 = vmul.f32 0.12903225, %v8200_v53  ;;  %v1692_v12 = vmul.f32 0.12903225, %v8202_v57  ;;  %v1693_v13 = vmul.f32 0.12903225, %v8205_v51  ;;  %v1387_v0 = vsel %vm728_vm5, %v1386_v38, %v1385_v52  ;;  %v8260_v58 = vpop.permute.xlu0 %3121 }
 0x212   : > { %v1694_v39 = vmul.f32 0.12903225, %v8207_v5  ;;  %v1695_v44 = vmul.f32 0.12903225, %v8209_v45  ;;  %v1696_v24 = vmul.f32 0.12903225, %v8214_v43  ;;  %v1389_v56 = vsel %vm731_vm6, %v1388_v7, %v1387_v0 }
 0x213   : > { %v1707_v31 = vmul.f32 0.87096775, %v8216_v20  ;;  %v1708_v42 = vmul.f32 0.87096775, %v8218_v17  ;;  %12527 = vst [vmem:[#allocation19_spill] sm:$0xff] %v8246_v9  ;;  %12528 = vst [vmem:[#allocation20_spill] sm:$0xff] %v8252_v34  ;;  %v1391_v6 = vsel %vm734_vm7, %v1390_v3, %v1389_v56 }
 0x214   : > { %v1709_v28 = vmul.f32 0.87096775, %v8222_v21  ;;  %v1710_v32 = vmul.f32 0.87096775, %v8224_v54  ;;  %v1711_v8 = vmul.f32 0.87096775, %v8226_v29  ;;  %v1393_v55 = vsel %vm737_vm8, %v1392_v60, %v1391_v6 }
 0x215   : > { %v1712_v11 = vmul.f32 0.87096775, %v8230_v37  ;;  %v1713_v36 = vmul.f32 0.87096775, %v1563_v10  ;;  %v1714_v14 = vmul.f32 0.87096775, %v8232_v22  ;;  %v1725_v30 = vadd.f32 %v1707_v31, %v1689_v18  ;;  %1410 = vrot.lane.b32.xlu1 %v1393_v55, %s7224_s12  ;;  %v8292_v6 = vpop.permute.xlu0 %3388 }
 0x216   : > { %v1726_v47 = vadd.f32 %v1708_v42, %v1690_v61  ;;  %v1727_v38 = vadd.f32 %v1709_v28, %v1691_v63  ;;  %v1728_v46 = vadd.f32 %v1710_v32, %v1692_v12  ;;  %v1729_v7 = vadd.f32 %v1711_v8, %v1693_v13  ;;  %12529 = vst [vmem:[#allocation21_spill] sm:$0xff] %v8260_v58  ;;  %v8265_v12 = vpop.permute.xlu1 %5892  ;;  %v8279_v28 = vld [vmem:[#allocation2 + $0x4] sm:$0x1] }
 0x217   : > { %v1730_v23 = vadd.f32 %v1712_v11, %v1694_v39  ;;  %v1731_v52 = vadd.f32 %v1713_v36, %v1695_v44  ;;  %v1732_v0 = vadd.f32 %v1714_v14, %v1696_v24  ;;  %v1575_v3 = vmul.f32 0.61290324, %v8191_v50  ;;  %12530 = vst [vmem:[#allocation22_spill] sm:$0xff] %v8265_v12  ;;  %3131 = vst.msk [vmem:[#allocation3 + $0xb8] sm:$0x3] %vm1004_vm9, %v8260_v58 }
 0x218   : > { %v1761_v4 = vrot.slane %v1726_v47, 7  ;;  %v1763_v49 = vrot.slane %v1727_v38, 6  ;;  %v1765_v56 = vrot.slane %v1728_v46, 5  ;;  %v1767_v9 = vrot.slane %v1729_v7, 4  ;;  %v8304_v38 = vld [vmem:[#allocation2 + $0x74] sm:$0x1] }
 0x219   : > { %v1769_v25 = vrot.slane %v1730_v23, 3  ;;  %v1771_v16 = vrot.slane %v1731_v52, 2  ;;  %v1773_v60 = vrot.slane %v1732_v0, 1  ;;  %v1576_v61 = vmul.f32 0.61290324, %v8198_v27 }
 0x21a   : > { %v1762_v18 = vsel %vm719_vm2, %v1761_v4, %v1725_v30  ;;  %v1577_v63 = vmul.f32 0.61290324, %v8200_v53  ;;  %v1578_v39 = vmul.f32 0.61290324, %v8202_v57  ;;  %v1579_v50 = vmul.f32 0.61290324, %v8205_v51  ;;  %v8301_v36 = vpop.permute.xlu1 %5896 }
 0x21b   : > { %v1764_v13 = vsel %vm722_vm3, %v1763_v49, %v1762_v18  ;;  %v1580_v44 = vmul.f32 0.61290324, %v8207_v5  ;;  %v1581_v31 = vmul.f32 0.61290324, %v8209_v45  ;;  %v1582_v4 = vmul.f32 0.61290324, %v8214_v43 }
 0x21c   : > { %v1766_v24 = vsel %vm725_vm4, %v1765_v56, %v1764_v13  ;;  %v1593_v27 = vmul.f32 0.38709676, %v8216_v20  ;;  %v1594_v42 = vmul.f32 0.38709676, %v8218_v17  ;;  %v1595_v49 = vmul.f32 0.38709676, %v8222_v21 }
 0x21d   : > { %v1768_v53 = vsel %vm728_vm5, %v1767_v9, %v1766_v24  ;;  %v1596_v57 = vmul.f32 0.38709676, %v8224_v54  ;;  %v1597_v5 = vmul.f32 0.38709676, %v8226_v29  ;;  %v1598_v45 = vmul.f32 0.38709676, %v8230_v37 }
 0x21e   : > { %v1770_v51 = vsel %vm731_vm6, %v1769_v25, %v1768_v53  ;;  %v1599_v32 = vmul.f32 0.38709676, %v1563_v10  ;;  %v1600_v20 = vmul.f32 0.38709676, %v8232_v22  ;;  %v1611_v9 = vadd.f32 %v1593_v27, %v1575_v3  ;;  %v8286_v17 = vld [vmem:[#allocation2 + $0x14] sm:$0x1] }
 0x21f   : > { %v1772_v43 = vsel %vm734_vm7, %v1771_v16, %v1770_v51  ;;  %v1612_v8 = vadd.f32 %v1594_v42, %v1576_v61  ;;  %v8288_v21 = vld [vmem:[#allocation2 + $0x24] sm:$0x1]  ;;  %v8290_v54 = vld [vmem:[#allocation2 + $0x34] sm:$0x1]  ;;  %v1613_v29 = vadd.f32 %v1595_v49, %v1577_v63  ;;  %v1614_v11 = vadd.f32 %v1596_v57, %v1578_v39  ;;  %12531 = vst [vmem:[#allocation23_spill] sm:$0xff] %v8301_v36 }
 0x220   : > { %v1774_v25 = vsel %vm737_vm8, %v1773_v60, %v1772_v43  ;;  %v1615_v37 = vadd.f32 %v1597_v5, %v1579_v50  ;;  %v8295_v10 = vld [vmem:[#allocation2 + $0x44] sm:$0x1]  ;;  %v8297_v16 = vld [vmem:[#allocation2 + $0x54] sm:$0x1]  ;;  %v1616_v14 = vadd.f32 %v1598_v45, %v1580_v44  ;;  %v1617_v55 = vadd.f32 %v1599_v32, %v1581_v31  ;;  %v8306_v46 = vld [vmem:[#allocation2 + $0x5] sm:$0x1]  ;;  %v8330_v5 = vpop.permute.xlu0 %3652 }
 0x221   : > { %v8299_v22 = vld [vmem:[#allocation2 + $0x64] sm:$0x1]  ;;  %1791 = vrot.lane.b32.xlu0 %v1774_v25, %s7223_s11  ;;  %v1618_v30 = vadd.f32 %v1600_v20, %v1582_v4  ;;  %v1647_v47 = vrot.slane %v1612_v8, 7  ;;  %v8308_v7 = vld [vmem:[#allocation2 + $0x15] sm:$0x1]  ;;  %v1649_v23 = vrot.slane %v1613_v29, 6 }
 0x222   : > { %v1651_v52 = vrot.slane %v1614_v11, 5  ;;  %v1653_v0 = vrot.slane %v1615_v37, 4  ;;  %v8310_v3 = vld [vmem:[#allocation2 + $0x25] sm:$0x1]  ;;  %v8312_v56 = vld [vmem:[#allocation2 + $0x35] sm:$0x1] }
 0x223   : > { %v8314_v18 = vld [vmem:[#allocation2 + $0x45] sm:$0x1]  ;;  %v1953_v60 = vmul.f32 0.16129035, %v8279_v28  ;;  %v1648_v61 = vsel %vm719_vm2, %v1647_v47, %v1611_v9  ;;  %v1655_v63 = vrot.slane %v1616_v14, 3  ;;  %v1657_v13 = vrot.slane %v1617_v55, 2  ;;  %v8336_v9 = vpop.permute.xlu1 %6079 }
 0x224   : > { %v1659_v39 = vrot.slane %v1618_v30, 1  ;;  %v8318_v50 = vld [vmem:[#allocation2 + $0x55] sm:$0x1]  ;;  %v1827_v44 = vld [vmem:[#allocation2 + $0x65] sm:$0x1]  ;;  %v1650_v31 = vsel %vm722_vm3, %v1649_v23, %v1648_v61  ;;  %12532 = vst [vmem:[#allocation24_spill] sm:$0xff] %v8336_v9 }
 0x225   : > { %v8320_v24 = vld [vmem:[#allocation2 + $0x75] sm:$0x1]  ;;  %v1954_v4 = vmul.f32 0.16129035, %v8286_v17  ;;  %v1955_v27 = vmul.f32 0.16129035, %v8288_v21  ;;  %v1652_v42 = vsel %vm725_vm4, %v1651_v52, %v1650_v31 }
 0x226   : > { %v1956_v53 = vmul.f32 0.16129035, %v8290_v54  ;;  %v1957_v49 = vmul.f32 0.16129035, %v8295_v10  ;;  %v1958_v57 = vmul.f32 0.16129035, %v8297_v16  ;;  %v1654_v45 = vsel %vm728_vm5, %v1653_v0, %v1652_v42 }
 0x227   : > { %v1959_v51 = vmul.f32 0.16129035, %v8299_v22  ;;  %v1960_v32 = vmul.f32 0.16129035, %v8304_v38  ;;  %v1971_v43 = vmul.f32 0.83870965, %v8306_v46  ;;  %v1656_v8 = vsel %vm731_vm6, %v1655_v63, %v1654_v45 }
 0x228   : > { %v1972_v20 = vmul.f32 0.83870965, %v8308_v7  ;;  %v1973_v25 = vmul.f32 0.83870965, %v8310_v3  ;;  %v1974_v29 = vmul.f32 0.83870965, %v8312_v56  ;;  %v1658_v37 = vsel %vm734_vm7, %v1657_v13, %v1656_v8  ;;  %v8348_v8 = vpop.permute.xlu0 %3919 }
 0x229   : > { %v1975_v11 = vmul.f32 0.83870965, %v8314_v18  ;;  %v1976_v14 = vmul.f32 0.83870965, %v8318_v50  ;;  %v1977_v55 = vmul.f32 0.83870965, %v1827_v44  ;;  %v1660_v47 = vsel %vm737_vm8, %v1659_v39, %v1658_v37 }
 0x22a   : > { %v1978_v30 = vmul.f32 0.83870965, %v8320_v24  ;;  %v1989_v23 = vadd.f32 %v1971_v43, %v1953_v60  ;;  %v1990_v52 = vadd.f32 %v1972_v20, %v1954_v4  ;;  %v1991_v0 = vadd.f32 %v1973_v25, %v1955_v27  ;;  %1677 = vrot.lane.b32.xlu1 %v1660_v47, %s7221_s9  ;;  %v8351_v27 = vpop.permute.xlu1 %4795  ;;  %v8380_v37 = vld [vmem:[#allocation2 + $0x35] sm:$0x1]  ;;  %3662 = vst.msk [vmem:[#allocation3 + $0xc0] sm:$0x3] %vm1004_vm9, %v8330_v5 }
 0x22b   : > { %v1992_v61 = vadd.f32 %v1974_v29, %v1956_v53  ;;  %v1993_v63 = vadd.f32 %v1975_v11, %v1957_v49  ;;  %v1994_v31 = vadd.f32 %v1976_v14, %v1958_v57  ;;  %v1995_v42 = vadd.f32 %v1977_v55, %v1959_v51  ;;  %12533 = vst [vmem:[#allocation25_spill] sm:$0xff] %v8351_v27  ;;  %v8367_v29 = vld [vmem:[#allocation2 + $0x5] sm:$0x1]  ;;  %v8385_v55 = vld [vmem:[#allocation2 + $0x55] sm:$0x1] }
 0x22c   : > { %v1996_v45 = vadd.f32 %v1978_v30, %v1960_v32  ;;  %v2025_v9 = vrot.slane %v1990_v52, 7  ;;  %v2027_v36 = vrot.slane %v1991_v0, 6  ;;  %v1839_v13 = vmul.f32 0.6451613, %v8279_v28  ;;  %v8387_v30 = vld [vmem:[#allocation2 + $0x65] sm:$0x1] }
 0x22d   : > { %v2029_v12 = vrot.slane %v1992_v61, 5  ;;  %v2031_v26 = vrot.slane %v1993_v63, 4  ;;  %v2033_v34 = vrot.slane %v1994_v31, 3  ;;  %v2035_v39 = vrot.slane %v1995_v42, 2  ;;  %v8392_v61 = vld [vmem:[#allocation2 + $0x75] sm:$0x1] }
 0x22e   : > { %v2026_v60 = vsel %vm719_vm2, %v2025_v9, %v1989_v23  ;;  %v2037_v4 = vrot.slane %v1996_v45, 1  ;;  %v1840_v53 = vmul.f32 0.6451613, %v8286_v17  ;;  %v1841_v49 = vmul.f32 0.6451613, %v8288_v21 }
 0x22f   : > { %v2028_v57 = vsel %vm722_vm3, %v2027_v36, %v2026_v60  ;;  %v1842_v51 = vmul.f32 0.6451613, %v8290_v54  ;;  %v1843_v28 = vmul.f32 0.6451613, %v8295_v10  ;;  %v1844_v32 = vmul.f32 0.6451613, %v8297_v16 }
 0x230   : > { %v2030_v43 = vsel %vm725_vm4, %v2029_v12, %v2028_v57  ;;  %v1845_v20 = vmul.f32 0.6451613, %v8299_v22  ;;  %v1846_v9 = vmul.f32 0.6451613, %v8304_v38  ;;  %v1857_v25 = vmul.f32 0.3548387, %v8306_v46  ;;  %v8372_v38 = vpop.permute.xlu0 %4183 }
 0x231   : > { %v2032_v17 = vsel %vm728_vm5, %v2031_v26, %v2030_v43  ;;  %v1858_v21 = vmul.f32 0.3548387, %v8308_v7  ;;  %v1859_v36 = vmul.f32 0.3548387, %v8310_v3  ;;  %v1860_v54 = vmul.f32 0.3548387, %v8312_v56 }
 0x232   : > { %v2034_v10 = vsel %vm731_vm6, %v2033_v34, %v2032_v17  ;;  %v1861_v12 = vmul.f32 0.3548387, %v8314_v18  ;;  %v1862_v16 = vmul.f32 0.3548387, %v8318_v50  ;;  %v1863_v22 = vmul.f32 0.3548387, %v1827_v44 }
 0x233   : > { %v2036_v46 = vsel %vm734_vm7, %v2035_v39, %v2034_v10  ;;  %v1864_v26 = vmul.f32 0.3548387, %v8320_v24  ;;  %v1875_v7 = vadd.f32 %v1857_v25, %v1839_v13  ;;  %v1876_v11 = vadd.f32 %v1858_v21, %v1840_v53  ;;  %v8376_v3 = vld [vmem:[#allocation2 + $0x15] sm:$0x1]  ;;  %v8378_v56 = vld [vmem:[#allocation2 + $0x25] sm:$0x1]  ;;  %v8389_v24 = vpop.permute.xlu1 %759 }
 0x234   : > { %v2038_v34 = vsel %vm737_vm8, %v2037_v4, %v2036_v46  ;;  %v1877_v18 = vadd.f32 %v1859_v36, %v1841_v49  ;;  %v1878_v14 = vadd.f32 %v1860_v54, %v1842_v51  ;;  %v1879_v50 = vadd.f32 %v1861_v12, %v1843_v28  ;;  %v8383_v44 = vld [vmem:[#allocation2 + $0x45] sm:$0x1]  ;;  %v8394_v63 = vld [vmem:[#allocation2 + $0x6] sm:$0x1]  ;;  %v8396_v31 = vld [vmem:[#allocation2 + $0x16] sm:$0x1]  ;;  %v8416_v36 = vpop.permute.xlu0 %4450 }
 0x235   : > { %2055 = vrot.lane.b32.xlu0 %v2038_v34, %s7222_s10  ;;  %v1880_v47 = vadd.f32 %v1862_v16, %v1844_v32  ;;  %v1881_v23 = vadd.f32 %v1863_v22, %v1845_v20  ;;  %v1882_v52 = vadd.f32 %v1864_v26, %v1846_v9  ;;  %v1911_v0 = vrot.slane %v1876_v11, 7  ;;  %v8398_v39 = vld [vmem:[#allocation2 + $0x26] sm:$0x1]  ;;  %v8400_v60 = vld [vmem:[#allocation2 + $0x36] sm:$0x1] }
 0x236   : > { %v1913_v42 = vrot.slane %v1877_v18, 6  ;;  %v1915_v45 = vrot.slane %v1878_v14, 5  ;;  %v1917_v13 = vrot.slane %v1879_v50, 4  ;;  %v8402_v4 = vld [vmem:[#allocation2 + $0x46] sm:$0x1] }
 0x237   : > { %v2220_v53 = vmul.f32 0.19354838, %v8367_v29  ;;  %v1912_v49 = vsel %vm719_vm2, %v1911_v0, %v1875_v7  ;;  %v1919_v57 = vrot.slane %v1880_v47, 3  ;;  %v1921_v51 = vrot.slane %v1881_v23, 2  ;;  %v8406_v32 = vld [vmem:[#allocation2 + $0x56] sm:$0x1]  ;;  %v8426_v11 = vpop.permute.xlu1 %3007 }
 0x238   : > { %v1923_v28 = vrot.slane %v1882_v52, 1  ;;  %v8408_v43 = vld [vmem:[#allocation2 + $0x66] sm:$0x1]  ;;  %v8410_v20 = vld [vmem:[#allocation2 + $0x76] sm:$0x1]  ;;  %v1914_v9 = vsel %vm722_vm3, %v1913_v42, %v1912_v49  ;;  %12534 = vst [vmem:[#allocation26_spill] sm:$0xff] %v8426_v11  ;;  %v8438_v19 = vpop.permute.xlu0 %4714 }
 0x239   : > { %v2221_v25 = vmul.f32 0.19354838, %v8376_v3  ;;  %v2222_v17 = vmul.f32 0.19354838, %v8378_v56  ;;  %v2223_v21 = vmul.f32 0.19354838, %v8380_v37  ;;  %v1916_v54 = vsel %vm725_vm4, %v1915_v45, %v1914_v9 }
 0x23a   : > { %v2224_v10 = vmul.f32 0.19354838, %v8383_v44  ;;  %v2225_v12 = vmul.f32 0.19354838, %v8385_v55  ;;  %v2226_v16 = vmul.f32 0.19354838, %v8387_v30  ;;  %v1918_v22 = vsel %vm728_vm5, %v1917_v13, %v1916_v54 }
 0x23b   : > { %v2227_v46 = vmul.f32 0.19354838, %v8392_v61  ;;  %v2238_v26 = vmul.f32 0.8064516, %v8394_v63  ;;  %v2239_v7 = vmul.f32 0.8064516, %v8396_v31  ;;  %v1920_v34 = vsel %vm731_vm6, %v1919_v57, %v1918_v22 }
 0x23c   : > { %v2240_v18 = vmul.f32 0.8064516, %v8398_v39  ;;  %v2241_v14 = vmul.f32 0.8064516, %v8400_v60  ;;  %v2242_v50 = vmul.f32 0.8064516, %v8402_v4  ;;  %v1922_v47 = vsel %vm734_vm7, %v1921_v51, %v1920_v34 }
 0x23d   : > { %v2243_v23 = vmul.f32 0.8064516, %v8406_v32  ;;  %v2244_v52 = vmul.f32 0.8064516, %v8408_v43  ;;  %v2245_v0 = vmul.f32 0.8064516, %v8410_v20  ;;  %v1924_v42 = vsel %vm737_vm8, %v1923_v28, %v1922_v47 }
 0x23e   : > { %v2256_v45 = vadd.f32 %v2238_v26, %v2220_v53  ;;  %v2257_v13 = vadd.f32 %v2239_v7, %v2221_v25  ;;  %v2258_v49 = vadd.f32 %v2240_v18, %v2222_v17  ;;  %1941 = vrot.lane.b32.xlu1 %v1924_v42, %s7224_s12  ;;  %v2259_v57 = vadd.f32 %v2241_v14, %v2223_v21  ;;  %v8444_v53 = vpop.permute.xlu1 %3274  ;;  %v8464_v14 = vld [vmem:[#allocation2 + $0x6] sm:$0x1]  ;;  %v8492_v42 = vld [vmem:[#allocation2 + $0x56] sm:$0x1] }
 0x23f   : > { %v2260_v9 = vadd.f32 %v2242_v50, %v2224_v10  ;;  %v2261_v54 = vadd.f32 %v2243_v23, %v2225_v12  ;;  %v2262_v22 = vadd.f32 %v2244_v52, %v2226_v16  ;;  %12535 = vst [vmem:[#allocation27_spill] sm:$0xff] %v8438_v19  ;;  %v2263_v51 = vadd.f32 %v2245_v0, %v2227_v46  ;;  %v8478_v50 = vld [vmem:[#allocation2 + $0x16] sm:$0x1]  ;;  %v8485_v23 = vld [vmem:[#allocation2 + $0x26] sm:$0x1] }
 0x240   : > { %v2292_v34 = vrot.slane %v2257_v13, 7  ;;  %v2294_v2 = vrot.slane %v2258_v49, 6  ;;  %v2296_v35 = vrot.slane %v2259_v57, 5  ;;  %4193 = vst.msk [vmem:[#allocation3 + $0xc8] sm:$0x3] %vm1004_vm9, %v8372_v38  ;;  %v12326_v21 = vmov 0.0  }
 0x241   : > { %v2298_v1 = vrot.slane %v2260_v9, 4  ;;  %v2300_v48 = vrot.slane %v2261_v54, 3  ;;  %v2302_v59 = vrot.slane %v2262_v22, 2  ;;  %v2304_v25 = vrot.slane %v2263_v51, 1  ;;  %658 = vst.msk [vmem:[#allocation3 + $0x90] sm:$0x3] %vm657_vm10, %v12326_v21  ;;  %6628 = vmatprep.mubr.f32.mxu1 %v12326_v21 }
 0x242   : > { %v2293_v28 = vsel %vm719_vm2, %v2292_v34, %v2256_v45  ;;  %v2106_v10 = vmul.f32 0.67741936, %v8367_v29  ;;  %v2107_v12 = vmul.f32 0.67741936, %v8376_v3  ;;  %768 = vst.msk [vmem:[#allocation3 + $0x90] sm:$0x3] %vm767_vm11, %v8389_v24 }
 0x243   : > { %v2295_v17 = vsel %vm722_vm3, %v2294_v2, %v2293_v28  ;;  %v2108_v46 = vmul.f32 0.67741936, %v8378_v56  ;;  %v2109_v26 = vmul.f32 0.67741936, %v8380_v37  ;;  %v2110_v2 = vmul.f32 0.67741936, %v8383_v44 }
 0x244   : > { %v2297_v16 = vsel %vm725_vm4, %v2296_v35, %v2295_v17  ;;  %v2111_v18 = vmul.f32 0.67741936, %v8385_v55  ;;  %v2112_v29 = vmul.f32 0.67741936, %v8387_v30  ;;  %v2113_v3 = vmul.f32 0.67741936, %v8392_v61  ;;  %v8466_v35 = vpop.permute.xlu0 %991 }
 0x245   : > { %v2299_v7 = vsel %vm728_vm5, %v2298_v1, %v2297_v16  ;;  %v2124_v56 = vmul.f32 0.32258064, %v8394_v63  ;;  %v2125_v37 = vmul.f32 0.32258064, %v8396_v31  ;;  %v2126_v44 = vmul.f32 0.32258064, %v8398_v39 }
 0x246   : > { %v2301_v24 = vsel %vm731_vm6, %v2300_v48, %v2299_v7  ;;  %1005 = vst.msk [vmem:[#allocation3 + $0x98] sm:$0x3] %vm1004_vm9, %v8466_v35  ;;  %v2127_v55 = vmul.f32 0.32258064, %v8400_v60  ;;  %v2128_v30 = vmul.f32 0.32258064, %v8402_v4  ;;  %v8480_v48 = vpop.permute.xlu1 %3538 }
 0x247   : > { %v2303_v1 = vsel %vm734_vm7, %v2302_v59, %v2301_v24  ;;  %v2129_v61 = vmul.f32 0.32258064, %v8406_v32  ;;  %v2130_v31 = vmul.f32 0.32258064, %v8408_v43  ;;  %v2131_v39 = vmul.f32 0.32258064, %v8410_v20 }
 0x248   : > { %v2305_v63 = vsel %vm737_vm8, %v2304_v25, %v2303_v1  ;;  %v2142_v47 = vadd.f32 %v2124_v56, %v2106_v10  ;;  %v8487_v59 = vld [vmem:[#allocation2 + $0x36] sm:$0x1]  ;;  %v8489_v60 = vld [vmem:[#allocation2 + $0x46] sm:$0x1]  ;;  %v2143_v4 = vadd.f32 %v2125_v37, %v2107_v12  ;;  %v2144_v32 = vadd.f32 %v2126_v44, %v2108_v46  ;;  %v8498_v57 = vld [vmem:[#allocation2 + $0x7] sm:$0x1] }
 0x249   : > { %2322 = vrot.lane.b32.xlu0 %v2305_v63, %s7223_s11  ;;  %v2145_v52 = vadd.f32 %v2127_v55, %v2109_v26  ;;  %v2146_v0 = vadd.f32 %v2128_v30, %v2110_v2  ;;  %v8494_v45 = vld [vmem:[#allocation2 + $0x66] sm:$0x1]  ;;  %v8496_v43 = vld [vmem:[#allocation2 + $0x76] sm:$0x1]  ;;  %v2147_v20 = vadd.f32 %v2129_v61, %v2111_v18  ;;  %v2148_v13 = vadd.f32 %v2130_v31, %v2112_v29  ;;  %v8500_v9 = vld [vmem:[#allocation2 + $0x17] sm:$0x1] }
 0x24a   : > { %v2149_v49 = vadd.f32 %v2131_v39, %v2113_v3  ;;  %v8502_v54 = vld [vmem:[#allocation2 + $0x27] sm:$0x1]  ;;  %v2484_v22 = vmul.f32 0.22580647, %v8464_v14  ;;  %v2178_v51 = vrot.slane %v2143_v4, 7  ;;  %v2180_v34 = vrot.slane %v2144_v32, 6  ;;  %v8516_v37 = vpop.permute.xlu1 %3805 }
 0x24b   : > { %v2182_v28 = vrot.slane %v2145_v52, 5  ;;  %v2184_v25 = vrot.slane %v2146_v0, 4  ;;  %v2355_v17 = vld [vmem:[#allocation2 + $0x37] sm:$0x1]  ;;  %v8505_v10 = vld [vmem:[#allocation2 + $0x47] sm:$0x1] }
 0x24c   : > { %v8507_v12 = vld [vmem:[#allocation2 + $0x57] sm:$0x1]  ;;  %v2186_v16 = vrot.slane %v2147_v20, 3  ;;  %v2188_v46 = vrot.slane %v2148_v13, 2  ;;  %v2190_v26 = vrot.slane %v2149_v49, 1  ;;  %v2179_v29 = vsel %vm719_vm2, %v2178_v51, %v2142_v47 }
 0x24d   : > { %v2358_v2 = vld [vmem:[#allocation2 + $0x67] sm:$0x1]  ;;  %v8509_v7 = vld [vmem:[#allocation2 + $0x77] sm:$0x1]  ;;  %v2485_v18 = vmul.f32 0.22580647, %v8478_v50  ;;  %v2181_v44 = vsel %vm722_vm3, %v2180_v34, %v2179_v29 }
 0x24e   : > { %v2486_v3 = vmul.f32 0.22580647, %v8485_v23  ;;  %v2487_v24 = vmul.f32 0.22580647, %v8487_v59  ;;  %v2488_v56 = vmul.f32 0.22580647, %v8489_v60  ;;  %v2183_v61 = vsel %vm725_vm4, %v2182_v28, %v2181_v44  ;;  %v8533_v62 = vpop.permute.xlu1 %4069 }
 0x24f   : > { %v2489_v1 = vmul.f32 0.22580647, %v8492_v42  ;;  %v2490_v55 = vmul.f32 0.22580647, %v8494_v45  ;;  %v2491_v30 = vmul.f32 0.22580647, %v8496_v43  ;;  %v2185_v47 = vsel %vm728_vm5, %v2184_v25, %v2183_v61 }
 0x250   : > { %v2502_v63 = vmul.f32 0.7741935, %v8498_v57  ;;  %v2503_v31 = vmul.f32 0.7741935, %v8500_v9  ;;  %v2504_v39 = vmul.f32 0.7741935, %v8502_v54  ;;  %v2187_v0 = vsel %vm731_vm6, %v2186_v16, %v2185_v47 }
 0x251   : > { %v2505_v4 = vmul.f32 0.7741935, %v2355_v17  ;;  %v2506_v32 = vmul.f32 0.7741935, %v8505_v10  ;;  %v2507_v52 = vmul.f32 0.7741935, %v8507_v12  ;;  %v2189_v51 = vsel %vm734_vm7, %v2188_v46, %v2187_v0 }
 0x252   : > { %v2508_v20 = vmul.f32 0.7741935, %v2358_v2  ;;  %v2509_v13 = vmul.f32 0.7741935, %v8509_v7  ;;  %v2520_v49 = vadd.f32 %v2502_v63, %v2484_v22  ;;  %v2521_v34 = vadd.f32 %v2503_v31, %v2485_v18  ;;  %3281 = vst.msk [vmem:[#allocation3 + $0xb8] sm:$0x3] %vm1156_vm12, %v8444_v53 }
 0x253   : > { %v2522_v28 = vadd.f32 %v2504_v39, %v2486_v3  ;;  %v2523_v29 = vadd.f32 %v2505_v4, %v2487_v24  ;;  %v2191_v44 = vsel %vm737_vm8, %v2190_v26, %v2189_v51  ;;  %v2524_v21 = vadd.f32 %v2506_v32, %v2488_v56  ;;  %3812 = vst.msk [vmem:[#allocation3 + $0xc0] sm:$0x3] %vm1156_vm12, %v8516_v37 }
 0x254   : > { %v2525_v25 = vadd.f32 %v2507_v52, %v2489_v1  ;;  %v2526_v61 = vadd.f32 %v2508_v20, %v2490_v55  ;;  %2208 = vrot.lane.b32.xlu1 %v2191_v44, %s7221_s9  ;;  %v2527_v33 = vadd.f32 %v2509_v13, %v2491_v30  ;;  %v2556_v16 = vrot.slane %v2521_v34, 7  ;;  %v8560_v52 = vld [vmem:[#allocation2 + $0x17] sm:$0x1]  ;;  %v8576_v44 = vld [vmem:[#allocation2 + $0x8] sm:$0x1] }
 0x255   : > { %v2558_v47 = vrot.slane %v2522_v28, 6  ;;  %v2560_v15 = vrot.slane %v2523_v29, 5  ;;  %v2562_v40 = vrot.slane %v2524_v21, 4  ;;  %v2370_v46 = vmul.f32 0.70967746, %v8464_v14 }
 0x256   : > { %v2564_v22 = vrot.slane %v2525_v25, 3  ;;  %v2566_v63 = vrot.slane %v2526_v61, 2  ;;  %v2557_v18 = vsel %vm719_vm2, %v2556_v16, %v2520_v49  ;;  %v2568_v3 = vrot.slane %v2527_v33, 1  ;;  %v8567_v49 = vld [vmem:[#allocation2 + $0x47] sm:$0x1] }
 0x257   : > { %v2371_v26 = vmul.f32 0.70967746, %v8478_v50  ;;  %v2372_v24 = vmul.f32 0.70967746, %v8485_v23  ;;  %v2559_v56 = vsel %vm722_vm3, %v2558_v47, %v2557_v18  ;;  %v2373_v1 = vmul.f32 0.70967746, %v8487_v59 }
 0x258   : > { %v2374_v55 = vmul.f32 0.70967746, %v8489_v60  ;;  %v2375_v30 = vmul.f32 0.70967746, %v8492_v42  ;;  %v2561_v21 = vsel %vm725_vm4, %v2560_v15, %v2559_v56  ;;  %v2376_v31 = vmul.f32 0.70967746, %v8494_v45  ;;  %v8553_v60 = vpop.permute.xlu1 %4336 }
 0x259   : > { %v2377_v14 = vmul.f32 0.70967746, %v8496_v43  ;;  %v2388_v33 = vmul.f32 0.29032257, %v8498_v57  ;;  %v2563_v50 = vsel %vm728_vm5, %v2562_v40, %v2561_v21  ;;  %v2389_v23 = vmul.f32 0.29032257, %v8500_v9 }
 0x25a   : > { %v2390_v39 = vmul.f32 0.29032257, %v8502_v54  ;;  %v2391_v4 = vmul.f32 0.29032257, %v2355_v17  ;;  %v8551_v59 = vld [vmem:[#allocation2 + $0x7] sm:$0x1]  ;;  %v2565_v42 = vsel %vm731_vm6, %v2564_v22, %v2563_v50 }
 0x25b   : > { %v2392_v15 = vmul.f32 0.29032257, %v8505_v10  ;;  %v2393_v45 = vmul.f32 0.29032257, %v8507_v12  ;;  %v2394_v43 = vmul.f32 0.29032257, %v2358_v2  ;;  %v2567_v57 = vsel %vm734_vm7, %v2566_v63, %v2565_v42 }
 0x25c   : > { %v2395_v40 = vmul.f32 0.29032257, %v8509_v7  ;;  %v2406_v32 = vadd.f32 %v2388_v33, %v2370_v46  ;;  %v2407_v9 = vadd.f32 %v2389_v23, %v2371_v26  ;;  %v8562_v54 = vld [vmem:[#allocation2 + $0x27] sm:$0x1]  ;;  %v8564_v17 = vld [vmem:[#allocation2 + $0x37] sm:$0x1]  ;;  %v2569_v0 = vsel %vm737_vm8, %v2568_v3, %v2567_v57  ;;  %v8594_v21 = vpop.permute.xlu1 %4600 }
 0x25d   : > { %v2408_v20 = vadd.f32 %v2390_v39, %v2372_v24  ;;  %v2409_v13 = vadd.f32 %v2391_v4, %v2373_v1  ;;  %v2410_v10 = vadd.f32 %v2392_v15, %v2374_v55  ;;  %v8569_v12 = vld [vmem:[#allocation2 + $0x57] sm:$0x1]  ;;  %v8571_v2 = vld [vmem:[#allocation2 + $0x67] sm:$0x1]  ;;  %2586 = vrot.lane.b32.xlu0 %v2569_v0, %s7222_s10  ;;  %v2411_v7 = vadd.f32 %v2393_v45, %v2375_v30  ;;  %v8578_v25 = vld [vmem:[#allocation2 + $0x18] sm:$0x1] }
 0x25e   : > { %v2412_v51 = vadd.f32 %v2394_v43, %v2376_v31  ;;  %v2413_v34 = vadd.f32 %v2395_v40, %v2377_v14  ;;  %v2442_v28 = vrot.slane %v2407_v9, 7  ;;  %v8574_v29 = vld [vmem:[#allocation2 + $0x77] sm:$0x1]  ;;  %v8580_v22 = vld [vmem:[#allocation2 + $0x28] sm:$0x1]  ;;  %vm1153_vm10 = vcmask 269320  }
 0x25f   : > { %v2444_v61 = vrot.slane %v2408_v20, 6  ;;  %v2446_v16 = vrot.slane %v2409_v13, 5  ;;  %v2448_v47 = vrot.slane %v2410_v10, 4  ;;  %v8582_v63 = vld [vmem:[#allocation2 + $0x38] sm:$0x1]  ;;  %v2450_v26 = vrot.slane %v2411_v7, 3 }
 0x260   : > { %v8584_v46 = vld [vmem:[#allocation2 + $0x48] sm:$0x1]  ;;  %v2751_v18 = vmul.f32 0.2580645, %v8551_v59  ;;  %v2443_v3 = vsel %vm719_vm2, %v2442_v28, %v2406_v32  ;;  %v2452_v24 = vrot.slane %v2412_v51, 2  ;;  %v2454_v56 = vrot.slane %v2413_v34, 1 }
 0x261   : > { %v8588_v1 = vld [vmem:[#allocation2 + $0x58] sm:$0x1]  ;;  %v8590_v55 = vld [vmem:[#allocation2 + $0x68] sm:$0x1]  ;;  %v2445_v31 = vsel %vm722_vm3, %v2444_v61, %v2443_v3  ;;  %v2752_v14 = vmul.f32 0.2580645, %v8560_v52 }
 0x262   : > { %v8592_v30 = vld [vmem:[#allocation2 + $0x78] sm:$0x1]  ;;  %v2753_v33 = vmul.f32 0.2580645, %v8562_v54  ;;  %v2754_v50 = vmul.f32 0.2580645, %v8564_v17  ;;  %v2447_v23 = vsel %vm725_vm4, %v2446_v16, %v2445_v31  ;;  %v1265_v16 = vpop.permute.xlu0 %1264 }
 0x263   : > { %v2755_v39 = vmul.f32 0.2580645, %v8567_v49  ;;  %v2756_v4 = vmul.f32 0.2580645, %v8569_v12  ;;  %v2757_v42 = vmul.f32 0.2580645, %v8571_v2  ;;  %v2449_v15 = vsel %vm728_vm5, %v2448_v47, %v2447_v23  ;;  %v8617_v47 = vpop.permute.xlu1 %875 }
 0x264   : > { %v2758_v45 = vmul.f32 0.2580645, %v8574_v29  ;;  %v2769_v43 = vmul.f32 0.7419355, %v8576_v44  ;;  %v2770_v57 = vmul.f32 0.7419355, %v8578_v25  ;;  %v2451_v40 = vsel %vm731_vm6, %v2450_v26, %v2449_v15 }
 0x265   : > { %v2771_v32 = vmul.f32 0.7419355, %v8580_v22  ;;  %v2772_v9 = vmul.f32 0.7419355, %v8582_v63  ;;  %v2773_v0 = vmul.f32 0.7419355, %v8584_v46  ;;  %v2453_v20 = vsel %vm734_vm7, %v2452_v24, %v2451_v40 }
 0x266   : > { %v2774_v13 = vmul.f32 0.7419355, %v8588_v1  ;;  %v2775_v10 = vmul.f32 0.7419355, %v8590_v55  ;;  %v2776_v7 = vmul.f32 0.7419355, %v8592_v30  ;;  %v2455_v51 = vsel %vm737_vm8, %v2454_v56, %v2453_v20 }
 0x267   : > { %v2787_v34 = vadd.f32 %v2769_v43, %v2751_v18  ;;  %v2788_v28 = vadd.f32 %v2770_v57, %v2752_v14  ;;  %v2789_v61 = vadd.f32 %v2771_v32, %v2753_v33  ;;  %2472 = vrot.lane.b32.xlu1 %v2455_v51, %s7224_s12  ;;  %v2790_v3 = vadd.f32 %v2772_v9, %v2754_v50  ;;  %v4734_v43 = vld [vmem:[#allocation2 + $0x9f] sm:$0x1]  ;;  %v4735_v9 = vld [vmem:[#allocation2 + $0xaf] sm:$0x1] }
 0x268   : > { %v2791_v26 = vadd.f32 %v2773_v0, %v2755_v39  ;;  %v2792_v31 = vadd.f32 %v2774_v13, %v2756_v4  ;;  %v2793_v24 = vadd.f32 %v2775_v10, %v2757_v42  ;;  %v2794_v23 = vadd.f32 %v2776_v7, %v2758_v45  ;;  %4343 = vst.msk [vmem:[#allocation3 + $0xc8] sm:$0x3] %vm1156_vm12, %v8553_v60  ;;  %v1149_v42 = vpop.permute.xlu1 %1148  ;;  %v4737_v0 = vld [vmem:[#allocation2 + $0xcf] sm:$0x1] }
 0x269   : > { %v2823_v15 = vrot.slane %v2788_v28, 7  ;;  %v2825_v40 = vrot.slane %v2789_v61, 6  ;;  %v2827_v41 = vrot.slane %v2790_v3, 5  ;;  %3395 = vst.msk [vmem:[#allocation3 + $0xb8] sm:$0x3] %vm767_vm11, %v8292_v6  ;;  %v4775_v61 = vrot.slane %v4734_v43, 7 }
 0x26a   : > { %v2829_v58 = vrot.slane %v2791_v26, 4  ;;  %v2831_v11 = vrot.slane %v2792_v31, 3  ;;  %v2833_v56 = vrot.slane %v2793_v24, 2  ;;  %v2835_v14 = vrot.slane %v2794_v23, 1  ;;  %3926 = vst.msk [vmem:[#allocation3 + $0xc0] sm:$0x3] %vm767_vm11, %v8348_v8  ;;  %v8643_v8 = vpop.permute.xlu0 %1528 }
 0x26b   : > { %v2824_v18 = vsel %vm719_vm2, %v2823_v15, %v2787_v34  ;;  %v2637_v33 = vmul.f32 0.7419355, %v8551_v59  ;;  %v2638_v50 = vmul.f32 0.7419355, %v8560_v52  ;;  %4457 = vst.msk [vmem:[#allocation3 + $0xc8] sm:$0x3] %vm767_vm11, %v8416_v36 }
 0x26c   : > { %v2826_v53 = vsel %vm722_vm3, %v2825_v40, %v2824_v18  ;;  %v2639_v37 = vmul.f32 0.7419355, %v8562_v54  ;;  %v2640_v60 = vmul.f32 0.7419355, %v8564_v17  ;;  %v2641_v39 = vmul.f32 0.7419355, %v8567_v49 }
 0x26d   : > { %v2828_v6 = vsel %vm725_vm4, %v2827_v41, %v2826_v53  ;;  %v2642_v59 = vmul.f32 0.7419355, %v8569_v12  ;;  %v2643_v52 = vmul.f32 0.7419355, %v8571_v2  ;;  %v2644_v4 = vmul.f32 0.7419355, %v8574_v29 }
 0x26e   : > { %v2830_v36 = vsel %vm728_vm5, %v2829_v58, %v2828_v6  ;;  %v2655_v45 = vmul.f32 0.2580645, %v8576_v44  ;;  %v2656_v54 = vmul.f32 0.2580645, %v8578_v25  ;;  %v2657_v17 = vmul.f32 0.2580645, %v8580_v22 }
 0x26f   : > { %1538 = vst.msk [vmem:[#allocation3 + $0xa0] sm:$0x3] %vm1004_vm9, %v8643_v8  ;;  %v2832_v41 = vsel %vm731_vm6, %v2831_v11, %v2830_v36  ;;  %v2658_v49 = vmul.f32 0.2580645, %v8582_v63  ;;  %v2659_v12 = vmul.f32 0.2580645, %v8584_v46 }
 0x270   : > { %1157 = vst.msk [vmem:[#allocation3 + $0x98] sm:$0x3] %vm1156_vm12, %v1149_v42  ;;  %v2660_v2 = vmul.f32 0.2580645, %v8588_v1  ;;  %v2834_v58 = vsel %vm734_vm7, %v2833_v56, %v2832_v41  ;;  %v2661_v29 = vmul.f32 0.2580645, %v8590_v55  ;;  %v2673_v25 = vadd.f32 %v2655_v45, %v2637_v33 }
 0x271   : > { %1271 = vst.msk [vmem:[#allocation3 + $0x98] sm:$0x3] %vm767_vm11, %v1265_v16  ;;  %v2662_v44 = vmul.f32 0.2580645, %v8592_v30  ;;  %v4733_v22 = vld [vmem:[#allocation2 + $0x8f] sm:$0x1]  ;;  %v2836_v57 = vsel %vm737_vm8, %v2835_v14, %v2834_v58  ;;  %v2674_v11 = vadd.f32 %v2656_v54, %v2638_v50  ;;  %v2675_v32 = vadd.f32 %v2657_v17, %v2639_v37 }
 0x272   : > { %v2676_v63 = vadd.f32 %v2658_v49, %v2640_v60  ;;  %v4736_v46 = vld [vmem:[#allocation2 + $0xbf] sm:$0x1]  ;;  %2853 = vrot.lane.b32.xlu0 %v2836_v57, %s7223_s11  ;;  %v2677_v1 = vadd.f32 %v2659_v12, %v2641_v39  ;;  %v2678_v20 = vadd.f32 %v2660_v2, %v2642_v59  ;;  %v2679_v13 = vadd.f32 %v2661_v29, %v2643_v52  ;;  %v4739_v7 = vld [vmem:[#allocation2 + $0xef] sm:$0x1]  ;;  %v8664_v16 = vld [vmem:[#allocation2 + $0x88] sm:$0x1] }
 0x273   : > { %v2680_v10 = vadd.f32 %v2662_v44, %v2644_v4  ;;  %v4738_v55 = vld [vmem:[#allocation2 + $0xdf] sm:$0x1]  ;;  %v2709_v51 = vrot.slane %v2674_v11, 7  ;;  %v2711_v34 = vrot.slane %v2675_v32, 6  ;;  %v8666_v23 = vld [vmem:[#allocation2 + $0x98] sm:$0x1]  ;;  %v4776_v56 = vsel %vm719_vm2, %v4775_v61, %v4733_v22 }
 0x274   : > { %v8662_v30 = vld [vmem:[#allocation2 + $0xff] sm:$0x1]  ;;  %v2713_v28 = vrot.slane %v2676_v63, 5  ;;  %v2715_v3 = vrot.slane %v2677_v1, 4  ;;  %v2717_v26 = vrot.slane %v2678_v20, 3  ;;  %v2719_v31 = vrot.slane %v2679_v13, 2 }
 0x275   : > { %v2721_v24 = vrot.slane %v2680_v10, 1  ;;  %v8668_v15 = vld [vmem:[#allocation2 + $0xa8] sm:$0x1]  ;;  %v2710_v40 = vsel %vm719_vm2, %v2709_v51, %v2673_v25  ;;  %v4777_v18 = vrot.slane %v4735_v9, 6  ;;  %v4779_v14 = vrot.slane %v4736_v46, 5 }
 0x276   : > { %v8672_v33 = vld [vmem:[#allocation2 + $0xb8] sm:$0x1]  ;;  %v8674_v50 = vld [vmem:[#allocation2 + $0xc8] sm:$0x1]  ;;  %v2712_v53 = vsel %vm722_vm3, %v2711_v34, %v2710_v40  ;;  %v4781_v37 = vrot.slane %v4737_v0, 4  ;;  %v4783_v60 = vrot.slane %v4738_v55, 3 }
 0x277   : > { %v4785_v39 = vrot.slane %v4739_v7, 2  ;;  %v8677_v6 = vld [vmem:[#allocation2 + $0xd8] sm:$0x1]  ;;  %v8679_v59 = vld [vmem:[#allocation2 + $0xe8] sm:$0x1]  ;;  %v2714_v52 = vsel %vm725_vm4, %v2713_v28, %v2712_v53  ;;  %v4778_v4 = vsel %vm722_vm3, %v4777_v18, %v4776_v56  ;;  %v4787_v42 = vrot.slane %v8662_v30, 1 }
 0x278   : > { %v8684_v36 = vld [vmem:[#allocation2 + $0xf8] sm:$0x1]  ;;  %v8686_v45 = vld [vmem:[#allocation2 + $0x89] sm:$0x1]  ;;  %v8688_v54 = vld [vmem:[#allocation2 + $0x99] sm:$0x1]  ;;  %v2716_v17 = vsel %vm728_vm5, %v2715_v3, %v2714_v52  ;;  %v4780_v41 = vsel %vm725_vm4, %v4779_v14, %v4778_v4  ;;  %v1415_v52 = vpop.permute.xlu1 %1414 }
 0x279   : > { %3545 = vst.msk [vmem:[#allocation3 + $0xb8] sm:$0x3] %vm883_vm13, %v8480_v48  ;;  %v8694_v49 = vld [vmem:[#allocation2 + $0xa9] sm:$0x1]  ;;  %v8696_v12 = vld [vmem:[#allocation2 + $0xb9] sm:$0x1]  ;;  %v2718_v29 = vsel %vm731_vm6, %v2717_v26, %v2716_v17  ;;  %v4782_v48 = vsel %vm728_vm5, %v4781_v37, %v4780_v41 }
 0x27a   : > { %v8698_v2 = vld [vmem:[#allocation2 + $0xc9] sm:$0x1]  ;;  %v3023_v58 = vmul.f32 0.2903226, %v8664_v16  ;;  %4076 = vst.msk [vmem:[#allocation3 + $0xc0] sm:$0x3] %vm883_vm13, %v8533_v62 }
 0x27b   : > { %4607 = vst.msk [vmem:[#allocation3 + $0xc8] sm:$0x3] %vm883_vm13, %v8594_v21  ;;  %884 = vst.msk [vmem:[#allocation3 + $0x90] sm:$0x3] %vm883_vm13, %v8617_v47  ;;  %v8711_v44 = vld [vmem:[#allocation2 + $0xd9] sm:$0x1]  ;;  %v2720_v21 = vsel %vm734_vm7, %v2719_v31, %v2718_v29 }
 0x27c   : > { %3661 = vst.msk [vmem:[#allocation3 + $0xb8] sm:$0x3] %vm1002_vm14, %v8330_v5  ;;  %v8713_v25 = vld [vmem:[#allocation2 + $0xe9] sm:$0x1]  ;;  %v3024_v22 = vmul.f32 0.2903226, %v8666_v23  ;;  %v4784_v5 = vsel %vm731_vm6, %v4783_v60, %v4782_v48  ;;  %v2722_v11 = vsel %vm737_vm8, %v2721_v24, %v2720_v21 }
 0x27d   : > { %v3025_v62 = vmul.f32 0.2903226, %v8668_v15  ;;  %4192 = vst.msk [vmem:[#allocation3 + $0xc0] sm:$0x3] %vm1002_vm14, %v8372_v38  ;;  %4723 = vst.msk [vmem:[#allocation3 + $0xc8] sm:$0x3] %vm1002_vm14, %v8438_v19  ;;  %v4786_v38 = vsel %vm734_vm7, %v4785_v39, %v4784_v5  ;;  %2739 = vrot.lane.b32.xlu1 %v2722_v11, %s7221_s9 }
 0x27e   : > { %1003 = vst.msk [vmem:[#allocation3 + $0x90] sm:$0x3] %vm1002_vm14, %v8466_v35  ;;  %v8725_v47 = vld [vmem:[#allocation2 + $0xf9] sm:$0x1]  ;;  %v3026_v43 = vmul.f32 0.2903226, %v8672_v33  ;;  %v4788_v35 = vsel %vm737_vm8, %v4787_v42, %v4786_v38 }
 0x27f   : > { %v3027_v57 = vmul.f32 0.2903226, %v8674_v50  ;;  %v3028_v32 = vmul.f32 0.2903226, %v8677_v6  ;;  %v3029_v63 = vmul.f32 0.2903226, %v8679_v59  ;;  %4793 = vrot.lane.b32.xlu0 %v4788_v35, %s7221_s9 }
 0x280   : > { %v673_v9 = vld [vmem:[#allocation2 + $0x90] sm:$0x1]  ;;  %v3030_v46 = vmul.f32 0.2903226, %v8684_v36  ;;  %v3041_v0 = vmul.f32 0.7096774, %v8686_v45 }
 0x281   : > { %v3042_v1 = vmul.f32 0.7096774, %v8688_v54  ;;  %v3043_v20 = vmul.f32 0.7096774, %v8694_v49  ;;  %v3044_v13 = vmul.f32 0.7096774, %v8696_v12 }
 0x282   : > { %v3045_v10 = vmul.f32 0.7096774, %v8698_v2  ;;  %v672_v55 = vld [vmem:[#allocation2 + $0x80] sm:$0x1]  ;;  %v3046_v7 = vmul.f32 0.7096774, %v8711_v44  ;;  %v3059_v34 = vadd.f32 %v3041_v0, %v3023_v58 }
 0x283   : > { %v3047_v30 = vmul.f32 0.7096774, %v8713_v25  ;;  %v3048_v51 = vmul.f32 0.7096774, %v8725_v47  ;;  %v674_v28 = vld [vmem:[#allocation2 + $0xa0] sm:$0x1]  ;;  %v3060_v61 = vadd.f32 %v3042_v1, %v3024_v22  ;;  %v3061_v3 = vadd.f32 %v3043_v20, %v3025_v62 }
 0x284   : > { %v3062_v26 = vadd.f32 %v3044_v13, %v3026_v43  ;;  %v3063_v31 = vadd.f32 %v3045_v10, %v3027_v57  ;;  %v675_v24 = vld [vmem:[#allocation2 + $0xb0] sm:$0x1]  ;;  %v676_v40 = vld [vmem:[#allocation2 + $0xc0] sm:$0x1]  ;;  %v3064_v18 = vadd.f32 %v3046_v7, %v3028_v32  ;;  %v739_v39 = vrot.slane %v673_v9, 7 }
 0x285   : > { %v677_v56 = vld [vmem:[#allocation2 + $0xd0] sm:$0x1]  ;;  %v3065_v14 = vadd.f32 %v3047_v30, %v3029_v63  ;;  %v3066_v53 = vadd.f32 %v3048_v51, %v3030_v46  ;;  %v678_v37 = vld [vmem:[#allocation2 + $0xe0] sm:$0x1]  ;;  %v3101_v4 = vrot.slane %v3060_v61, 7  ;;  %v3103_v42 = vrot.slane %v3061_v3, 6 }
 0x286   : > { %v679_v60 = vld [vmem:[#allocation2 + $0xf0] sm:$0x1]  ;;  %v3105_v17 = vrot.slane %v3062_v26, 5  ;;  %v8745_v41 = vld [vmem:[#allocation2 + $0x89] sm:$0x1]  ;;  %v3107_v58 = vrot.slane %v3063_v31, 4  ;;  %v740_v22 = vsel %vm719_vm2, %v739_v39, %v672_v55 }
 0x287   : > { %1421 = vst.msk [vmem:[#allocation3 + $0x98] sm:$0x3] %vm883_vm13, %v1415_v52  ;;  %v3109_v29 = vrot.slane %v3064_v18, 3  ;;  %v3111_v48 = vrot.slane %v3065_v14, 2  ;;  %v8749_v62 = vld [vmem:[#allocation2 + $0x99] sm:$0x1]  ;;  %v3102_v5 = vsel %vm719_vm2, %v3101_v4, %v3059_v34 }
 0x288   : > { %v8751_v21 = vld [vmem:[#allocation2 + $0xa9] sm:$0x1]  ;;  %1537 = vst.msk [vmem:[#allocation3 + $0x98] sm:$0x3] %vm1002_vm14, %v8643_v8  ;;  %v741_v43 = vrot.slane %v674_v28, 6  ;;  %v743_v57 = vrot.slane %v675_v24, 5  ;;  %v3104_v63 = vsel %vm722_vm3, %v3103_v42, %v3102_v5 }
 0x289   : > { %v745_v11 = vrot.slane %v676_v40, 4  ;;  %v8756_v38 = vld [vmem:[#allocation2 + $0xb9] sm:$0x1]  ;;  %v8758_v32 = vld [vmem:[#allocation2 + $0xc9] sm:$0x1]  ;;  %v3113_v9 = vrot.slane %v3066_v53, 1  ;;  %v3106_v8 = vsel %vm725_vm4, %v3105_v17, %v3104_v63 }
 0x28a   : > { %v747_v35 = vrot.slane %v677_v56, 3  ;;  %v749_v46 = vrot.slane %v678_v37, 2  ;;  %v8761_v0 = vld [vmem:[#allocation2 + $0xd9] sm:$0x1]  ;;  %v8763_v1 = vld [vmem:[#allocation2 + $0xe9] sm:$0x1]  ;;  %v742_v20 = vsel %vm722_vm3, %v741_v43, %v740_v22  ;;  %v3108_v34 = vsel %vm728_vm5, %v3107_v58, %v3106_v8 }
 0x28b   : > { %v751_v13 = vrot.slane %v679_v60, 1  ;;  %v8767_v10 = vmul.f32 0.516129, %v672_v55  ;;  %v8769_v7 = vld [vmem:[#allocation2 + $0xf9] sm:$0x1]  ;;  %v744_v28 = vsel %vm725_vm4, %v743_v57, %v742_v20  ;;  %v3110_v40 = vsel %vm731_vm6, %v3109_v29, %v3108_v34 }
 0x28c   : > { %v8771_v30 = vld [vmem:[#allocation2 + $0x8a] sm:$0x1]  ;;  %v8773_v51 = vld [vmem:[#allocation2 + $0x9a] sm:$0x1]  ;;  %v8777_v61 = vmul.f32 0.032258093, %v672_v55  ;;  %v746_v56 = vsel %vm728_vm5, %v745_v11, %v744_v28  ;;  %v3112_v55 = vsel %vm734_vm7, %v3111_v48, %v3110_v40  ;;  %v1796_v40 = vpop.permute.xlu0 %1795 }
 0x28d   : > { %12536 = vst [vmem:[#allocation28_spill] sm:$0xff] %v8767_v10  ;;  %v8779_v3 = vld [vmem:[#allocation2 + $0xaa] sm:$0x1]  ;;  %v8781_v26 = vld [vmem:[#allocation2 + $0xba] sm:$0x1]  ;;  %v748_v37 = vsel %vm731_vm6, %v747_v35, %v746_v56  ;;  %v3114_v4 = vsel %vm737_vm8, %v3113_v9, %v3112_v55 }
 0x28e   : > { %12537 = vst [vmem:[#allocation29_spill] sm:$0xff] %v8777_v61  ;;  %v8783_v31 = vld [vmem:[#allocation2 + $0xca] sm:$0x1]  ;;  %v3290_v24 = vmul.f32 0.32258064, %v8745_v41  ;;  %v750_v42 = vsel %vm734_vm7, %v749_v46, %v748_v37  ;;  %3119 = vrot.lane.b32.xlu1 %v3114_v4, %s7222_s10 }
 0x28f   : > { %v8788_v18 = vld [vmem:[#allocation2 + $0xda] sm:$0x1]  ;;  %v3291_v14 = vmul.f32 0.32258064, %v8749_v62  ;;  %v3292_v53 = vmul.f32 0.32258064, %v8751_v21  ;;  %v752_v48 = vsel %vm737_vm8, %v751_v13, %v750_v42 }
 0x290   : > { %v8794_v60 = vld [vmem:[#allocation2 + $0xea] sm:$0x1]  ;;  %v3293_v39 = vmul.f32 0.32258064, %v8756_v38  ;;  %v3294_v52 = vmul.f32 0.32258064, %v8758_v32  ;;  %757 = vrot.lane.b32.xlu0 %v752_v48, %s7223_s11 }
 0x291   : > { %12538 = vst [vmem:[#allocation30_spill] sm:$0xff] %v8794_v60  ;;  %v8800_v17 = vld [vmem:[#allocation2 + $0xfa] sm:$0x1]  ;;  %v3295_v58 = vmul.f32 0.32258064, %v8761_v0 }
 0x292   : > { %12539 = vst [vmem:[#allocation31_spill] sm:$0xff] %v8800_v17  ;;  %v3296_v29 = vmul.f32 0.32258064, %v8763_v1  ;;  %v3297_v22 = vmul.f32 0.32258064, %v8769_v7 }
 0x293   : > { %v3308_v5 = vmul.f32 0.67741936, %v8771_v30  ;;  %v3309_v43 = vmul.f32 0.67741936, %v8773_v51  ;;  %v3310_v57 = vmul.f32 0.67741936, %v8779_v3 }
 0x294   : > { %v3311_v11 = vmul.f32 0.67741936, %v8781_v26  ;;  %v3312_v63 = vmul.f32 0.67741936, %v8783_v31  ;;  %v3313_v9 = vmul.f32 0.67741936, %v8788_v18 }
 0x295   : > { %v3314_v35 = vmul.f32 0.67741936, %v8794_v60  ;;  %v3315_v46 = vmul.f32 0.67741936, %v8800_v17  ;;  %v3326_v8 = vadd.f32 %v3308_v5, %v3290_v24  ;;  %v3327_v20 = vadd.f32 %v3309_v43, %v3291_v14  ;;  %v8830_v43 = vpop.permute.xlu0 %2059 }
 0x296   : > { %v3328_v13 = vadd.f32 %v3310_v57, %v3292_v53  ;;  %v3329_v34 = vadd.f32 %v3311_v11, %v3293_v39  ;;  %v3330_v28 = vadd.f32 %v3312_v63, %v3294_v52  ;;  %v3331_v56 = vadd.f32 %v3313_v9, %v3295_v58  ;;  %2069 = vst.msk [vmem:[#allocation3 + $0xa8] sm:$0x3] %vm1004_vm9, %v8830_v43  ;;  %v8850_v9 = vld [vmem:[#allocation2 + $0xba] sm:$0x1] }
 0x297   : > { %v3332_v55 = vadd.f32 %v3314_v35, %v3296_v29  ;;  %v3333_v37 = vadd.f32 %v3315_v46, %v3297_v22  ;;  %v2909_v4 = vmul.f32 0.7741935, %v8664_v16  ;;  %v3368_v42 = vrot.slane %v3327_v20, 7  ;;  %v8852_v35 = vld [vmem:[#allocation2 + $0xca] sm:$0x1] }
 0x298   : > { %v3370_v48 = vrot.slane %v3328_v13, 6  ;;  %v3372_v10 = vrot.slane %v3329_v34, 5  ;;  %v3374_v61 = vrot.slane %v3330_v28, 4  ;;  %v3376_v27 = vrot.slane %v3331_v56, 3  ;;  %v8857_v20 = vld [vmem:[#allocation2 + $0xea] sm:$0x1] }
 0x299   : > { %v3378_v19 = vrot.slane %v3332_v55, 2  ;;  %v3380_v60 = vrot.slane %v3333_v37, 1  ;;  %v2910_v17 = vmul.f32 0.7741935, %v8666_v23  ;;  %v3369_v24 = vsel %vm719_vm2, %v3368_v42, %v3326_v8  ;;  %v8859_v13 = vld [vmem:[#allocation2 + $0xfa] sm:$0x1] }
 0x29a   : > { %v2911_v14 = vmul.f32 0.7741935, %v8668_v15  ;;  %v2912_v53 = vmul.f32 0.7741935, %v8672_v33  ;;  %v2913_v39 = vmul.f32 0.7741935, %v8674_v50  ;;  %v3371_v52 = vsel %vm722_vm3, %v3370_v48, %v3369_v24  ;;  %v1682_v33 = vpop.permute.xlu1 %1681 }
 0x29b   : > { %v2914_v16 = vmul.f32 0.7741935, %v8677_v6  ;;  %v2915_v58 = vmul.f32 0.7741935, %v8679_v59  ;;  %v2916_v29 = vmul.f32 0.7741935, %v8684_v36  ;;  %v3373_v22 = vsel %vm725_vm4, %v3372_v10, %v3371_v52 }
 0x29c   : > { %v2927_v23 = vmul.f32 0.22580644, %v8686_v45  ;;  %v2928_v5 = vmul.f32 0.22580644, %v8688_v54  ;;  %v2929_v15 = vmul.f32 0.22580644, %v8694_v49  ;;  %v3375_v50 = vsel %vm728_vm5, %v3374_v61, %v3373_v22 }
 0x29d   : > { %v2930_v57 = vmul.f32 0.22580644, %v8696_v12  ;;  %v2931_v6 = vmul.f32 0.22580644, %v8698_v2  ;;  %v2932_v59 = vmul.f32 0.22580644, %v8711_v44  ;;  %v3377_v45 = vsel %vm731_vm6, %v3376_v27, %v3375_v50 }
 0x29e   : > { %v8836_v36 = vld [vmem:[#allocation2 + $0x8a] sm:$0x1]  ;;  %1688 = vst.msk [vmem:[#allocation3 + $0xa0] sm:$0x3] %vm1156_vm12, %v1682_v33  ;;  %v2933_v54 = vmul.f32 0.22580644, %v8713_v25  ;;  %v2945_v10 = vadd.f32 %v2927_v23, %v2909_v4  ;;  %v3379_v2 = vsel %vm734_vm7, %v3378_v19, %v3377_v45  ;;  %v2946_v44 = vadd.f32 %v2928_v5, %v2910_v17 }
 0x29f   : > { %v2934_v49 = vmul.f32 0.22580644, %v8725_v47  ;;  %v8844_v61 = vld [vmem:[#allocation2 + $0x9a] sm:$0x1]  ;;  %v8846_v12 = vld [vmem:[#allocation2 + $0xaa] sm:$0x1]  ;;  %v2947_v11 = vadd.f32 %v2929_v15, %v2911_v14  ;;  %v2948_v63 = vadd.f32 %v2930_v57, %v2912_v53  ;;  %v3381_v25 = vsel %vm737_vm8, %v3380_v60, %v3379_v2 }
 0x2a0   : > { %1802 = vst.msk [vmem:[#allocation3 + $0xa0] sm:$0x3] %vm767_vm11, %v1796_v40  ;;  %v8854_v27 = vld [vmem:[#allocation2 + $0xda] sm:$0x1]  ;;  %v2949_v47 = vadd.f32 %v2931_v6, %v2913_v39  ;;  %v2950_v46 = vadd.f32 %v2932_v59, %v2914_v16  ;;  %v2951_v8 = vadd.f32 %v2933_v54, %v2915_v58  ;;  %v8861_v34 = vld [vmem:[#allocation2 + $0x8b] sm:$0x1]  ;;  %3386 = vrot.lane.b32.xlu1 %v3381_v25, %s7223_s11 }
 0x2a1   : > { %v2952_v19 = vadd.f32 %v2934_v49, %v2916_v29  ;;  %v2987_v17 = vrot.slane %v2946_v44, 7  ;;  %v2989_v28 = vrot.slane %v2947_v11, 6  ;;  %v2991_v40 = vrot.slane %v2948_v63, 5  ;;  %v8864_v56 = vld [vmem:[#allocation2 + $0x9b] sm:$0x1] }
 0x2a2   : > { %v8866_v55 = vld [vmem:[#allocation2 + $0xab] sm:$0x1]  ;;  %v8868_v60 = vld [vmem:[#allocation2 + $0xbb] sm:$0x1]  ;;  %v2993_v37 = vrot.slane %v2949_v47, 4  ;;  %v2995_v4 = vrot.slane %v2950_v46, 3 }
 0x2a3   : > { %v2997_v42 = vrot.slane %v2951_v8, 2  ;;  %v8870_v48 = vld [vmem:[#allocation2 + $0xcb] sm:$0x1]  ;;  %v8872_v24 = vld [vmem:[#allocation2 + $0xdb] sm:$0x1]  ;;  %v2988_v39 = vsel %vm719_vm2, %v2987_v17, %v2945_v10  ;;  %v2999_v52 = vrot.slane %v2952_v19, 1 }
 0x2a4   : > { %v8874_v14 = vld [vmem:[#allocation2 + $0xeb] sm:$0x1]  ;;  %v3554_v53 = vmul.f32 0.35483873, %v8836_v36  ;;  %v8878_v16 = vld [vmem:[#allocation2 + $0xfb] sm:$0x1]  ;;  %v2990_v22 = vsel %vm722_vm3, %v2989_v28, %v2988_v39 }
 0x2a5   : > { %v3555_v58 = vmul.f32 0.35483873, %v8844_v61  ;;  %v3556_v29 = vmul.f32 0.35483873, %v8846_v12  ;;  %v3557_v23 = vmul.f32 0.35483873, %v8850_v9  ;;  %v2992_v33 = vsel %vm725_vm4, %v2991_v40, %v2990_v22 }
 0x2a6   : > { %v3558_v5 = vmul.f32 0.35483873, %v8852_v35  ;;  %v3559_v15 = vmul.f32 0.35483873, %v8854_v27  ;;  %v3560_v50 = vmul.f32 0.35483873, %v8857_v20  ;;  %v2994_v59 = vsel %vm728_vm5, %v2993_v37, %v2992_v33 }
 0x2a7   : > { %v3561_v57 = vmul.f32 0.35483873, %v8859_v13  ;;  %v3572_v6 = vmul.f32 0.6451613, %v8861_v34  ;;  %v3573_v45 = vmul.f32 0.6451613, %v8864_v56  ;;  %v2996_v10 = vsel %vm731_vm6, %v2995_v4, %v2994_v59 }
 0x2a8   : > { %v3574_v54 = vmul.f32 0.6451613, %v8866_v55  ;;  %v3575_v49 = vmul.f32 0.6451613, %v8868_v60  ;;  %v3576_v2 = vmul.f32 0.6451613, %v8870_v48  ;;  %v2998_v63 = vsel %vm734_vm7, %v2997_v42, %v2996_v10 }
 0x2a9   : > { %v3577_v44 = vmul.f32 0.6451613, %v8872_v24  ;;  %v3578_v11 = vmul.f32 0.6451613, %v8874_v14  ;;  %v3579_v25 = vmul.f32 0.6451613, %v8878_v16  ;;  %v3590_v47 = vadd.f32 %v3572_v6, %v3554_v53 }
 0x2aa   : > { %v3591_v46 = vadd.f32 %v3573_v45, %v3555_v58  ;;  %v3000_v8 = vsel %vm737_vm8, %v2999_v52, %v2998_v63  ;;  %v3592_v19 = vadd.f32 %v3574_v54, %v3556_v29  ;;  %v3593_v17 = vadd.f32 %v3575_v49, %v3557_v23 }
 0x2ab   : > { %v3594_v28 = vadd.f32 %v3576_v2, %v3558_v5  ;;  %3005 = vrot.lane.b32.xlu0 %v3000_v8, %s7224_s12  ;;  %v3595_v40 = vadd.f32 %v3577_v44, %v3559_v15  ;;  %v3596_v37 = vadd.f32 %v3578_v11, %v3560_v50  ;;  %v3597_v4 = vadd.f32 %v3579_v25, %v3561_v57  ;;  %v1946_v2 = vpop.permute.xlu1 %1945  ;;  %v8927_v25 = vld [vmem:[#allocation2 + $0x9b] sm:$0x1] }
 0x2ac   : > { %v3632_v39 = vrot.slane %v3591_v46, 7  ;;  %v3634_v22 = vrot.slane %v3592_v19, 6  ;;  %v3636_v33 = vrot.slane %v3593_v17, 5  ;;  %v3176_v42 = vmul.f32 0.8064516, %v8745_v41 }
 0x2ad   : > { %v3638_v59 = vrot.slane %v3594_v28, 4  ;;  %v3640_v53 = vrot.slane %v3595_v40, 3  ;;  %v3642_v58 = vrot.slane %v3596_v37, 2  ;;  %v3644_v6 = vrot.slane %v3597_v4, 1  ;;  %1952 = vst.msk [vmem:[#allocation3 + $0xa0] sm:$0x3] %vm883_vm13, %v1946_v2 }
 0x2ae   : > { %v3633_v10 = vsel %vm719_vm2, %v3632_v39, %v3590_v47  ;;  %v3177_v29 = vmul.f32 0.8064516, %v8749_v62  ;;  %v3178_v23 = vmul.f32 0.8064516, %v8751_v21  ;;  %v3179_v5 = vmul.f32 0.8064516, %v8756_v38 }
 0x2af   : > { %v3635_v52 = vsel %vm722_vm3, %v3634_v22, %v3633_v10  ;;  %v3180_v50 = vmul.f32 0.8064516, %v8758_v32  ;;  %v3181_v57 = vmul.f32 0.8064516, %v8761_v0  ;;  %v3182_v41 = vmul.f32 0.8064516, %v8763_v1 }
 0x2b0   : > { %v3637_v15 = vsel %vm725_vm4, %v3636_v33, %v3635_v52  ;;  %v3183_v54 = vmul.f32 0.8064516, %v8769_v7  ;;  %v3194_v49 = vmul.f32 0.19354838, %v8771_v30  ;;  %v3195_v62 = vmul.f32 0.19354838, %v8773_v51 }
 0x2b1   : > { %v3639_v45 = vsel %vm728_vm5, %v3638_v59, %v3637_v15  ;;  %v3196_v38 = vmul.f32 0.19354838, %v8779_v3  ;;  %v3197_v44 = vmul.f32 0.19354838, %v8781_v26  ;;  %v3198_v32 = vmul.f32 0.19354838, %v8783_v31 }
 0x2b2   : > { %v3641_v21 = vsel %vm731_vm6, %v3640_v53, %v3639_v45  ;;  %v3199_v1 = vmul.f32 0.19354838, %v8788_v18  ;;  %v12540_v7 = vld [vmem:[#allocation30_spill] sm:$0xff]  ;;  %v12541_v30 = vld [vmem:[#allocation31_spill] sm:$0xff]  ;;  %2068 = vst.msk [vmem:[#allocation3 + $0xa0] sm:$0x3] %vm1002_vm14, %v8830_v43  ;;  %v3212_v26 = vadd.f32 %v3194_v49, %v3176_v42  ;;  %v3213_v31 = vadd.f32 %v3195_v62, %v3177_v29 }
 0x2b3   : > { %v3643_v0 = vsel %vm734_vm7, %v3642_v58, %v3641_v21  ;;  %v3200_v11 = vmul.f32 0.19354838, %v12540_v7  ;;  %v3201_v63 = vmul.f32 0.19354838, %v12541_v30  ;;  %v8925_v51 = vld [vmem:[#allocation2 + $0x8b] sm:$0x1]  ;;  %v3214_v47 = vadd.f32 %v3196_v38, %v3178_v23 }
 0x2b4   : > { %v3645_v3 = vsel %vm737_vm8, %v3644_v6, %v3643_v0  ;;  %v8932_v46 = vld [vmem:[#allocation2 + $0xab] sm:$0x1]  ;;  %v8934_v8 = vld [vmem:[#allocation2 + $0xbb] sm:$0x1]  ;;  %v3215_v19 = vadd.f32 %v3197_v44, %v3179_v5  ;;  %v3216_v17 = vadd.f32 %v3198_v32, %v3180_v50  ;;  %v3217_v28 = vadd.f32 %v3199_v1, %v3181_v57  ;;  %v8945_v59 = vld [vmem:[#allocation2 + $0x8c] sm:$0x1] }
 0x2b5   : > { %v8936_v18 = vld [vmem:[#allocation2 + $0xcb] sm:$0x1]  ;;  %3650 = vrot.lane.b32.xlu1 %v3645_v3, %s7222_s10  ;;  %v3218_v40 = vadd.f32 %v3200_v11, %v3182_v41  ;;  %v8939_v37 = vld [vmem:[#allocation2 + $0xdb] sm:$0x1]  ;;  %v3219_v39 = vadd.f32 %v3201_v63, %v3183_v54  ;;  %v3254_v22 = vrot.slane %v3213_v31, 7  ;;  %v3256_v33 = vrot.slane %v3214_v47, 6 }
 0x2b6   : > { %v8941_v43 = vld [vmem:[#allocation2 + $0xeb] sm:$0x1]  ;;  %v8943_v4 = vld [vmem:[#allocation2 + $0xfb] sm:$0x1]  ;;  %v8947_v42 = vld [vmem:[#allocation2 + $0x9c] sm:$0x1] }
 0x2b7   : > { %v8949_v10 = vld [vmem:[#allocation2 + $0xac] sm:$0x1]  ;;  %v3258_v53 = vrot.slane %v3215_v19, 5  ;;  %v3260_v58 = vrot.slane %v3216_v17, 4  ;;  %v3262_v6 = vrot.slane %v3217_v28, 3  ;;  %v3264_v52 = vrot.slane %v3218_v40, 2 }
 0x2b8   : > { %v12542_v29 = vmov 0.0   ;;  %v8952_v23 = vld [vmem:[#allocation2 + $0xbc] sm:$0x1]  ;;  %v8954_v5 = vld [vmem:[#allocation2 + $0xcc] sm:$0x1]  ;;  %v3255_v50 = vsel %vm719_vm2, %v3254_v22, %v3212_v26  ;;  %v3266_v57 = vrot.slane %v3219_v39, 1 }
 0x2b9   : > { %663 = vst.msk [vmem:[#allocation3 + $0xd0] sm:$0x3] %vm662_vm15, %v12542_v29  ;;  %v8956_v15 = vld [vmem:[#allocation2 + $0xdc] sm:$0x1]  ;;  %v12543_v41 = vld [vmem:[#allocation27_spill] sm:$0xff]  ;;  %v3257_v2 = vsel %vm722_vm3, %v3256_v33, %v3255_v50  ;;  %v12546_v21 = vld [vmem:[#allocation25_spill] sm:$0xff] }
 0x2ba   : > { %4724 = vst.msk [vmem:[#allocation3 + $0xd0] sm:$0x3] %vm1004_vm9, %v12543_v41  ;;  %v8961_v45 = vld [vmem:[#allocation2 + $0xec] sm:$0x1]  ;;  %v8963_v54 = vld [vmem:[#allocation2 + $0xfc] sm:$0x1]  ;;  %v3259_v0 = vsel %vm725_vm4, %v3258_v53, %v3257_v2  ;;  %v2327_v41 = vpop.permute.xlu0 %2326 }
 0x2bb   : > { %12544 = vst [vmem:[#allocation30_spill] sm:$0xff] %v8961_v45  ;;  %12545 = vst [vmem:[#allocation31_spill] sm:$0xff] %v8963_v54  ;;  %v3821_v49 = vmul.f32 0.38709676, %v8925_v51  ;;  %v3822_v62 = vmul.f32 0.38709676, %v8927_v25  ;;  %v3261_v30 = vsel %vm728_vm5, %v3260_v58, %v3259_v0 }
 0x2bc   : > { %4802 = vst.msk [vmem:[#allocation3 + $0xd0] sm:$0x3] %vm1156_vm12, %v12546_v21  ;;  %v3823_v38 = vmul.f32 0.38709676, %v8932_v46  ;;  %v3824_v44 = vmul.f32 0.38709676, %v8934_v8  ;;  %v3263_v31 = vsel %vm731_vm6, %v3262_v6, %v3261_v30 }
 0x2bd   : > { %v3825_v32 = vmul.f32 0.38709676, %v8936_v18  ;;  %v3826_v1 = vmul.f32 0.38709676, %v8939_v37  ;;  %v3827_v7 = vmul.f32 0.38709676, %v8941_v43  ;;  %v3265_v28 = vsel %vm734_vm7, %v3264_v52, %v3263_v31 }
 0x2be   : > { %v3828_v11 = vmul.f32 0.38709676, %v8943_v4  ;;  %v3839_v63 = vmul.f32 0.61290324, %v8945_v59  ;;  %v3840_v3 = vmul.f32 0.61290324, %v8947_v42  ;;  %v3267_v33 = vsel %vm737_vm8, %v3266_v57, %v3265_v28 }
 0x2bf   : > { %v3841_v26 = vmul.f32 0.61290324, %v8949_v10  ;;  %v3842_v47 = vmul.f32 0.61290324, %v8952_v23  ;;  %v3843_v19 = vmul.f32 0.61290324, %v8954_v5  ;;  %3272 = vrot.lane.b32.xlu0 %v3267_v33, %s7221_s9 }
 0x2c0   : > { %v3844_v17 = vmul.f32 0.61290324, %v8956_v15  ;;  %v3845_v40 = vmul.f32 0.61290324, %v8961_v45  ;;  %v3846_v39 = vmul.f32 0.61290324, %v8963_v54  ;;  %v3857_v22 = vadd.f32 %v3839_v63, %v3821_v49 }
 0x2c1   : > { %v3858_v53 = vadd.f32 %v3840_v3, %v3822_v62  ;;  %v3859_v58 = vadd.f32 %v3841_v26, %v3823_v38  ;;  %v3860_v50 = vadd.f32 %v3842_v47, %v3824_v44  ;;  %v3861_v6 = vadd.f32 %v3843_v19, %v3825_v32  ;;  %v9003_v47 = vpop.permute.xlu0 %2590  ;;  %v9022_v28 = vld [vmem:[#allocation2 + $0xac] sm:$0x1] }
 0x2c2   : > { %v3862_v2 = vadd.f32 %v3844_v17, %v3826_v1  ;;  %v3863_v21 = vadd.f32 %v3845_v40, %v3827_v7  ;;  %v3864_v0 = vadd.f32 %v3846_v39, %v3828_v11  ;;  %v3440_v31 = vmul.f32 0.8387097, %v8836_v36  ;;  %2600 = vst.msk [vmem:[#allocation3 + $0xb0] sm:$0x3] %vm1004_vm9, %v9003_v47  ;;  %v9024_v40 = vld [vmem:[#allocation2 + $0xbc] sm:$0x1] }
 0x2c3   : > { %v3899_v30 = vrot.slane %v3858_v53, 7  ;;  %v3901_v29 = vrot.slane %v3859_v58, 6  ;;  %v3903_v52 = vrot.slane %v3860_v50, 5  ;;  %v3905_v45 = vrot.slane %v3861_v6, 4  ;;  %v9031_v33 = vld [vmem:[#allocation2 + $0xec] sm:$0x1] }
 0x2c4   : > { %v3907_v54 = vrot.slane %v3862_v2, 3  ;;  %v3909_v49 = vrot.slane %v3863_v21, 2  ;;  %v3911_v63 = vrot.slane %v3864_v0, 1  ;;  %v3441_v62 = vmul.f32 0.8387097, %v8844_v61 }
 0x2c5   : > { %v3900_v57 = vsel %vm719_vm2, %v3899_v30, %v3857_v22  ;;  %v3442_v38 = vmul.f32 0.8387097, %v8846_v12  ;;  %v3443_v44 = vmul.f32 0.8387097, %v8850_v9  ;;  %v3444_v1 = vmul.f32 0.8387097, %v8852_v35  ;;  %v2213_v12 = vpop.permute.xlu1 %2212 }
 0x2c6   : > { %v3902_v32 = vsel %vm722_vm3, %v3901_v29, %v3900_v57  ;;  %v3445_v7 = vmul.f32 0.8387097, %v8854_v27  ;;  %v3446_v36 = vmul.f32 0.8387097, %v8857_v20  ;;  %v3447_v3 = vmul.f32 0.8387097, %v8859_v13 }
 0x2c7   : > { %v3904_v11 = vsel %vm725_vm4, %v3903_v52, %v3902_v32  ;;  %v3458_v26 = vmul.f32 0.16129032, %v8861_v34  ;;  %v3459_v61 = vmul.f32 0.16129032, %v8864_v56  ;;  %v3460_v29 = vmul.f32 0.16129032, %v8866_v55 }
 0x2c8   : > { %v3906_v9 = vsel %vm728_vm5, %v3905_v45, %v3904_v11  ;;  %v3461_v35 = vmul.f32 0.16129032, %v8868_v60  ;;  %v3462_v27 = vmul.f32 0.16129032, %v8870_v48  ;;  %v9009_v20 = vld [vmem:[#allocation2 + $0x8c] sm:$0x1] }
 0x2c9   : > { %2219 = vst.msk [vmem:[#allocation3 + $0xa8] sm:$0x3] %vm1156_vm12, %v2213_v12  ;;  %v3908_v13 = vsel %vm731_vm6, %v3907_v54, %v3906_v9  ;;  %v3463_v34 = vmul.f32 0.16129032, %v8872_v24  ;;  %v3464_v56 = vmul.f32 0.16129032, %v8874_v14  ;;  %v3476_v48 = vadd.f32 %v3458_v26, %v3440_v31 }
 0x2ca   : > { %v3465_v45 = vmul.f32 0.16129032, %v8878_v16  ;;  %v9018_v55 = vld [vmem:[#allocation2 + $0x9c] sm:$0x1]  ;;  %2333 = vst.msk [vmem:[#allocation3 + $0xa8] sm:$0x3] %vm767_vm11, %v2327_v41  ;;  %v3910_v60 = vsel %vm734_vm7, %v3909_v49, %v3908_v13  ;;  %v3477_v19 = vadd.f32 %v3459_v61, %v3441_v62  ;;  %v3478_v17 = vadd.f32 %v3460_v29, %v3442_v38 }
 0x2cb   : > { %v9026_v54 = vld [vmem:[#allocation2 + $0xcc] sm:$0x1]  ;;  %v3912_v24 = vsel %vm737_vm8, %v3911_v63, %v3910_v60  ;;  %v3479_v14 = vadd.f32 %v3461_v35, %v3443_v44  ;;  %v3480_v39 = vadd.f32 %v3462_v27, %v3444_v1  ;;  %v3481_v16 = vadd.f32 %v3463_v34, %v3445_v7  ;;  %v9029_v22 = vld [vmem:[#allocation2 + $0xdc] sm:$0x1]  ;;  %v9036_v2 = vld [vmem:[#allocation2 + $0x8d] sm:$0x1] }
 0x2cc   : > { %v9033_v53 = vld [vmem:[#allocation2 + $0xfc] sm:$0x1]  ;;  %3917 = vrot.lane.b32.xlu1 %v3912_v24, %s7223_s11  ;;  %v3482_v58 = vadd.f32 %v3464_v56, %v3446_v36  ;;  %v3483_v50 = vadd.f32 %v3465_v45, %v3447_v3  ;;  %v3518_v41 = vrot.slane %v3477_v19, 7  ;;  %v3520_v6 = vrot.slane %v3478_v17, 6  ;;  %v9038_v21 = vld [vmem:[#allocation2 + $0x9d] sm:$0x1] }
 0x2cd   : > { %v9040_v0 = vld [vmem:[#allocation2 + $0xad] sm:$0x1]  ;;  %v3522_v30 = vrot.slane %v3479_v14, 5  ;;  %v3524_v52 = vrot.slane %v3480_v39, 4  ;;  %v3526_v31 = vrot.slane %v3481_v16, 3  ;;  %vm998_vm9 = vcmask 7168  }
 0x2ce   : > { %v9042_v49 = vld [vmem:[#allocation2 + $0xbd] sm:$0x1]  ;;  %v9044_v63 = vld [vmem:[#allocation2 + $0xcd] sm:$0x1]  ;;  %v4085_v62 = vmul.f32 0.41935486, %v9009_v20  ;;  %v3519_v38 = vsel %vm719_vm2, %v3518_v41, %v3476_v48 }
 0x2cf   : > { %v9046_v57 = vld [vmem:[#allocation2 + $0xdd] sm:$0x1]  ;;  %v3528_v44 = vrot.slane %v3482_v58, 2  ;;  %v3530_v32 = vrot.slane %v3483_v50, 1  ;;  %v9050_v1 = vld [vmem:[#allocation2 + $0xed] sm:$0x1]  ;;  %v3521_v11 = vsel %vm722_vm3, %v3520_v6, %v3519_v38 }
 0x2d0   : > { %v9052_v7 = vld [vmem:[#allocation2 + $0xfd] sm:$0x1]  ;;  %v4086_v36 = vmul.f32 0.41935486, %v9018_v55  ;;  %v4087_v3 = vmul.f32 0.41935486, %v9022_v28  ;;  %v3523_v12 = vsel %vm725_vm4, %v3522_v30, %v3521_v11 }
 0x2d1   : > { %12547 = vst [vmem:[#allocation27_spill] sm:$0xff] %v9052_v7  ;;  %v4088_v26 = vmul.f32 0.41935486, %v9024_v40  ;;  %v4089_v61 = vmul.f32 0.41935486, %v9026_v54  ;;  %v3525_v27 = vsel %vm728_vm5, %v3524_v52, %v3523_v12 }
 0x2d2   : > { %v4090_v9 = vmul.f32 0.41935486, %v9029_v22  ;;  %v4091_v29 = vmul.f32 0.41935486, %v9031_v33  ;;  %v4092_v35 = vmul.f32 0.41935486, %v9033_v53  ;;  %v3527_v45 = vsel %vm731_vm6, %v3526_v31, %v3525_v27 }
 0x2d3   : > { %v4103_v13 = vmul.f32 0.58064514, %v9036_v2  ;;  %v4104_v34 = vmul.f32 0.58064514, %v9038_v21  ;;  %v4105_v56 = vmul.f32 0.58064514, %v9040_v0  ;;  %v3529_v17 = vsel %vm734_vm7, %v3528_v44, %v3527_v45 }
 0x2d4   : > { %v4106_v60 = vmul.f32 0.58064514, %v9042_v49  ;;  %v4107_v48 = vmul.f32 0.58064514, %v9044_v63  ;;  %v4108_v19 = vmul.f32 0.58064514, %v9046_v57  ;;  %v3531_v16 = vsel %vm737_vm8, %v3530_v32, %v3529_v17 }
 0x2d5   : > { %v4109_v24 = vmul.f32 0.58064514, %v9050_v1  ;;  %v4110_v14 = vmul.f32 0.58064514, %v9052_v7  ;;  %v4121_v39 = vadd.f32 %v4103_v13, %v4085_v62  ;;  %v4122_v58 = vadd.f32 %v4104_v34, %v4086_v36  ;;  %3536 = vrot.lane.b32.xlu0 %v3531_v16, %s7224_s12  ;;  %v9100_v17 = vld [vmem:[#allocation2 + $0x9d] sm:$0x1] }
 0x2d6   : > { %v4123_v50 = vadd.f32 %v4105_v56, %v4087_v3  ;;  %v4124_v41 = vadd.f32 %v4106_v60, %v4088_v26  ;;  %v4125_v6 = vadd.f32 %v4107_v48, %v4089_v61  ;;  %v4126_v30 = vadd.f32 %v4108_v19, %v4090_v9  ;;  %v2477_v56 = vpop.permute.xlu1 %2476  ;;  %v9109_v16 = vld [vmem:[#allocation2 + $0xcd] sm:$0x1] }
 0x2d7   : > { %v4127_v52 = vadd.f32 %v4109_v24, %v4091_v29  ;;  %v4128_v31 = vadd.f32 %v4110_v14, %v4092_v35  ;;  %v4163_v38 = vrot.slane %v4122_v58, 7  ;;  %v3707_v44 = vmul.f32 0.87096775, %v8925_v51  ;;  %2483 = vst.msk [vmem:[#allocation3 + $0xa8] sm:$0x3] %vm883_vm13, %v2477_v56 }
 0x2d8   : > { %v4165_v11 = vrot.slane %v4123_v50, 6  ;;  %v4167_v12 = vrot.slane %v4124_v41, 5  ;;  %v4169_v27 = vrot.slane %v4125_v6, 4  ;;  %v4171_v45 = vrot.slane %v4126_v30, 3  ;;  %2599 = vst.msk [vmem:[#allocation3 + $0xa8] sm:$0x3] %vm1002_vm14, %v9003_v47 }
 0x2d9   : > { %v4173_v7 = vrot.slane %v4127_v52, 2  ;;  %v4175_v62 = vrot.slane %v4128_v31, 1  ;;  %v4164_v32 = vsel %vm719_vm2, %v4163_v38, %v4121_v39  ;;  %v3708_v36 = vmul.f32 0.87096775, %v8927_v25  ;;  %v9105_v14 = vld [vmem:[#allocation2 + $0xad] sm:$0x1] }
 0x2da   : > { %v3709_v3 = vmul.f32 0.87096775, %v8932_v46  ;;  %v3710_v26 = vmul.f32 0.87096775, %v8934_v8  ;;  %v4166_v61 = vsel %vm722_vm3, %v4165_v11, %v4164_v32  ;;  %v3711_v9 = vmul.f32 0.87096775, %v8936_v18 }
 0x2db   : > { %v3712_v29 = vmul.f32 0.87096775, %v8939_v37  ;;  %v3713_v51 = vmul.f32 0.87096775, %v8941_v43  ;;  %v4168_v35 = vsel %vm725_vm4, %v4167_v12, %v4166_v61  ;;  %v3714_v13 = vmul.f32 0.87096775, %v8943_v4 }
 0x2dc   : > { %v3725_v34 = vmul.f32 0.12903225, %v8945_v59  ;;  %v3726_v25 = vmul.f32 0.12903225, %v8947_v42  ;;  %v4170_v46 = vsel %vm728_vm5, %v4169_v27, %v4168_v35  ;;  %v3727_v8 = vmul.f32 0.12903225, %v8949_v10 }
 0x2dd   : > { %v3728_v60 = vmul.f32 0.12903225, %v8952_v23  ;;  %v3729_v18 = vmul.f32 0.12903225, %v8954_v5  ;;  %v9093_v37 = vld [vmem:[#allocation2 + $0x8d] sm:$0x1]  ;;  %v4172_v43 = vsel %vm731_vm6, %v4171_v45, %v4170_v46 }
 0x2de   : > { %v3730_v4 = vmul.f32 0.12903225, %v8956_v15  ;;  %v12548_v59 = vld [vmem:[#allocation30_spill] sm:$0xff]  ;;  %v12549_v42 = vld [vmem:[#allocation31_spill] sm:$0xff]  ;;  %v4174_v10 = vsel %vm734_vm7, %v4173_v7, %v4172_v43  ;;  %v3743_v23 = vadd.f32 %v3725_v34, %v3707_v44  ;;  %v3744_v5 = vadd.f32 %v3726_v25, %v3708_v36  ;;  %v9107_v39 = vld [vmem:[#allocation2 + $0xbd] sm:$0x1] }
 0x2df   : > { %v3731_v48 = vmul.f32 0.12903225, %v12548_v59  ;;  %v3732_v19 = vmul.f32 0.12903225, %v12549_v42  ;;  %v3745_v24 = vadd.f32 %v3727_v8, %v3709_v3  ;;  %v4176_v15 = vsel %vm737_vm8, %v4175_v62, %v4174_v10  ;;  %v9112_v6 = vld [vmem:[#allocation2 + $0xdd] sm:$0x1] }
 0x2e0   : > { %v3746_v58 = vadd.f32 %v3728_v60, %v3710_v26  ;;  %v3747_v50 = vadd.f32 %v3729_v18, %v3711_v9  ;;  %v3748_v41 = vadd.f32 %v3730_v4, %v3712_v29  ;;  %v9114_v30 = vld [vmem:[#allocation2 + $0xed] sm:$0x1]  ;;  %v9116_v47 = vld [vmem:[#allocation2 + $0xfd] sm:$0x1]  ;;  %4181 = vrot.lane.b32.xlu1 %v4176_v15, %s7222_s10  ;;  %v3785_v31 = vrot.slane %v3744_v5, 7 }
 0x2e1   : > { %v3749_v7 = vadd.f32 %v3731_v48, %v3713_v51  ;;  %v3750_v52 = vadd.f32 %v3732_v19, %v3714_v13  ;;  %v3787_v38 = vrot.slane %v3745_v24, 6  ;;  %v9119_v11 = vld [vmem:[#allocation2 + $0x8e] sm:$0x1]  ;;  %v9121_v12 = vld [vmem:[#allocation2 + $0x9e] sm:$0x1] }
 0x2e2   : > { %v9123_v44 = vld [vmem:[#allocation2 + $0xae] sm:$0x1]  ;;  %v3789_v27 = vrot.slane %v3746_v58, 5  ;;  %v3791_v45 = vrot.slane %v3747_v50, 4  ;;  %v3793_v62 = vrot.slane %v3748_v41, 3  ;;  %v3786_v61 = vsel %vm719_vm2, %v3785_v31, %v3743_v23 }
 0x2e3   : > { %v9125_v32 = vld [vmem:[#allocation2 + $0xbe] sm:$0x1]  ;;  %v9127_v36 = vld [vmem:[#allocation2 + $0xce] sm:$0x1]  ;;  %v4352_v26 = vmul.f32 0.4516129, %v9093_v37  ;;  %v3788_v34 = vsel %vm722_vm3, %v3787_v38, %v3786_v61 }
 0x2e4   : > { %v9129_v3 = vld [vmem:[#allocation2 + $0xde] sm:$0x1]  ;;  %v3795_v9 = vrot.slane %v3749_v7, 2  ;;  %v3797_v29 = vrot.slane %v3750_v52, 1  ;;  %v9133_v51 = vld [vmem:[#allocation2 + $0xee] sm:$0x1]  ;;  %v3790_v8 = vsel %vm725_vm4, %v3789_v27, %v3788_v34 }
 0x2e5   : > { %v9135_v35 = vld [vmem:[#allocation2 + $0xfe] sm:$0x1]  ;;  %v4353_v13 = vmul.f32 0.4516129, %v9100_v17  ;;  %v4354_v25 = vmul.f32 0.4516129, %v9105_v14  ;;  %v3792_v4 = vsel %vm728_vm5, %v3791_v45, %v3790_v8 }
 0x2e6   : > { %12550 = vst [vmem:[#allocation25_spill] sm:$0xff] %v9135_v35  ;;  %v4355_v56 = vmul.f32 0.4516129, %v9107_v39  ;;  %v4356_v46 = vmul.f32 0.4516129, %v9109_v16  ;;  %v3794_v19 = vsel %vm731_vm6, %v3793_v62, %v3792_v4 }
 0x2e7   : > { %v4357_v60 = vmul.f32 0.4516129, %v9112_v6  ;;  %v4358_v18 = vmul.f32 0.4516129, %v9114_v30  ;;  %v4359_v43 = vmul.f32 0.4516129, %v9116_v47  ;;  %v3796_v24 = vsel %vm734_vm7, %v3795_v9, %v3794_v19 }
 0x2e8   : > { %v4370_v59 = vmul.f32 0.5483871, %v9119_v11  ;;  %v4371_v48 = vmul.f32 0.5483871, %v9121_v12  ;;  %v4372_v42 = vmul.f32 0.5483871, %v9123_v44  ;;  %v3798_v41 = vsel %vm737_vm8, %v3797_v29, %v3796_v24 }
 0x2e9   : > { %v4373_v10 = vmul.f32 0.5483871, %v9125_v32  ;;  %v4374_v23 = vmul.f32 0.5483871, %v9127_v36  ;;  %v4375_v5 = vmul.f32 0.5483871, %v9129_v3  ;;  %3803 = vrot.lane.b32.xlu0 %v3798_v41, %s7221_s9 }
 0x2ea   : > { %v4376_v15 = vmul.f32 0.5483871, %v9133_v51  ;;  %v4377_v58 = vmul.f32 0.5483871, %v9135_v35  ;;  %v4388_v50 = vadd.f32 %v4370_v59, %v4352_v26  ;;  %v4389_v7 = vadd.f32 %v4371_v48, %v4353_v13  ;;  %v9183_v24 = vld [vmem:[#allocation2 + $0x9e] sm:$0x1] }
 0x2eb   : > { %v4390_v52 = vadd.f32 %v4372_v42, %v4354_v25  ;;  %v4391_v31 = vadd.f32 %v4373_v10, %v4355_v56  ;;  %v4392_v38 = vadd.f32 %v4374_v23, %v4356_v46  ;;  %v4393_v27 = vadd.f32 %v4375_v5, %v4357_v60  ;;  %v2744_v42 = vpop.permute.xlu1 %2743  ;;  %v12551_v23 = vld [vmem:[#allocation27_spill] sm:$0xff]  ;;  %v9191_v41 = vld [vmem:[#allocation2 + $0xce] sm:$0x1] }
 0x2ec   : > { %v4394_v45 = vadd.f32 %v4376_v15, %v4358_v18  ;;  %v4395_v62 = vadd.f32 %v4377_v58, %v4359_v43  ;;  %v4430_v61 = vrot.slane %v4389_v7, 7  ;;  %v3971_v9 = vmul.f32 0.9032258, %v9009_v20  ;;  %2750 = vst.msk [vmem:[#allocation3 + $0xb0] sm:$0x3] %vm1156_vm12, %v2744_v42 }
 0x2ed   : > { %v4432_v34 = vrot.slane %v4390_v52, 6  ;;  %v4434_v8 = vrot.slane %v4391_v31, 5  ;;  %v4436_v4 = vrot.slane %v4392_v38, 4  ;;  %v4438_v19 = vrot.slane %v4393_v27, 3  ;;  %v9187_v58 = vld [vmem:[#allocation2 + $0xae] sm:$0x1] }
 0x2ee   : > { %v4440_v35 = vrot.slane %v4394_v45, 2  ;;  %v4442_v26 = vrot.slane %v4395_v62, 1  ;;  %v4431_v29 = vsel %vm719_vm2, %v4430_v61, %v4388_v50  ;;  %v3972_v13 = vmul.f32 0.9032258, %v9018_v55  ;;  %v9189_v50 = vld [vmem:[#allocation2 + $0xbe] sm:$0x1] }
 0x2ef   : > { %v3973_v25 = vmul.f32 0.9032258, %v9022_v28  ;;  %v3974_v56 = vmul.f32 0.9032258, %v9024_v40  ;;  %v4433_v46 = vsel %vm722_vm3, %v4432_v34, %v4431_v29  ;;  %v3975_v60 = vmul.f32 0.9032258, %v9026_v54 }
 0x2f0   : > { %v3976_v18 = vmul.f32 0.9032258, %v9029_v22  ;;  %v3977_v20 = vmul.f32 0.9032258, %v9031_v33  ;;  %v4435_v43 = vsel %vm725_vm4, %v4434_v8, %v4433_v46  ;;  %v3978_v59 = vmul.f32 0.9032258, %v9033_v53  ;;  %v2858_v33 = vpop.permute.xlu0 %2857 }
 0x2f1   : > { %v3989_v48 = vmul.f32 0.09677419, %v9036_v2  ;;  %v3990_v55 = vmul.f32 0.09677419, %v9038_v21  ;;  %v4437_v28 = vsel %vm728_vm5, %v4436_v4, %v4435_v43  ;;  %v3991_v40 = vmul.f32 0.09677419, %v9040_v0 }
 0x2f2   : > { %v3992_v10 = vmul.f32 0.09677419, %v9042_v49  ;;  %v3993_v54 = vmul.f32 0.09677419, %v9044_v63  ;;  %v9176_v22 = vld [vmem:[#allocation2 + $0x8e] sm:$0x1]  ;;  %v4439_v53 = vsel %vm731_vm6, %v4438_v19, %v4437_v28 }
 0x2f3   : > { %v3994_v2 = vmul.f32 0.09677419, %v9046_v57  ;;  %v3995_v21 = vmul.f32 0.09677419, %v9050_v1  ;;  %v3996_v5 = vmul.f32 0.09677419, %v12551_v23  ;;  %v4441_v0 = vsel %vm734_vm7, %v4440_v35, %v4439_v53 }
 0x2f4   : > { %2864 = vst.msk [vmem:[#allocation3 + $0xb0] sm:$0x3] %vm767_vm11, %v2858_v33  ;;  %v4007_v49 = vadd.f32 %v3989_v48, %v3971_v9  ;;  %v4008_v63 = vadd.f32 %v3990_v55, %v3972_v13  ;;  %v4009_v15 = vadd.f32 %v3991_v40, %v3973_v25  ;;  %v12552_v57 = vld [vmem:[#allocation26_spill] sm:$0xff]  ;;  %v4443_v1 = vsel %vm737_vm8, %v4442_v26, %v4441_v0  ;;  %v9196_v38 = vld [vmem:[#allocation2 + $0xde] sm:$0x1]  ;;  %v12553_v45 = vld [vmem:[#allocation21_spill] sm:$0xff] }
 0x2f5   : > { %3014 = vst.msk [vmem:[#allocation3 + $0xb0] sm:$0x3] %vm883_vm13, %v12552_v57  ;;  %v4010_v7 = vadd.f32 %v3992_v10, %v3974_v56  ;;  %v4011_v52 = vadd.f32 %v3993_v54, %v3975_v60  ;;  %v4012_v31 = vadd.f32 %v3994_v2, %v3976_v18  ;;  %v9198_v35 = vld [vmem:[#allocation2 + $0xee] sm:$0x1]  ;;  %v9200_v27 = vld [vmem:[#allocation2 + $0xfe] sm:$0x1]  ;;  %4448 = vrot.lane.b32.xlu1 %v4443_v1, %s7223_s11 }
 0x2f6   : > { %3130 = vst.msk [vmem:[#allocation3 + $0xb0] sm:$0x3] %vm1002_vm14, %v12553_v45  ;;  %v4013_v62 = vadd.f32 %v3995_v21, %v3977_v20  ;;  %v4014_v61 = vadd.f32 %v3996_v5, %v3978_v59  ;;  %v4049_v34 = vrot.slane %v4008_v63, 7  ;;  %v4051_v8 = vrot.slane %v4009_v15, 6  ;;  %v9205_v9 = vld [vmem:[#allocation2 + $0x8f] sm:$0x1] }
 0x2f7   : > { %v9207_v4 = vld [vmem:[#allocation2 + $0x9f] sm:$0x1]  ;;  %v9209_v19 = vld [vmem:[#allocation2 + $0xaf] sm:$0x1]  ;;  %v4053_v26 = vrot.slane %v4010_v7, 5  ;;  %v4055_v29 = vrot.slane %v4011_v52, 4 }
 0x2f8   : > { %v4057_v13 = vrot.slane %v4012_v31, 3  ;;  %v9211_v25 = vld [vmem:[#allocation2 + $0xbf] sm:$0x1]  ;;  %v9213_v56 = vld [vmem:[#allocation2 + $0xcf] sm:$0x1]  ;;  %v4050_v18 = vsel %vm719_vm2, %v4049_v34, %v4007_v49  ;;  %v4059_v20 = vrot.slane %v4013_v62, 2 }
 0x2f9   : > { %v9215_v46 = vld [vmem:[#allocation2 + $0xdf] sm:$0x1]  ;;  %v4616_v60 = vmul.f32 0.48387098, %v9176_v22  ;;  %v4061_v43 = vrot.slane %v4014_v61, 1  ;;  %v4052_v42 = vsel %vm722_vm3, %v4051_v8, %v4050_v18  ;;  %vm880_vm11 = vcmask 794120  }
 0x2fa   : > { %v9219_v59 = vld [vmem:[#allocation2 + $0xef] sm:$0x1]  ;;  %v9221_v48 = vld [vmem:[#allocation2 + $0xff] sm:$0x1]  ;;  %v4617_v55 = vmul.f32 0.48387098, %v9183_v24  ;;  %v4054_v54 = vsel %vm725_vm4, %v4053_v26, %v4052_v42 }
 0x2fb   : > { %12554 = vst [vmem:[#allocation30_spill] sm:$0xff] %v9221_v48  ;;  %v4618_v28 = vmul.f32 0.48387098, %v9187_v58  ;;  %v4619_v40 = vmul.f32 0.48387098, %v9189_v50  ;;  %v4056_v21 = vsel %vm728_vm5, %v4055_v29, %v4054_v54  ;;  %vm996_vm12 = vcmask 1048328  }
 0x2fc   : > { %v4620_v10 = vmul.f32 0.48387098, %v9191_v41  ;;  %v4621_v33 = vmul.f32 0.48387098, %v9196_v38  ;;  %v4622_v53 = vmul.f32 0.48387098, %v9198_v35  ;;  %v4058_v49 = vsel %vm731_vm6, %v4057_v13, %v4056_v21 }
 0x2fd   : > { %v4623_v2 = vmul.f32 0.48387098, %v9200_v27  ;;  %v4634_v23 = vmul.f32 0.516129, %v9205_v9  ;;  %v4635_v5 = vmul.f32 0.516129, %v9207_v4  ;;  %v4060_v1 = vsel %vm734_vm7, %v4059_v20, %v4058_v49 }
 0x2fe   : > { %v4636_v0 = vmul.f32 0.516129, %v9209_v19  ;;  %v4637_v63 = vmul.f32 0.516129, %v9211_v25  ;;  %v4638_v15 = vmul.f32 0.516129, %v9213_v56  ;;  %v4062_v45 = vsel %vm737_vm8, %v4061_v43, %v4060_v1 }
 0x2ff   : > { %v4639_v57 = vmul.f32 0.516129, %v9215_v46  ;;  %v4640_v7 = vmul.f32 0.516129, %v9219_v59  ;;  %v4641_v52 = vmul.f32 0.516129, %v9221_v48  ;;  %v4652_v31 = vadd.f32 %v4634_v23, %v4616_v60  ;;  %4067 = vrot.lane.b32.xlu0 %v4062_v45, %s7224_s12 }
 0x300   : > { %v4653_v62 = vadd.f32 %v4635_v5, %v4617_v55  ;;  %v4654_v61 = vadd.f32 %v4636_v0, %v4618_v28  ;;  %v4655_v34 = vadd.f32 %v4637_v63, %v4619_v40  ;;  %v4656_v8 = vadd.f32 %v4638_v15, %v4620_v10  ;;  %v12555_v15 = vld [vmem:[#allocation25_spill] sm:$0xff] }
 0x301   : > { %v4657_v26 = vadd.f32 %v4639_v57, %v4621_v33  ;;  %v4658_v29 = vadd.f32 %v4640_v7, %v4622_v53  ;;  %v4659_v13 = vadd.f32 %v4641_v52, %v4623_v2  ;;  %v4238_v20 = vmul.f32 0.9354839, %v9093_v37 }
 0x302   : > { %v4694_v18 = vrot.slane %v4653_v62, 7  ;;  %v4696_v42 = vrot.slane %v4654_v61, 6  ;;  %v4698_v54 = vrot.slane %v4655_v34, 5  ;;  %v4700_v21 = vrot.slane %v4656_v8, 4  ;;  %v9271_v62 = vld [vmem:[#allocation2 + $0x91] sm:$0x1] }
 0x303   : > { %v4702_v49 = vrot.slane %v4657_v26, 3  ;;  %v4704_v48 = vrot.slane %v4658_v29, 2  ;;  %v4706_v60 = vrot.slane %v4659_v13, 1  ;;  %v4239_v55 = vmul.f32 0.9354839, %v9100_v17 }
 0x304   : > { %v4695_v43 = vsel %vm719_vm2, %v4694_v18, %v4652_v31  ;;  %v4240_v28 = vmul.f32 0.9354839, %v9105_v14  ;;  %v4241_v40 = vmul.f32 0.9354839, %v9107_v39  ;;  %v4242_v33 = vmul.f32 0.9354839, %v9109_v16 }
 0x305   : > { %v4697_v10 = vsel %vm722_vm3, %v4696_v42, %v4695_v43  ;;  %v4243_v53 = vmul.f32 0.9354839, %v9112_v6  ;;  %v4244_v37 = vmul.f32 0.9354839, %v9114_v30  ;;  %v4245_v23 = vmul.f32 0.9354839, %v9116_v47 }
 0x306   : > { %v4699_v2 = vsel %vm725_vm4, %v4698_v54, %v4697_v10  ;;  %v4256_v5 = vmul.f32 0.06451613, %v9119_v11  ;;  %v4257_v17 = vmul.f32 0.06451613, %v9121_v12  ;;  %v4258_v39 = vmul.f32 0.06451613, %v9123_v44 }
 0x307   : > { %v4701_v14 = vsel %vm728_vm5, %v4700_v21, %v4699_v2  ;;  %v4259_v0 = vmul.f32 0.06451613, %v9125_v32  ;;  %v4260_v16 = vmul.f32 0.06451613, %v9127_v36  ;;  %v4261_v30 = vmul.f32 0.06451613, %v9129_v3 }
 0x308   : > { %v4703_v6 = vsel %vm731_vm6, %v4702_v49, %v4701_v14  ;;  %v4262_v63 = vmul.f32 0.06451613, %v9133_v51  ;;  %v4263_v47 = vmul.f32 0.06451613, %v12555_v15  ;;  %v4274_v57 = vadd.f32 %v4256_v5, %v4238_v20  ;;  %v9268_v31 = vld [vmem:[#allocation2 + $0x81] sm:$0x1] }
 0x309   : > { %v4705_v11 = vsel %vm734_vm7, %v4704_v48, %v4703_v6  ;;  %v4275_v12 = vadd.f32 %v4257_v17, %v4239_v55  ;;  %v4276_v1 = vadd.f32 %v4258_v39, %v4240_v28  ;;  %v4277_v44 = vadd.f32 %v4259_v0, %v4241_v40  ;;  %v9273_v61 = vld [vmem:[#allocation2 + $0xa1] sm:$0x1]  ;;  %v9275_v48 = vld [vmem:[#allocation2 + $0xb1] sm:$0x1]  ;;  %v9283_v42 = vld [vmem:[#allocation2 + $0x90] sm:$0x1] }
 0x30a   : > { %v4707_v7 = vsel %vm737_vm8, %v4706_v60, %v4705_v11  ;;  %v4278_v52 = vadd.f32 %v4260_v16, %v4242_v33  ;;  %v4279_v32 = vadd.f32 %v4261_v30, %v4243_v53  ;;  %v4280_v36 = vadd.f32 %v4262_v63, %v4244_v37  ;;  %v9277_v29 = vld [vmem:[#allocation2 + $0xc1] sm:$0x1]  ;;  %v9279_v13 = vld [vmem:[#allocation2 + $0xd1] sm:$0x1]  ;;  %v9289_v43 = vld [vmem:[#allocation2 + $0xa0] sm:$0x1] }
 0x30b   : > { %4712 = vrot.lane.b32.xlu1 %v4707_v7, %s7222_s10  ;;  %v4281_v3 = vadd.f32 %v4263_v47, %v4245_v23  ;;  %v4316_v45 = vrot.slane %v4275_v12, 7  ;;  %v4318_v51 = vrot.slane %v4276_v1, 6  ;;  %v4320_v34 = vrot.slane %v4277_v44, 5  ;;  %v9281_v18 = vld [vmem:[#allocation2 + $0xe1] sm:$0x1] }
 0x30c   : > { %v4322_v8 = vrot.slane %v4278_v52, 4  ;;  %v4324_v26 = vrot.slane %v4279_v32, 3  ;;  %v894_v54 = vmul.f32 0.032258093, %v9283_v42  ;;  %v4326_v21 = vrot.slane %v4280_v36, 2  ;;  %v12556_v7 = vld [vmem:[#allocation29_spill] sm:$0xff] }
 0x30d   : > { %v4317_v20 = vsel %vm719_vm2, %v4316_v45, %v4274_v57  ;;  %v4328_v49 = vrot.slane %v4281_v3, 1  ;;  %v9287_v60 = vld [vmem:[#allocation2 + $0xf1] sm:$0x1]  ;;  %v895_v55 = vmul.f32 0.032258093, %v9289_v43  ;;  %vm659_vm13 = vcmask 539912  }
 0x30e   : > { %v4319_v28 = vsel %vm722_vm3, %v4318_v51, %v4317_v20  ;;  %v9293_v40 = vld [vmem:[#allocation2 + $0xb0] sm:$0x1]  ;;  %v9296_v33 = vld [vmem:[#allocation2 + $0xc0] sm:$0x1]  ;;  %v911_v0 = vmul.f32 0.9677419, %v9268_v31 }
 0x30f   : > { %v896_v10 = vmul.f32 0.032258093, %v9293_v40  ;;  %v897_v53 = vmul.f32 0.032258093, %v9296_v33  ;;  %v9299_v37 = vld [vmem:[#allocation2 + $0xd0] sm:$0x1]  ;;  %v4321_v23 = vsel %vm725_vm4, %v4320_v34, %v4319_v28 }
 0x310   : > { %v898_v2 = vmul.f32 0.032258093, %v9299_v37  ;;  %v9303_v5 = vld [vmem:[#allocation2 + $0xe0] sm:$0x1]  ;;  %v9306_v14 = vld [vmem:[#allocation2 + $0xf0] sm:$0x1]  ;;  %v4323_v16 = vsel %vm728_vm5, %v4322_v8, %v4321_v23  ;;  %v929_v44 = vadd.f32 %v911_v0, %v12556_v7 }
 0x311   : > { %v899_v17 = vmul.f32 0.032258093, %v9303_v5  ;;  %v900_v39 = vmul.f32 0.032258093, %v9306_v14  ;;  %v912_v6 = vmul.f32 0.9677419, %v9271_v62  ;;  %v4325_v15 = vsel %vm731_vm6, %v4324_v26, %v4323_v16 }
 0x312   : > { %v913_v30 = vmul.f32 0.9677419, %v9273_v61  ;;  %v914_v63 = vmul.f32 0.9677419, %v9275_v48  ;;  %v915_v47 = vmul.f32 0.9677419, %v9277_v29  ;;  %v4327_v12 = vsel %vm734_vm7, %v4326_v21, %v4325_v15 }
 0x313   : > { %v916_v11 = vmul.f32 0.9677419, %v9279_v13  ;;  %v917_v57 = vmul.f32 0.9677419, %v9281_v18  ;;  %v918_v1 = vmul.f32 0.9677419, %v9287_v60  ;;  %v930_v52 = vadd.f32 %v912_v6, %v894_v54 }
 0x314   : > { %v4329_v32 = vsel %vm737_vm8, %v4328_v49, %v4327_v12  ;;  %v931_v36 = vadd.f32 %v913_v30, %v895_v55  ;;  %v932_v3 = vadd.f32 %v914_v63, %v896_v10  ;;  %v933_v45 = vadd.f32 %v915_v47, %v897_v53  ;;  %v9337_v47 = vld [vmem:[#allocation2 + $0x81] sm:$0x1]  ;;  %v9347_v12 = vld [vmem:[#allocation2 + $0x91] sm:$0x1] }
 0x315   : > { %4334 = vrot.lane.b32.xlu0 %v4329_v32, %s7221_s9  ;;  %v934_v51 = vadd.f32 %v916_v11, %v898_v2  ;;  %v935_v34 = vadd.f32 %v917_v57, %v899_v17  ;;  %v936_v8 = vadd.f32 %v918_v1, %v900_v39  ;;  %v971_v26 = vrot.slane %v930_v52, 7  ;;  %v12557_v57 = vld [vmem:[#allocation30_spill] sm:$0xff]  ;;  %v9356_v52 = vld [vmem:[#allocation2 + $0xd1] sm:$0x1] }
 0x316   : > { %v973_v20 = vrot.slane %v931_v36, 6  ;;  %v975_v28 = vrot.slane %v932_v3, 5  ;;  %v977_v23 = vrot.slane %v933_v45, 4  ;;  %v4502_v21 = vmul.f32 0.96774197, %v9176_v22 }
 0x317   : > { %v972_v16 = vsel %vm719_vm2, %v971_v26, %v929_v44  ;;  %v979_v0 = vrot.slane %v934_v51, 3  ;;  %v981_v54 = vrot.slane %v935_v34, 2  ;;  %v983_v6 = vrot.slane %v936_v8, 1  ;;  %v9359_v3 = vld [vmem:[#allocation2 + $0xe1] sm:$0x1] }
 0x318   : > { %v974_v49 = vsel %vm722_vm3, %v973_v20, %v972_v16  ;;  %v4503_v55 = vmul.f32 0.96774197, %v9183_v24  ;;  %v4504_v10 = vmul.f32 0.96774197, %v9187_v58  ;;  %v4505_v53 = vmul.f32 0.96774197, %v9189_v50  ;;  %v9372_v16 = vpop.permute.xlu0 %755 }
 0x319   : > { %v976_v2 = vsel %vm725_vm4, %v975_v28, %v974_v49  ;;  %v4506_v17 = vmul.f32 0.96774197, %v9191_v41  ;;  %v4507_v39 = vmul.f32 0.96774197, %v9196_v38  ;;  %v4508_v22 = vmul.f32 0.96774197, %v9198_v35 }
 0x31a   : > { %v978_v30 = vsel %vm728_vm5, %v977_v23, %v976_v2  ;;  %v4509_v63 = vmul.f32 0.96774197, %v9200_v27  ;;  %v4520_v15 = vmul.f32 0.032258064, %v9205_v9  ;;  %v4521_v24 = vmul.f32 0.032258064, %v9207_v4 }
 0x31b   : > { %v980_v58 = vsel %vm731_vm6, %v979_v0, %v978_v30  ;;  %v4522_v50 = vmul.f32 0.032258064, %v9209_v19  ;;  %v4523_v41 = vmul.f32 0.032258064, %v9211_v25  ;;  %v4524_v38 = vmul.f32 0.032258064, %v9213_v56 }
 0x31c   : > { %v982_v35 = vsel %vm734_vm7, %v981_v54, %v980_v58  ;;  %v4525_v11 = vmul.f32 0.032258064, %v9215_v46  ;;  %v4526_v27 = vmul.f32 0.032258064, %v9219_v59  ;;  %v4527_v9 = vmul.f32 0.032258064, %v12557_v57 }
 0x31d   : > { %v9349_v4 = vld [vmem:[#allocation2 + $0xa1] sm:$0x1]  ;;  %v984_v1 = vsel %vm737_vm8, %v983_v6, %v982_v35  ;;  %v4538_v7 = vadd.f32 %v4520_v15, %v4502_v21  ;;  %v4539_v19 = vadd.f32 %v4521_v24, %v4503_v55  ;;  %v4540_v44 = vadd.f32 %v4522_v50, %v4504_v10  ;;  %v9352_v25 = vld [vmem:[#allocation2 + $0xb1] sm:$0x1]  ;;  %v9363_v51 = vld [vmem:[#allocation2 + $0x82] sm:$0x1] }
 0x31e   : > { %v9354_v56 = vld [vmem:[#allocation2 + $0xc1] sm:$0x1]  ;;  %989 = vrot.lane.b32.xlu1 %v984_v1, %s7222_s10  ;;  %v4541_v46 = vadd.f32 %v4523_v41, %v4505_v53  ;;  %v4542_v59 = vadd.f32 %v4524_v38, %v4506_v17  ;;  %v4543_v32 = vadd.f32 %v4525_v11, %v4507_v39  ;;  %v4544_v36 = vadd.f32 %v4526_v27, %v4508_v22  ;;  %v9361_v45 = vld [vmem:[#allocation2 + $0xf1] sm:$0x1]  ;;  %v9365_v20 = vld [vmem:[#allocation2 + $0x92] sm:$0x1] }
 0x31f   : > { %v4545_v34 = vadd.f32 %v4527_v9, %v4509_v63  ;;  %v4580_v8 = vrot.slane %v4539_v19, 7  ;;  %v4582_v26 = vrot.slane %v4540_v44, 6  ;;  %v9367_v28 = vld [vmem:[#allocation2 + $0xa2] sm:$0x1]  ;;  %v9369_v23 = vld [vmem:[#allocation2 + $0xb2] sm:$0x1] }
 0x320   : > { %v1166_v21 = vmul.f32 0.06451613, %v9337_v47  ;;  %12558 = vst [vmem:[#allocation31_spill] sm:$0xff] %v9372_v16  ;;  %v4584_v0 = vrot.slane %v4541_v46, 5  ;;  %v4586_v54 = vrot.slane %v4542_v59, 4  ;;  %v4588_v6 = vrot.slane %v4543_v32, 3  ;;  %v9401_v46 = vpop.permute.xlu1 %4791  ;;  %v9403_v59 = vpop.permute.xlu0 %3117 }
 0x321   : > { %v4590_v49 = vrot.slane %v4544_v36, 2  ;;  %v9374_v55 = vld [vmem:[#allocation2 + $0xc2] sm:$0x1]  ;;  %v9376_v10 = vld [vmem:[#allocation2 + $0xd2] sm:$0x1]  ;;  %v4581_v2 = vsel %vm719_vm2, %v4580_v8, %v4538_v7  ;;  %v4592_v17 = vrot.slane %v4545_v34, 1 }
 0x322   : > { %v9378_v53 = vld [vmem:[#allocation2 + $0xe2] sm:$0x1]  ;;  %v9381_v39 = vld [vmem:[#allocation2 + $0xf2] sm:$0x1]  ;;  %v1167_v22 = vmul.f32 0.06451613, %v9347_v12  ;;  %v4583_v63 = vsel %vm722_vm3, %v4582_v26, %v4581_v2 }
 0x323   : > { %v1168_v30 = vmul.f32 0.06451613, %v9349_v4  ;;  %v1169_v15 = vmul.f32 0.06451613, %v9352_v25  ;;  %v1170_v24 = vmul.f32 0.06451613, %v9354_v56  ;;  %v4585_v50 = vsel %vm725_vm4, %v4584_v0, %v4583_v63 }
 0x324   : > { %v1171_v58 = vmul.f32 0.06451613, %v9356_v52  ;;  %v1172_v41 = vmul.f32 0.06451613, %v9359_v3  ;;  %v1173_v38 = vmul.f32 0.06451613, %v9361_v45  ;;  %v4587_v11 = vsel %vm728_vm5, %v4586_v54, %v4585_v50 }
 0x325   : > { %v1184_v35 = vmul.f32 0.9354839, %v9363_v51  ;;  %v1185_v27 = vmul.f32 0.9354839, %v9365_v20  ;;  %v1186_v57 = vmul.f32 0.9354839, %v9367_v28  ;;  %v4589_v1 = vsel %vm731_vm6, %v4588_v6, %v4587_v11 }
 0x326   : > { %v1187_v9 = vmul.f32 0.9354839, %v9369_v23  ;;  %v1188_v7 = vmul.f32 0.9354839, %v9374_v55  ;;  %v1189_v19 = vmul.f32 0.9354839, %v9376_v10  ;;  %v4591_v32 = vsel %vm734_vm7, %v4590_v49, %v4589_v1 }
 0x327   : > { %v1190_v44 = vmul.f32 0.9354839, %v9378_v53  ;;  %12559 = vst [vmem:[#allocation27_spill] sm:$0xff] %v9401_v46  ;;  %12560 = vst [vmem:[#allocation26_spill] sm:$0xff] %v9403_v59  ;;  %v1191_v36 = vmul.f32 0.9354839, %v9381_v39  ;;  %v1202_v34 = vadd.f32 %v1184_v35, %v1166_v21  ;;  %v1203_v8 = vadd.f32 %v1185_v27, %v1167_v22 }
 0x328   : > { %v4593_v26 = vsel %vm737_vm8, %v4592_v17, %v4591_v32  ;;  %v1204_v0 = vadd.f32 %v1186_v57, %v1168_v30  ;;  %v1205_v54 = vadd.f32 %v1187_v9, %v1169_v15  ;;  %v1206_v6 = vadd.f32 %v1188_v7, %v1170_v24  ;;  %v9427_v7 = vld [vmem:[#allocation2 + $0x82] sm:$0x1]  ;;  %v9441_v32 = vld [vmem:[#allocation2 + $0xb2] sm:$0x1] }
 0x329   : > { %4598 = vrot.lane.b32.xlu0 %v4593_v26, %s7224_s12  ;;  %v1207_v2 = vadd.f32 %v1189_v19, %v1171_v58  ;;  %v1208_v63 = vadd.f32 %v1190_v44, %v1172_v41  ;;  %v1209_v50 = vadd.f32 %v1191_v36, %v1173_v38  ;;  %v1244_v11 = vrot.slane %v1203_v8, 7  ;;  %v9415_v58 = vpop.permute.xlu1 %3003  ;;  %v9417_v41 = vpop.permute.xlu0 %3384  ;;  %v9446_v8 = vld [vmem:[#allocation2 + $0xd2] sm:$0x1] }
 0x32a   : > { %v1246_v46 = vrot.slane %v1204_v0, 6  ;;  %v1248_v16 = vrot.slane %v1205_v54, 5  ;;  %v1250_v59 = vrot.slane %v1206_v6, 4  ;;  %v778_v49 = vmul.f32 0.516129, %v9283_v42  ;;  %12561 = vst [vmem:[#allocation21_spill] sm:$0xff] %v9415_v58 }
 0x32b   : > { %v1245_v1 = vsel %vm719_vm2, %v1244_v11, %v1202_v34  ;;  %v1252_v21 = vrot.slane %v1207_v2, 3  ;;  %v1254_v22 = vrot.slane %v1208_v63, 2  ;;  %v1256_v35 = vrot.slane %v1209_v50, 1  ;;  %12562 = vst [vmem:[#allocation25_spill] sm:$0xff] %v9417_v41  ;;  %v9451_v6 = vld [vmem:[#allocation2 + $0xf2] sm:$0x1] }
 0x32c   : > { %v1247_v17 = vsel %vm722_vm3, %v1246_v46, %v1245_v1  ;;  %v779_v30 = vmul.f32 0.516129, %v9289_v43  ;;  %v780_v15 = vmul.f32 0.516129, %v9293_v40  ;;  %v781_v24 = vmul.f32 0.516129, %v9296_v33 }
 0x32d   : > { %v1249_v38 = vsel %vm725_vm4, %v1248_v16, %v1247_v17  ;;  %v782_v42 = vmul.f32 0.516129, %v9299_v37  ;;  %v783_v27 = vmul.f32 0.516129, %v9303_v5  ;;  %v784_v57 = vmul.f32 0.516129, %v9306_v14  ;;  %v9457_v50 = vpop.permute.xlu1 %3270  ;;  %v9459_v11 = vpop.permute.xlu0 %3648 }
 0x32e   : > { %v1251_v9 = vsel %vm728_vm5, %v1250_v59, %v1249_v38  ;;  %v795_v43 = vmul.f32 0.48387095, %v9268_v31  ;;  %v796_v40 = vmul.f32 0.48387095, %v9271_v62  ;;  %v797_v33 = vmul.f32 0.48387095, %v9273_v61 }
 0x32f   : > { %v1253_v19 = vsel %vm731_vm6, %v1252_v21, %v1251_v9  ;;  %v798_v16 = vmul.f32 0.48387095, %v9275_v48  ;;  %v799_v37 = vmul.f32 0.48387095, %v9277_v29  ;;  %v800_v5 = vmul.f32 0.48387095, %v9279_v13 }
 0x330   : > { %v1255_v14 = vsel %vm734_vm7, %v1254_v22, %v1253_v19  ;;  %v801_v44 = vmul.f32 0.48387095, %v9281_v18  ;;  %v802_v31 = vmul.f32 0.48387095, %v9287_v60  ;;  %v12563_v46 = vld [vmem:[#allocation28_spill] sm:$0xff]  ;;  %v814_v36 = vadd.f32 %v796_v40, %v778_v49  ;;  %12564 = vst [vmem:[#allocation29_spill] sm:$0xff] %v9457_v50 }
 0x331   : > { %v813_v62 = vadd.f32 %v795_v43, %v12563_v46  ;;  %v9437_v59 = vld [vmem:[#allocation2 + $0x92] sm:$0x1]  ;;  %v9439_v61 = vld [vmem:[#allocation2 + $0xa2] sm:$0x1]  ;;  %v1257_v48 = vsel %vm737_vm8, %v1256_v35, %v1255_v14  ;;  %v815_v29 = vadd.f32 %v797_v33, %v779_v30  ;;  %v816_v34 = vadd.f32 %v798_v16, %v780_v15  ;;  %v9453_v2 = vld [vmem:[#allocation2 + $0x83] sm:$0x1] }
 0x332   : > { %v9444_v13 = vld [vmem:[#allocation2 + $0xc2] sm:$0x1]  ;;  %1262 = vrot.lane.b32.xlu1 %v1257_v48, %s7223_s11  ;;  %v817_v60 = vadd.f32 %v799_v37, %v781_v24  ;;  %v818_v26 = vadd.f32 %v800_v5, %v782_v42  ;;  %v819_v0 = vadd.f32 %v801_v44, %v783_v27  ;;  %v820_v54 = vadd.f32 %v802_v31, %v784_v57  ;;  %v9455_v63 = vld [vmem:[#allocation2 + $0x93] sm:$0x1]  ;;  %v9461_v22 = vld [vmem:[#allocation2 + $0xa3] sm:$0x1] }
 0x333   : > { %v9448_v18 = vld [vmem:[#allocation2 + $0xe2] sm:$0x1]  ;;  %12565 = vst [vmem:[#allocation30_spill] sm:$0xff] %v9459_v11  ;;  %v855_v49 = vrot.slane %v814_v36, 7  ;;  %v857_v1 = vrot.slane %v815_v29, 6  ;;  %v859_v21 = vrot.slane %v816_v34, 5 }
 0x334   : > { %v9463_v35 = vld [vmem:[#allocation2 + $0xb3] sm:$0x1]  ;;  %v9465_v17 = vld [vmem:[#allocation2 + $0xc3] sm:$0x1]  ;;  %v1430_v30 = vmul.f32 0.09677422, %v9427_v7 }
 0x335   : > { %v861_v15 = vrot.slane %v817_v60, 4  ;;  %v863_v24 = vrot.slane %v818_v26, 3  ;;  %v865_v38 = vrot.slane %v819_v0, 2  ;;  %v867_v42 = vrot.slane %v820_v54, 1  ;;  %v9468_v27 = vld [vmem:[#allocation2 + $0xd3] sm:$0x1]  ;;  %v9490_v60 = vpop.permute.xlu1 %3534  ;;  %v9492_v26 = vpop.permute.xlu0 %3915 }
 0x336   : > { %v9470_v57 = vld [vmem:[#allocation2 + $0xe3] sm:$0x1]  ;;  %v9472_v9 = vld [vmem:[#allocation2 + $0xf3] sm:$0x1]  ;;  %v856_v43 = vsel %vm719_vm2, %v855_v49, %v813_v62  ;;  %v1431_v40 = vmul.f32 0.09677422, %v9437_v59 }
 0x337   : > { %12566 = vst [vmem:[#allocation28_spill] sm:$0xff] %v9470_v57  ;;  %12567 = vst [vmem:[#allocation32_spill] sm:$0xff] %v9472_v9  ;;  %v1432_v33 = vmul.f32 0.09677422, %v9439_v61  ;;  %v1433_v19 = vmul.f32 0.09677422, %v9441_v32  ;;  %v858_v16 = vsel %vm722_vm3, %v857_v1, %v856_v43 }
 0x338   : > { %v1434_v37 = vmul.f32 0.09677422, %v9444_v13  ;;  %v1435_v5 = vmul.f32 0.09677422, %v9446_v8  ;;  %v1436_v14 = vmul.f32 0.09677422, %v9448_v18  ;;  %v860_v44 = vsel %vm725_vm4, %v859_v21, %v858_v16 }
 0x339   : > { %v1437_v31 = vmul.f32 0.09677422, %v9451_v6  ;;  %v1448_v46 = vmul.f32 0.9032258, %v9453_v2  ;;  %v1449_v62 = vmul.f32 0.9032258, %v9455_v63  ;;  %v862_v48 = vsel %vm728_vm5, %v861_v15, %v860_v44  ;;  %v9501_v11 = vpop.permute.xlu1 %3801 }
 0x33a   : > { %v1450_v36 = vmul.f32 0.9032258, %v9461_v22  ;;  %v1451_v29 = vmul.f32 0.9032258, %v9463_v35  ;;  %v1452_v34 = vmul.f32 0.9032258, %v9465_v17  ;;  %v864_v0 = vsel %vm731_vm6, %v863_v24, %v862_v48 }
 0x33b   : > { %12568 = vst [vmem:[#allocation33_spill] sm:$0xff] %v9490_v60  ;;  %12569 = vst [vmem:[#allocation34_spill] sm:$0xff] %v9492_v26  ;;  %v1453_v54 = vmul.f32 0.9032258, %v9468_v27  ;;  %v1454_v49 = vmul.f32 0.9032258, %v9470_v57  ;;  %v866_v21 = vsel %vm734_vm7, %v865_v38, %v864_v0  ;;  %v1466_v15 = vadd.f32 %v1448_v46, %v1430_v30  ;;  %v9503_v57 = vpop.permute.xlu0 %4179 }
 0x33c   : > { %v1455_v1 = vmul.f32 0.9032258, %v9472_v9  ;;  %v1467_v43 = vadd.f32 %v1449_v62, %v1431_v40  ;;  %v1468_v16 = vadd.f32 %v1450_v36, %v1432_v33  ;;  %v868_v44 = vsel %vm737_vm8, %v867_v42, %v866_v21  ;;  %12570 = vst [vmem:[#allocation35_spill] sm:$0xff] %v9501_v11  ;;  %12571 = vst [vmem:[#allocation36_spill] sm:$0xff] %v9503_v57  ;;  %v9537_v0 = vld [vmem:[#allocation2 + $0xb3] sm:$0x1] }
 0x33d   : > { %v1469_v58 = vadd.f32 %v1451_v29, %v1433_v19  ;;  %v1470_v41 = vadd.f32 %v1452_v34, %v1434_v37  ;;  %v1471_v60 = vadd.f32 %v1453_v54, %v1435_v5  ;;  %873 = vrot.lane.b32.xlu0 %v868_v44, %s7224_s12  ;;  %v1472_v26 = vadd.f32 %v1454_v49, %v1436_v14  ;;  %v9516_v36 = vpop.permute.xlu1 %4065  ;;  %v9544_v21 = vld [vmem:[#allocation2 + $0xe3] sm:$0x1] }
 0x33e   : > { %v1473_v24 = vadd.f32 %v1455_v1, %v1437_v31  ;;  %v1508_v48 = vrot.slane %v1467_v43, 7  ;;  %v1510_v50 = vrot.slane %v1468_v16, 6  ;;  %v1050_v40 = vmul.f32 0.5483871, %v9337_v47  ;;  %12572 = vst [vmem:[#allocation37_spill] sm:$0xff] %v9516_v36 }
 0x33f   : > { %v1512_v9 = vrot.slane %v1469_v58, 5  ;;  %v1514_v38 = vrot.slane %v1470_v41, 4  ;;  %v1516_v30 = vrot.slane %v1471_v60, 3  ;;  %v1518_v33 = vrot.slane %v1472_v26, 2  ;;  %v9518_v29 = vpop.permute.xlu0 %4446  ;;  %v9540_v1 = vld [vmem:[#allocation2 + $0xc3] sm:$0x1] }
 0x340   : > { %v1509_v42 = vsel %vm719_vm2, %v1508_v48, %v1466_v15  ;;  %v1520_v19 = vrot.slane %v1473_v24, 1  ;;  %v1051_v37 = vmul.f32 0.5483871, %v9347_v12  ;;  %v1052_v14 = vmul.f32 0.5483871, %v9349_v4  ;;  %12573 = vst [vmem:[#allocation38_spill] sm:$0xff] %v9518_v29 }
 0x341   : > { %v1511_v5 = vsel %vm722_vm3, %v1510_v50, %v1509_v42  ;;  %v1053_v31 = vmul.f32 0.5483871, %v9352_v25  ;;  %v1054_v46 = vmul.f32 0.5483871, %v9354_v56  ;;  %v1055_v41 = vmul.f32 0.5483871, %v9356_v52 }
 0x342   : > { %v1513_v58 = vsel %vm725_vm4, %v1512_v9, %v1511_v5  ;;  %v1056_v47 = vmul.f32 0.5483871, %v9359_v3  ;;  %v1057_v62 = vmul.f32 0.5483871, %v9361_v45  ;;  %v1068_v4 = vmul.f32 0.4516129, %v9363_v51 }
 0x343   : > { %v1515_v12 = vsel %vm728_vm5, %v1514_v38, %v1513_v58  ;;  %v1069_v25 = vmul.f32 0.4516129, %v9365_v20  ;;  %v1070_v56 = vmul.f32 0.4516129, %v9367_v28  ;;  %v9524_v50 = vld [vmem:[#allocation2 + $0x83] sm:$0x1] }
 0x344   : > { %v1517_v52 = vsel %vm731_vm6, %v1516_v30, %v1515_v12  ;;  %v1071_v3 = vmul.f32 0.4516129, %v9369_v23  ;;  %v1072_v45 = vmul.f32 0.4516129, %v9374_v55  ;;  %v1073_v9 = vmul.f32 0.4516129, %v9376_v10 }
 0x345   : > { %v1519_v34 = vsel %vm734_vm7, %v1518_v33, %v1517_v52  ;;  %v1074_v60 = vmul.f32 0.4516129, %v9378_v53  ;;  %v1075_v51 = vmul.f32 0.4516129, %v9381_v39  ;;  %v1086_v26 = vadd.f32 %v1068_v4, %v1050_v40  ;;  %v9533_v20 = vld [vmem:[#allocation2 + $0x93] sm:$0x1]  ;;  %v9546_v53 = vpop.permute.xlu1 %4332  ;;  %v9548_v39 = vpop.permute.xlu0 %4710 }
 0x346   : > { %v9535_v28 = vld [vmem:[#allocation2 + $0xa3] sm:$0x1]  ;;  %v1521_v54 = vsel %vm737_vm8, %v1520_v19, %v1519_v34  ;;  %v1087_v23 = vadd.f32 %v1069_v25, %v1051_v37  ;;  %v1088_v49 = vadd.f32 %v1070_v56, %v1052_v14  ;;  %v1089_v55 = vadd.f32 %v1071_v3, %v1053_v31  ;;  %v9542_v10 = vld [vmem:[#allocation2 + $0xd3] sm:$0x1]  ;;  %12574 = vst [vmem:[#allocation39_spill] sm:$0xff] %v9546_v53 }
 0x347   : > { %12575 = vst [vmem:[#allocation40_spill] sm:$0xff] %v9548_v39  ;;  %1526 = vrot.lane.b32.xlu1 %v1521_v54, %s7222_s10  ;;  %v1090_v15 = vadd.f32 %v1072_v45, %v1054_v46  ;;  %v1091_v43 = vadd.f32 %v1073_v9, %v1055_v41  ;;  %v1092_v16 = vadd.f32 %v1074_v60, %v1056_v47  ;;  %v9551_v24 = vld [vmem:[#allocation2 + $0xf3] sm:$0x1]  ;;  %v9553_v48 = vld [vmem:[#allocation2 + $0x84] sm:$0x1]  ;;  %vm6005_vm14 = vcmask 523264  }
 0x348   : > { %v1093_v44 = vadd.f32 %v1075_v51, %v1057_v62  ;;  %v9555_v38 = vld [vmem:[#allocation2 + $0x94] sm:$0x1]  ;;  %v1128_v30 = vrot.slane %v1087_v23, 7  ;;  %v1130_v40 = vrot.slane %v1088_v49, 6  ;;  %v1132_v42 = vrot.slane %v1089_v55, 5 }
 0x349   : > { %v9557_v33 = vld [vmem:[#allocation2 + $0xa4] sm:$0x1]  ;;  %v9559_v19 = vld [vmem:[#allocation2 + $0xb4] sm:$0x1]  ;;  %v1697_v5 = vmul.f32 0.12903225, %v9524_v50  ;;  %v9574_v52 = vpop.permute.xlu1 %4596  ;;  %v9576_v3 = vpop.permute.xlu0 %987 }
 0x34a   : > { %v9561_v37 = vld [vmem:[#allocation2 + $0xc4] sm:$0x1]  ;;  %v1134_v14 = vrot.slane %v1090_v15, 4  ;;  %v1136_v31 = vrot.slane %v1091_v43, 3  ;;  %v1138_v46 = vrot.slane %v1092_v16, 2  ;;  %v1140_v58 = vrot.slane %v1093_v44, 1 }
 0x34b   : > { %v9564_v41 = vld [vmem:[#allocation2 + $0xd4] sm:$0x1]  ;;  %v9566_v47 = vld [vmem:[#allocation2 + $0xe4] sm:$0x1]  ;;  %v1129_v12 = vsel %vm719_vm2, %v1128_v30, %v1086_v26  ;;  %v1698_v4 = vmul.f32 0.12903225, %v9533_v20 }
 0x34c   : > { %v9568_v62 = vld [vmem:[#allocation2 + $0xf4] sm:$0x1]  ;;  %v1699_v25 = vmul.f32 0.12903225, %v9535_v28  ;;  %v1700_v56 = vmul.f32 0.12903225, %v9537_v0  ;;  %v1131_v45 = vsel %vm722_vm3, %v1130_v40, %v1129_v12 }
 0x34d   : > { %12576 = vst [vmem:[#allocation41_spill] sm:$0xff] %v9568_v62  ;;  %12577 = vst [vmem:[#allocation42_spill] sm:$0xff] %v9574_v52  ;;  %v1701_v9 = vmul.f32 0.12903225, %v9540_v1  ;;  %v1702_v34 = vmul.f32 0.12903225, %v9542_v10  ;;  %v1133_v51 = vsel %vm725_vm4, %v1132_v42, %v1131_v45  ;;  %v9594_v42 = vpop.permute.xlu1 %871  ;;  %v9596_v12 = vpop.permute.xlu0 %1260 }
 0x34e   : > { %12578 = vst [vmem:[#allocation43_spill] sm:$0xff] %v9576_v3  ;;  %v1703_v60 = vmul.f32 0.12903225, %v9544_v21  ;;  %v1704_v26 = vmul.f32 0.12903225, %v9551_v24  ;;  %v1135_v49 = vsel %vm728_vm5, %v1134_v14, %v1133_v51  ;;  %12579 = vst [vmem:[#allocation44_spill] sm:$0xff] %v9594_v42 }
 0x34f   : > { %v1715_v54 = vmul.f32 0.87096775, %v9553_v48  ;;  %v1716_v23 = vmul.f32 0.87096775, %v9555_v38  ;;  %v1717_v55 = vmul.f32 0.87096775, %v9557_v33  ;;  %v1137_v16 = vsel %vm731_vm6, %v1136_v31, %v1135_v49 }
 0x350   : > { %v1718_v15 = vmul.f32 0.87096775, %v9559_v19  ;;  %v1719_v43 = vmul.f32 0.87096775, %v9561_v37  ;;  %v1720_v44 = vmul.f32 0.87096775, %v9564_v41  ;;  %v1139_v14 = vsel %vm734_vm7, %v1138_v46, %v1137_v16 }
 0x351   : > { %v1721_v30 = vmul.f32 0.87096775, %v9566_v47  ;;  %v1722_v40 = vmul.f32 0.87096775, %v9568_v62  ;;  %12580 = vst [vmem:[#allocation45_spill] sm:$0xff] %v9596_v12  ;;  %v1733_v45 = vadd.f32 %v1715_v54, %v1697_v5  ;;  %v1734_v51 = vadd.f32 %v1716_v23, %v1698_v4  ;;  %v9602_v46 = vpop.permute.xlu1 %1144  ;;  %v9604_v5 = vpop.permute.xlu0 %1524  ;;  %v12586_v54 = vld [vmem:[#allocation32_spill] sm:$0xff] }
 0x352   : > { %v1735_v39 = vadd.f32 %v1717_v55, %v1699_v25  ;;  %v1141_v52 = vsel %vm737_vm8, %v1140_v58, %v1139_v14  ;;  %v1736_v36 = vadd.f32 %v1718_v15, %v1700_v56  ;;  %v1737_v29 = vadd.f32 %v1719_v43, %v1701_v9  ;;  %12581 = vst [vmem:[#allocation46_spill] sm:$0xff] %v9602_v46  ;;  %v9633_v55 = vld [vmem:[#allocation2 + $0x94] sm:$0x1]  ;;  %v9635_v15 = vld [vmem:[#allocation2 + $0xa4] sm:$0x1] }
 0x353   : > { %v1738_v31 = vadd.f32 %v1720_v44, %v1702_v34  ;;  %1146 = vrot.lane.b32.xlu0 %v1141_v52, %s7221_s9  ;;  %v1739_v49 = vadd.f32 %v1721_v30, %v1703_v60  ;;  %v1740_v53 = vadd.f32 %v1722_v40, %v1704_v26  ;;  %v1775_v11 = vrot.slane %v1734_v51, 7  ;;  %12582 = vst [vmem:[#allocation47_spill] sm:$0xff] %v9604_v5  ;;  %v9620_v60 = vld [vmem:[#allocation2 + $0x84] sm:$0x1]  ;;  %v12585_v26 = vld [vmem:[#allocation28_spill] sm:$0xff] }
 0x354   : > { %v1777_v3 = vrot.slane %v1735_v39, 6  ;;  %v1779_v57 = vrot.slane %v1736_v36, 5  ;;  %v1781_v42 = vrot.slane %v1737_v29, 4  ;;  %v1316_v12 = vmul.f32 0.5806452, %v9427_v7 }
 0x355   : > { %v1783_v62 = vrot.slane %v1738_v31, 3  ;;  %v1776_v58 = vsel %vm719_vm2, %v1775_v11, %v1733_v45  ;;  %v1785_v4 = vrot.slane %v1739_v49, 2  ;;  %v1787_v25 = vrot.slane %v1740_v53, 1  ;;  %v9637_v43 = vld [vmem:[#allocation2 + $0xb4] sm:$0x1] }
 0x356   : > { %v1317_v56 = vmul.f32 0.5806452, %v9437_v59  ;;  %v1778_v52 = vsel %vm722_vm3, %v1777_v3, %v1776_v58  ;;  %v1318_v9 = vmul.f32 0.5806452, %v9439_v61  ;;  %v1319_v36 = vmul.f32 0.5806452, %v9441_v32  ;;  %v9622_v32 = vpop.permute.xlu1 %1410 }
 0x357   : > { %v1320_v29 = vmul.f32 0.5806452, %v9444_v13  ;;  %v1780_v7 = vsel %vm725_vm4, %v1779_v57, %v1778_v52  ;;  %v1321_v39 = vmul.f32 0.5806452, %v9446_v8  ;;  %v1322_v34 = vmul.f32 0.5806452, %v9448_v18  ;;  %v9624_v13 = vpop.permute.xlu0 %1791 }
 0x358   : > { %v1323_v11 = vmul.f32 0.5806452, %v9451_v6  ;;  %v1782_v53 = vsel %vm728_vm5, %v1781_v42, %v1780_v7  ;;  %v1334_v59 = vmul.f32 0.41935483, %v9453_v2  ;;  %v1335_v3 = vmul.f32 0.41935483, %v9455_v63 }
 0x359   : > { %v1336_v61 = vmul.f32 0.41935483, %v9461_v22  ;;  %12583 = vst [vmem:[#allocation48_spill] sm:$0xff] %v9622_v32  ;;  %12584 = vst [vmem:[#allocation49_spill] sm:$0xff] %v9624_v13  ;;  %v1784_v8 = vsel %vm731_vm6, %v1783_v62, %v1782_v53  ;;  %v1337_v18 = vmul.f32 0.41935483, %v9463_v35 }
 0x35a   : > { %v1338_v6 = vmul.f32 0.41935483, %v9465_v17  ;;  %v1339_v57 = vmul.f32 0.41935483, %v9468_v27  ;;  %v1786_v2 = vsel %vm734_vm7, %v1785_v4, %v1784_v8  ;;  %v1340_v63 = vmul.f32 0.41935483, %v12585_v26  ;;  %v9653_v49 = vpop.permute.xlu1 %1677 }
 0x35b   : > { %v1341_v22 = vmul.f32 0.41935483, %v12586_v54  ;;  %v1352_v23 = vadd.f32 %v1334_v59, %v1316_v12  ;;  %v1788_v62 = vsel %vm737_vm8, %v1787_v25, %v1786_v2  ;;  %v1353_v35 = vadd.f32 %v1335_v3, %v1317_v56  ;;  %v9640_v44 = vld [vmem:[#allocation2 + $0xc4] sm:$0x1]  ;;  %v9642_v27 = vld [vmem:[#allocation2 + $0xd4] sm:$0x1]  ;;  %v9655_v58 = vpop.permute.xlu0 %2055 }
 0x35c   : > { %v1354_v16 = vadd.f32 %v1336_v61, %v1318_v9  ;;  %v1355_v17 = vadd.f32 %v1337_v18, %v1319_v36  ;;  %v9644_v30 = vld [vmem:[#allocation2 + $0xe4] sm:$0x1]  ;;  %1793 = vrot.lane.b32.xlu1 %v1788_v62, %s7223_s11  ;;  %v1356_v40 = vadd.f32 %v1338_v6, %v1320_v29  ;;  %v1357_v42 = vadd.f32 %v1339_v57, %v1321_v39  ;;  %v9647_v45 = vld [vmem:[#allocation2 + $0xf4] sm:$0x1]  ;;  %v9649_v51 = vld [vmem:[#allocation2 + $0x85] sm:$0x1] }
 0x35d   : > { %v1358_v12 = vadd.f32 %v1340_v63, %v1322_v34  ;;  %v1359_v14 = vadd.f32 %v1341_v22, %v1323_v11  ;;  %v9651_v31 = vld [vmem:[#allocation2 + $0x95] sm:$0x1]  ;;  %12587 = vst [vmem:[#allocation28_spill] sm:$0xff] %v9653_v49  ;;  %12588 = vst [vmem:[#allocation32_spill] sm:$0xff] %v9655_v58  ;;  %v1394_v4 = vrot.slane %v1353_v35, 7 }
 0x35e   : > { %v1396_v25 = vrot.slane %v1354_v16, 6  ;;  %v1398_v56 = vrot.slane %v1355_v17, 5  ;;  %v9657_v52 = vld [vmem:[#allocation2 + $0xa5] sm:$0x1]  ;;  %v9659_v9 = vld [vmem:[#allocation2 + $0xb5] sm:$0x1]  ;;  %v9678_v54 = vpop.permute.xlu1 %1941 }
 0x35f   : > { %v9661_v36 = vld [vmem:[#allocation2 + $0xc5] sm:$0x1]  ;;  %v1961_v29 = vmul.f32 0.16129035, %v9620_v60  ;;  %v1400_v7 = vrot.slane %v1356_v40, 4  ;;  %v1402_v39 = vrot.slane %v1357_v42, 3  ;;  %v1395_v61 = vsel %vm719_vm2, %v1394_v4, %v1352_v23  ;;  %v9680_v22 = vpop.permute.xlu0 %2322 }
 0x360   : > { %v1404_v34 = vrot.slane %v1358_v12, 2  ;;  %v1406_v11 = vrot.slane %v1359_v14, 1  ;;  %v9664_v53 = vld [vmem:[#allocation2 + $0xd5] sm:$0x1]  ;;  %v9666_v59 = vld [vmem:[#allocation2 + $0xe5] sm:$0x1]  ;;  %v1397_v57 = vsel %vm722_vm3, %v1396_v25, %v1395_v61 }
 0x361   : > { %v9668_v3 = vld [vmem:[#allocation2 + $0xf5] sm:$0x1]  ;;  %v1962_v8 = vmul.f32 0.16129035, %v9633_v55  ;;  %v1963_v18 = vmul.f32 0.16129035, %v9635_v15  ;;  %v1399_v23 = vsel %vm725_vm4, %v1398_v56, %v1397_v57 }
 0x362   : > { %12589 = vst [vmem:[#allocation50_spill] sm:$0xff] %v9668_v3  ;;  %v1964_v6 = vmul.f32 0.16129035, %v9637_v43  ;;  %v1965_v2 = vmul.f32 0.16129035, %v9640_v44  ;;  %12590 = vst [vmem:[#allocation51_spill] sm:$0xff] %v9678_v54  ;;  %v1401_v17 = vsel %vm728_vm5, %v1400_v7, %v1399_v23  ;;  %v9695_v7 = vpop.permute.xlu1 %2208 }
 0x363   : > { %v1966_v26 = vmul.f32 0.16129035, %v9642_v27  ;;  %v1967_v63 = vmul.f32 0.16129035, %v9644_v30  ;;  %12591 = vst [vmem:[#allocation52_spill] sm:$0xff] %v9680_v22  ;;  %v1403_v14 = vsel %vm731_vm6, %v1402_v39, %v1401_v17  ;;  %12592 = vst [vmem:[#allocation53_spill] sm:$0xff] %v9695_v7  ;;  %v9697_v23 = vpop.permute.xlu0 %2586 }
 0x364   : > { %v1968_v62 = vmul.f32 0.16129035, %v9647_v45  ;;  %v1979_v35 = vmul.f32 0.83870965, %v9649_v51  ;;  %v1980_v16 = vmul.f32 0.83870965, %v9651_v31  ;;  %v1405_v61 = vsel %vm734_vm7, %v1404_v34, %v1403_v14 }
 0x365   : > { %v1981_v40 = vmul.f32 0.83870965, %v9657_v52  ;;  %v1982_v42 = vmul.f32 0.83870965, %v9659_v9  ;;  %v1983_v12 = vmul.f32 0.83870965, %v9661_v36  ;;  %v1407_v22 = vsel %vm737_vm8, %v1406_v11, %v1405_v61 }
 0x366   : > { %v1984_v4 = vmul.f32 0.83870965, %v9664_v53  ;;  %v1985_v25 = vmul.f32 0.83870965, %v9666_v59  ;;  %v1986_v56 = vmul.f32 0.83870965, %v9668_v3  ;;  %v1997_v57 = vadd.f32 %v1979_v35, %v1961_v29  ;;  %1412 = vrot.lane.b32.xlu0 %v1407_v22, %s7224_s12 }
 0x367   : > { %v1998_v54 = vadd.f32 %v1980_v16, %v1962_v8  ;;  %v1999_v32 = vadd.f32 %v1981_v40, %v1963_v18  ;;  %12593 = vst [vmem:[#allocation54_spill] sm:$0xff] %v9697_v23  ;;  %v2000_v13 = vadd.f32 %v1982_v42, %v1964_v6  ;;  %v2001_v49 = vadd.f32 %v1983_v12, %v1965_v2  ;;  %v9704_v6 = vpop.permute.xlu1 %2472  ;;  %v9706_v2 = vpop.permute.xlu0 %2853  ;;  %v9733_v42 = vld [vmem:[#allocation2 + $0x95] sm:$0x1]  ;;  %v9736_v14 = vld [vmem:[#allocation2 + $0xa5] sm:$0x1] }
 0x368   : > { %v2002_v39 = vadd.f32 %v1984_v4, %v1966_v26  ;;  %v2003_v17 = vadd.f32 %v1985_v25, %v1967_v63  ;;  %v2004_v46 = vadd.f32 %v1986_v56, %v1968_v62  ;;  %v1583_v8 = vmul.f32 0.61290324, %v9524_v50  ;;  %12594 = vst [vmem:[#allocation55_spill] sm:$0xff] %v9704_v6  ;;  %12595 = vst [vmem:[#allocation56_spill] sm:$0xff] %v9706_v2  ;;  %v12598_v62 = vld [vmem:[#allocation41_spill] sm:$0xff] }
 0x369   : > { %v2039_v58 = vrot.slane %v1998_v54, 7  ;;  %v2041_v5 = vrot.slane %v1999_v32, 6  ;;  %v2043_v3 = vrot.slane %v2000_v13, 5  ;;  %v2045_v34 = vrot.slane %v2001_v49, 4  ;;  %v9738_v4 = vld [vmem:[#allocation2 + $0xb5] sm:$0x1] }
 0x36a   : > { %v2047_v29 = vrot.slane %v2002_v39, 3  ;;  %v2049_v35 = vrot.slane %v2003_v17, 2  ;;  %v2051_v16 = vrot.slane %v2004_v46, 1  ;;  %v1584_v11 = vmul.f32 0.61290324, %v9533_v20  ;;  %2596 = vst.msk [vmem:[#allocation3 + $0x20] sm:$0xff] %vm998_vm9, %v9697_v23 }
 0x36b   : > { %v2040_v18 = vsel %vm719_vm2, %v2039_v58, %v1997_v57  ;;  %v1585_v63 = vmul.f32 0.61290324, %v9535_v28  ;;  %v1586_v32 = vmul.f32 0.61290324, %v9537_v0  ;;  %v1587_v13 = vmul.f32 0.61290324, %v9540_v1  ;;  %v9724_v22 = vpop.permute.xlu1 %2739 }
 0x36c   : > { %v2042_v26 = vsel %vm722_vm3, %v2041_v5, %v2040_v18  ;;  %v1588_v49 = vmul.f32 0.61290324, %v9542_v10  ;;  %v1589_v46 = vmul.f32 0.61290324, %v9544_v21  ;;  %v1590_v20 = vmul.f32 0.61290324, %v9551_v24  ;;  %v9726_v21 = vpop.permute.xlu0 %4793 }
 0x36d   : > { %v2044_v50 = vsel %vm725_vm4, %v2043_v3, %v2042_v26  ;;  %v1601_v54 = vmul.f32 0.38709676, %v9553_v48  ;;  %v1602_v5 = vmul.f32 0.38709676, %v9555_v38  ;;  %v1603_v28 = vmul.f32 0.38709676, %v9557_v33 }
 0x36e   : > { %v2046_v58 = vsel %vm728_vm5, %v2045_v34, %v2044_v50  ;;  %v1604_v1 = vmul.f32 0.38709676, %v9559_v19  ;;  %v1605_v3 = vmul.f32 0.38709676, %v9561_v37  ;;  %v1606_v10 = vmul.f32 0.38709676, %v9564_v41 }
 0x36f   : > { %v2048_v0 = vsel %vm731_vm6, %v2047_v29, %v2046_v58  ;;  %12596 = vst [vmem:[#allocation57_spill] sm:$0xff] %v9724_v22  ;;  %12597 = vst [vmem:[#allocation58_spill] sm:$0xff] %v9726_v21  ;;  %v1607_v48 = vmul.f32 0.38709676, %v9566_v47  ;;  %v1608_v38 = vmul.f32 0.38709676, %v12598_v62  ;;  %v1619_v40 = vadd.f32 %v1601_v54, %v1583_v8  ;;  %v9755_v26 = vpop.permute.xlu1 %3119 }
 0x370   : > { %v2050_v24 = vsel %vm734_vm7, %v2049_v35, %v2048_v0  ;;  %v9731_v33 = vld [vmem:[#allocation2 + $0x85] sm:$0x1]  ;;  %v1620_v37 = vadd.f32 %v1602_v5, %v1584_v11  ;;  %v1621_v12 = vadd.f32 %v1603_v28, %v1585_v63  ;;  %v1622_v41 = vadd.f32 %v1604_v1, %v1586_v32  ;;  %v9743_v39 = vld [vmem:[#allocation2 + $0xd5] sm:$0x1]  ;;  %v9749_v35 = vld [vmem:[#allocation2 + $0x86] sm:$0x1]  ;;  %v758_v63 = vpop.permute.xlu0 %757 }
 0x371   : > { %v2052_v19 = vsel %vm737_vm8, %v2051_v16, %v2050_v24  ;;  %v9740_v25 = vld [vmem:[#allocation2 + $0xc5] sm:$0x1]  ;;  %v1623_v47 = vadd.f32 %v1605_v3, %v1587_v13  ;;  %v1624_v56 = vadd.f32 %v1606_v10, %v1588_v49  ;;  %v1625_v61 = vadd.f32 %v1607_v48, %v1589_v46  ;;  %v9747_v34 = vld [vmem:[#allocation2 + $0xf5] sm:$0x1]  ;;  %v9751_v16 = vld [vmem:[#allocation2 + $0x96] sm:$0x1] }
 0x372   : > { %2057 = vrot.lane.b32.xlu1 %v2052_v19, %s7222_s10  ;;  %v1626_v57 = vadd.f32 %v1608_v38, %v1590_v20  ;;  %v9745_v17 = vld [vmem:[#allocation2 + $0xe5] sm:$0x1]  ;;  %v1661_v29 = vrot.slane %v1620_v37, 7  ;;  %v1663_v8 = vrot.slane %v1621_v12, 6  ;;  %v1665_v18 = vrot.slane %v1622_v41, 5  ;;  %12599 = vst [vmem:[#allocation41_spill] sm:$0xff] %v9755_v26 }
 0x373   : > { %v9753_v11 = vld [vmem:[#allocation2 + $0xa6] sm:$0x1]  ;;  %v1667_v32 = vrot.slane %v1623_v47, 4  ;;  %v1669_v13 = vrot.slane %v1624_v56, 3  ;;  %v1671_v50 = vrot.slane %v1625_v61, 2  ;;  %v12600_v46 = vmov 0.0   ;;  %v9783_v41 = vpop.permute.xlu1 %3386 }
 0x374   : > { %v1673_v49 = vrot.slane %v1626_v57, 1  ;;  %655 = vst.msk [vmem:[#allocation3] sm:$0xff] %vm654_vm0, %v12600_v46  ;;  %656 = vst.msk [vmem:[#allocation3 + $0x48] sm:$0xff] %vm654_vm0, %v12600_v46  ;;  %v9759_v20 = vld [vmem:[#allocation2 + $0xb6] sm:$0x1]  ;;  %v1662_v5 = vsel %vm719_vm2, %v1661_v29, %v1619_v40 }
 0x375   : > { %v9761_v58 = vld [vmem:[#allocation2 + $0xc6] sm:$0x1]  ;;  %v9763_v54 = vld [vmem:[#allocation2 + $0xd6] sm:$0x1]  ;;  %v2228_v1 = vmul.f32 0.19354838, %v9731_v33  ;;  %v1664_v10 = vsel %vm722_vm3, %v1663_v8, %v1662_v5 }
 0x376   : > { %v9766_v28 = vld [vmem:[#allocation2 + $0xe6] sm:$0x1]  ;;  %v9768_v0 = vld [vmem:[#allocation2 + $0xf6] sm:$0x1]  ;;  %v2229_v3 = vmul.f32 0.19354838, %v9733_v42  ;;  %v1666_v40 = vsel %vm725_vm4, %v1665_v18, %v1664_v10 }
 0x377   : > { %12601 = vst [vmem:[#allocation59_spill] sm:$0xff] %v9766_v28  ;;  %12602 = vst [vmem:[#allocation60_spill] sm:$0xff] %v9768_v0  ;;  %v12603_v24 = vld [vmem:[#allocation31_spill] sm:$0xff]  ;;  %v2230_v48 = vmul.f32 0.19354838, %v9736_v14  ;;  %v1668_v47 = vsel %vm728_vm5, %v1667_v32, %v1666_v40 }
 0x378   : > { %765 = vst.msk [vmem:[#allocation3] sm:$0xff] %vm764_vm1, %v12603_v24  ;;  %v2231_v62 = vmul.f32 0.19354838, %v9738_v4  ;;  %v2232_v38 = vmul.f32 0.19354838, %v9740_v25  ;;  %766 = vst.msk [vmem:[#allocation3 + $0x48] sm:$0xff] %vm764_vm1, %v758_v63  ;;  %v1670_v29 = vsel %vm731_vm6, %v1669_v13, %v1668_v47 }
 0x379   : > { %v2233_v19 = vmul.f32 0.19354838, %v9743_v39  ;;  %v2234_v37 = vmul.f32 0.19354838, %v9745_v17  ;;  %v2235_v12 = vmul.f32 0.19354838, %v9747_v34  ;;  %v1672_v5 = vsel %vm734_vm7, %v1671_v50, %v1670_v29 }
 0x37a   : > { %12604 = vst [vmem:[#allocation31_spill] sm:$0xff] %v9783_v41  ;;  %v2246_v56 = vmul.f32 0.8064516, %v9749_v35  ;;  %v2247_v61 = vmul.f32 0.8064516, %v9751_v16  ;;  %v1674_v40 = vsel %vm737_vm8, %v1673_v49, %v1672_v5  ;;  %v9797_v41 = vpop.permute.xlu1 %3650  ;;  %3129 = vst.msk [vmem:[#allocation3 + $0x70] sm:$0xff] %vm998_vm9, %v9755_v26 }
 0x37b   : > { %v2248_v57 = vmul.f32 0.8064516, %v9753_v11  ;;  %v2249_v8 = vmul.f32 0.8064516, %v9759_v20  ;;  %v2250_v18 = vmul.f32 0.8064516, %v9761_v58  ;;  %1679 = vrot.lane.b32.xlu0 %v1674_v40, %s7221_s9 }
 0x37c   : > { %v2251_v63 = vmul.f32 0.8064516, %v9763_v54  ;;  %v2252_v10 = vmul.f32 0.8064516, %v9766_v28  ;;  %v2253_v32 = vmul.f32 0.8064516, %v9768_v0  ;;  %v2264_v24 = vadd.f32 %v2246_v56, %v2228_v1 }
 0x37d   : > { %v2265_v21 = vadd.f32 %v2247_v61, %v2229_v3  ;;  %v2266_v46 = vadd.f32 %v2248_v57, %v2230_v48  ;;  %v2267_v6 = vadd.f32 %v2249_v8, %v2231_v62  ;;  %12605 = vst [vmem:[#allocation61_spill] sm:$0xff] %v9797_v41  ;;  %v2268_v13 = vadd.f32 %v2250_v18, %v2232_v38  ;;  %v12607_v61 = vld [vmem:[#allocation50_spill] sm:$0xff]  ;;  %v9823_v57 = vld [vmem:[#allocation2 + $0x86] sm:$0x1] }
 0x37e   : > { %v2269_v47 = vadd.f32 %v2251_v63, %v2233_v19  ;;  %v2270_v2 = vadd.f32 %v2252_v10, %v2234_v37  ;;  %v2271_v22 = vadd.f32 %v2253_v32, %v2235_v12  ;;  %v1847_v28 = vmul.f32 0.6451613, %v9620_v60  ;;  %v9805_v19 = vpop.permute.xlu1 %3917  ;;  %v9833_v5 = vld [vmem:[#allocation2 + $0xc6] sm:$0x1]  ;;  %v9835_v10 = vld [vmem:[#allocation2 + $0xd6] sm:$0x1] }
 0x37f   : > { %v2306_v7 = vrot.slane %v2265_v21, 7  ;;  %v2308_v50 = vrot.slane %v2266_v46, 6  ;;  %v2310_v29 = vrot.slane %v2267_v6, 5  ;;  %v2312_v0 = vrot.slane %v2268_v13, 4  ;;  %12606 = vst [vmem:[#allocation62_spill] sm:$0xff] %v9805_v19  ;;  %3660 = vst.msk [vmem:[#allocation3 + $0x78] sm:$0xff] %vm998_vm9, %v9797_v41 }
 0x380   : > { %v2314_v1 = vrot.slane %v2269_v47, 3  ;;  %v2316_v56 = vrot.slane %v2270_v2, 2  ;;  %v2318_v49 = vrot.slane %v2271_v22, 1  ;;  %v1848_v48 = vmul.f32 0.6451613, %v9633_v55 }
 0x381   : > { %v2307_v3 = vsel %vm719_vm2, %v2306_v7, %v2264_v24  ;;  %v1849_v62 = vmul.f32 0.6451613, %v9635_v15  ;;  %v1850_v38 = vmul.f32 0.6451613, %v9637_v43  ;;  %v1851_v6 = vmul.f32 0.6451613, %v9640_v44 }
 0x382   : > { %v2309_v21 = vsel %vm722_vm3, %v2308_v50, %v2307_v3  ;;  %v1852_v60 = vmul.f32 0.6451613, %v9642_v27  ;;  %v1853_v46 = vmul.f32 0.6451613, %v9644_v30  ;;  %v1854_v7 = vmul.f32 0.6451613, %v9647_v45 }
 0x383   : > { %v2311_v2 = vsel %vm725_vm4, %v2310_v29, %v2309_v21  ;;  %v1865_v55 = vmul.f32 0.3548387, %v9649_v51  ;;  %v1866_v15 = vmul.f32 0.3548387, %v9651_v31  ;;  %v1867_v22 = vmul.f32 0.3548387, %v9657_v52 }
 0x384   : > { %v2313_v43 = vsel %vm728_vm5, %v2312_v0, %v2311_v2  ;;  %v1868_v37 = vmul.f32 0.3548387, %v9659_v9  ;;  %v1869_v44 = vmul.f32 0.3548387, %v9661_v36  ;;  %v1870_v30 = vmul.f32 0.3548387, %v9664_v53 }
 0x385   : > { %v2315_v27 = vsel %vm731_vm6, %v2314_v1, %v2313_v43  ;;  %v1871_v12 = vmul.f32 0.3548387, %v9666_v59  ;;  %v1872_v45 = vmul.f32 0.3548387, %v12607_v61  ;;  %v1883_v31 = vadd.f32 %v1865_v55, %v1847_v28  ;;  %v9826_v52 = vld [vmem:[#allocation2 + $0x96] sm:$0x1]  ;;  %v9839_v28 = vpop.permute.xlu1 %4181 }
 0x386   : > { %v2317_v51 = vsel %vm734_vm7, %v2316_v56, %v2315_v27  ;;  %v1884_v0 = vadd.f32 %v1866_v15, %v1848_v48  ;;  %v1885_v8 = vadd.f32 %v1867_v22, %v1849_v62  ;;  %v9828_v9 = vld [vmem:[#allocation2 + $0xa6] sm:$0x1]  ;;  %v9830_v36 = vld [vmem:[#allocation2 + $0xb6] sm:$0x1]  ;;  %v1886_v53 = vadd.f32 %v1868_v37, %v1850_v38  ;;  %12608 = vst [vmem:[#allocation50_spill] sm:$0xff] %v9839_v28  ;;  %v12611_v43 = vld [vmem:[#allocation30_spill] sm:$0xff] }
 0x387   : > { %v2319_v18 = vsel %vm737_vm8, %v2318_v49, %v2317_v51  ;;  %v1887_v63 = vadd.f32 %v1869_v44, %v1851_v6  ;;  %v1888_v59 = vadd.f32 %v1870_v30, %v1852_v60  ;;  %v9837_v32 = vld [vmem:[#allocation2 + $0xe6] sm:$0x1]  ;;  %v1889_v24 = vadd.f32 %v1871_v12, %v1853_v46  ;;  %v9842_v50 = vld [vmem:[#allocation2 + $0xf6] sm:$0x1]  ;;  %v9844_v29 = vld [vmem:[#allocation2 + $0x87] sm:$0x1] }
 0x388   : > { %2324 = vrot.lane.b32.xlu1 %v2319_v18, %s7223_s11  ;;  %v1890_v40 = vadd.f32 %v1872_v45, %v1854_v7  ;;  %v1925_v13 = vrot.slane %v1884_v0, 7  ;;  %v1927_v47 = vrot.slane %v1885_v8, 6  ;;  %v9846_v1 = vld [vmem:[#allocation2 + $0x97] sm:$0x1]  ;;  %v1929_v56 = vrot.slane %v1886_v53, 5  ;;  %v12609_v46 = vld [vmem:[#allocation26_spill] sm:$0xff] }
 0x389   : > { %v1931_v49 = vrot.slane %v1887_v63, 4  ;;  %v1933_v3 = vrot.slane %v1888_v59, 3  ;;  %v9848_v48 = vld [vmem:[#allocation2 + $0xa7] sm:$0x1]  ;;  %v9850_v62 = vld [vmem:[#allocation2 + $0xb7] sm:$0x1] }
 0x38a   : > { %v9852_v38 = vld [vmem:[#allocation2 + $0xc7] sm:$0x1]  ;;  %v1926_v21 = vsel %vm719_vm2, %v1925_v13, %v1883_v31  ;;  %v1935_v6 = vrot.slane %v1889_v24, 2  ;;  %v1937_v60 = vrot.slane %v1890_v40, 1  ;;  %3127 = vst.msk [vmem:[#allocation3 + $0x28] sm:$0xff] %vm998_vm9, %v12609_v46  ;;  %3658 = vst.msk [vmem:[#allocation3 + $0x30] sm:$0xff] %vm998_vm9, %v12611_v43  ;;  %v9894_v24 = vpop.permute.xlu0 %3005 }
 0x38b   : > { %v9857_v2 = vld [vmem:[#allocation2 + $0xd7] sm:$0x1]  ;;  %v9859_v7 = vld [vmem:[#allocation2 + $0xe7] sm:$0x1]  ;;  %v2492_v15 = vmul.f32 0.22580647, %v9823_v57  ;;  %v1928_v30 = vsel %vm722_vm3, %v1927_v47, %v1926_v21  ;;  %v9900_v21 = vpop.permute.xlu1 %4448 }
 0x38c   : > { %v9861_v55 = vld [vmem:[#allocation2 + $0xf7] sm:$0x1]  ;;  %v12612_v22 = vld [vmem:[#allocation36_spill] sm:$0xff]  ;;  %4191 = vst.msk [vmem:[#allocation3 + $0x80] sm:$0xff] %vm998_vm9, %v9839_v28  ;;  %v2493_v12 = vmul.f32 0.22580647, %v9826_v52  ;;  %v1930_v51 = vsel %vm725_vm4, %v1929_v56, %v1928_v30 }
 0x38d   : > { %12610 = vst [vmem:[#allocation63_spill] sm:$0xff] %v9861_v55  ;;  %4189 = vst.msk [vmem:[#allocation3 + $0x38] sm:$0xff] %vm998_vm9, %v12612_v22  ;;  %v12613_v37 = vld [vmem:[#allocation43_spill] sm:$0xff]  ;;  %v12615_v27 = vld [vmem:[#allocation32_spill] sm:$0xff]  ;;  %v2494_v61 = vmul.f32 0.22580647, %v9828_v9  ;;  %v1932_v18 = vsel %vm728_vm5, %v1931_v49, %v1930_v51 }
 0x38e   : > { %999 = vst.msk [vmem:[#allocation3 + $0x8] sm:$0xff] %vm998_vm9, %v12613_v37  ;;  %v12614_v44 = vld [vmem:[#allocation47_spill] sm:$0xff]  ;;  %2065 = vst.msk [vmem:[#allocation3 + $0x18] sm:$0xff] %vm998_vm9, %v12615_v27  ;;  %v2495_v45 = vmul.f32 0.22580647, %v9830_v36  ;;  %v1934_v40 = vsel %vm731_vm6, %v1933_v3, %v1932_v18 }
 0x38f   : > { %1534 = vst.msk [vmem:[#allocation3 + $0x10] sm:$0xff] %vm998_vm9, %v12614_v44  ;;  %v2496_v31 = vmul.f32 0.22580647, %v9833_v5  ;;  %v2497_v0 = vmul.f32 0.22580647, %v9835_v10  ;;  %12616 = vst [vmem:[#allocation64_spill] sm:$0xff] %v9894_v24  ;;  %v1936_v49 = vsel %vm734_vm7, %v1935_v6, %v1934_v40 }
 0x390   : > { %v2498_v8 = vmul.f32 0.22580647, %v9837_v32  ;;  %v2499_v53 = vmul.f32 0.22580647, %v9842_v50  ;;  %v2510_v63 = vmul.f32 0.7741935, %v9844_v29  ;;  %v1938_v24 = vsel %vm737_vm8, %v1937_v60, %v1936_v49 }
 0x391   : > { %v2511_v59 = vmul.f32 0.7741935, %v9846_v1  ;;  %v2512_v13 = vmul.f32 0.7741935, %v9848_v48  ;;  %v2513_v47 = vmul.f32 0.7741935, %v9850_v62  ;;  %1943 = vrot.lane.b32.xlu0 %v1938_v24, %s7224_s12 }
 0x392   : > { %v2514_v56 = vmul.f32 0.7741935, %v9852_v38  ;;  %12617 = vst [vmem:[#allocation65_spill] sm:$0xff] %v9900_v21  ;;  %v2515_v30 = vmul.f32 0.7741935, %v9857_v2  ;;  %v2528_v28 = vadd.f32 %v2510_v63, %v2492_v15 }
 0x393   : > { %v2516_v51 = vmul.f32 0.7741935, %v9859_v7  ;;  %v2517_v26 = vmul.f32 0.7741935, %v9861_v55  ;;  %v2529_v3 = vadd.f32 %v2511_v59, %v2493_v12  ;;  %v2530_v18 = vadd.f32 %v2512_v13, %v2494_v61  ;;  %v9909_v55 = vpop.permute.xlu0 %3272  ;;  %v9945_v13 = vld [vmem:[#allocation2 + $0xc7] sm:$0x1] }
 0x394   : > { %v2531_v41 = vadd.f32 %v2513_v47, %v2495_v45  ;;  %v2532_v46 = vadd.f32 %v2514_v56, %v2496_v31  ;;  %v2533_v23 = vadd.f32 %v2515_v30, %v2497_v0  ;;  %v2114_v40 = vmul.f32 0.67741936, %v9731_v33  ;;  %v9914_v45 = vpop.permute.xlu1 %4712  ;;  %v12620_v0 = vld [vmem:[#allocation60_spill] sm:$0xff]  ;;  %v9949_v47 = vld [vmem:[#allocation2 + $0xe7] sm:$0x1]  ;;  %3280 = vst.msk [vmem:[#allocation3 + $0x70] sm:$0xff] %vm1153_vm10, %v9909_v55 }
 0x395   : > { %v2534_v27 = vadd.f32 %v2516_v51, %v2498_v8  ;;  %v2535_v44 = vadd.f32 %v2517_v26, %v2499_v53  ;;  %v2570_v37 = vrot.slane %v2529_v3, 7  ;;  %v2572_v6 = vrot.slane %v2530_v18, 6  ;;  %12618 = vst [vmem:[#allocation66_spill] sm:$0xff] %v9914_v45  ;;  %v9936_v53 = vld [vmem:[#allocation2 + $0x97] sm:$0x1]  ;;  %v12636_v55 = vld [vmem:[#allocation38_spill] sm:$0xff] }
 0x396   : > { %v2574_v22 = vrot.slane %v2531_v41, 5  ;;  %v2576_v43 = vrot.slane %v2532_v46, 4  ;;  %v2578_v21 = vrot.slane %v2533_v23, 3  ;;  %v2115_v12 = vmul.f32 0.67741936, %v9733_v42 }
 0x397   : > { %v2580_v19 = vrot.slane %v2534_v27, 2  ;;  %v2571_v60 = vsel %vm719_vm2, %v2570_v37, %v2528_v28  ;;  %v2582_v15 = vrot.slane %v2535_v44, 1  ;;  %v2116_v61 = vmul.f32 0.67741936, %v9736_v14  ;;  %v9928_v27 = vld [vmem:[#allocation2 + $0x87] sm:$0x1]  ;;  %v9942_v63 = vpop.permute.xlu0 %3536 }
 0x398   : > { %v2573_v26 = vsel %vm722_vm3, %v2572_v6, %v2571_v60  ;;  %v2117_v31 = vmul.f32 0.67741936, %v9738_v4  ;;  %v2118_v33 = vmul.f32 0.67741936, %v9740_v25  ;;  %v2119_v23 = vmul.f32 0.67741936, %v9743_v39  ;;  %v9951_v56 = vpop.permute.xlu1 %989 }
 0x399   : > { %v2575_v41 = vsel %vm725_vm4, %v2574_v22, %v2573_v26  ;;  %v2120_v46 = vmul.f32 0.67741936, %v9745_v17  ;;  %v2121_v28 = vmul.f32 0.67741936, %v9747_v34  ;;  %v2132_v42 = vmul.f32 0.32258064, %v9749_v35 }
 0x39a   : > { %v2577_v14 = vsel %vm728_vm5, %v2576_v43, %v2575_v41  ;;  %v2133_v37 = vmul.f32 0.32258064, %v9751_v16  ;;  %v2134_v44 = vmul.f32 0.32258064, %v9753_v11  ;;  %v2135_v4 = vmul.f32 0.32258064, %v9759_v20 }
 0x39b   : > { %v2579_v25 = vsel %vm731_vm6, %v2578_v21, %v2577_v14  ;;  %v2136_v39 = vmul.f32 0.32258064, %v9761_v58  ;;  %v2137_v17 = vmul.f32 0.32258064, %v9763_v54  ;;  %v12619_v22 = vld [vmem:[#allocation59_spill] sm:$0xff]  ;;  %v2150_v8 = vadd.f32 %v2132_v42, %v2114_v40  ;;  %12622 = vst [vmem:[#allocation60_spill] sm:$0xff] %v9951_v56 }
 0x39c   : > { %v2138_v34 = vmul.f32 0.32258064, %v12619_v22  ;;  %v2581_v35 = vsel %vm734_vm7, %v2580_v19, %v2579_v25  ;;  %v2139_v43 = vmul.f32 0.32258064, %v12620_v0  ;;  %v2151_v16 = vadd.f32 %v2133_v37, %v2115_v12  ;;  %v9938_v11 = vld [vmem:[#allocation2 + $0xa7] sm:$0x1] }
 0x39d   : > { %v9940_v20 = vld [vmem:[#allocation2 + $0xb7] sm:$0x1]  ;;  %12621 = vst [vmem:[#allocation59_spill] sm:$0xff] %v9942_v63  ;;  %v2583_v58 = vsel %vm737_vm8, %v2582_v15, %v2581_v35  ;;  %v2152_v59 = vadd.f32 %v2134_v44, %v2116_v61  ;;  %v2153_v54 = vadd.f32 %v2135_v4, %v2117_v31  ;;  %v2154_v24 = vadd.f32 %v2136_v39, %v2118_v33  ;;  %v9956_v18 = vld [vmem:[#allocation2 + $0x88] sm:$0x1]  ;;  %v9984_v35 = vpop.permute.xlu0 %3803 }
 0x39e   : > { %v9947_v19 = vld [vmem:[#allocation2 + $0xd7] sm:$0x1]  ;;  %2588 = vrot.lane.b32.xlu1 %v2583_v58, %s7222_s10  ;;  %v2155_v21 = vadd.f32 %v2137_v17, %v2119_v23  ;;  %v2156_v49 = vadd.f32 %v2138_v34, %v2120_v46  ;;  %v2157_v30 = vadd.f32 %v2139_v43, %v2121_v28  ;;  %v2192_v51 = vrot.slane %v2151_v16, 7  ;;  %v9958_v6 = vld [vmem:[#allocation2 + $0x98] sm:$0x1]  ;;  %1001 = vst.msk [vmem:[#allocation3 + $0x50] sm:$0xff] %vm998_vm9, %v9951_v56 }
 0x39f   : > { %v9954_v3 = vld [vmem:[#allocation2 + $0xf7] sm:$0x1]  ;;  %v2194_v40 = vrot.slane %v2152_v59, 6  ;;  %v2196_v60 = vrot.slane %v2153_v54, 5  ;;  %v2198_v15 = vrot.slane %v2154_v24, 4  ;;  %3811 = vst.msk [vmem:[#allocation3 + $0x78] sm:$0xff] %vm1153_vm10, %v9984_v35 }
 0x3a0   : > { %v9962_v12 = vld [vmem:[#allocation2 + $0xa8] sm:$0x1]  ;;  %v9964_v61 = vld [vmem:[#allocation2 + $0xb8] sm:$0x1]  ;;  %v2759_v31 = vmul.f32 0.2580645, %v9928_v27  ;;  %v2193_v33 = vsel %vm719_vm2, %v2192_v51, %v2150_v8 }
 0x3a1   : > { %v9966_v26 = vld [vmem:[#allocation2 + $0xc8] sm:$0x1]  ;;  %v2200_v23 = vrot.slane %v2155_v21, 3  ;;  %v2202_v41 = vrot.slane %v2156_v49, 2  ;;  %v2204_v46 = vrot.slane %v2157_v30, 1  ;;  %v2195_v37 = vsel %vm722_vm3, %v2194_v40, %v2193_v33  ;;  %v10001_v63 = vpop.permute.xlu0 %4067  ;;  %v12637_v35 = vld [vmem:[#allocation45_spill] sm:$0xff] }
 0x3a2   : > { %v9970_v28 = vld [vmem:[#allocation2 + $0xd8] sm:$0x1]  ;;  %v9972_v42 = vld [vmem:[#allocation2 + $0xe8] sm:$0x1]  ;;  %v2760_v44 = vmul.f32 0.2580645, %v9936_v53  ;;  %v2197_v39 = vsel %vm725_vm4, %v2196_v60, %v2195_v37 }
 0x3a3   : > { %12623 = vst [vmem:[#allocation67_spill] sm:$0xff] %v9970_v28  ;;  %12624 = vst [vmem:[#allocation68_spill] sm:$0xff] %v9972_v42  ;;  %v9974_v14 = vld [vmem:[#allocation2 + $0xf8] sm:$0x1]  ;;  %v2761_v4 = vmul.f32 0.2580645, %v9938_v11  ;;  %v2199_v0 = vsel %vm728_vm5, %v2198_v15, %v2197_v39 }
 0x3a4   : > { %12625 = vst [vmem:[#allocation69_spill] sm:$0xff] %v9974_v14  ;;  %v2762_v25 = vmul.f32 0.2580645, %v9940_v20  ;;  %v2763_v17 = vmul.f32 0.2580645, %v9945_v13  ;;  %v2201_v58 = vsel %vm731_vm6, %v2200_v23, %v2199_v0 }
 0x3a5   : > { %v2764_v22 = vmul.f32 0.2580645, %v9947_v19  ;;  %v2765_v34 = vmul.f32 0.2580645, %v9949_v47  ;;  %v2766_v43 = vmul.f32 0.2580645, %v9954_v3  ;;  %v2203_v21 = vsel %vm734_vm7, %v2202_v41, %v2201_v58 }
 0x3a6   : > { %v2777_v8 = vmul.f32 0.7419355, %v9956_v18  ;;  %v2778_v16 = vmul.f32 0.7419355, %v9958_v6  ;;  %v2779_v59 = vmul.f32 0.7419355, %v9962_v12  ;;  %v2205_v40 = vsel %vm737_vm8, %v2204_v46, %v2203_v21 }
 0x3a7   : > { %v2780_v54 = vmul.f32 0.7419355, %v9964_v61  ;;  %v2781_v24 = vmul.f32 0.7419355, %v9966_v26  ;;  %v2782_v49 = vmul.f32 0.7419355, %v9970_v28  ;;  %2210 = vrot.lane.b32.xlu0 %v2205_v40, %s7221_s9 }
 0x3a8   : > { %v2783_v30 = vmul.f32 0.7419355, %v9972_v42  ;;  %v2784_v51 = vmul.f32 0.7419355, %v9974_v14  ;;  %v2795_v60 = vadd.f32 %v2777_v8, %v2759_v31  ;;  %v2796_v15 = vadd.f32 %v2778_v16, %v2760_v44 }
 0x3a9   : > { %v2797_v33 = vadd.f32 %v2779_v59, %v2761_v4  ;;  %v2798_v23 = vadd.f32 %v2780_v54, %v2762_v25  ;;  %v2799_v37 = vadd.f32 %v2781_v24, %v2763_v17  ;;  %v2800_v39 = vadd.f32 %v2782_v49, %v2764_v22  ;;  %v4335_v59 = vpop.permute.xlu0 %4334 }
 0x3aa   : > { %v2801_v0 = vadd.f32 %v2783_v30, %v2765_v34  ;;  %v2802_v56 = vadd.f32 %v2784_v51, %v2766_v43  ;;  %v2837_v45 = vrot.slane %v2796_v15, 7  ;;  %v2378_v58 = vmul.f32 0.70967746, %v9823_v57  ;;  %4342 = vst.msk [vmem:[#allocation3 + $0x80] sm:$0xff] %vm1153_vm10, %v4335_v59 }
 0x3ab   : > { %v2839_v41 = vrot.slane %v2797_v33, 6  ;;  %v2841_v42 = vrot.slane %v2798_v23, 5  ;;  %v2843_v14 = vrot.slane %v2799_v37, 4  ;;  %v2845_v28 = vrot.slane %v2800_v39, 3  ;;  %v12627_v23 = vld [vmem:[#allocation29_spill] sm:$0xff]  ;;  %v12628_v39 = vld [vmem:[#allocation35_spill] sm:$0xff] }
 0x3ac   : > { %v2847_v46 = vrot.slane %v2801_v0, 2  ;;  %v2838_v31 = vsel %vm719_vm2, %v2837_v45, %v2795_v60  ;;  %v2849_v44 = vrot.slane %v2802_v56, 1  ;;  %v2379_v4 = vmul.f32 0.70967746, %v9826_v52  ;;  %3279 = vst.msk [vmem:[#allocation3 + $0x28] sm:$0xff] %vm1153_vm10, %v12627_v23  ;;  %3810 = vst.msk [vmem:[#allocation3 + $0x30] sm:$0xff] %vm1153_vm10, %v12628_v39 }
 0x3ad   : > { %v2380_v25 = vmul.f32 0.70967746, %v9828_v9  ;;  %v2840_v17 = vsel %vm722_vm3, %v2839_v41, %v2838_v31  ;;  %v2381_v22 = vmul.f32 0.70967746, %v9830_v36  ;;  %v2382_v34 = vmul.f32 0.70967746, %v9833_v5 }
 0x3ae   : > { %v2383_v57 = vmul.f32 0.70967746, %v9835_v10  ;;  %v2842_v43 = vsel %vm725_vm4, %v2841_v42, %v2840_v17  ;;  %v2384_v8 = vmul.f32 0.70967746, %v9837_v32  ;;  %v2385_v16 = vmul.f32 0.70967746, %v9842_v50 }
 0x3af   : > { %v2396_v45 = vmul.f32 0.29032257, %v9844_v29  ;;  %v2844_v52 = vsel %vm728_vm5, %v2843_v14, %v2842_v43  ;;  %v2397_v9 = vmul.f32 0.29032257, %v9846_v1  ;;  %v2398_v56 = vmul.f32 0.29032257, %v9848_v48 }
 0x3b0   : > { %v2399_v36 = vmul.f32 0.29032257, %v9850_v62  ;;  %v2846_v5 = vsel %vm731_vm6, %v2845_v28, %v2844_v52  ;;  %v2400_v10 = vmul.f32 0.29032257, %v9852_v38  ;;  %v2401_v42 = vmul.f32 0.29032257, %v9857_v2 }
 0x3b1   : > { %v2402_v32 = vmul.f32 0.29032257, %v9859_v7  ;;  %v2848_v50 = vsel %vm734_vm7, %v2847_v46, %v2846_v5  ;;  %v12626_v29 = vld [vmem:[#allocation63_spill] sm:$0xff]  ;;  %v2414_v14 = vadd.f32 %v2396_v45, %v2378_v58  ;;  %v2415_v24 = vadd.f32 %v2397_v9, %v2379_v4  ;;  %v12630_v41 = vld [vmem:[#allocation46_spill] sm:$0xff]  ;;  %v12631_v58 = vld [vmem:[#allocation28_spill] sm:$0xff] }
 0x3b2   : > { %v2403_v54 = vmul.f32 0.29032257, %v12626_v29  ;;  %v2850_v1 = vsel %vm737_vm8, %v2849_v44, %v2848_v50  ;;  %v2416_v48 = vadd.f32 %v2398_v56, %v2380_v25  ;;  %v2417_v21 = vadd.f32 %v2399_v36, %v2381_v22  ;;  %v10029_v37 = vld [vmem:[#allocation3 + $0xd0] sm:$0x3]  ;;  %1154 = vst.msk [vmem:[#allocation3 + $0x8] sm:$0xff] %vm1153_vm10, %v12630_v41  ;;  %1686 = vst.msk [vmem:[#allocation3 + $0x10] sm:$0xff] %vm1153_vm10, %v12631_v58 }
 0x3b3   : > { %v2418_v62 = vadd.f32 %v2400_v10, %v2382_v34  ;;  %2855 = vrot.lane.b32.xlu1 %v2850_v1, %s7223_s11  ;;  %v2419_v28 = vadd.f32 %v2401_v42, %v2383_v57  ;;  %v2420_v38 = vadd.f32 %v2402_v32, %v2384_v8  ;;  %v2456_v2 = vrot.slane %v2415_v24, 7  ;;  %v12629_v0 = vld [vmem:[#allocation39_spill] sm:$0xff]  ;;  %v12632_v46 = vld [vmem:[#allocation53_spill] sm:$0xff]  ;;  %v12635_v34 = vld [vmem:[#allocation34_spill] sm:$0xff]  ;;  %1269 = vst.msk [vmem:[#allocation3 + $0x8] sm:$0xff] %vm764_vm1, %v12637_v35 }
 0x3b4   : > { %v2421_v49 = vadd.f32 %v2403_v54, %v2385_v16  ;;  %v2458_v30 = vrot.slane %v2416_v48, 6  ;;  %v2460_v7 = vrot.slane %v2417_v21, 5  ;;  %4341 = vst.msk [vmem:[#allocation3 + $0x38] sm:$0xff] %vm1153_vm10, %v12629_v0  ;;  %2217 = vst.msk [vmem:[#allocation3 + $0x18] sm:$0xff] %vm1153_vm10, %v12632_v46  ;;  %v12633_v31 = vld [vmem:[#allocation57_spill] sm:$0xff]  ;;  %v12639_v43 = vld [vmem:[#allocation52_spill] sm:$0xff]  ;;  %v4599_v16 = vpop.permute.xlu0 %4598 }
 0x3b5   : > { %v2462_v51 = vrot.slane %v2418_v62, 4  ;;  %v2457_v40 = vsel %vm719_vm2, %v2456_v2, %v2414_v14  ;;  %v2464_v60 = vrot.slane %v2419_v28, 3  ;;  %v2466_v15 = vrot.slane %v2420_v38, 2  ;;  %2748 = vst.msk [vmem:[#allocation3 + $0x20] sm:$0xff] %vm1153_vm10, %v12633_v31  ;;  %v12634_v4 = vld [vmem:[#allocation25_spill] sm:$0xff]  ;;  %v12644_v54 = vld [vmem:[#allocation67_spill] sm:$0xff]  ;;  %v1263_v31 = vpop.permute.xlu1 %1262 }
 0x3b6   : > { %v2468_v33 = vrot.slane %v2421_v49, 1  ;;  %v2459_v44 = vsel %vm722_vm3, %v2458_v30, %v2457_v40  ;;  %3393 = vst.msk [vmem:[#allocation3 + $0x28] sm:$0xff] %vm764_vm1, %v12634_v4  ;;  %v2645_v25 = vmul.f32 0.7419355, %v9928_v27  ;;  %v2646_v17 = vmul.f32 0.7419355, %v9936_v53 }
 0x3b7   : > { %v2647_v22 = vmul.f32 0.7419355, %v9938_v11  ;;  %3924 = vst.msk [vmem:[#allocation3 + $0x30] sm:$0xff] %vm764_vm1, %v12635_v34  ;;  %4455 = vst.msk [vmem:[#allocation3 + $0x38] sm:$0xff] %vm764_vm1, %v12636_v55  ;;  %v12638_v57 = vld [vmem:[#allocation49_spill] sm:$0xff]  ;;  %v12640_v27 = vld [vmem:[#allocation56_spill] sm:$0xff]  ;;  %v2461_v45 = vsel %vm725_vm4, %v2460_v7, %v2459_v44  ;;  %5249 = vrot.lane.b32.xlu1 %v10029_v37, %s7226_s13 }
 0x3b8   : > { %1800 = vst.msk [vmem:[#allocation3 + $0x10] sm:$0xff] %vm764_vm1, %v12638_v57  ;;  %2331 = vst.msk [vmem:[#allocation3 + $0x18] sm:$0xff] %vm764_vm1, %v12639_v43  ;;  %v12641_v53 = vld [vmem:[#allocation31_spill] sm:$0xff]  ;;  %v12642_v11 = vld [vmem:[#allocation62_spill] sm:$0xff]  ;;  %v2648_v52 = vmul.f32 0.7419355, %v9940_v20  ;;  %v2463_v36 = vsel %vm728_vm5, %v2462_v51, %v2461_v45  ;;  %v874_v62 = vpop.permute.xlu0 %873 }
 0x3b9   : > { %2862 = vst.msk [vmem:[#allocation3 + $0x20] sm:$0xff] %vm764_vm1, %v12640_v27  ;;  %3394 = vst.msk [vmem:[#allocation3 + $0x70] sm:$0xff] %vm764_vm1, %v12641_v53  ;;  %v12643_v8 = vld [vmem:[#allocation65_spill] sm:$0xff]  ;;  %v2649_v9 = vmul.f32 0.7419355, %v9945_v13  ;;  %v2465_v59 = vsel %vm731_vm6, %v2464_v60, %v2463_v36  ;;  %v12645_v14 = vld [vmem:[#allocation68_spill] sm:$0xff] }
 0x3ba   : > { %3925 = vst.msk [vmem:[#allocation3 + $0x78] sm:$0xff] %vm764_vm1, %v12642_v11  ;;  %4456 = vst.msk [vmem:[#allocation3 + $0x80] sm:$0xff] %vm764_vm1, %v12643_v8  ;;  %v2650_v56 = vmul.f32 0.7419355, %v9947_v19  ;;  %v2651_v5 = vmul.f32 0.7419355, %v9949_v47  ;;  %v2467_v19 = vsel %vm734_vm7, %v2466_v15, %v2465_v59 }
 0x3bb   : > { %v2652_v10 = vmul.f32 0.7419355, %v9954_v3  ;;  %v2663_v42 = vmul.f32 0.2580645, %v9956_v18  ;;  %v10082_v32 = vld [vmem:[#allocation3 + $0x90] sm:$0x3]  ;;  %v2469_v18 = vsel %vm737_vm8, %v2468_v33, %v2467_v19 }
 0x3bc   : > { %v2664_v50 = vmul.f32 0.2580645, %v9958_v6  ;;  %v2665_v20 = vmul.f32 0.2580645, %v9962_v12  ;;  %v2666_v13 = vmul.f32 0.2580645, %v9964_v61  ;;  %5233 = vrot.lane.b32.xlu1 %v10082_v32, %s7226_s13  ;;  %2474 = vrot.lane.b32.xlu0 %v2469_v18, %s7224_s12 }
 0x3bd   : > { %v2667_v29 = vmul.f32 0.2580645, %v9966_v26  ;;  %v2668_v47 = vmul.f32 0.2580645, %v12644_v54  ;;  %v2669_v3 = vmul.f32 0.2580645, %v12645_v14  ;;  %v2681_v48 = vadd.f32 %v2663_v42, %v2645_v25 }
 0x3be   : > { %v12646_v24 = vld [vmem:[#allocation69_spill] sm:$0xff]  ;;  %v2682_v21 = vadd.f32 %v2664_v50, %v2646_v17  ;;  %v2683_v6 = vadd.f32 %v2665_v20, %v2647_v22  ;;  %v2684_v12 = vadd.f32 %v2666_v13, %v2648_v52  ;;  %v12649_v60 = vld [vmem:[#allocation42_spill] sm:$0xff]  ;;  %v12650_v15 = vld [vmem:[#allocation44_spill] sm:$0xff]  ;;  %4075 = vst.msk [vmem:[#allocation3 + $0x78] sm:$0xff] %vm880_vm11, %v10001_v63  ;;  %v1527_v50 = vpop.permute.xlu1 %1526 }
 0x3bf   : > { %v2670_v1 = vmul.f32 0.2580645, %v12646_v24  ;;  %v2685_v61 = vadd.f32 %v2667_v29, %v2649_v9  ;;  %v2686_v26 = vadd.f32 %v2668_v47, %v2650_v56  ;;  %v2687_v38 = vadd.f32 %v2669_v3, %v2651_v5  ;;  %v12647_v7 = vld [vmem:[#allocation33_spill] sm:$0xff]  ;;  %4605 = vst.msk [vmem:[#allocation3 + $0x38] sm:$0xff] %vm880_vm11, %v12649_v60  ;;  %881 = vst.msk [vmem:[#allocation3] sm:$0xff] %vm880_vm11, %v12650_v15  ;;  %v12651_v33 = vld [vmem:[#allocation48_spill] sm:$0xff] }
 0x3c0   : > { %v2723_v28 = vrot.slane %v2682_v21, 7  ;;  %v2725_v49 = vrot.slane %v2683_v6, 6  ;;  %v2727_v2 = vrot.slane %v2684_v12, 5  ;;  %3543 = vst.msk [vmem:[#allocation3 + $0x28] sm:$0xff] %vm880_vm11, %v12647_v7  ;;  %v10099_v51 = vld [vmem:[#allocation3 + $0xc0] sm:$0x3] }
 0x3c1   : > { %v2729_v30 = vrot.slane %v2685_v61, 4  ;;  %v12648_v40 = vld [vmem:[#allocation37_spill] sm:$0xff]  ;;  %1419 = vst.msk [vmem:[#allocation3 + $0x8] sm:$0xff] %vm880_vm11, %v12651_v33  ;;  %v12652_v23 = vld [vmem:[#allocation51_spill] sm:$0xff]  ;;  %4606 = vst.msk [vmem:[#allocation3 + $0x80] sm:$0xff] %vm880_vm11, %v4599_v16  ;;  %v2688_v58 = vadd.f32 %v2670_v1, %v2652_v10  ;;  %5245 = vrot.lane.b32.xlu1 %v10099_v51, %s7226_s13  ;;  %v2731_v8 = vrot.slane %v2686_v26, 3 }
 0x3c2   : > { %4074 = vst.msk [vmem:[#allocation3 + $0x30] sm:$0xff] %vm880_vm11, %v12648_v40  ;;  %1950 = vst.msk [vmem:[#allocation3 + $0x10] sm:$0xff] %vm880_vm11, %v12652_v23  ;;  %v12653_v39 = vld [vmem:[#allocation55_spill] sm:$0xff]  ;;  %v12654_v0 = vld [vmem:[#allocation21_spill] sm:$0xff]  ;;  %v2724_v46 = vsel %vm719_vm2, %v2723_v28, %v2681_v48  ;;  %v12668_v16 = vmov 0.0   ;;  %v2733_v52 = vrot.slane %v2687_v38, 2 }
 0x3c3   : > { %2481 = vst.msk [vmem:[#allocation3 + $0x18] sm:$0xff] %vm880_vm11, %v12653_v39  ;;  %3012 = vst.msk [vmem:[#allocation3 + $0x20] sm:$0xff] %vm880_vm11, %v12654_v0  ;;  %v12655_v41 = vld [vmem:[#allocation59_spill] sm:$0xff]  ;;  %v2726_v44 = vsel %vm722_vm3, %v2725_v49, %v2724_v46  ;;  %v12656_v4 = vld [vmem:[#allocation30_spill] sm:$0xff]  ;;  %v2735_v36 = vrot.slane %v2688_v58, 1  ;;  %v7229_v40 = vmov 8  }
 0x3c4   : > { %3544 = vst.msk [vmem:[#allocation3 + $0x70] sm:$0xff] %vm880_vm11, %v12655_v41  ;;  %882 = vst.msk [vmem:[#allocation3 + $0x48] sm:$0xff] %vm880_vm11, %v874_v62  ;;  %v12657_v25 = vld [vmem:[#allocation36_spill] sm:$0xff]  ;;  %v12659_v17 = vld [vmem:[#allocation43_spill] sm:$0xff]  ;;  %v2728_v11 = vsel %vm725_vm4, %v2727_v2, %v2726_v44  ;;  %7170 = vset.pattern.permute.xlu1 %v7229_v40  ;;  %vm5251_vm2 = vcmask 1031168  }
 0x3c5   : > { %3657 = vst.msk [vmem:[#allocation3 + $0x28] sm:$0xff] %vm996_vm12, %v12656_v4  ;;  %4188 = vst.msk [vmem:[#allocation3 + $0x30] sm:$0xff] %vm996_vm12, %v12657_v25  ;;  %v12658_v63 = vld [vmem:[#allocation40_spill] sm:$0xff]  ;;  %v12660_v22 = vld [vmem:[#allocation47_spill] sm:$0xff]  ;;  %v2730_v45 = vsel %vm728_vm5, %v2729_v30, %v2728_v11  ;;  %v1147_v47 = vpop.permute.xlu0 %1146  ;;  %vm5438_vm5 = vcmask 785408  }
 0x3c6   : > { %4719 = vst.msk [vmem:[#allocation3 + $0x38] sm:$0xff] %vm996_vm12, %v12658_v63  ;;  %997 = vst.msk [vmem:[#allocation3] sm:$0xff] %vm996_vm12, %v12659_v17  ;;  %v12661_v34 = vld [vmem:[#allocation32_spill] sm:$0xff]  ;;  %v12662_v55 = vld [vmem:[#allocation54_spill] sm:$0xff]  ;;  %v2732_v56 = vsel %vm731_vm6, %v2731_v8, %v2730_v45  ;;  %vm5097_vm6 = vcmask 1039360  }
 0x3c7   : > { %1533 = vst.msk [vmem:[#allocation3 + $0x8] sm:$0xff] %vm996_vm12, %v12660_v22  ;;  %2064 = vst.msk [vmem:[#allocation3 + $0x10] sm:$0xff] %vm996_vm12, %v12661_v34  ;;  %v12663_v35 = vld [vmem:[#allocation26_spill] sm:$0xff]  ;;  %v12664_v57 = vld [vmem:[#allocation61_spill] sm:$0xff]  ;;  %v2734_v42 = vsel %vm734_vm7, %v2733_v52, %v2732_v56  ;;  %vm5818_vm7 = vcmask 769024  }
 0x3c8   : > { %2595 = vst.msk [vmem:[#allocation3 + $0x18] sm:$0xff] %vm996_vm12, %v12662_v55  ;;  %3126 = vst.msk [vmem:[#allocation3 + $0x20] sm:$0xff] %vm996_vm12, %v12663_v35  ;;  %v12665_v43 = vld [vmem:[#allocation50_spill] sm:$0xff]  ;;  %v12667_v53 = vld [vmem:[#allocation60_spill] sm:$0xff]  ;;  %v2736_v59 = vsel %vm737_vm8, %v2735_v36, %v2734_v42  ;;  %vm5691_vm8 = vcmask 777216  }
 0x3c9   : > { %3659 = vst.msk [vmem:[#allocation3 + $0x70] sm:$0xff] %vm996_vm12, %v12664_v57  ;;  %4190 = vst.msk [vmem:[#allocation3 + $0x78] sm:$0xff] %vm996_vm12, %v12665_v43  ;;  %v12666_v27 = vld [vmem:[#allocation66_spill] sm:$0xff]  ;;  %v10153_v9 = vld [vmem:[#allocation3 + $0xb8] sm:$0x3]  ;;  %2741 = vrot.lane.b32.xlu0 %v2736_v59, %s7221_s9 }
 0x3ca   : > { %4721 = vst.msk [vmem:[#allocation3 + $0x80] sm:$0xff] %vm996_vm12, %v12666_v27  ;;  %1000 = vst.msk [vmem:[#allocation3 + $0x48] sm:$0xff] %vm996_vm12, %v12667_v53  ;;  %5430 = vrot.lane.b32.xlu1 %v10153_v9, %s7227_s14  ;;  %v12669_v5 = vld [vmem:[#allocation27_spill] sm:$0xff]  ;;  %v12670_v10 = vld [vmem:[#allocation58_spill] sm:$0xff] }
 0x3cb   : > { %660 = vst.msk [vmem:[#allocation3 + $0x40] sm:$0xff] %vm659_vm13, %v12668_v16  ;;  %661 = vst.msk [vmem:[#allocation3 + $0x88] sm:$0xff] %vm659_vm13, %v12668_v16  ;;  %v10169_v20 = vld [vmem:[#allocation3 + $0xa0] sm:$0x3]  ;;  %v10176_v13 = vld [vmem:[#allocation3 + $0xb0] sm:$0x3] }
 0x3cc   : > { %4720 = vst.msk [vmem:[#allocation3 + $0x40] sm:$0xff] %vm998_vm9, %v12658_v63  ;;  %4722 = vst.msk [vmem:[#allocation3 + $0x88] sm:$0xff] %vm998_vm9, %v12666_v27  ;;  %v12671_v19 = vld [vmem:[#allocation7_spill] sm:$0xff]  ;;  %v10183_v54 = vld [vmem:[#allocation3 + $0x98] sm:$0x3] }
 0x3cd   : > { %4800 = vst.msk [vmem:[#allocation3 + $0x40] sm:$0xff] %vm1153_vm10, %v12669_v5  ;;  %4801 = vst.msk [vmem:[#allocation3 + $0x88] sm:$0xff] %vm1153_vm10, %v12670_v10  ;;  %5420 = vrot.lane.b32.xlu0 %v10082_v32, %s7227_s14  ;;  %v5015_v29 = vmul.f32 %v12671_v19, %v10029_v37  ;;  %v5007_v14 = vmul.f32 %v12671_v19, %v10082_v32  ;;  %v10192_v3 = vld [vmem:[#allocation3 + $0xa8] sm:$0x3]  ;;  %v5012_v37 = vmul.f32 %v12671_v19, %v10153_v9  ;;  %v10224_v61 = vld [vmem:[#allocation3] sm:$0xff] }
 0x3ce   : > { %1536 = vst.msk [vmem:[#allocation3 + $0x58] sm:$0xff] %vm998_vm9, %v1527_v50  ;;  %5237 = vrot.lane.b32.xlu1 %v10169_v20, %s7226_s13  ;;  %v4975_v18 = vld [vmem:[#allocation3 + $0xc8] sm:$0x3]  ;;  %v5008_v1 = vmul.f32 %v12671_v19, %v10183_v54  ;;  %v5010_v48 = vmul.f32 %v12671_v19, %v10192_v3  ;;  %v1794_v6 = vpop.permute.xlu1 %1793  ;;  %v10231_v26 = vld [vmem:[#allocation3 + $0x30] sm:$0xff]  ;;  %v5013_v28 = vmul.f32 %v12671_v19, %v10099_v51  ;;  %v4957_v30 = vld [vmem:[#allocation3 + $0x38] sm:$0xff] }
 0x3cf   : > { %1155 = vst.msk [vmem:[#allocation3 + $0x50] sm:$0xff] %vm1153_vm10, %v1147_v47  ;;  %v5014_v24 = vmul.f32 %v12671_v19, %v4975_v18  ;;  %v10238_v38 = vld [vmem:[#allocation3 + $0x28] sm:$0xff]  ;;  %v5009_v49 = vmul.f32 %v12671_v19, %v10169_v20  ;;  %v5011_v7 = vmul.f32 %v12671_v19, %v10176_v13  ;;  %v10251_v60 = vld [vmem:[#allocation3 + $0x10] sm:$0xff]  ;;  %v10257_v15 = vld [vmem:[#allocation3 + $0x20] sm:$0xff] }
 0x3d0   : > { %1270 = vst.msk [vmem:[#allocation3 + $0x50] sm:$0xff] %vm764_vm1, %v1263_v31  ;;  %v10263_v33 = vld [vmem:[#allocation3 + $0x8] sm:$0xff]  ;;  %v12672_v23 = vld [vmem:[#allocation9_spill] sm:$0xff]  ;;  %v10270_v0 = vld [vmem:[#allocation3 + $0x18] sm:$0xff] }
 0x3d1   : > { %5095 = vrot.lane.b32.xlu0 %v5015_v29, %s7228_s15  ;;  %v4989_v41 = vmul.f32 %v12672_v23, %v10224_v61  ;;  %v4994_v31 = vmul.f32 %v12672_v23, %v10238_v38  ;;  %v4996_v4 = vmul.f32 %v12672_v23, %v4957_v30  ;;  %v4990_v25 = vmul.f32 %v12672_v23, %v10263_v33  ;;  %v12673_v22 = vld [vmem:[#allocation12_spill] sm:$0xff]  ;;  %v10322_v27 = vld [vmem:[#allocation3 + $0x48] sm:$0xff]  ;;  %v10349_v59 = vld [vmem:[#allocation3 + $0x70] sm:$0xff] }
 0x3d2   : > { %5241 = vrot.lane.b32.xlu1 %v10176_v13, %s7226_s13  ;;  %v4992_v17 = vmul.f32 %v12672_v23, %v10270_v0  ;;  %v5585_v34 = vmul.f32 %v12673_v22, %v10251_v60  ;;  %v4995_v57 = vmul.f32 %v12672_v23, %v10231_v26  ;;  %12675 = vst [vmem:[#allocation29_spill] sm:$0xff] %v10322_v27  ;;  %v12677_v8 = vld [vmem:[#allocation6_spill] sm:$0xff]  ;;  %v10359_v29 = vld [vmem:[#allocation3 + $0x80] sm:$0xff]  ;;  %v12682_v47 = vld [vmem:[#allocation64_spill] sm:$0xff] }
 0x3d3   : > { %v4991_v53 = vmul.f32 %v12672_v23, %v10251_v60  ;;  %v4993_v56 = vmul.f32 %v12672_v23, %v10257_v15  ;;  %v4998_v5 = vmul.f32 %v12677_v8, %v10322_v27  ;;  %v5584_v10 = vmul.f32 %v12673_v22, %v10263_v33  ;;  %12681 = vst [vmem:[#allocation53_spill] sm:$0xff] %v10359_v29 }
 0x3d4   : > { %v10218_v12 = vld [vmem:[#allocation3 + $0x40] sm:$0xff]  ;;  %v10313_v35 = vld [vmem:[#allocation3 + $0x88] sm:$0xff] }
 0x3d5   : > { %5079 = vrot.lane.b32.xlu0 %v5007_v14, %s7228_s15  ;;  %v4997_v39 = vmul.f32 %v12672_v23, %v10218_v12  ;;  %v5006_v45 = vmul.f32 %v12677_v8, %v10313_v35  ;;  %v12683_v14 = vld [vmem:[#allocation41_spill] sm:$0xff] }
 0x3d6   : > { %5422 = vrot.lane.b32.xlu1 %v10183_v54, %s7227_s14 }
 0x3d8   : > { %v1413_v21 = vpop.permute.xlu0 %1412 }
 0x3d9   : > { %5243 = vrot.lane.b32.xlu0 %v10153_v9, %s7226_s13  ;;  %1420 = vst.msk [vmem:[#allocation3 + $0x50] sm:$0xff] %vm880_vm11, %v1413_v21 }
 0x3da   : > { %5426 = vrot.lane.b32.xlu1 %v10192_v3, %s7227_s14  ;;  %1535 = vst.msk [vmem:[#allocation3 + $0x50] sm:$0xff] %vm996_vm12, %v1527_v50 }
 0x3dd   : > { %5247 = vrot.lane.b32.xlu0 %v4975_v18, %s7226_s13 }
 0x3de   : > { %5089 = vrot.lane.b32.xlu1 %v5012_v37, %s7228_s15 }
 0x3e1   : > { %5432 = vrot.lane.b32.xlu0 %v10099_v51, %s7227_s14  ;;  %v10383_v21 = vld [vmem:[#allocation3 + $0x50] sm:$0xff] }
 0x3e2   : > { %5093 = vrot.lane.b32.xlu1 %v5014_v24, %s7228_s15  ;;  %v10373_v24 = vld [vmem:[#allocation3 + $0x78] sm:$0xff] }
 0x3e4   : > { %v2058_v62 = vpop.permute.xlu1 %2057 }
 0x3e5   : > { %5235 = vrot.lane.b32.xlu0 %v10183_v54, %s7226_s13  ;;  %2067 = vst.msk [vmem:[#allocation3 + $0x60] sm:$0xff] %vm998_vm9, %v2058_v62 }
 0x3e6   : > { %5081 = vrot.lane.b32.xlu1 %v5008_v1, %s7228_s15 }
 0x3e9   : > { %5239 = vrot.lane.b32.xlu0 %v10192_v3, %s7226_s13 }
 0x3ea   : > { %5085 = vrot.lane.b32.xlu1 %v5010_v48, %s7228_s15 }
 0x3ed   : > { %5424 = vrot.lane.b32.xlu0 %v10169_v20, %s7227_s14  ;;  %v1680_v2 = vpop.permute.xlu0 %1679 }
 0x3ee   : > { %5213 = vrot.lane.b32.xlu1 %v10218_v12, %s7226_s13  ;;  %1687 = vst.msk [vmem:[#allocation3 + $0x58] sm:$0xff] %vm1153_vm10, %v1680_v2 }
 0x3ef   : > { %1801 = vst.msk [vmem:[#allocation3 + $0x58] sm:$0xff] %vm764_vm1, %v1794_v6 }
 0x3f1   : > { %5428 = vrot.lane.b32.xlu0 %v10176_v13, %s7227_s14 }
 0x3f2   : > { %5197 = vrot.lane.b32.xlu1 %v10224_v61, %s7226_s13 }
 0x3f5   : > { %5091 = vrot.lane.b32.xlu0 %v5013_v28, %s7228_s15 }
 0x3f6   : > { %5209 = vrot.lane.b32.xlu1 %v10231_v26, %s7226_s13 }
 0x3f9   : > { %5083 = vrot.lane.b32.xlu0 %v5009_v49, %s7228_s15 }
 0x3fa   : > { %5394 = vrot.lane.b32.xlu1 %v10238_v38, %s7227_s14  ;;  %v2325_v46 = vpop.permute.xlu1 %2324 }
 0x3fd   : > { %5087 = vrot.lane.b32.xlu0 %v5011_v7, %s7228_s15 }
 0x3fe   : > { %5398 = vrot.lane.b32.xlu1 %v4957_v30, %s7227_s14 }
 0x401   : > { %5400 = vrot.lane.b32.xlu0 %v10218_v12, %s7227_s14 }
 0x402   : > { %5201 = vrot.lane.b32.xlu1 %v10251_v60, %s7226_s13 }
 0x403   : > { %v1944_v58 = vpop.permute.xlu0 %1943 }
 0x404   : > { %1951 = vst.msk [vmem:[#allocation3 + $0x58] sm:$0xff] %vm880_vm11, %v1944_v58 }
 0x405   : > { %5384 = vrot.lane.b32.xlu0 %v10224_v61, %s7227_s14  ;;  %2066 = vst.msk [vmem:[#allocation3 + $0x58] sm:$0xff] %vm996_vm12, %v2058_v62 }
 0x406   : > { %5205 = vrot.lane.b32.xlu1 %v10257_v15, %s7226_s13 }
 0x409   : > { %5059 = vrot.lane.b32.xlu0 %v4997_v39, %s7228_s15 }
 0x40a   : > { %5386 = vrot.lane.b32.xlu1 %v10263_v33, %s7227_s14 }
 0x40d   : > { %5043 = vrot.lane.b32.xlu0 %v4989_v41, %s7228_s15 }
 0x40e   : > { %5390 = vrot.lane.b32.xlu1 %v10270_v0, %s7227_s14 }
 0x410   : > { %v2589_v44 = vpop.permute.xlu1 %2588 }
 0x411   : > { %5207 = vrot.lane.b32.xlu0 %v10238_v38, %s7226_s13  ;;  %2598 = vst.msk [vmem:[#allocation3 + $0x68] sm:$0xff] %vm998_vm9, %v2589_v44 }
 0x412   : > { %5766 = vrot.lane.b32.xlu1 %v10263_v33, %s7230_s16 }
 0x415   : > { %5211 = vrot.lane.b32.xlu0 %v4957_v30, %s7226_s13  ;;  %v10403_v30 = vld [vmem:[#allocation3 + $0x58] sm:$0xff] }
 0x416   : > { %5768 = vrot.lane.b32.xlu1 %v10251_v60, %s7230_s16 }
 0x419   : > { %5396 = vrot.lane.b32.xlu0 %v10231_v26, %s7227_s14  ;;  %v2211_v63 = vpop.permute.xlu0 %2210 }
 0x41a   : > { %5053 = vrot.lane.b32.xlu1 %v4994_v31, %s7228_s15  ;;  %2218 = vst.msk [vmem:[#allocation3 + $0x60] sm:$0xff] %vm1153_vm10, %v2211_v63  ;;  %v5004_v31 = vmul.f32 %v12677_v8, %v10373_v24 }
 0x41b   : > { %2332 = vst.msk [vmem:[#allocation3 + $0x60] sm:$0xff] %vm764_vm1, %v2325_v46 }
 0x41d   : > { %5199 = vrot.lane.b32.xlu0 %v10263_v33, %s7226_s13 }
 0x41e   : > { %5057 = vrot.lane.b32.xlu1 %v4996_v4, %s7228_s15 }
 0x421   : > { %5203 = vrot.lane.b32.xlu0 %v10270_v0, %s7226_s13 }
 0x422   : > { %5045 = vrot.lane.b32.xlu1 %v4990_v25, %s7228_s15  ;;  %v5000_v25 = vmul.f32 %v12677_v8, %v10403_v30 }
 0x425   : > { %5388 = vrot.lane.b32.xlu0 %v10251_v60, %s7227_s14  ;;  %v2856_v55 = vpop.permute.xlu1 %2855 }
 0x426   : > { %5049 = vrot.lane.b32.xlu1 %v4992_v17, %s7228_s15 }
 0x429   : > { %5392 = vrot.lane.b32.xlu0 %v10257_v15, %s7227_s14  ;;  %v10319_v43 = vpop.permute.xlu1 %5249 }
 0x42a   : > { %5641 = vrot.lane.b32.xlu1 %v5585_v34, %s7231_s17  ;;  %12674 = vst [vmem:[#allocation63_spill] sm:$0xff] %v10319_v43  ;;  %v12713_v43 = vmov 6  }
 0x42d   : > { %5055 = vrot.lane.b32.xlu0 %v4995_v57, %s7228_s15  ;;  %v5003_v57 = vmul.f32 %v12677_v8, %v10349_v59 }
 0x42e   : > { %5418 = vrot.lane.b32.xlu1 %v10313_v35, %s7227_s14  ;;  %v10328_v11 = vpop.permute.xlu1 %5233  ;;  %v2475_v52 = vpop.permute.xlu0 %2474 }
 0x42f   : > { %12676 = vst [vmem:[#allocation35_spill] sm:$0xff] %v10328_v11  ;;  %2482 = vst.msk [vmem:[#allocation3 + $0x60] sm:$0xff] %vm880_vm11, %v2475_v52 }
 0x430   : > { %2597 = vst.msk [vmem:[#allocation3 + $0x60] sm:$0xff] %vm996_vm12, %v2589_v44 }
 0x431   : > { %5047 = vrot.lane.b32.xlu0 %v4991_v53, %s7228_s15 }
 0x432   : > { %5402 = vrot.lane.b32.xlu1 %v10322_v27, %s7227_s14 }
 0x433   : > { %v10338_v36 = vpop.permute.xlu1 %5245 }
 0x434   : > { %12678 = vst [vmem:[#allocation39_spill] sm:$0xff] %v10338_v36 }
 0x435   : > { %5051 = vrot.lane.b32.xlu0 %v4993_v56, %s7228_s15 }
 0x436   : > { %5077 = vrot.lane.b32.xlu1 %v5006_v45, %s7228_s15  ;;  %v12703_v45 = vld [vmem:[#allocation13_spill] sm:$0xff] }
 0x437   : > { %v10393_v28 = vld [vmem:[#allocation3 + $0x60] sm:$0xff]  ;;  %v5594_v52 = vmul.f32 %v12703_v45, %v10403_v30 }
 0x439   : > { %5639 = vrot.lane.b32.xlu0 %v5584_v10, %s7231_s17 }
 0x43a   : > { %5061 = vrot.lane.b32.xlu1 %v4998_v5, %s7228_s15  ;;  %v5005_v5 = vmul.f32 %v12677_v8, %v10359_v29 }
 0x43b   : > { %v2742_v50 = vpop.permute.xlu0 %2741 }
 0x43c   : > { %v10346_v42 = vpop.permute.xlu1 %5430  ;;  %2749 = vst.msk [vmem:[#allocation3 + $0x68] sm:$0xff] %vm1153_vm10, %v2742_v50  ;;  %vm6385_vm10 = vcmask 506880  }
 0x43d   : > { %12679 = vst [vmem:[#allocation46_spill] sm:$0xff] %v10346_v42  ;;  %2863 = vst.msk [vmem:[#allocation3 + $0x68] sm:$0xff] %vm764_vm1, %v2856_v55  ;;  %5231 = vrot.lane.b32.xlu0 %v10313_v35, %s7226_s13 }
 0x43e   : > { %5225 = vrot.lane.b32.xlu1 %v10349_v59, %s7226_s13  ;;  %3013 = vst.msk [vmem:[#allocation3 + $0x68] sm:$0xff] %vm880_vm11, %v12682_v47  ;;  %v4999_v47 = vmul.f32 %v12677_v8, %v10383_v21  ;;  %vm6258_vm11 = vcmask 515072  }
 0x43f   : > { %3128 = vst.msk [vmem:[#allocation3 + $0x68] sm:$0xff] %vm996_vm12, %v12683_v14  ;;  %v10367_v37 = vpop.permute.xlu0 %5420 }
 0x440   : > { %v10354_v19 = vpop.permute.xlu1 %5237  ;;  %12684 = vst [vmem:[#allocation57_spill] sm:$0xff] %v10367_v37  ;;  %v12747_v37 = vld [vmem:[#allocation18_spill] sm:$0xff] }
 0x441   : > { %12680 = vst [vmem:[#allocation28_spill] sm:$0xff] %v10354_v19  ;;  %5215 = vrot.lane.b32.xlu0 %v10322_v27, %s7226_s13 }
 0x442   : > { %5229 = vrot.lane.b32.xlu1 %v10359_v29, %s7226_s13 }
 0x443   : > { %v10377_v1 = vpop.permute.xlu0 %5095 }
 0x444   : > { %v10369_v18 = vpop.permute.xlu1 %5241  ;;  %12686 = vst [vmem:[#allocation34_spill] sm:$0xff] %v10377_v1  ;;  %v5592_v1 = vmul.f32 %v12703_v45, %v10322_v27 }
 0x445   : > { %12685 = vst [vmem:[#allocation25_spill] sm:$0xff] %v10369_v18  ;;  %5227 = vrot.lane.b32.xlu0 %v10373_v24, %s7226_s13 }
 0x446   : > { %5414 = vrot.lane.b32.xlu1 %v10373_v24, %s7227_s14  ;;  %v10413_v23 = vld [vmem:[#allocation3 + $0x68] sm:$0xff] }
 0x447   : > { %v10387_v6 = vpop.permute.xlu0 %5079  ;;  %v5002_v34 = vmul.f32 %v12677_v8, %v10413_v23 }
 0x448   : > { %v10379_v48 = vpop.permute.xlu1 %5422  ;;  %12688 = vst [vmem:[#allocation45_spill] sm:$0xff] %v10387_v6 }
 0x449   : > { %12687 = vst [vmem:[#allocation38_spill] sm:$0xff] %v10379_v48  ;;  %5412 = vrot.lane.b32.xlu0 %v10349_v59, %s7227_s14  ;;  %v6170_v48 = vmul.f32 %v12747_v37, %v10169_v20 }
 0x44a   : > { %5217 = vrot.lane.b32.xlu1 %v10383_v21, %s7226_s13 }
 0x44b   : > { %v10397_v49 = vpop.permute.xlu0 %5243 }
 0x44c   : > { %v10389_v62 = vpop.permute.xlu1 %5426  ;;  %12690 = vst [vmem:[#allocation52_spill] sm:$0xff] %v10397_v49 }
 0x44d   : > { %12689 = vst [vmem:[#allocation49_spill] sm:$0xff] %v10389_v62  ;;  %5416 = vrot.lane.b32.xlu0 %v10359_v29, %s7227_s14 }
 0x44e   : > { %5221 = vrot.lane.b32.xlu1 %v10393_v28, %s7226_s13 }
 0x44f   : > { %v10407_v7 = vpop.permute.xlu0 %5247 }
 0x450   : > { %v10399_v2 = vpop.permute.xlu1 %5089  ;;  %12692 = vst [vmem:[#allocation31_spill] sm:$0xff] %v10407_v7  ;;  %v5583_v7 = vmul.f32 %v12673_v22, %v10224_v61 }
 0x451   : > { %12691 = vst [vmem:[#allocation56_spill] sm:$0xff] %v10399_v2  ;;  %5219 = vrot.lane.b32.xlu0 %v10403_v30, %s7226_s13 }
 0x452   : > { %5406 = vrot.lane.b32.xlu1 %v10403_v30, %s7227_s14 }
 0x453   : > { %v10417_v39 = vpop.permute.xlu0 %5432 }
 0x454   : > { %v10409_v40 = vpop.permute.xlu1 %5093  ;;  %12694 = vst [vmem:[#allocation65_spill] sm:$0xff] %v10417_v39 }
 0x455   : > { %12693 = vst [vmem:[#allocation62_spill] sm:$0xff] %v10409_v40  ;;  %5223 = vrot.lane.b32.xlu0 %v10413_v23, %s7226_s13 }
 0x456   : > { %5410 = vrot.lane.b32.xlu1 %v10413_v23, %s7227_s14 }
 0x457   : > { %v10425_v58 = vpop.permute.xlu0 %5235 }
 0x458   : > { %v10419_v41 = vpop.permute.xlu1 %5081  ;;  %12696 = vst [vmem:[#allocation68_spill] sm:$0xff] %v10425_v58  ;;  %v5589_v58 = vmul.f32 %v12673_v22, %v10231_v26 }
 0x459   : > { %12695 = vst [vmem:[#allocation67_spill] sm:$0xff] %v10419_v41  ;;  %5404 = vrot.lane.b32.xlu0 %v10383_v21, %s7227_s14 }
 0x45a   : > { %5786 = vrot.lane.b32.xlu1 %v10403_v30, %s7230_s16 }
 0x45b   : > { %v10434_v44 = vpop.permute.xlu0 %5239 }
 0x45c   : > { %v10427_v46 = vpop.permute.xlu1 %5085  ;;  %12698 = vst [vmem:[#allocation33_spill] sm:$0xff] %v10434_v44  ;;  %v12725_v44 = vld [vmem:[#allocation15_spill] sm:$0xff] }
 0x45d   : > { %12697 = vst [vmem:[#allocation69_spill] sm:$0xff] %v10427_v46  ;;  %5408 = vrot.lane.b32.xlu0 %v10393_v28, %s7227_s14  ;;  %v6161_v16 = vmul.f32 %v12725_v44, %v10403_v30  ;;  %v6163_v11 = vmul.f32 %v12725_v44, %v10413_v23 }
 0x45e   : > { %5073 = vrot.lane.b32.xlu1 %v5004_v31, %s7228_s15  ;;  %v7187_v31 = vld [vmem:[%s12304_s2] sm:$0xff] }
 0x45f   : > { %v10443_v63 = vpop.permute.xlu0 %5424 }
 0x460   : > { %v10436_v4 = vpop.permute.xlu1 %5213  ;;  %12700 = vst [vmem:[#allocation42_spill] sm:$0xff] %v10443_v63 }
 0x461   : > { %12699 = vst [vmem:[#allocation37_spill] sm:$0xff] %v10436_v4  ;;  %5784 = vrot.lane.b32.xlu0 %v10383_v21, %s7230_s16 }
 0x462   : > { %5065 = vrot.lane.b32.xlu1 %v5000_v25, %s7228_s15 }
 0x463   : > { %v10452_v55 = vpop.permute.xlu0 %5428 }
 0x464   : > { %v10445_v17 = vpop.permute.xlu1 %5197  ;;  %12701 = vst [vmem:[#allocation44_spill] sm:$0xff] %v10452_v55  ;;  %v12721_v55 = vld [vmem:[#allocation16_spill] sm:$0xff] }
 0x465   : > { %5071 = vrot.lane.b32.xlu0 %v5003_v57, %s7228_s15  ;;  %v6151_v62 = vmul.f32 %v12721_v55, %v10263_v33 }
 0x466   : > { %5069 = vrot.lane.b32.xlu1 %v5002_v34, %s7228_s15  ;;  %v5001_v34 = vmul.f32 %v12677_v8, %v10393_v28 }
 0x467   : > { %v10462_v56 = vpop.permute.xlu0 %5091 }
 0x468   : > { %v10456_v53 = vpop.permute.xlu1 %5209  ;;  %12704 = vst [vmem:[#allocation51_spill] sm:$0xff] %v10462_v56 }
 0x469   : > { %12702 = vst [vmem:[#allocation48_spill] sm:$0xff] %v10456_v53  ;;  %5075 = vrot.lane.b32.xlu0 %v5005_v5, %s7228_s15 }
 0x46a   : > { %5659 = vrot.lane.b32.xlu1 %v5594_v52, %s7231_s17  ;;  %v7188_v52 = vld [vmem:[%s12304_s2 + $0x8] sm:$0xff] }
 0x46b   : > { %v10471_v50 = vpop.permute.xlu0 %5083 }
 0x46c   : > { %v10466_v10 = vpop.permute.xlu1 %5394  ;;  %12706 = vst [vmem:[#allocation21_spill] sm:$0xff] %v10471_v50 }
 0x46d   : > { %12705 = vst [vmem:[#allocation55_spill] sm:$0xff] %v10466_v10  ;;  %5063 = vrot.lane.b32.xlu0 %v4999_v47, %s7228_s15  ;;  %v5593_v47 = vmul.f32 %v12703_v45, %v10383_v21 }
 0x46e   : > { %5782 = vrot.lane.b32.xlu1 %v10322_v27, %s7230_s16 }
 0x46f   : > { %v10481_v25 = vpop.permute.xlu0 %5087 }
 0x470   : > { %v10475_v14 = vpop.permute.xlu1 %5398  ;;  %12708 = vst [vmem:[#allocation30_spill] sm:$0xff] %v10481_v25  ;;  %v12722_v25 = vmov 0  }
 0x471   : > { %12707 = vst [vmem:[#allocation59_spill] sm:$0xff] %v10475_v14  ;;  %5067 = vrot.lane.b32.xlu0 %v5001_v34, %s7228_s15 }
 0x472   : > { %6459 = vperm.xlu1 %7170, %v7187_v31  }
 0x473   : > { %v10491_v5 = vpop.permute.xlu0 %5400 }
 0x474   : > { %v10485_v57 = vpop.permute.xlu1 %5201  ;;  %12709 = vst [vmem:[#allocation36_spill] sm:$0xff] %v10491_v5 }
 0x475   : > { %5657 = vrot.lane.b32.xlu0 %v5593_v47, %s7231_s17  ;;  %v7189_v47 = vld [vmem:[%s12304_s2 + $0x10] sm:$0x3] }
 0x476   : > { %6463 = vperm.xlu1 %7170, %v7188_v52  }
 0x477   : > { %v10501_v8 = vpop.permute.xlu0 %5384 }
 0x478   : > { %v10495_v40 = vpop.permute.xlu1 %5205 }
 0x479   : > { %12710 = vst [vmem:[#allocation40_spill] sm:$0xff] %v10495_v40  ;;  %5764 = vrot.lane.b32.xlu0 %v10224_v61, %s7230_s16 }
 0x47a   : > { %5655 = vrot.lane.b32.xlu1 %v5592_v1, %s7231_s17 }
 0x47b   : > { %v10509_v4 = vpop.permute.xlu0 %5059 }
 0x47c   : > { %v10503_v34 = vpop.permute.xlu1 %5386  ;;  %12711 = vst [vmem:[#allocation43_spill] sm:$0xff] %v10509_v4 }
 0x47d   : > { %5900 = vperm.xlu0 %7168, %v7189_v47  }
 0x47e   : > { %5955 = vrot.lane.b32.xlu1 %v10251_v60, %s7232_s24 }
 0x47f   : > { %v10518_v1 = vpop.permute.xlu0 %5043 }
 0x480   : > { %v10511_v14 = vpop.permute.xlu1 %5390  ;;  %12712 = vst [vmem:[#allocation47_spill] sm:$0xff] %v10518_v1 }
 0x481   : > { %7169 = vset.pattern.permute.xlu0 %v12713_v43 }
 0x482   : > { %5973 = vrot.lane.b32.xlu1 %v10403_v30, %s7232_s24  ;;  %6083 = vperm.xlu0 %7169, %v7188_v52  }
 0x483   : > { %v10525_v4 = vpop.permute.xlu0 %5207 }
 0x484   : > { %v10520_v5 = vpop.permute.xlu1 %5766  ;;  %12714 = vst [vmem:[#allocation32_spill] sm:$0xff] %v10525_v4 }
 0x486   : > { %5969 = vrot.lane.b32.xlu1 %v10322_v27, %s7232_s24  ;;  %5637 = vrot.lane.b32.xlu0 %v5583_v7, %s7231_s17 }
 0x487   : > { %v10534_v56 = vpop.permute.xlu0 %5211 }
 0x488   : > { %v10529_v39 = vpop.permute.xlu1 %5768  ;;  %12715 = vst [vmem:[#allocation54_spill] sm:$0xff] %v10534_v56 }
 0x48a   : > { %5802 = vrot.lane.b32.xlu1 %v10183_v54, %s7230_s16  ;;  %5953 = vrot.lane.b32.xlu0 %v10263_v33, %s7232_s24 }
 0x48b   : > { %v10542_v43 = vpop.permute.xlu0 %5396 }
 0x48c   : > { %v10536_v36 = vpop.permute.xlu1 %5053  ;;  %12717 = vst [vmem:[#allocation61_spill] sm:$0xff] %v10542_v43  ;;  %v12720_v43 = vld [vmem:[#allocation14_spill] sm:$0xff] }
 0x48d   : > { %12716 = vst [vmem:[#allocation26_spill] sm:$0xff] %v10536_v36  ;;  %v5603_v2 = vmul.f32 %v12720_v43, %v10169_v20 }
 0x48e   : > { %5804 = vrot.lane.b32.xlu1 %v10169_v20, %s7230_s16  ;;  %5971 = vrot.lane.b32.xlu0 %v10383_v21, %s7232_s24 }
 0x48f   : > { %v10550_v7 = vpop.permute.xlu0 %5199 }
 0x490   : > { %v10544_v52 = vpop.permute.xlu1 %5057 }
 0x491   : > { %12718 = vst [vmem:[#allocation50_spill] sm:$0xff] %v10544_v52 }
 0x492   : > { %6335 = vrot.lane.b32.xlu1 %v10251_v60, %s7233_s27  ;;  %5951 = vrot.lane.b32.xlu0 %v10224_v61, %s7232_s24 }
 0x493   : > { %v10558_v42 = vpop.permute.xlu0 %5203 }
 0x494   : > { %v10552_v56 = vpop.permute.xlu1 %5045 }
 0x495   : > { %12719 = vst [vmem:[#allocation66_spill] sm:$0xff] %v10552_v56 }
 0x496   : > { %6353 = vrot.lane.b32.xlu1 %v10403_v30, %s7233_s27  ;;  %6087 = vperm.xlu0 %7169, %v7189_v47  }
 0x497   : > { %v10565_v49 = vpop.permute.xlu0 %5388 }
 0x498   : > { %v10560_v52 = vpop.permute.xlu1 %5049 }
 0x49a   : > { %5677 = vrot.lane.b32.xlu1 %v5603_v2, %s7231_s17  ;;  %7171 = vset.pattern.permute.xlu0 %v12722_v25  ;;  %v6160_v2 = vmul.f32 %v12725_v44, %v10383_v21 }
 0x49b   : > { %4889 = vperm.xlu0 %7171, %v7187_v31   ;;  %v10573_v46 = vpop.permute.xlu0 %5392 }
 0x49c   : > { %v10567_v53 = vpop.permute.xlu1 %5641  ;;  %12723 = vst [vmem:[#allocation60_spill] sm:$0xff] %v10573_v46 }
 0x49e   : > { %6206 = vrot.lane.b32.xlu1 %v6151_v62, %s7234_s28 }
 0x49f   : > { %6333 = vrot.lane.b32.xlu0 %v10263_v33, %s7233_s27  ;;  %v10582_v10 = vpop.permute.xlu0 %5055 }
 0x4a0   : > { %v10575_v18 = vpop.permute.xlu1 %5418  ;;  %12726 = vst [vmem:[#allocation58_spill] sm:$0xff] %v10582_v10 }
 0x4a1   : > { %12724 = vst [vmem:[#allocation27_spill] sm:$0xff] %v10575_v18 }
 0x4a2   : > { %6224 = vrot.lane.b32.xlu1 %v6160_v2, %s7234_s28  ;;  %v5602_v2 = vmul.f32 %v12720_v43, %v10183_v54 }
 0x4a3   : > { %6351 = vrot.lane.b32.xlu0 %v10383_v21, %s7233_s27  ;;  %v10590_v62 = vpop.permute.xlu0 %5047 }
 0x4a4   : > { %v10584_v36 = vpop.permute.xlu1 %5402 }
 0x4a5   : > { %12727 = vst [vmem:[#allocation7_spill] sm:$0xff] %v10584_v36  ;;  %v5440_v36 = vsel %vm5438_vm5, %v10503_v34, %v10565_v49 }
 0x4a6   : > { %6331 = vrot.lane.b32.xlu1 %v10224_v61, %s7233_s27 }
 0x4a7   : > { %5675 = vrot.lane.b32.xlu0 %v5602_v2, %s7231_s17  ;;  %v10597_v33 = vpop.permute.xlu0 %5051 }
 0x4a8   : > { %v10592_v31 = vpop.permute.xlu1 %5077  ;;  %12729 = vst [vmem:[#allocation6_spill] sm:$0xff] %v10597_v33 }
 0x4a9   : > { %12728 = vst [vmem:[#allocation9_spill] sm:$0xff] %v10592_v31 }
 0x4aa   : > { %6467 = vperm.xlu1 %7170, %v7189_v47   ;;  %v6152_v47 = vmul.f32 %v12721_v55, %v10251_v60 }
 0x4ab   : > { %5800 = vrot.lane.b32.xlu0 %v10082_v32, %s7230_s16  ;;  %v10605_v10 = vpop.permute.xlu0 %5639 }
 0x4ac   : > { %v10599_v18 = vpop.permute.xlu1 %5061 }
 0x4ad   : > { %12730 = vst [vmem:[#allocation64_spill] sm:$0xff] %v10599_v18 }
 0x4ae   : > { %5770 = vrot.lane.b32.xlu1 %v10270_v0, %s7230_s16 }
 0x4af   : > { %7172 = vset.pattern.permute.xlu1 %v12722_v25  ;;  %6208 = vrot.lane.b32.xlu0 %v6152_v47, %s7234_s28  ;;  %v10615_v2 = vpop.permute.xlu0 %5231 }
 0x4b0   : > { %v10608_v31 = vpop.permute.xlu1 %5225  ;;  %12732 = vst [vmem:[#allocation16_spill] sm:$0xff] %v10615_v2  ;;  %v5586_v2 = vmul.f32 %v12673_v22, %v10270_v0 }
 0x4b1   : > { %12731 = vst [vmem:[#allocation41_spill] sm:$0xff] %v10608_v31  ;;  %v6150_v31 = vmul.f32 %v12721_v55, %v10224_v61 }
 0x4b2   : > { %5788 = vrot.lane.b32.xlu1 %v10393_v28, %s7230_s16 }
 0x4b3   : > { %6226 = vrot.lane.b32.xlu0 %v6161_v16, %s7234_s28  ;;  %v10624_v25 = vpop.permute.xlu0 %5215  ;;  %v5601_v16 = vmul.f32 %v12720_v43, %v10082_v32 }
 0x4b4   : > { %v10617_v4 = vpop.permute.xlu1 %5229  ;;  %12734 = vst [vmem:[#allocation70_spill] sm:$0xff] %v10624_v25 }
 0x4b5   : > { %12733 = vst [vmem:[#allocation15_spill] sm:$0xff] %v10617_v4  ;;  %v5595_v4 = vmul.f32 %v12703_v45, %v10393_v28 }
 0x4b6   : > { %5989 = vrot.lane.b32.xlu1 %v10183_v54, %s7232_s24 }
 0x4b7   : > { %6349 = vrot.lane.b32.xlu0 %v10322_v27, %s7233_s27  ;;  %v10633_v47 = vpop.permute.xlu0 %5227 }
 0x4b8   : > { %v10626_v60 = vpop.permute.xlu1 %5414  ;;  %12736 = vst [vmem:[#allocation72_spill] sm:$0xff] %v10633_v47 }
 0x4b9   : > { %12735 = vst [vmem:[#allocation71_spill] sm:$0xff] %v10626_v60 }
 0x4ba   : > { %6204 = vrot.lane.b32.xlu1 %v6150_v31, %s7234_s28 }
 0x4bb   : > { %5673 = vrot.lane.b32.xlu0 %v5601_v16, %s7231_s17  ;;  %v10643_v61 = vpop.permute.xlu0 %5412 }
 0x4bc   : > { %v10635_v30 = vpop.permute.xlu1 %5217  ;;  %12738 = vst [vmem:[#allocation74_spill] sm:$0xff] %v10643_v61 }
 0x4bd   : > { %12737 = vst [vmem:[#allocation73_spill] sm:$0xff] %v10635_v30 }
 0x4be   : > { %5643 = vrot.lane.b32.xlu1 %v5586_v2, %s7231_s17 }
 0x4bf   : > { %5772 = vrot.lane.b32.xlu0 %v10257_v15, %s7230_s16  ;;  %v10652_v60 = vpop.permute.xlu0 %5416 }
 0x4c0   : > { %v10645_v31 = vpop.permute.xlu1 %5221  ;;  %12740 = vst [vmem:[#allocation76_spill] sm:$0xff] %v10652_v60  ;;  %v6159_v60 = vmul.f32 %v12725_v44, %v10322_v27  ;;  %v12783_v27 = vld [vmem:[#allocation11_spill] sm:$0xff] }
 0x4c1   : > { %12739 = vst [vmem:[#allocation75_spill] sm:$0xff] %v10645_v31 }
 0x4c2   : > { %5661 = vrot.lane.b32.xlu1 %v5595_v4, %s7231_s17 }
 0x4c3   : > { %5790 = vrot.lane.b32.xlu0 %v10413_v23, %s7230_s16  ;;  %v10660_v2 = vpop.permute.xlu0 %5219 }
 0x4c4   : > { %v10654_v47 = vpop.permute.xlu1 %5406  ;;  %12742 = vst [vmem:[#allocation78_spill] sm:$0xff] %v10660_v2 }
 0x4c5   : > { %12741 = vst [vmem:[#allocation77_spill] sm:$0xff] %v10654_v47 }
 0x4c6   : > { %5987 = vrot.lane.b32.xlu1 %v10082_v32, %s7232_s24 }
 0x4c7   : > { %5991 = vrot.lane.b32.xlu0 %v10169_v20, %s7232_s24  ;;  %v10668_v4 = vpop.permute.xlu0 %5223 }
 0x4c8   : > { %v10662_v16 = vpop.permute.xlu1 %5410  ;;  %12744 = vst [vmem:[#allocation80_spill] sm:$0xff] %v10668_v4 }
 0x4c9   : > { %12743 = vst [vmem:[#allocation79_spill] sm:$0xff] %v10662_v16  ;;  %v5587_v16 = vmul.f32 %v12673_v22, %v10257_v15 }
 0x4ca   : > { %5959 = vrot.lane.b32.xlu1 %v10257_v15, %s7232_s24 }
 0x4cb   : > { %6222 = vrot.lane.b32.xlu0 %v6159_v60, %s7234_s28  ;;  %v10675_v61 = vpop.permute.xlu0 %5404  ;;  %v5596_v60 = vmul.f32 %v12703_v45, %v10413_v23 }
 0x4cc   : > { %v10677_v31 = vpop.permute.xlu1 %5786 }
 0x4cd   : > { %12745 = vst [vmem:[#allocation81_spill] sm:$0xff] %v10677_v31 }
 0x4ce   : > { %5977 = vrot.lane.b32.xlu1 %v10413_v23, %s7232_s24 }
 0x4cf   : > { %5645 = vrot.lane.b32.xlu0 %v5587_v16, %s7231_s17  ;;  %v10684_v4 = vpop.permute.xlu0 %5408 }
 0x4d0   : > { %12746 = vst [vmem:[#allocation82_spill] sm:$0xff] %v10684_v4  ;;  %v10690_v63 = vpop.permute.xlu1 %5073 }
 0x4d1   : > { %12748 = vst [vmem:[#allocation83_spill] sm:$0xff] %v10690_v63  ;;  %v6169_v63 = vmul.f32 %v12747_v37, %v10183_v54 }
 0x4d2   : > { %6371 = vrot.lane.b32.xlu1 %v10169_v20, %s7233_s27  ;;  %v6168_v20 = vmul.f32 %v12747_v37, %v10082_v32 }
 0x4d3   : > { %5663 = vrot.lane.b32.xlu0 %v5596_v60, %s7231_s17  ;;  %v10694_v6 = vpop.permute.xlu0 %5784 }
 0x4d4   : > { %v10700_v16 = vpop.permute.xlu1 %5065 }
 0x4d5   : > { %12749 = vst [vmem:[#allocation84_spill] sm:$0xff] %v10700_v16 }
 0x4d6   : > { %6244 = vrot.lane.b32.xlu1 %v6170_v48, %s7234_s28 }
 0x4d7   : > { %5957 = vrot.lane.b32.xlu0 %v10270_v0, %s7232_s24  ;;  %v10704_v4 = vpop.permute.xlu0 %5071 }
 0x4d8   : > { %12750 = vst [vmem:[#allocation85_spill] sm:$0xff] %v10704_v4  ;;  %v10709_v48 = vpop.permute.xlu1 %5069  ;;  %v5605_v4 = vmul.f32 %v12720_v43, %v10176_v13 }
 0x4d9   : > { %12751 = vst [vmem:[#allocation86_spill] sm:$0xff] %v10709_v48 }
 0x4da   : > { %5806 = vrot.lane.b32.xlu1 %v10192_v3, %s7230_s16 }
 0x4db   : > { %5975 = vrot.lane.b32.xlu0 %v10393_v28, %s7232_s24  ;;  %v10715_v60 = vpop.permute.xlu0 %5075 }
 0x4dc   : > { %12752 = vst [vmem:[#allocation87_spill] sm:$0xff] %v10715_v60 }
 0x4de   : > { %6240 = vrot.lane.b32.xlu1 %v6168_v20, %s7234_s28  ;;  %v10722_v20 = vpop.permute.xlu1 %5659 }
 0x4df   : > { %6369 = vrot.lane.b32.xlu0 %v10183_v54, %s7233_s27  ;;  %12753 = vst [vmem:[#allocation88_spill] sm:$0xff] %v10722_v20  ;;  %v10726_v48 = vpop.permute.xlu0 %5063  ;;  %v6154_v54 = vmul.f32 %v12721_v55, %v10257_v15 }
 0x4e0   : > { %12754 = vst [vmem:[#allocation89_spill] sm:$0xff] %v10726_v48 }
 0x4e2   : > { %6339 = vrot.lane.b32.xlu1 %v10257_v15, %s7233_s27  ;;  %v10733_v60 = vpop.permute.xlu1 %5782 }
 0x4e3   : > { %6242 = vrot.lane.b32.xlu0 %v6169_v63, %s7234_s28  ;;  %12755 = vst [vmem:[#allocation90_spill] sm:$0xff] %v10733_v60  ;;  %v10738_v63 = vpop.permute.xlu0 %5067 }
 0x4e4   : > { %12756 = vst [vmem:[#allocation91_spill] sm:$0xff] %v10738_v63 }
 0x4e6   : > { %6357 = vrot.lane.b32.xlu1 %v10413_v23, %s7233_s27  ;;  %v5604_v23 = vmul.f32 %v12720_v43, %v10192_v3 }
 0x4e7   : > { %6367 = vrot.lane.b32.xlu0 %v10082_v32, %s7233_s27  ;;  %v10749_v15 = vpop.permute.xlu0 %5657 }
 0x4e8   : > { %12759 = vst [vmem:[#allocation94_spill] sm:$0xff] %v10749_v15 }
 0x4ea   : > { %5681 = vrot.lane.b32.xlu1 %v5605_v4, %s7231_s17 }
 0x4eb   : > { %5808 = vrot.lane.b32.xlu0 %v10176_v13, %s7230_s16 }
 0x4ee   : > { %6212 = vrot.lane.b32.xlu1 %v6154_v54, %s7234_s28  ;;  %v6153_v54 = vmul.f32 %v12721_v55, %v10270_v0 }
 0x4ef   : > { %6337 = vrot.lane.b32.xlu0 %v10270_v0, %s7233_s27  ;;  %v5598_v0 = vmul.f32 %v12703_v45, %v10373_v24 }
 0x4f1   : > { %v10742_v41 = vpop.permute.xlu1 %6459 }
 0x4f2   : > { %12757 = vst [vmem:[#allocation92_spill] sm:$0xff] %v10742_v41  ;;  %6230 = vrot.lane.b32.xlu1 %v6163_v11, %s7234_s28  ;;  %v10762_v11 = vpop.permute.xlu0 %5764 }
 0x4f3   : > { %6355 = vrot.lane.b32.xlu0 %v10393_v28, %s7233_s27  ;;  %12761 = vst [vmem:[#allocation96_spill] sm:$0xff] %v10762_v11 }
 0x4f5   : > { %v10747_v32 = vpop.permute.xlu1 %6463 }
 0x4f6   : > { %12758 = vst [vmem:[#allocation93_spill] sm:$0xff] %v10747_v32  ;;  %5776 = vrot.lane.b32.xlu1 %v10231_v26, %s7230_s16 }
 0x4f7   : > { %5679 = vrot.lane.b32.xlu0 %v5604_v23, %s7231_s17  ;;  %v6162_v23 = vmul.f32 %v12725_v44, %v10393_v28 }
 0x4f9   : > { %v10757_v4 = vpop.permute.xlu1 %5655 }
 0x4fa   : > { %12760 = vst [vmem:[#allocation95_spill] sm:$0xff] %v10757_v4  ;;  %5794 = vrot.lane.b32.xlu1 %v10373_v24, %s7230_s16 }
 0x4fb   : > { %6210 = vrot.lane.b32.xlu0 %v6153_v54, %s7234_s28 }
 0x4fc   : > { %v10771_v50 = vpop.permute.xlu0 %5900 }
 0x4fd   : > { %v10766_v63 = vpop.permute.xlu1 %5955  ;;  %12763 = vst [vmem:[#allocation98_spill] sm:$0xff] %v10771_v50 }
 0x4fe   : > { %12762 = vst [vmem:[#allocation97_spill] sm:$0xff] %v10766_v63  ;;  %5995 = vrot.lane.b32.xlu1 %v10176_v13, %s7232_s24 }
 0x4ff   : > { %6228 = vrot.lane.b32.xlu0 %v6162_v23, %s7234_s28 }
 0x501   : > { %v10777_v19 = vpop.permute.xlu1 %5973  ;;  %v10783_v33 = vpop.permute.xlu0 %6083 }
 0x502   : > { %12764 = vst [vmem:[#allocation99_spill] sm:$0xff] %v10777_v19  ;;  %5649 = vrot.lane.b32.xlu1 %v5589_v58, %s7231_s17  ;;  %12765 = vst [vmem:[#allocation100_spill] sm:$0xff] %v10783_v33 }
 0x503   : > { %5774 = vrot.lane.b32.xlu0 %v10238_v38, %s7230_s16 }
 0x505   : > { %v10785_v54 = vpop.permute.xlu1 %5969  ;;  %v10790_v50 = vpop.permute.xlu0 %5637 }
 0x506   : > { %12766 = vst [vmem:[#allocation101_spill] sm:$0xff] %v10785_v54  ;;  %5667 = vrot.lane.b32.xlu1 %v5598_v0, %s7231_s17  ;;  %12767 = vst [vmem:[#allocation102_spill] sm:$0xff] %v10790_v50  ;;  %v4803_v0 = vlaneseq  ;;  %v5597_v50 = vmul.f32 %v12703_v45, %v10349_v59 }
 0x507   : > { %5792 = vrot.lane.b32.xlu0 %v10349_v59, %s7230_s16 }
 0x508   : > { %v10814_v4 = vand.u32 127, %v4803_v0 }
 0x509   : > { %v10792_v28 = vpop.permute.xlu1 %5802  ;;  %v10798_v58 = vpop.permute.xlu0 %5953 }
 0x50a   : > { %12768 = vst [vmem:[#allocation103_spill] sm:$0xff] %v10792_v28  ;;  %5963 = vrot.lane.b32.xlu1 %v10231_v26, %s7232_s24  ;;  %12769 = vst [vmem:[#allocation104_spill] sm:$0xff] %v10798_v58  ;;  %v5588_v28 = vmul.f32 %v12673_v22, %v10238_v38  ;;  %v4805_v40 = vadd.s32 128, %v10814_v4  ;;  %v5099_v22 = vsel %vm5097_vm6, %v10552_v56, %v10590_v62  ;;  %v4806_v25 = vadd.s32 256, %v10814_v4 }
 0x50b   : > { %5993 = vrot.lane.b32.xlu0 %v10192_v3, %s7232_s24  ;;  %12772 = vst [vmem:[#allocation107_spill] sm:$0xff] %v10814_v4 }
 0x50c   : > { %v4813_v0 = vand.u32 31, %v4805_v40 }
 0x50d   : > { %v10800_v23 = vpop.permute.xlu1 %5804  ;;  %v10806_v46 = vpop.permute.xlu0 %5971 }
 0x50e   : > { %12770 = vst [vmem:[#allocation105_spill] sm:$0xff] %v10800_v23  ;;  %5981 = vrot.lane.b32.xlu1 %v10373_v24, %s7232_s24  ;;  %v6172_v23 = vmul.f32 %v12747_v37, %v10176_v13  ;;  %vm10839_vm3 = vcmp.gt.s32.totalorder %v4813_v0, 0  ;;  %vm10845_vm4 = vcmp.lt.s32.totalorder %v4813_v0, 31 }
 0x50f   : > { %5647 = vrot.lane.b32.xlu0 %v5588_v28, %s7231_s17  ;;  %v5488_v1 = vsel %vm10839_vm3, %v5440_v36, 0.0  ;;  %v6171_v36 = vmul.f32 %v12747_v37, %v10192_v3  ;;  %v12880_v37 = vld [vmem:[#allocation84_spill] sm:$0xff] }
 0x511   : > { %v10810_v29 = vpop.permute.xlu1 %6335  ;;  %v10820_v54 = vpop.permute.xlu0 %5951 }
 0x512   : > { %12771 = vst [vmem:[#allocation106_spill] sm:$0xff] %v10810_v29  ;;  %6375 = vrot.lane.b32.xlu1 %v10176_v13, %s7233_s27  ;;  %12773 = vst [vmem:[#allocation108_spill] sm:$0xff] %v10820_v54  ;;  %v4837_v13 = vld [vmem:[#allocation3 + $0x8] sm:$0xff]  ;;  %v5253_v54 = vsel %vm5251_vm2, %v10550_v7, %v10485_v57 }
 0x513   : > { %5665 = vrot.lane.b32.xlu0 %v5597_v50, %s7231_s17  ;;  %v5301_v45 = vsel %vm10845_vm4, %v5253_v54, 0.0 }
 0x514   : > { %v5337_v32 = vmul.f32 %v12783_v27, %v5301_v45 }
 0x515   : > { %v10824_v60 = vpop.permute.xlu1 %6353  ;;  %v10828_v11 = vpop.permute.xlu0 %6087 }
 0x516   : > { %12774 = vst [vmem:[#allocation109_spill] sm:$0xff] %v10824_v60  ;;  %6248 = vrot.lane.b32.xlu1 %v6172_v23, %s7234_s28  ;;  %12775 = vst [vmem:[#allocation110_spill] sm:$0xff] %v10828_v11  ;;  %v12777_v23 = vmov 0 }
 0x517   : > { %5961 = vrot.lane.b32.xlu0 %v10238_v38, %s7232_s24  ;;  %v12778_v23 = vsel %vm10839_vm3, 4294967295, %v12777_v23 }
 0x518   : > { %12779 = vst [vmem:[#allocation112_spill] sm:$0xff] %v12778_v23 }
 0x519   : > { %v10830_v28 = vpop.permute.xlu1 %5677 }
 0x51a   : > { %12776 = vst [vmem:[#allocation111_spill] sm:$0xff] %v10830_v28  ;;  %5812 = vrot.lane.b32.xlu1 %v10099_v51, %s7230_s16  ;;  %v10849_v11 = vpop.permute.xlu0 %4889  ;;  %v4861_v28 = vsel %vm10839_vm3, %v4837_v13, 0.0  ;;  %v4869_v13 = vsel %vm10839_vm3, %v10383_v21, 0.0  ;;  %v12784_v21 = vld [vmem:[#allocation4_spill] sm:$0xff] }
 0x51b   : > { %5979 = vrot.lane.b32.xlu0 %v10349_v59, %s7232_s24  ;;  %v4903_v0 = vmul.f32 %v10849_v11, %v4861_v28  ;;  %v5261_v28 = vsel %vm5251_vm2, %v10635_v30, %v10660_v2  ;;  %v4911_v45 = vmul.f32 %v12784_v21, %v4869_v13  ;;  %v5607_v2 = vmul.f32 %v12720_v43, %v10099_v51 }
 0x51c   : > { %v4812_v30 = vand.u32 31, %v10814_v4 }
 0x51d   : > { %v10843_v40 = vpop.permute.xlu1 %6206  ;;  %v5147_v54 = vadd.f32 %v5099_v22, %v4903_v0  ;;  %v5107_v22 = vsel %vm5097_vm6, %v10726_v48, %v10700_v16  ;;  %v4814_v16 = vand.u32 31, %v4806_v25  ;;  %v12786_v48 = vld [vmem:[#allocation20_spill] sm:$0xff] }
 0x51e   : > { %6343 = vrot.lane.b32.xlu1 %v10231_v26, %s7233_s27  ;;  %v10876_v41 = vpop.permute.xlu0 %6333  ;;  %v5524_v27 = vmul.f32 %v12786_v48, %v5488_v1  ;;  %v5155_v13 = vadd.f32 %v5107_v22, %v4911_v45  ;;  %v12787_v1 = vld [vmem:[#allocation8_spill] sm:$0xff]  ;;  %vm10915_vm15 = vcmp.gt.s32.totalorder %v4812_v30, 0  ;;  %vm10945_vm1 = vcmp.lt.s32.totalorder %v4812_v30, 31 }
 0x51f   : > { %6373 = vrot.lane.b32.xlu0 %v10192_v3, %s7233_s27  ;;  %v5361_v0 = vadd.f32 %v5337_v32, %v5147_v54  ;;  %v5448_v32 = vsel %vm5438_vm5, %v10675_v61, %v10654_v47  ;;  %v6156_v54 = vmul.f32 %v12721_v55, %v10231_v26  ;;  %v5820_v3 = vsel %vm5818_vm7, %v10520_v5, %v10529_v39 }
 0x520   : > { %v5496_v22 = vsel %vm10839_vm3, %v5448_v32, 0.0  ;;  %vm10919_vm0 = vcmp.gt.s32.totalorder %v4814_v16, 0  ;;  %v12791_v26 = vmov 0  ;;  %v5828_v32 = vsel %vm5818_vm7, %v10694_v6, %v10677_v31 }
 0x521   : > { %v10869_v18 = vpop.permute.xlu1 %6224  ;;  %v12792_v26 = vsel %vm10919_vm0, 4294967295, %v12791_v26  ;;  %vm10949_vm9 = vcmp.lt.s32.totalorder %v4814_v16, 31  ;;  %v5876_v30 = vsel %vm10845_vm4, %v5828_v32, 0.0 }
 0x522   : > { %12782 = vst [vmem:[#allocation113_spill] sm:$0xff] %v10869_v18  ;;  %6361 = vrot.lane.b32.xlu1 %v10373_v24, %s7233_s27  ;;  %v5309_v18 = vsel %vm10845_vm4, %v5261_v28, 0.0  ;;  %v10901_v51 = vpop.permute.xlu0 %6351  ;;  %v5548_v28 = vadd.f32 %v5524_v27, %v5361_v0  ;;  %12793 = vst [vmem:[#allocation114_spill] sm:$0xff] %v12792_v26  ;;  %v4838_v27 = vld [vmem:[#allocation3 + $0x10] sm:$0xff]  ;;  %v5693_v0 = vsel %vm5691_vm8, %v10605_v10, %v10567_v53  ;;  %v12815_v26 = vld [vmem:[#allocation70_spill] sm:$0xff] }
 0x523   : > { %6246 = vrot.lane.b32.xlu0 %v6171_v36, %s7234_s28  ;;  %v5345_v25 = vmul.f32 %v12787_v1, %v5309_v18  ;;  %v5868_v18 = vsel %vm10845_vm4, %v5820_v3, 0.0  ;;  %v6007_v3 = vsel %vm6005_vm14, %v10798_v58, %v10766_v63  ;;  %v4862_v31 = vsel %vm10919_vm0, %v4838_v27, 0.0  ;;  %v12800_v63 = vld [vmem:[#allocation22_spill] sm:$0xff] }
 0x524   : > { %v4904_v23 = vmul.f32 %v10849_v11, %v4862_v31  ;;  %v5252_v31 = vsel %vm5251_vm2, %v10445_v17, %v10550_v7 }
 0x525   : > { %v10895_v56 = vpop.permute.xlu1 %6331  ;;  %v5369_v36 = vadd.f32 %v5345_v25, %v5155_v13  ;;  %v6165_v13 = vmul.f32 %v12725_v44, %v10373_v24  ;;  %v12795_v25 = vld [vmem:[#allocation17_spill] sm:$0xff]  ;;  %v5701_v24 = vsel %vm5691_vm8, %v10749_v15, %v10722_v20 }
 0x526   : > { %12785 = vst [vmem:[#allocation4_spill] sm:$0xff] %v10895_v56  ;;  %5685 = vrot.lane.b32.xlu1 %v5607_v2, %s7231_s17  ;;  %v10923_v47 = vpop.permute.xlu0 %5675  ;;  %v4836_v20 = vld [vmem:[#allocation3] sm:$0xff]  ;;  %v6055_v56 = vsel %vm10839_vm3, %v6007_v3, 0.0 }
 0x527   : > { %12794 = vst [vmem:[#allocation115_spill] sm:$0xff] %v10923_v47  ;;  %5810 = vrot.lane.b32.xlu0 %v10153_v9, %s7230_s16  ;;  %v5741_v47 = vadd.f32 %v5693_v0, %v5548_v28 }
 0x529   : > { %v10913_v45 = vpop.permute.xlu1 %6467 }
 0x52a   : > { %12788 = vst [vmem:[#allocation8_spill] sm:$0xff] %v10913_v45  ;;  %6216 = vrot.lane.b32.xlu1 %v6156_v54, %s7234_s28  ;;  %v5532_v54 = vmul.f32 %v12795_v25, %v5496_v22  ;;  %v6015_v45 = vsel %vm6005_vm14, %v10806_v46, %v10777_v19  ;;  %v5904_v19 = vmul.f32 %v12800_v63, %v5868_v18  ;;  %v10963_v0 = vpop.permute.xlu0 %5800 }
 0x52b   : > { %12801 = vst [vmem:[#allocation116_spill] sm:$0xff] %v10963_v0  ;;  %v6063_v27 = vsel %vm10839_vm3, %v6015_v45, 0.0  ;;  %6341 = vrot.lane.b32.xlu0 %v10238_v38, %s7233_s27  ;;  %v4860_v0 = vsel %vm10915_vm15, %v4836_v20, 0.0  ;;  %v5441_v20 = vsel %vm5438_vm5, %v10565_v49, %v10511_v14 }
 0x52c   : > { %v5556_v28 = vadd.f32 %v5532_v54, %v5369_v36  ;;  %v5928_v32 = vadd.f32 %v5904_v19, %v5741_v47  ;;  %v12802_v54 = vld [vmem:[#allocation23_spill] sm:$0xff]  ;;  %v12804_v36 = vld [vmem:[#allocation24_spill] sm:$0xff]  ;;  %v6099_v58 = vmul.f32 %v10783_v33, %v6063_v27  ;;  %v6387_v19 = vsel %vm6385_vm10, %v10876_v41, %v10810_v29 }
 0x52d   : > { %v10956_v22 = vpop.permute.xlu1 %5770  ;;  %v5912_v45 = vmul.f32 %v12802_v54, %v5876_v30  ;;  %v6091_v15 = vmul.f32 %v12804_v36, %v6055_v56  ;;  %v5100_v30 = vsel %vm5097_vm6, %v10590_v62, %v10560_v52  ;;  %v4902_v7 = vmul.f32 %v10849_v11, %v4860_v0 }
 0x52e   : > { %v10968_v16 = vsel %vm5818_vm7, %v10529_v39, %v10956_v22  ;;  %6234 = vrot.lane.b32.xlu1 %v6165_v13, %s7234_s28  ;;  %v5254_v39 = vsel %vm5251_vm2, %v10485_v57, %v10558_v42  ;;  %v5749_v18 = vadd.f32 %v5701_v24, %v5556_v28  ;;  %v10984_v13 = vadd.s32 384, %v10814_v4  ;;  %v11000_v47 = vpop.permute.xlu0 %6208 }
 0x52f   : > { %v6395_v57 = vsel %vm6385_vm10, %v10901_v51, %v10824_v60  ;;  %12805 = vst [vmem:[#allocation118_spill] sm:$0xff] %v11000_v47  ;;  %v5302_v56 = vsel %vm10949_vm9, %v5254_v39, 0.0  ;;  %v6260_v24 = vsel %vm6258_vm11, %v10843_v40, %v11000_v47  ;;  %6359 = vrot.lane.b32.xlu0 %v10349_v59, %s7233_s27  ;;  %v6115_v17 = vadd.f32 %v6091_v15, %v5928_v32  ;;  %v11025_v39 = vld [vmem:[#allocation3 + $0xb8] sm:$0x3] }
 0x530   : > { %v5936_v28 = vadd.f32 %v5912_v45, %v5749_v18  ;;  %v6435_v27 = vsel %vm10845_vm4, %v6387_v19, 0.0  ;;  %v6443_v49 = vsel %vm10845_vm4, %v6395_v57, 0.0  ;;  %v5606_v47 = vmul.f32 %v11025_v39, %v12720_v43  ;;  %v12807_v45 = vld [vmem:[#allocation11_spill] sm:$0xff] }
 0x531   : > { %v10987_v3 = vpop.permute.xlu1 %5788  ;;  %v5148_v29 = vadd.f32 %v5100_v30, %v4904_v23  ;;  %v5439_v62 = vsel %vm5438_vm5, %v10501_v8, %v10503_v34  ;;  %v5300_v15 = vsel %vm10945_vm1, %v5252_v31, 0.0  ;;  %v6308_v0 = vadd.f32 %v6260_v24, %v6115_v17  ;;  %v12808_v23 = vld [vmem:[#allocation66_spill] sm:$0xff]  ;;  %v12809_v30 = vld [vmem:[#allocation47_spill] sm:$0xff]  ;;  %v12810_v8 = vld [vmem:[#allocation113_spill] sm:$0xff] }
 0x532   : > { %12803 = vst [vmem:[#allocation117_spill] sm:$0xff] %v10987_v3  ;;  %5780 = vrot.lane.b32.xlu1 %v10218_v12, %s7230_s16  ;;  %v6123_v18 = vadd.f32 %v6099_v58, %v5936_v28  ;;  %v11036_v32 = vpop.permute.xlu0 %6226  ;;  %v5338_v19 = vmul.f32 %v12807_v45, %v5302_v56  ;;  %v5489_v57 = vsel %vm10919_vm0, %v5441_v20, 0.0  ;;  %v5098_v3 = vsel %vm5097_vm6, %v12809_v30, %v12808_v23  ;;  %v12811_v58 = vld [vmem:[#allocation92_spill] sm:$0xff]  ;;  %v12812_v24 = vld [vmem:[#allocation93_spill] sm:$0xff] }
 0x533   : > { %12806 = vst [vmem:[#allocation119_spill] sm:$0xff] %v11036_v32  ;;  %v6268_v34 = vsel %vm6258_vm11, %v12810_v8, %v11036_v32  ;;  %5683 = vrot.lane.b32.xlu0 %v5606_v47, %s7231_s17  ;;  %v6471_v31 = vmul.f32 %v12811_v58, %v6435_v27  ;;  %v6479_v28 = vmul.f32 %v12812_v24, %v6443_v49  ;;  %v5487_v56 = vsel %vm10915_vm15, %v5439_v62, 0.0  ;;  %v12813_v20 = vld [vmem:[#allocation29_spill] sm:$0xff] }
 0x534   : > { %v6316_v17 = vadd.f32 %v6268_v34, %v6123_v18  ;;  %v5146_v4 = vadd.f32 %v5098_v3, %v4902_v7  ;;  %v4868_v43 = vsel %vm10915_vm15, %v12813_v20, 0.0  ;;  %v6155_v23 = vmul.f32 %v12721_v55, %v10238_v38  ;;  %v12814_v27 = vld [vmem:[#allocation73_spill] sm:$0xff]  ;;  %v12817_v20 = vld [vmem:[#allocation64_spill] sm:$0xff] }
 0x535   : > { %v11029_v60 = vpop.permute.xlu1 %5989  ;;  %v5362_v32 = vadd.f32 %v5338_v19, %v5148_v29  ;;  %v5336_v47 = vmul.f32 %v12807_v45, %v5300_v15  ;;  %v5260_v49 = vsel %vm5251_vm2, %v12815_v26, %v12814_v27  ;;  %v6495_v7 = vadd.f32 %v6471_v31, %v6308_v0  ;;  %v11067_v18 = vld [vmem:[#allocation3 + $0xc0] sm:$0x3]  ;;  %v12818_v0 = vld [vmem:[#allocation12_spill] sm:$0xff] }
 0x536   : > { %5798 = vrot.lane.b32.xlu1 %v10313_v35, %s7230_s16  ;;  %v11065_v3 = vpop.permute.xlu0 %6349  ;;  %v6503_v62 = vadd.f32 %v6479_v28, %v6316_v17  ;;  %v5525_v38 = vmul.f32 %v12786_v48, %v5489_v57  ;;  %v12816_v34 = vld [vmem:[#allocation89_spill] sm:$0xff]  ;;  %v4910_v15 = vmul.f32 %v12784_v21, %v4868_v43  ;;  %v5591_v31 = vmul.f32 %v12818_v0, %v10218_v12  ;;  %v12819_v43 = vld [vmem:[#allocation7_spill] sm:$0xff] }
 0x537   : > { %v5106_v29 = vsel %vm5097_vm6, %v12817_v20, %v12816_v34  ;;  %6214 = vrot.lane.b32.xlu0 %v6155_v23, %s7234_s28  ;;  %v5360_v19 = vadd.f32 %v5336_v47, %v5146_v4  ;;  %v5523_v28 = vmul.f32 %v12786_v48, %v5487_v56  ;;  %v5308_v17 = vsel %vm10945_vm1, %v5260_v49, 0.0  ;;  %v12821_v49 = vld [vmem:[#allocation96_spill] sm:$0xff] }
 0x538   : > { %v7106_v26 = vpack.c.bf16 %v6503_v62, %v6495_v7  ;;  %v6164_v57 = vmul.f32 %v12725_v44, %v10349_v59  ;;  %v5549_v34 = vadd.f32 %v5525_v38, %v5362_v32  ;;  %v4815_v23 = vand.u32 31, %v10984_v13 }
 0x539   : > { %v11059_v30 = vpop.permute.xlu1 %6204  ;;  %v5447_v4 = vsel %vm5438_vm5, %v12819_v43, %v10675_v61  ;;  %v5154_v47 = vadd.f32 %v5106_v29, %v4910_v15  ;;  %v12820_v59 = vsel %vm10949_vm9, %v10968_v16, 0.0  ;;  %v5344_v61 = vmul.f32 %v12787_v1, %v5308_v17 }
 0x53a   : > { %5999 = vrot.lane.b32.xlu1 %v11067_v18, %s7232_s24  ;;  %7107 = vmatprep.subr.bf16.mxu1 %v7106_v26  ;;  %v11090_v12 = vpop.permute.xlu0 %5673  ;;  %v5905_v13 = vmul.f32 %v12800_v63, %v12820_v59  ;;  %v5819_v7 = vsel %vm5818_vm7, %v12821_v49, %v10520_v5  ;;  %v5547_v62 = vadd.f32 %v5523_v28, %v5360_v19  ;;  %v5495_v20 = vsel %vm10915_vm15, %v5447_v4, 0.0  ;;  %v12827_v19 = vld [vmem:[#allocation90_spill] sm:$0xff]  ;;  %v4839_v28 = vld [vmem:[#allocation3 + $0x18] sm:$0xff] }
 0x53b   : > { %6232 = vrot.lane.b32.xlu0 %v6164_v57, %s7234_s28  ;;  %vm11114_vm12 = vcmp.lt.s32.totalorder %v4815_v23, 31  ;;  %vm11118_vm13 = vcmp.gt.s32.totalorder %v4815_v23, 0  ;;  %v5368_v5 = vadd.f32 %v5344_v61, %v5154_v47  ;;  %v5867_v17 = vsel %vm10945_vm1, %v5819_v7, 0.0  ;;  %v12829_v57 = vld [vmem:[#allocation102_spill] sm:$0xff]  ;;  %v12830_v23 = vld [vmem:[#allocation101_spill] sm:$0xff]  ;;  %v11141_v4 = vld [vmem:[#allocation3 + $0x38] sm:$0xff] }
 0x53c   : > { %v6014_v43 = vsel %vm6005_vm14, %v12830_v23, %v10806_v46  ;;  %v5531_v47 = vmul.f32 %v12795_v25, %v5495_v20  ;;  %v12832_v59 = vld [vmem:[#allocation108_spill] sm:$0xff]  ;;  %v12834_v49 = vld [vmem:[#allocation94_spill] sm:$0xff]  ;;  %v12835_v7 = vld [vmem:[#allocation95_spill] sm:$0xff]  ;;  %v4863_v20 = vsel %vm11118_vm13, %v4839_v28, 0.0 }
 0x53d   : > { %v11084_v27 = vpop.permute.xlu1 %5643 }
 0x53e   : > { %v5694_v56 = vsel %vm5691_vm8, %v10567_v53, %v11084_v27  ;;  %5653 = vrot.lane.b32.xlu1 %v5591_v31, %s7231_s17  ;;  %v12822_v53 = vld [vmem:[#allocation13_spill] sm:$0xff]  ;;  %v11125_v31 = vpop.permute.xlu0 %5772  ;;  %v5555_v23 = vadd.f32 %v5531_v47, %v5368_v5  ;;  %v12837_v47 = vld [vmem:[#allocation60_spill] sm:$0xff] }
 0x53f   : > { %v5742_v32 = vadd.f32 %v5694_v56, %v5549_v34  ;;  %v5600_v38 = vmul.f32 %v12822_v53, %v10313_v35  ;;  %v5827_v35 = vsel %vm5818_vm7, %v12827_v19, %v10694_v6  ;;  %12828 = vst [vmem:[#allocation11_spill] sm:$0xff] %v11125_v31  ;;  %v5692_v34 = vsel %vm5691_vm8, %v12829_v57, %v10605_v10  ;;  %v12831_v56 = vld [vmem:[#allocation104_spill] sm:$0xff] }
 0x540   : > { %v11139_v6 = vsel %vm5818_vm7, %v10956_v22, %v11125_v31  ;;  %5778 = vrot.lane.b32.xlu0 %v11141_v4, %s7230_s16  ;;  %v6006_v10 = vsel %vm6005_vm14, %v12832_v59, %v12831_v56  ;;  %v5875_v61 = vsel %vm10945_vm1, %v5827_v35, 0.0  ;;  %v5903_v57 = vmul.f32 %v12800_v63, %v5867_v17  ;;  %v11170_v35 = vld [vmem:[#allocation3 + $0xd0] sm:$0x3]  ;;  %v12836_v56 = vld [vmem:[#allocation53_spill] sm:$0xff] }
 0x541   : > { %v11110_v29 = vadd.f32 %v5905_v13, %v5742_v32  ;;  %v11112_v16 = vpop.permute.xlu1 %5661  ;;  %v5740_v13 = vadd.f32 %v5692_v34, %v5547_v62  ;;  %v12833_v32 = vld [vmem:[#allocation40_spill] sm:$0xff]  ;;  %v6062_v62 = vsel %vm10915_vm15, %v6014_v43, 0.0  ;;  %v6054_v28 = vsel %vm10915_vm15, %v6006_v10, 0.0 }
 0x542   : > { %5671 = vrot.lane.b32.xlu1 %v5600_v38, %s7231_s17  ;;  %v5255_v22 = vsel %vm5251_vm2, %v10558_v42, %v12833_v32  ;;  %v5700_v38 = vsel %vm5691_vm8, %v12835_v7, %v12834_v49  ;;  %v11167_v34 = vpop.permute.xlu0 %5790  ;;  %v4905_v42 = vmul.f32 %v10849_v11, %v4863_v20  ;;  %v5442_v59 = vsel %vm5438_vm5, %v10511_v14, %v12837_v47  ;;  %v12838_v49 = vld [vmem:[#allocation6_spill] sm:$0xff] }
 0x543   : > { %v5303_v5 = vsel %vm11114_vm12, %v5255_v22, 0.0  ;;  %v5748_v17 = vadd.f32 %v5700_v38, %v5555_v23  ;;  %v5927_v43 = vadd.f32 %v5903_v57, %v5740_v13  ;;  %v5101_v7 = vsel %vm5097_vm6, %v10560_v52, %v12838_v49  ;;  %v12840_v22 = vld [vmem:[#allocation4_spill] sm:$0xff]  ;;  %v11199_v52 = vld [vmem:[#allocation3 + $0x40] sm:$0xff] }
 0x544   : > { %5796 = vrot.lane.b32.xlu0 %v12836_v56, %s7230_s16  ;;  %v5911_v20 = vmul.f32 %v12802_v54, %v5875_v61  ;;  %v6098_v10 = vmul.f32 %v10783_v33, %v6062_v62  ;;  %v6090_v31 = vmul.f32 %v12804_v36, %v6054_v28  ;;  %v6386_v13 = vsel %vm6385_vm10, %v12840_v22, %v10876_v41 }
 0x545   : > { %v11162_v19 = vpop.permute.xlu1 %5987  ;;  %v6394_v14 = vsel %vm6385_vm10, %v11065_v3, %v10901_v51  ;;  %v5149_v57 = vadd.f32 %v5101_v7, %v4905_v42  ;;  %v6259_v61 = vsel %vm6258_vm11, %v11059_v30, %v10843_v40  ;;  %v5339_v41 = vmul.f32 %v12807_v45, %v5303_v5  ;;  %v4853_v30 = vld [vmem:[#allocation3 + $0x98] sm:$0x3] }
 0x546   : > { %5436 = vrot.lane.b32.xlu1 %v11170_v35, %s7227_s14  ;;  %v11197_v38 = vpop.permute.xlu0 %5991  ;;  %v5935_v23 = vadd.f32 %v5911_v20, %v5748_v17  ;;  %v6114_v62 = vadd.f32 %v6090_v31, %v5927_v43  ;;  %v5490_v51 = vsel %vm11118_vm13, %v5442_v59, 0.0  ;;  %v6434_v3 = vsel %vm10945_vm1, %v6386_v13, 0.0  ;;  %v11219_v31 = vld [vmem:[#allocation3 + $0x88] sm:$0xff]  ;;  %v4852_v59 = vld [vmem:[#allocation3 + $0x90] sm:$0x3] }
 0x547   : > { %12841 = vst [vmem:[#allocation47_spill] sm:$0xff] %v11197_v38  ;;  %v6442_v42 = vsel %vm10945_vm1, %v6394_v14, 0.0  ;;  %v5590_v28 = vmul.f32 %v11141_v4, %v12818_v0  ;;  %v5363_v17 = vadd.f32 %v5339_v41, %v5149_v57  ;;  %v5526_v0 = vmul.f32 %v12786_v48, %v5490_v51 }
 0x548   : > { %5997 = vrot.lane.b32.xlu0 %v11025_v39, %s7232_s24  ;;  %v6307_v7 = vadd.f32 %v6259_v61, %v6114_v62  ;;  %v6122_v22 = vadd.f32 %v6098_v10, %v5935_v23  ;;  %v6470_v20 = vmul.f32 %v12811_v58, %v6434_v3  ;;  %v6478_v13 = vmul.f32 %v12812_v24, %v6442_v42  ;;  %v12844_v23 = vld [vmem:[#allocation28_spill] sm:$0xff]  ;;  %v12847_v42 = vld [vmem:[#allocation21_spill] sm:$0xff] }
 0x549   : > { %v11188_v46 = vpop.permute.xlu1 %5959  ;;  %v4877_v57 = vsel %vm10839_vm3, %v4853_v30, 0.0  ;;  %v5599_v61 = vmul.f32 %v12822_v53, %v12836_v56  ;;  %v5550_v51 = vadd.f32 %v5526_v0, %v5363_v17  ;;  %v4876_v3 = vsel %vm10915_vm15, %v4852_v59, 0.0  ;;  %v12848_v30 = vld [vmem:[#allocation67_spill] sm:$0xff]  ;;  %v12850_v17 = vld [vmem:[#allocation5_spill] sm:$0xff] }
 0x54a   : > { %12839 = vst [vmem:[#allocation66_spill] sm:$0xff] %v11188_v46  ;;  %5967 = vrot.lane.b32.xlu1 %v11199_v52, %s7232_s24  ;;  %v6223_v5 = vpop.permute.xlu0 %6222  ;;  %v5115_v53 = vsel %vm5097_vm6, %v12848_v30, %v12847_v42  ;;  %v12851_v0 = vsel %vm11114_vm12, %v11139_v6, 0.0 }
 0x54b   : > { %v6267_v43 = vsel %vm6258_vm11, %v6223_v5, %v12810_v8  ;;  %v12845_v8 = vld [vmem:[#allocation68_spill] sm:$0xff]  ;;  %v5906_v59 = vmul.f32 %v12800_v63, %v12851_v0 }
 0x54c   : > { %5651 = vrot.lane.b32.xlu0 %v5590_v28, %s7231_s17  ;;  %v6315_v10 = vadd.f32 %v6267_v43, %v6122_v22  ;;  %v5269_v62 = vsel %vm5251_vm2, %v12845_v8, %v12844_v23  ;;  %v6494_v28 = vadd.f32 %v6470_v20, %v6307_v7  ;;  %v12849_v7 = vld [vmem:[#allocation18_spill] sm:$0xff]  ;;  %v4919_v43 = vmul.f32 %v12850_v17, %v4877_v57 }
 0x54d   : > { %v11217_v40 = vpop.permute.xlu1 %5977  ;;  %v6174_v22 = vmul.f32 %v11067_v18, %v12849_v7  ;;  %v12856_v23 = vld [vmem:[#allocation38_spill] sm:$0xff] }
 0x54e   : > { %5985 = vrot.lane.b32.xlu1 %v11219_v31, %s7232_s24  ;;  %v6502_v5 = vadd.f32 %v6478_v13, %v6315_v10  ;;  %v11238_v48 = vpop.permute.xlu0 %5645  ;;  %v12852_v10 = vld [vmem:[#allocation35_spill] sm:$0xff]  ;;  %v5163_v0 = vadd.f32 %v5115_v53, %v4919_v43 }
 0x54f   : > { %12846 = vst [vmem:[#allocation29_spill] sm:$0xff] %v11238_v48  ;;  %v5695_v56 = vsel %vm5691_vm8, %v11084_v27, %v11238_v48  ;;  %v5268_v42 = vsel %vm5251_vm2, %v12852_v10, %v12845_v8  ;;  %v5317_v27 = vsel %vm10845_vm4, %v5269_v62, 0.0  ;;  %v12855_v48 = vld [vmem:[#allocation42_spill] sm:$0xff]  ;;  %v12857_v8 = vld [vmem:[#allocation57_spill] sm:$0xff] }
 0x550   : > { %5669 = vrot.lane.b32.xlu0 %v5599_v61, %s7231_s17  ;;  %v7108_v20 = vpack.c.bf16 %v6502_v5, %v6494_v28  ;;  %v5743_v13 = vadd.f32 %v5695_v56, %v5550_v51  ;;  %v12853_v61 = vld [vmem:[#allocation45_spill] sm:$0xff]  ;;  %v5456_v6 = vsel %vm5438_vm5, %v12856_v23, %v12855_v48  ;;  %v5455_v62 = vsel %vm5438_vm5, %v12857_v8, %v12856_v23  ;;  %v12858_v56 = vld [vmem:[#allocation10_spill] sm:$0xff] }
 0x551   : > { %v11233_v41 = vpop.permute.xlu1 %6371  ;;  %v4918_v51 = vmul.f32 %v12850_v17, %v4876_v3  ;;  %v5316_v53 = vsel %vm10945_vm1, %v5268_v42, 0.0  ;;  %v5353_v43 = vmul.f32 %v12858_v56, %v5317_v27  ;;  %v5503_v23 = vsel %vm10915_vm15, %v5455_v62, 0.0  ;;  %v12861_v42 = vld [vmem:[#allocation103_spill] sm:$0xff]  ;;  %v12862_v8 = vld [vmem:[#allocation97_spill] sm:$0xff] }
 0x552   : > { %12843 = vst [vmem:[#allocation113_spill] sm:$0xff] %v11233_v41  ;;  %6379 = vrot.lane.b32.xlu1 %v11067_v18, %s7233_s27  ;;  %v5114_v18 = vsel %vm5097_vm6, %v12853_v61, %v12848_v30  ;;  %v5930_v28 = vadd.f32 %v5906_v59, %v5743_v13  ;;  %7109 = vmatpush1.bf16.msra.mxu1 %v7108_v20  ;;  %v11272_v5 = vpop.permute.xlu0 %5663  ;;  %v11279_v30 = vld [vmem:[#allocation3 + $0xc8] sm:$0x3]  ;;  %v5504_v59 = vsel %vm10839_vm3, %v5456_v6, 0.0  ;;  %v12860_v61 = vld [vmem:[#allocation105_spill] sm:$0xff] }
 0x553   : > { %v5377_v3 = vadd.f32 %v5353_v43, %v5163_v0  ;;  %v5352_v10 = vmul.f32 %v12858_v56, %v5316_v53  ;;  %v5836_v27 = vsel %vm5818_vm7, %v12861_v42, %v12860_v61  ;;  %v12863_v0 = vld [vmem:[#allocation19_spill] sm:$0xff] }
 0x554   : > { %5434 = vrot.lane.b32.xlu0 %v11279_v30, %s7227_s14  ;;  %v5540_v62 = vmul.f32 %v12863_v0, %v5504_v59  ;;  %v12866_v56 = vld [vmem:[#allocation115_spill] sm:$0xff]  ;;  %v5539_v63 = vmul.f32 %v12863_v0, %v5503_v23  ;;  %v6022_v23 = vsel %vm6005_vm14, %v11162_v19, %v11029_v60 }
 0x555   : > { %v11267_v57 = vpop.permute.xlu1 %6244  ;;  %v5708_v14 = vsel %vm5691_vm8, %v11090_v12, %v12866_v56 }
 0x556   : > { %12854 = vst [vmem:[#allocation73_spill] sm:$0xff] %v11267_v57  ;;  %6252 = vrot.lane.b32.xlu1 %v6174_v22, %s7234_s28  ;;  %v5162_v22 = vadd.f32 %v5114_v18, %v4918_v51  ;;  %v5958_v13 = vpop.permute.xlu0 %5957  ;;  %v6023_v51 = vsel %vm6005_vm14, %v11029_v60, %v11197_v38  ;;  %v5884_v38 = vsel %vm10845_vm4, %v5836_v27, 0.0  ;;  %v5564_v17 = vadd.f32 %v5540_v62, %v5377_v3 }
 0x557   : > { %v6008_v6 = vsel %vm6005_vm14, %v12862_v8, %v5958_v13  ;;  %v6009_v18 = vsel %vm6005_vm14, %v5958_v13, %v11188_v46  ;;  %v12865_v8 = vld [vmem:[#allocation111_spill] sm:$0xff] }
 0x558   : > { %5965 = vrot.lane.b32.xlu0 %v11141_v4, %s7232_s24  ;;  %v6056_v43 = vsel %vm10919_vm0, %v6008_v6, 0.0  ;;  %v6057_v61 = vsel %vm11118_vm13, %v6009_v18, 0.0  ;;  %v5709_v13 = vsel %vm5691_vm8, %v12866_v56, %v12865_v8  ;;  %v12867_v6 = vld [vmem:[#allocation116_spill] sm:$0xff] }
 0x559   : > { %v11288_v20 = vpop.permute.xlu1 %5806  ;;  %v6092_v46 = vmul.f32 %v12804_v36, %v6056_v43  ;;  %v6093_v48 = vmul.f32 %v12804_v36, %v6057_v61  ;;  %v5835_v18 = vsel %vm5818_vm7, %v12867_v6, %v12861_v42  ;;  %v11332_v61 = vld [vmem:[#allocation3 + $0x80] sm:$0xff]  ;;  %v5757_v27 = vadd.f32 %v5709_v13, %v5564_v17  ;;  %v12870_v43 = vld [vmem:[#allocation98_spill] sm:$0xff] }
 0x55a   : > { %12859 = vst [vmem:[#allocation70_spill] sm:$0xff] %v11288_v20  ;;  %5816 = vrot.lane.b32.xlu1 %v11170_v35, %s7230_s16  ;;  %v5376_v20 = vadd.f32 %v5352_v10, %v5162_v22  ;;  %v11323_v22 = vpop.permute.xlu0 %5975  ;;  %v6071_v10 = vsel %vm10839_vm3, %v6023_v51, 0.0  ;;  %12868 = vst [vmem:[#allocation89_spill] sm:$0xff] %v11332_v61  ;;  %v5920_v60 = vmul.f32 %v12870_v43, %v5884_v38  ;;  %v5883_v19 = vsel %vm10945_vm1, %v5835_v18, 0.0  ;;  %v12871_v6 = vld [vmem:[#allocation110_spill] sm:$0xff] }
 0x55b   : > { %v11337_v3 = vadd.f32 %v6092_v46, %v11110_v29  ;;  %v11339_v42 = vadd.f32 %v6093_v48, %v5930_v28  ;;  %v6107_v36 = vmul.f32 %v12871_v6, %v6071_v10  ;;  %v6070_v29 = vsel %vm10915_vm15, %v6022_v23, 0.0  ;;  %v12872_v38 = vld [vmem:[#allocation14_spill] sm:$0xff] }
 0x55c   : > { %5983 = vrot.lane.b32.xlu0 %v11332_v61, %s7232_s24  ;;  %v5563_v62 = vadd.f32 %v5539_v63, %v5376_v20  ;;  %v5944_v12 = vadd.f32 %v5920_v60, %v5757_v27  ;;  %v5609_v17 = vmul.f32 %v11170_v35, %v12872_v38  ;;  %v5919_v28 = vmul.f32 %v12870_v43, %v5883_v19 }
 0x55d   : > { %v6241_v59 = vpop.permute.xlu1 %6240  ;;  %v6106_v2 = vmul.f32 %v12871_v6, %v6070_v29  ;;  %v6173_v20 = vmul.f32 %v11025_v39, %v12849_v7  ;;  %vm6539_vm3 = vcmask 1041408   ;;  %v12949_v15 = vld [vmem:[#allocation73_spill] sm:$0xff] }
 0x55e   : > { %6347 = vrot.lane.b32.xlu1 %v11199_v52, %s7233_s27  ;;  %v6370_v48 = vpop.permute.xlu0 %6369  ;;  %v5756_v46 = vadd.f32 %v5708_v14, %v5563_v62  ;;  %v6131_v18 = vadd.f32 %v6107_v36, %v5944_v12  ;;  %v12874_v14 = vld [vmem:[#allocation8_spill] sm:$0xff] }
 0x55f   : > { %v6403_v63 = vsel %vm6385_vm10, %v6370_v48, %v11233_v41  ;;  %v12896_v41 = vld [vmem:[#allocation106_spill] sm:$0xff] }
 0x560   : > { %6377 = vrot.lane.b32.xlu0 %v11025_v39, %s7233_s27  ;;  %v6451_v56 = vsel %vm10845_vm4, %v6403_v63, 0.0  ;;  %v5943_v23 = vadd.f32 %v5919_v28, %v5756_v46  ;;  %v6158_v39 = vmul.f32 %v11199_v52, %v12721_v55  ;;  %v7199_v28 = vld [vmem:[#allocation3 + $0x60] sm:$0xff]  ;;  %vm12502_vm4 = vcmask 146432  }
 0x561   : > { %v11344_v51 = vpop.permute.xlu1 %6339  ;;  %v6487_v62 = vmul.f32 %v12874_v14, %v6451_v56  ;;  %v4871_v52 = vsel %vm11118_vm13, %v7199_v28, 0.0  ;;  %v12875_v56 = vld [vmem:[#allocation75_spill] sm:$0xff] }
 0x562   : > { %12869 = vst [vmem:[#allocation64_spill] sm:$0xff] %v11344_v51  ;;  %6365 = vrot.lane.b32.xlu1 %v11219_v31, %s7233_s27  ;;  %v6243_v10 = vpop.permute.xlu0 %6242  ;;  %v6130_v19 = vadd.f32 %v6106_v2, %v5943_v23 }
 0x563   : > { %v6276_v27 = vsel %vm6258_vm11, %v6243_v10, %v11267_v57  ;;  %v6275_v50 = vsel %vm6258_vm11, %v6241_v59, %v6243_v10  ;;  %v12877_v10 = vld [vmem:[#allocation80_spill] sm:$0xff] }
 0x564   : > { %6250 = vrot.lane.b32.xlu0 %v6173_v20, %s7234_s28  ;;  %v6324_v60 = vadd.f32 %v6276_v27, %v6131_v18  ;;  %v6323_v12 = vadd.f32 %v6275_v50, %v6130_v19  ;;  %v12876_v20 = vld [vmem:[#allocation78_spill] sm:$0xff]  ;;  %v5263_v23 = vsel %vm5251_vm2, %v12875_v56, %v12877_v10 }
 0x565   : > { %v11366_v13 = vpop.permute.xlu1 %6357  ;;  %v5262_v18 = vsel %vm5251_vm2, %v12876_v20, %v12875_v56 }
 0x566   : > { %12873 = vst [vmem:[#allocation12_spill] sm:$0xff] %v11366_v13  ;;  %5689 = vrot.lane.b32.xlu1 %v5609_v17, %s7231_s17  ;;  %v6511_v29 = vadd.f32 %v6487_v62, %v6324_v60  ;;  %v6368_v63 = vpop.permute.xlu0 %6367  ;;  %v7198_v17 = vld [vmem:[#allocation3 + $0x58] sm:$0xff]  ;;  %v12879_v60 = vld [vmem:[#allocation91_spill] sm:$0xff]  ;;  %v5310_v28 = vsel %vm10949_vm9, %v5262_v18, 0.0 }
 0x567   : > { %v6402_v46 = vsel %vm6385_vm10, %v6368_v63, %v6370_v48  ;;  %v4870_v59 = vsel %vm10919_vm0, %v7198_v17, 0.0  ;;  %v6167_v48 = vmul.f32 %v11219_v31, %v12725_v44  ;;  %v5108_v50 = vsel %vm5097_vm6, %v12880_v37, %v12879_v60  ;;  %v11416_v17 = vld [vmem:[%s12305_s3] sm:$0xff] }
 0x568   : > { %5814 = vrot.lane.b32.xlu0 %v11279_v30, %s7230_s16  ;;  %v6450_v2 = vsel %vm10945_vm1, %v6402_v46, 0.0  ;;  %6987 = vmatprep.subr.msk.mxu1 %vm6539_vm3, %v6511_v29  ;;  %v4912_v29 = vmul.f32 %v12784_v21, %v4870_v59  ;;  %v4913_v63 = vmul.f32 %v12784_v21, %v4871_v52  ;;  %12882 = vst [vmem:[#allocation96_spill] sm:$0xff] %v11416_v17  ;;  %v12884_v59 = vld [vmem:[#allocation77_spill] sm:$0xff]  ;;  %s7005_s16 = sshll.u32 %s13054_s19, 7 }
 0x569   : > { %v11376_v36 = vpop.permute.xlu1 %5681  ;;  %v6486_v27 = vmul.f32 %v12874_v14, %v6450_v2  ;;  %v5311_v2 = vsel %vm11114_vm12, %v5263_v23, 0.0  ;;  %v5346_v18 = vmul.f32 %v12787_v1, %v5310_v28  ;;  %v5608_v28 = vmul.f32 %v11279_v30, %v12872_v38  ;;  %v12891_v38 = vld [vmem:[#allocation117_spill] sm:$0xff]  ;;  %s12281_s21 = scalar_lea.vmem %s12307_s5, %s7005_s16 }
 0x56a   : > { %6220 = vrot.lane.b32.xlu1 %v6158_v39, %s7234_s28  ;;  %v12881_v39 = vld [vmem:[#allocation86_spill] sm:$0xff]  ;;  %v11406_v19 = vpop.permute.xlu0 %5808  ;;  %v5156_v20 = vadd.f32 %v5108_v50, %v4912_v29  ;;  %v5347_v23 = vmul.f32 %v12787_v1, %v5311_v2  ;;  %v12887_v50 = vmov 0.0  }
 0x56b   : > { %v5109_v31 = vsel %vm5097_vm6, %v12879_v60, %v12881_v39  ;;  %v6510_v46 = vadd.f32 %v6486_v27, %v6323_v12  ;;  %v12885_v12 = vld [vmem:[#allocation79_spill] sm:$0xff] }
 0x56c   : > { %6345 = vrot.lane.b32.xlu0 %v11141_v4, %s7233_s27  ;;  %v5157_v27 = vadd.f32 %v5109_v31, %v4913_v63  ;;  %v11445_v31 = vld [vmem:[%s12305_s3 + $0x8] sm:$0xf]  ;;  %v5370_v63 = vadd.f32 %v5346_v18, %v5156_v20  ;;  %v12892_v18 = vld [vmem:[#allocation81_spill] sm:$0xff] }
 0x56d   : > { %v11398_v62 = vpop.permute.xlu1 %6212  ;;  %6988 = vmatpush1.msk.msra.mxu1 %vm6539_vm3, %v6510_v46  ;;  %12888 = vst [vmem:[#allocation90_spill] sm:$0xff] %v11445_v31 }
 0x56e   : > { %12878 = vst [vmem:[#allocation7_spill] sm:$0xff] %v11398_v62  ;;  %6238 = vrot.lane.b32.xlu1 %v6167_v48, %s7234_s28  ;;  %v12883_v48 = vld [vmem:[#allocation82_spill] sm:$0xff]  ;;  %v6338_v37 = vpop.permute.xlu0 %6337  ;;  %6989 = vmatmul.mubr.msk.f32.vlgmr.msra.gmra.mrb[10].mxu1 %vm12502_vm4, %v11416_v17  ;;  %v5371_v46 = vadd.f32 %v5347_v23, %v5157_v27  ;;  %v6176_v17 = vmul.f32 %v11170_v35, %v12849_v7 }
 0x56f   : > { %v5449_v52 = vsel %vm5438_vm5, %v12884_v59, %v12883_v48  ;;  %v5450_v56 = vsel %vm5438_vm5, %v12883_v48, %v12885_v12  ;;  %6634 = vmatprep.mubr.f32.mxu1 %v12887_v50  ;;  %v5829_v23 = vsel %vm5818_vm7, %v12892_v18, %v12891_v38  ;;  %v6389_v6 = vsel %vm6385_vm10, %v6338_v37, %v11344_v51 }
 0x570   : > { %v5497_v48 = vsel %vm10919_vm0, %v5449_v52, 0.0  ;;  %6363 = vrot.lane.b32.xlu0 %v11332_v61, %s7233_s27  ;;  %v5498_v29 = vsel %vm11118_vm13, %v5450_v56, 0.0  ;;  %v12890_v56 = vld [vmem:[#allocation107_spill] sm:$0xff] }
 0x571   : > { %v11429_v60 = vpop.permute.xlu1 %6230  ;;  %v5533_v59 = vmul.f32 %v12795_v25, %v5497_v48  ;;  %v11461_v20 = vadd.s32 512, %v12890_v56  ;;  %v5534_v27 = vmul.f32 %v12795_v25, %v5498_v29  ;;  %v5830_v48 = vsel %vm5818_vm7, %v12891_v38, %v11167_v34 }
 0x572   : > { %12886 = vst [vmem:[#allocation13_spill] sm:$0xff] %v11429_v60  ;;  %6003 = vrot.lane.b32.xlu1 %v11170_v35, %s7232_s24  ;;  %v6356_v52 = vpop.permute.xlu0 %6355  ;;  %6990 = vmatmul.mubr.msk.f32.gmra.mrb[12].mxu1 %vm12502_vm4, %v11445_v31  ;;  %v5703_v29 = vsel %vm5691_vm8, %v11112_v16, %v11272_v5  ;;  %v6017_v38 = vsel %vm6005_vm14, %v11323_v22, %v11217_v40 }
 0x573   : > { %6705 = vmatprep.mubr.f32.mxu1 %v12887_v50  ;;  %v5557_v14 = vadd.f32 %v5533_v59, %v5370_v63  ;;  %v6157_v50 = vmul.f32 %v11141_v4, %v12721_v55  ;;  %v4816_v59 = vand.u32 31, %v11461_v20  ;;  %v12898_v20 = vld [vmem:[#allocation109_spill] sm:$0xff] }
 0x574   : > { %5687 = vrot.lane.b32.xlu0 %v5608_v28, %s7231_s17  ;;  %v5558_v28 = vadd.f32 %v5534_v27, %v5371_v46  ;;  %v6065_v46 = vsel %vm11118_vm13, %v6017_v38, 0.0 }
 0x575   : > { %v11451_v2 = vpop.permute.xlu1 %5776  ;;  %vm11536_vm15 = vcmp.gt.s32.totalorder %v4816_v59, 0  ;;  %vm11560_vm1 = vcmp.lt.s32.totalorder %v4816_v59, 31 }
 0x576   : > { %12889 = vst [vmem:[#allocation102_spill] sm:$0xff] %v11451_v2  ;;  %6383 = vrot.lane.b32.xlu1 %v11170_v35, %s7233_s27  ;;  %v12893_v35 = vld [vmem:[#allocation88_spill] sm:$0xff]  ;;  %v12894_v2 = vld [vmem:[#allocation99_spill] sm:$0xff]  ;;  %v5751_v55 = vadd.f32 %v5703_v29, %v5558_v28  ;;  %v12899_v28 = vld [vmem:[#allocation118_spill] sm:$0xff] }
 0x577   : > { %v5702_v31 = vsel %vm5691_vm8, %v12893_v35, %v11112_v16  ;;  %v6016_v18 = vsel %vm6005_vm14, %v12894_v2, %v11323_v22  ;;  %v5877_v35 = vsel %vm10949_vm9, %v5829_v23, 0.0  ;;  %v5878_v16 = vsel %vm11114_vm12, %v5830_v48, 0.0  ;;  %v11496_v22 = vpop.permute.xlu0 %5679 }
 0x578   : > { %v6388_v2 = vsel %vm6385_vm10, %v12896_v41, %v6338_v37  ;;  %v5750_v63 = vadd.f32 %v5702_v31, %v5557_v14  ;;  %v6064_v4 = vsel %vm10919_vm0, %v6016_v18, 0.0  ;;  %6218 = vrot.lane.b32.xlu0 %v6157_v50, %s7234_s28  ;;  %v6166_v41 = vmul.f32 %v11332_v61, %v12725_v44  ;;  %v12918_v61 = vld [vmem:[#allocation33_spill] sm:$0xff] }
 0x579   : > { %v11486_v57 = vpop.permute.xlu1 %5794  ;;  %v5913_v37 = vmul.f32 %v12802_v54, %v5877_v35  ;;  %v5914_v27 = vmul.f32 %v12802_v54, %v5878_v16  ;;  %v6436_v14 = vsel %vm10949_vm9, %v6388_v2, 0.0  ;;  %v6100_v23 = vmul.f32 %v10783_v33, %v6064_v4 }
 0x57a   : > { %12895 = vst [vmem:[#allocation101_spill] sm:$0xff] %v11486_v57  ;;  %6256 = vrot.lane.b32.xlu1 %v6176_v17, %s7234_s28  ;;  %v6437_v17 = vsel %vm11114_vm12, %v6389_v6, 0.0  ;;  %v6101_v50 = vmul.f32 %v10783_v33, %v6065_v46  ;;  %v6396_v48 = vsel %vm6385_vm10, %v12898_v20, %v6356_v52  ;;  %v6397_v44 = vsel %vm6385_vm10, %v6356_v52, %v11366_v13 }
 0x57b   : > { %v6211_v29 = vpop.permute.xlu0 %6210  ;;  %v5937_v18 = vadd.f32 %v5913_v37, %v5750_v63  ;;  %v5938_v38 = vadd.f32 %v5914_v27, %v5751_v55  ;;  %v6472_v16 = vmul.f32 %v12811_v58, %v6436_v14  ;;  %v6473_v2 = vmul.f32 %v12811_v58, %v6437_v17  ;;  %v4840_v14 = vld [vmem:[#allocation3 + $0x20] sm:$0xff] }
 0x57c   : > { %v6261_v35 = vsel %vm6258_vm11, %v12899_v28, %v6211_v29  ;;  %v6262_v6 = vsel %vm6258_vm11, %v6211_v29, %v11398_v62  ;;  %6236 = vrot.lane.b32.xlu0 %v6166_v41, %s7234_s28  ;;  %v6444_v52 = vsel %vm10949_vm9, %v6396_v48, 0.0  ;;  %v6445_v63 = vsel %vm11114_vm12, %v6397_v44, 0.0  ;;  %v12924_v58 = vld [vmem:[#allocation21_spill] sm:$0xff]  ;;  %v12925_v62 = vld [vmem:[#allocation30_spill] sm:$0xff] }
 0x57d   : > { %v11513_v31 = vpop.permute.xlu1 %5995  ;;  %v6309_v4 = vadd.f32 %v6261_v35, %v11337_v3  ;;  %v6310_v46 = vadd.f32 %v6262_v6, %v11339_v42  ;;  %v6124_v20 = vadd.f32 %v6100_v23, %v5937_v18  ;;  %v6125_v41 = vadd.f32 %v6101_v50, %v5938_v38  ;;  %v12903_v3 = vld [vmem:[#allocation119_spill] sm:$0xff]  ;;  %v12905_v35 = vld [vmem:[#allocation32_spill] sm:$0xff] }
 0x57e   : > { %12897 = vst [vmem:[#allocation104_spill] sm:$0xff] %v11513_v31  ;;  %v6480_v44 = vmul.f32 %v12812_v24, %v6444_v52  ;;  %v6481_v23 = vmul.f32 %v12812_v24, %v6445_v63  ;;  %v4864_v38 = vsel %vm11536_vm15, %v4840_v14, 0.0  ;;  %v5256_v6 = vsel %vm5251_vm2, %v12833_v32, %v12905_v35  ;;  %v7200_v14 = vld [vmem:[#allocation3 + $0x68] sm:$0xff]  ;;  %v12919_v24 = vld [vmem:[#allocation28_spill] sm:$0xff] }
 0x57f   : > { %v6496_v37 = vadd.f32 %v6472_v16, %v6309_v4  ;;  %v6497_v27 = vadd.f32 %v6473_v2, %v6310_v46  ;;  %v6229_v29 = vpop.permute.xlu0 %6228  ;;  %v4906_v46 = vmul.f32 %v10849_v11, %v4864_v38 }
 0x580   : > { %v6269_v42 = vsel %vm6258_vm11, %v12903_v3, %v6229_v29  ;;  %v6270_v48 = vsel %vm6258_vm11, %v6229_v29, %v11429_v60  ;;  %6001 = vrot.lane.b32.xlu0 %v11279_v30, %s7232_s24  ;;  %v12908_v29 = vld [vmem:[#allocation26_spill] sm:$0xff]  ;;  %v4872_v3 = vsel %vm11536_vm15, %v7200_v14, 0.0  ;;  %v5270_v60 = vsel %vm5251_vm2, %v12919_v24, %v12918_v61 }
 0x581   : > { %v11534_v55 = vpop.permute.xlu1 %5649  ;;  %v6317_v50 = vadd.f32 %v6269_v42, %v6124_v20  ;;  %v6318_v18 = vadd.f32 %v6270_v48, %v6125_v41  ;;  %v5304_v41 = vsel %vm11560_vm1, %v5256_v6, 0.0  ;;  %v5102_v32 = vsel %vm5097_vm6, %v12838_v49, %v12908_v29  ;;  %v4854_v48 = vld [vmem:[#allocation3 + $0xa0] sm:$0x3]  ;;  %v4855_v6 = vld [vmem:[#allocation3 + $0xa8] sm:$0x3] }
 0x582   : > { %12900 = vst [vmem:[#allocation108_spill] sm:$0xff] %v11534_v55  ;;  %v6175_v42 = vmul.f32 %v11279_v30, %v12849_v7  ;;  %v5340_v7 = vmul.f32 %v12807_v45, %v5304_v41  ;;  %v12916_v41 = vld [vmem:[#allocation11_spill] sm:$0xff] }
 0x583   : > { %v6504_v16 = vadd.f32 %v6480_v44, %v6317_v50  ;;  %v6505_v2 = vadd.f32 %v6481_v23, %v6318_v18  ;;  %v11555_v4 = vpop.permute.xlu0 %5774  ;;  %v12910_v44 = vld [vmem:[#allocation55_spill] sm:$0xff]  ;;  %v5150_v50 = vadd.f32 %v5102_v32, %v4906_v46  ;;  %v12913_v18 = vld [vmem:[#allocation85_spill] sm:$0xff]  ;;  %v12915_v46 = vld [vmem:[#allocation74_spill] sm:$0xff] }
 0x584   : > { %6381 = vrot.lane.b32.xlu0 %v11279_v30, %s7233_s27  ;;  %v5110_v38 = vsel %vm5097_vm6, %v12881_v39, %v12913_v18  ;;  %v4914_v30 = vmul.f32 %v12784_v21, %v4872_v3  ;;  %v5823_v32 = vsel %vm5818_vm7, %v12916_v41, %v11555_v4 }
 0x585   : > { %v11550_v28 = vpop.permute.xlu1 %5667  ;;  %v7112_v63 = vpack.c.bf16 %v6504_v16, %v6496_v37  ;;  %v7110_v20 = vpack.c.bf16 %v6505_v2, %v6497_v27  ;;  %v5443_v37 = vsel %vm5438_vm5, %v12837_v47, %v12910_v44  ;;  %v12911_v27 = vld [vmem:[#allocation41_spill] sm:$0xff]  ;;  %v5364_v3 = vadd.f32 %v5340_v7, %v5150_v50 }
 0x586   : > { %12904 = vst [vmem:[#allocation40_spill] sm:$0xff] %v11550_v28  ;;  %v5264_v23 = vsel %vm5251_vm2, %v12877_v10, %v12911_v27  ;;  %v6520_v47 = vld [vmem:[%s12306_s4] sm:$0xff]  ;;  %v4878_v10 = vsel %vm10919_vm0, %v4854_v48, 0.0  ;;  %v5491_v16 = vsel %vm11536_vm15, %v5443_v37, 0.0  ;;  %v12917_v48 = vld [vmem:[#allocation20_spill] sm:$0xff]  ;;  %v5871_v50 = vsel %vm11560_vm1, %v5823_v32, 0.0 }
 0x587   : > { %7111 = vmatprep.subr.bf16.mxu1 %v7110_v20  ;;  %v11581_v49 = vpop.permute.xlu0 %5792  ;;  %v5312_v39 = vsel %vm11560_vm1, %v5264_v23, 0.0  ;;  %v5158_v20 = vadd.f32 %v5110_v38, %v4914_v30  ;;  %v5527_v37 = vmul.f32 %v12917_v48, %v5491_v16 }
 0x588   : > { %12912 = vst [vmem:[#allocation95_spill] sm:$0xff] %v11581_v49  ;;  %6254 = vrot.lane.b32.xlu0 %v6175_v42, %s7234_s28  ;;  %7113 = vmatpush1.bf16.msra.mxu1 %v7112_v63  ;;  %v5451_v63 = vsel %vm5438_vm5, %v12885_v12, %v12915_v46  ;;  %v4879_v42 = vsel %vm11118_vm13, %v4855_v6, 0.0  ;;  %v5348_v23 = vmul.f32 %v12787_v1, %v5312_v39  ;;  %v12920_v12 = vld [vmem:[#allocation5_spill] sm:$0xff] }
 0x589   : > { %v11573_v59 = vpop.permute.xlu1 %5963  ;;  %v4920_v38 = vmul.f32 %v12920_v12, %v4878_v10  ;;  %v5499_v30 = vsel %vm11536_vm15, %v5451_v63, 0.0  ;;  %v5831_v39 = vsel %vm5818_vm7, %v11167_v34, %v11581_v49  ;;  %v5551_v24 = vadd.f32 %v5527_v37, %v5364_v3  ;;  %v12923_v10 = vld [vmem:[#allocation69_spill] sm:$0xff]  ;;  %v12927_v37 = vld [vmem:[#allocation22_spill] sm:$0xff] }
 0x58a   : > { %12909 = vst [vmem:[#allocation94_spill] sm:$0xff] %v11573_v59  ;;  %v5372_v16 = vadd.f32 %v5348_v23, %v5158_v20  ;;  %v5116_v63 = vsel %vm5097_vm6, %v12924_v58, %v12923_v10  ;;  %v4921_v32 = vmul.f32 %v12920_v12, %v4879_v42  ;;  %v5117_v13 = vsel %vm5097_vm6, %v12923_v10, %v12925_v62  ;;  %v12928_v42 = vld [vmem:[#allocation49_spill] sm:$0xff]  ;;  %v12930_v10 = vld [vmem:[#allocation44_spill] sm:$0xff] }
 0x58b   : > { %v5994_v14 = vpop.permute.xlu0 %5993  ;;  %v5318_v34 = vsel %vm10949_vm9, %v5270_v60, 0.0  ;;  %v5535_v3 = vmul.f32 %v12795_v25, %v5499_v30  ;;  %v5907_v23 = vmul.f32 %v12927_v37, %v5871_v50  ;;  %v5458_v49 = vsel %vm5438_vm5, %v12928_v42, %v12930_v10 }
 0x58c   : > { %6524 = vperm.xlu0 %7171, %v6520_v47   ;;  %v12922_v47 = vld [vmem:[#allocation25_spill] sm:$0xff]  ;;  %v5164_v30 = vadd.f32 %v5116_v63, %v4920_v38  ;;  %v5165_v57 = vadd.f32 %v5117_v13, %v4921_v32  ;;  %v4809_v38 = vadd.s32 640, %v12890_v56 }
 0x58d   : > { %v11598_v2 = vpop.permute.xlu1 %5981  ;;  %v5271_v6 = vsel %vm5251_vm2, %v12918_v61, %v12922_v47  ;;  %v12926_v61 = vld [vmem:[#allocation29_spill] sm:$0xff] }
 0x58e   : > { %12914 = vst [vmem:[#allocation53_spill] sm:$0xff] %v11598_v2  ;;  %v5319_v58 = vsel %vm11114_vm12, %v5271_v6, 0.0  ;;  %v12929_v2 = vld [vmem:[#allocation42_spill] sm:$0xff] }
 0x58f   : > { %v11626_v41 = vpop.permute.xlu0 %5647  ;;  %v5457_v28 = vsel %vm5438_vm5, %v12929_v2, %v12928_v42  ;;  %v12932_v6 = vld [vmem:[#allocation10_spill] sm:$0xff] }
 0x590   : > { %v5696_v20 = vsel %vm5691_vm8, %v12926_v61, %v11626_v41  ;;  %v5879_v61 = vsel %vm11560_vm1, %v5831_v39, 0.0  ;;  %v5354_v37 = vmul.f32 %v12932_v6, %v5318_v34  ;;  %v5355_v25 = vmul.f32 %v12932_v6, %v5319_v58 }
 0x591   : > { %v11618_v7 = vpop.permute.xlu1 %6375  ;;  %v5744_v51 = vadd.f32 %v5696_v20, %v5551_v24  ;;  %v5559_v24 = vadd.f32 %v5535_v3, %v5372_v16  ;;  %v5505_v42 = vsel %vm10919_vm0, %v5457_v28, 0.0  ;;  %v5915_v39 = vmul.f32 %v12802_v54, %v5879_v61  ;;  %v12934_v3 = vld [vmem:[#allocation70_spill] sm:$0xff] }
 0x592   : > { %12921 = vst [vmem:[#allocation60_spill] sm:$0xff] %v11618_v7  ;;  %v5378_v16 = vadd.f32 %v5354_v37, %v5164_v30  ;;  %v5379_v63 = vadd.f32 %v5355_v25, %v5165_v57  ;;  %v5838_v58 = vsel %vm5818_vm7, %v12934_v3, %v11406_v19  ;;  %v12937_v25 = vld [vmem:[#allocation47_spill] sm:$0xff] }
 0x593   : > { %v5931_v50 = vadd.f32 %v5907_v23, %v5744_v51  ;;  %v11654_v20 = vpop.permute.xlu0 %5665  ;;  %v5506_v51 = vsel %vm11118_vm13, %v5458_v49, 0.0  ;;  %v12935_v23 = vld [vmem:[#allocation105_spill] sm:$0xff]  ;;  %v12936_v49 = vld [vmem:[#allocation66_spill] sm:$0xff]  ;;  %v6024_v57 = vsel %vm6005_vm14, %v12937_v25, %v5994_v14 }
 0x594   : > { %v5704_v2 = vsel %vm5691_vm8, %v11272_v5, %v11654_v20  ;;  %v5541_v5 = vmul.f32 %v12863_v0, %v5505_v42  ;;  %v5837_v28 = vsel %vm5818_vm7, %v12935_v23, %v12934_v3  ;;  %v5542_v37 = vmul.f32 %v12863_v0, %v5506_v51  ;;  %v12938_v42 = vld [vmem:[#allocation24_spill] sm:$0xff] }
 0x595   : > { %v11652_v60 = vpop.permute.xlu1 %6248  ;;  %v5752_v59 = vadd.f32 %v5704_v2, %v5559_v24  ;;  %v5710_v24 = vsel %vm5691_vm8, %v12865_v8, %v11496_v22  ;;  %v5711_v2 = vsel %vm5691_vm8, %v11496_v22, %v11376_v36  ;;  %v5885_v3 = vsel %vm10949_vm9, %v5837_v28, 0.0 }
 0x596   : > { %12931 = vst [vmem:[#allocation6_spill] sm:$0xff] %v11652_v60  ;;  %v5565_v23 = vadd.f32 %v5541_v5, %v5378_v16  ;;  %v6072_v8 = vsel %vm10919_vm0, %v6024_v57, 0.0  ;;  %v4817_v28 = vand.u32 31, %v4809_v38  ;;  %v5921_v53 = vmul.f32 %v12870_v43, %v5885_v3  ;;  %v12942_v38 = vld [vmem:[#allocation113_spill] sm:$0xff]  ;;  %v4856_v3 = vld [vmem:[#allocation3 + $0xb0] sm:$0x3] }
 0x597   : > { %v5939_v32 = vadd.f32 %v5915_v39, %v5752_v59  ;;  %v11669_v34 = vpop.permute.xlu0 %5961  ;;  %v6025_v59 = vsel %vm6005_vm14, %v5994_v14, %v11513_v31  ;;  %v5886_v14 = vsel %vm11114_vm12, %v5838_v58, 0.0  ;;  %v12941_v58 = vld [vmem:[#allocation110_spill] sm:$0xff]  ;;  %v4880_v9 = vsel %vm11536_vm15, %v4856_v3, 0.0 }
 0x598   : > { %v6010_v61 = vsel %vm6005_vm14, %v12936_v49, %v11669_v34  ;;  %v5566_v49 = vadd.f32 %v5542_v37, %v5379_v63  ;;  %v6073_v22 = vsel %vm11118_vm13, %v6025_v59, 0.0  ;;  %v5922_v26 = vmul.f32 %v12870_v43, %v5886_v14 }
 0x599   : > { %v11666_v13 = vpop.permute.xlu1 %5812  ;;  %v6058_v30 = vsel %vm11536_vm15, %v6010_v61, 0.0  ;;  %v6108_v37 = vmul.f32 %v12941_v58, %v6072_v8  ;;  %vm11727_vm0 = vcmp.gt.s32.totalorder %v4817_v28, 0  ;;  %vm11731_vm13 = vcmp.lt.s32.totalorder %v4817_v28, 31 }
 0x59a   : > { %12933 = vst [vmem:[#allocation4_spill] sm:$0xff] %v11666_v13  ;;  %v6094_v39 = vmul.f32 %v12938_v42, %v6058_v30  ;;  %v5758_v13 = vadd.f32 %v5710_v24, %v5565_v23  ;;  %v5759_v31 = vadd.f32 %v5711_v2, %v5566_v49  ;;  %v13017_v49 = vld [vmem:[#allocation8_spill] sm:$0xff] }
 0x59b   : > { %v11701_v61 = vpop.permute.xlu0 %5979 }
 0x59c   : > { %v6018_v25 = vsel %vm6005_vm14, %v11217_v40, %v11701_v61  ;;  %v11710_v30 = vadd.f32 %v6094_v39, %v5931_v50  ;;  %v6109_v40 = vmul.f32 %v12941_v58, %v6073_v22  ;;  %v4841_v50 = vld [vmem:[#allocation3 + $0x28] sm:$0xff]  ;;  %v5945_v14 = vadd.f32 %v5921_v53, %v5758_v13 }
 0x59d   : > { %v11695_v51 = vpop.permute.xlu1 %6343  ;;  %v6066_v16 = vsel %vm11536_vm15, %v6018_v25, 0.0  ;;  %v5946_v23 = vadd.f32 %v5922_v26, %v5759_v31  ;;  %v4865_v8 = vsel %vm11727_vm0, %v4841_v50, 0.0  ;;  %v7201_v31 = vld [vmem:[#allocation3 + $0x70] sm:$0xff] }
 0x59e   : > { %12939 = vst [vmem:[#allocation112_spill] sm:$0xff] %v11695_v51  ;;  %v6102_v63 = vmul.f32 %v10783_v33, %v6066_v16  ;;  %v12948_v16 = vld [vmem:[#allocation48_spill] sm:$0xff]  ;;  %v4873_v28 = vsel %vm11727_vm0, %v7201_v31, 0.0  ;;  %v4907_v50 = vmul.f32 %v10849_v11, %v4865_v8 }
 0x59f   : > { %v6374_v57 = vpop.permute.xlu0 %6373  ;;  %v5257_v13 = vsel %vm5251_vm2, %v12905_v35, %v12948_v16  ;;  %v6133_v53 = vadd.f32 %v6109_v40, %v5946_v23  ;;  %v4915_v8 = vmul.f32 %v12784_v21, %v4873_v28 }
 0x5a0   : > { %v6404_v59 = vsel %vm6385_vm10, %v12942_v38, %v6374_v57  ;;  %v6405_v24 = vsel %vm6385_vm10, %v6374_v57, %v11618_v7  ;;  %v11725_v2 = vadd.f32 %v6102_v63, %v5939_v32  ;;  %v6132_v63 = vadd.f32 %v6108_v37, %v5945_v14  ;;  %v12951_v37 = vld [vmem:[#allocation52_spill] sm:$0xff] }
 0x5a1   : > { %v11715_v5 = vpop.permute.xlu1 %6361  ;;  %v6452_v22 = vsel %vm10949_vm9, %v6404_v59, 0.0  ;;  %v6453_v32 = vsel %vm11114_vm12, %v6405_v24, 0.0  ;;  %v12950_v59 = vld [vmem:[#allocation8_spill] sm:$0xff]  ;;  %v5272_v40 = vsel %vm5251_vm2, %v12922_v47, %v12951_v37  ;;  %v5305_v3 = vsel %vm11731_vm13, %v5257_v13, 0.0 }
 0x5a2   : > { %12940 = vst [vmem:[#allocation68_spill] sm:$0xff] %v11715_v5  ;;  %v6488_v35 = vmul.f32 %v12950_v59, %v6452_v22  ;;  %v6489_v24 = vmul.f32 %v12950_v59, %v6453_v32  ;;  %v12952_v14 = vld [vmem:[#allocation72_spill] sm:$0xff]  ;;  %v12954_v22 = vld [vmem:[#allocation58_spill] sm:$0xff] }
 0x5a3   : > { %v6247_v26 = vpop.permute.xlu0 %6246  ;;  %v5265_v23 = vsel %vm5251_vm2, %v12911_v27, %v12952_v14  ;;  %v5103_v32 = vsel %vm5097_vm6, %v12908_v29, %v12954_v22  ;;  %v12956_v13 = vld [vmem:[#allocation56_spill] sm:$0xff] }
 0x5a4   : > { %v6277_v57 = vsel %vm6258_vm11, %v12949_v15, %v6247_v26  ;;  %v6278_v38 = vsel %vm6258_vm11, %v6247_v26, %v11652_v60  ;;  %v5118_v27 = vsel %vm5097_vm6, %v12925_v62, %v12956_v13  ;;  %v5151_v59 = vadd.f32 %v5103_v32, %v4907_v50  ;;  %v12958_v50 = vld [vmem:[#allocation71_spill] sm:$0xff] }
 0x5a5   : > { %v11741_v25 = vpop.permute.xlu1 %5685  ;;  %v6325_v7 = vadd.f32 %v6277_v57, %v6132_v63  ;;  %v6326_v31 = vadd.f32 %v6278_v38, %v6133_v53  ;;  %v12955_v63 = vld [vmem:[#allocation83_spill] sm:$0xff]  ;;  %v12957_v38 = vld [vmem:[#allocation61_spill] sm:$0xff]  ;;  %v4922_v60 = vmul.f32 %v12920_v12, %v4880_v9  ;;  %v5320_v62 = vsel %vm11560_vm1, %v5272_v40, 0.0  ;;  %v12961_v40 = vld [vmem:[#allocation96_spill] sm:$0xff] }
 0x5a6   : > { %12947 = vst [vmem:[#allocation67_spill] sm:$0xff] %v11741_v25  ;;  %v5111_v53 = vsel %vm5097_vm6, %v12913_v18, %v12955_v63  ;;  %v5444_v28 = vsel %vm5438_vm5, %v12910_v44, %v12957_v38  ;;  %v5313_v18 = vsel %vm11731_vm13, %v5265_v23, 0.0  ;;  %v5341_v44 = vmul.f32 %v12807_v45, %v5305_v3 }
 0x5a7   : > { %v6512_v47 = vadd.f32 %v6488_v35, %v6325_v7  ;;  %v6513_v15 = vadd.f32 %v6489_v24, %v6326_v31  ;;  %v11774_v57 = vpop.permute.xlu0 %5810  ;;  %v5452_v35 = vsel %vm5438_vm5, %v12915_v46, %v12958_v50  ;;  %v12960_v24 = vld [vmem:[#allocation46_spill] sm:$0xff]  ;;  %v5166_v23 = vadd.f32 %v5118_v27, %v4922_v60 }
 0x5a8   : > { %v5839_v29 = vsel %vm5818_vm7, %v11406_v19, %v11774_v57  ;;  %v5159_v19 = vadd.f32 %v5111_v53, %v4915_v8  ;;  %v5459_v31 = vsel %vm5438_vm5, %v12930_v10, %v12960_v24  ;;  %v5492_v32 = vsel %vm11727_vm0, %v5444_v28, 0.0  ;;  %v12963_v28 = vld [vmem:[#allocation102_spill] sm:$0xff] }
 0x5a9   : > { %v11766_v26 = vpop.permute.xlu1 %6216  ;;  %v5887_v7 = vsel %vm11560_vm1, %v5839_v29, 0.0  ;;  %6991 = vmatprep.subr.msk.mxu1 %vm6539_vm3, %v6513_v15  ;;  %v5349_v15 = vmul.f32 %v12787_v1, %v5313_v18  ;;  %v5365_v46 = vadd.f32 %v5341_v44, %v5151_v59  ;;  %v12962_v8 = vmov 0.0  }
 0x5aa   : > { %12953 = vst [vmem:[#allocation18_spill] sm:$0xff] %v11766_v26  ;;  %6992 = vmatpush1.msk.msra.mxu1 %vm6539_vm3, %v6512_v47  ;;  %v5356_v53 = vmul.f32 %v12932_v6, %v5320_v62  ;;  %v5500_v47 = vsel %vm11727_vm0, %v5452_v35, 0.0  ;;  %v5507_v10 = vsel %vm11536_vm15, %v5459_v31, 0.0  ;;  %v5528_v60 = vmul.f32 %v12917_v48, %v5492_v32  ;;  %v12965_v62 = vld [vmem:[#allocation94_spill] sm:$0xff]  ;;  %v12969_v48 = vld [vmem:[#allocation95_spill] sm:$0xff] }
 0x5ab   : > { %6993 = vmatmul.mubr.msk.f32.vlgmr.msra.gmra.mrb[14].mxu1 %vm12502_vm4, %v12961_v40  ;;  %v6342_v3 = vpop.permute.xlu0 %6341  ;;  %v5373_v27 = vadd.f32 %v5349_v15, %v5159_v19  ;;  %v5824_v29 = vsel %vm5818_vm7, %v11555_v4, %v12963_v28  ;;  %v5697_v18 = vsel %vm5691_vm8, %v11626_v41, %v11534_v55  ;;  %v6011_v44 = vsel %vm6005_vm14, %v11669_v34, %v12965_v62  ;;  %v12966_v31 = vld [vmem:[#allocation90_spill] sm:$0xff]  ;;  %v12967_v19 = vld [vmem:[#allocation17_spill] sm:$0xff] }
 0x5ac   : > { %6711 = vmatprep.mubr.f32.mxu1 %v12962_v8  ;;  %v5380_v59 = vadd.f32 %v5356_v53, %v5166_v23  ;;  %v5536_v32 = vmul.f32 %v12967_v19, %v5500_v47  ;;  %v12968_v15 = vld [vmem:[#allocation101_spill] sm:$0xff]  ;;  %v5543_v23 = vmul.f32 %v12863_v0, %v5507_v10  ;;  %v5872_v41 = vsel %vm11731_vm13, %v5824_v29, 0.0  ;;  %v12970_v53 = vld [vmem:[#allocation40_spill] sm:$0xff] }
 0x5ad   : > { %v11798_v9 = vpop.permute.xlu1 %6234  ;;  %v5832_v4 = vsel %vm5818_vm7, %v12969_v48, %v12968_v15  ;;  %v5705_v34 = vsel %vm5691_vm8, %v11654_v20, %v12970_v53  ;;  %v12971_v62 = vld [vmem:[#allocation53_spill] sm:$0xff]  ;;  %v6059_v48 = vsel %vm11727_vm0, %v6011_v44, 0.0  ;;  %v12973_v20 = vld [vmem:[#allocation22_spill] sm:$0xff] }
 0x5ae   : > { %12959 = vst [vmem:[#allocation35_spill] sm:$0xff] %v11798_v9  ;;  %v6019_v47 = vsel %vm6005_vm14, %v11701_v61, %v12971_v62  ;;  %v5560_v55 = vadd.f32 %v5536_v32, %v5373_v27  ;;  %v5880_v10 = vsel %vm11731_vm13, %v5832_v4, 0.0  ;;  %v5908_v53 = vmul.f32 %v12973_v20, %v5872_v41 }
 0x5af   : > { %v6360_v35 = vpop.permute.xlu0 %6359  ;;  %6994 = vmatmul.mubr.msk.f32.gmra.mrb[16].mxu1 %vm12502_vm4, %v12966_v31  ;;  %v6067_v61 = vsel %vm11727_vm0, %v6019_v47, 0.0  ;;  %v6095_v27 = vmul.f32 %v12938_v42, %v6059_v48  ;;  %v5916_v32 = vmul.f32 %v12802_v54, %v5880_v10  ;;  %v6391_v4 = vsel %vm6385_vm10, %v6342_v3, %v11695_v51  ;;  %v12997_v42 = vld [vmem:[#allocation63_spill] sm:$0xff]  ;;  %v7203_v51 = vld [vmem:[%s12305_s3] sm:$0xff] }
 0x5b0   : > { %6782 = vmatprep.mubr.f32.mxu1 %v12962_v8  ;;  %v5567_v8 = vadd.f32 %v5543_v23, %v5380_v59  ;;  %v5753_v28 = vadd.f32 %v5705_v34, %v5560_v55  ;;  %v6103_v41 = vmul.f32 %v10783_v33, %v6067_v61  ;;  %v12975_v34 = vld [vmem:[#allocation12_spill] sm:$0xff]  ;;  %v6439_v10 = vsel %vm11731_vm13, %v6391_v4, 0.0  ;;  %v12978_v4 = vld [vmem:[#allocation13_spill] sm:$0xff] }
 0x5b1   : > { %v11818_v40 = vpop.permute.xlu1 %5780  ;;  %v4843_v33 = vld [vmem:[#allocation3 + $0x38] sm:$0xff] }
 0x5b2   : > { %12964 = vst [vmem:[#allocation45_spill] sm:$0xff] %v11818_v40  ;;  %v5552_v40 = vadd.f32 %v5528_v60, %v5365_v46  ;;  %v12972_v60 = vld [vmem:[#allocation64_spill] sm:$0xff]  ;;  %v5940_v48 = vadd.f32 %v5916_v32, %v5753_v28 }
 0x5b3   : > { %v6390_v29 = vsel %vm6385_vm10, %v12972_v60, %v6342_v3  ;;  %v11850_v15 = vpop.permute.xlu0 %5683  ;;  %v12977_v60 = vld [vmem:[#allocation92_spill] sm:$0xff] }
 0x5b4   : > { %v5745_v31 = vadd.f32 %v5697_v18, %v5552_v40  ;;  %v5712_v40 = vsel %vm5691_vm8, %v11376_v36, %v11850_v15  ;;  %v5923_v18 = vmul.f32 %v12870_v43, %v5887_v7  ;;  %v6438_v55 = vsel %vm11560_vm1, %v6390_v29, 0.0 }
 0x5b5   : > { %v11844_v46 = vpop.permute.xlu1 %5798  ;;  %v5760_v44 = vadd.f32 %v5712_v40, %v5567_v8  ;;  %v6398_v36 = vsel %vm6385_vm10, %v12975_v34, %v6360_v35  ;;  %v6399_v7 = vsel %vm6385_vm10, %v6360_v35, %v11715_v5  ;;  %v6474_v29 = vmul.f32 %v12977_v60, %v6438_v55  ;;  %v4842_v5 = vld [vmem:[#allocation3 + $0x30] sm:$0xff] }
 0x5b6   : > { %v5932_v59 = vadd.f32 %v5908_v53, %v5745_v31  ;;  %v12976_v31 = vld [vmem:[#allocation7_spill] sm:$0xff]  ;;  %v6446_v35 = vsel %vm11560_vm1, %v6398_v36, 0.0  ;;  %v6447_v28 = vsel %vm11731_vm13, %v6399_v7, 0.0  ;;  %v6127_v34 = vadd.f32 %v6103_v41, %v5940_v48 }
 0x5b7   : > { %v5947_v8 = vadd.f32 %v5923_v18, %v5760_v44  ;;  %v6215_v47 = vpop.permute.xlu0 %6214 }
 0x5b8   : > { %v6263_v53 = vsel %vm6258_vm11, %v12976_v31, %v6215_v47  ;;  %v6264_v3 = vsel %vm6258_vm11, %v6215_v47, %v11766_v26  ;;  %v6119_v61 = vadd.f32 %v6095_v27, %v5932_v59  ;;  %v6475_v31 = vmul.f32 %v12977_v60, %v6439_v10  ;;  %v12979_v27 = vld [vmem:[#allocation93_spill] sm:$0xff] }
 0x5b9   : > { %v11865_v23 = vpop.permute.xlu1 %5999  ;;  %v6311_v40 = vadd.f32 %v6263_v53, %v11710_v30  ;;  %v6482_v59 = vmul.f32 %v12979_v27, %v6446_v35  ;;  %v6483_v36 = vmul.f32 %v12979_v27, %v6447_v28 }
 0x5ba   : > { %12974 = vst [vmem:[#allocation38_spill] sm:$0xff] %v11865_v23  ;;  %v6312_v44 = vadd.f32 %v6264_v3, %v6119_v61 }
 0x5bb   : > { %v6498_v32 = vadd.f32 %v6474_v29, %v6311_v40  ;;  %v6233_v47 = vpop.permute.xlu0 %6232 }
 0x5bc   : > { %v6271_v55 = vsel %vm6258_vm11, %v12978_v4, %v6233_v47  ;;  %v6272_v30 = vsel %vm6258_vm11, %v6233_v47, %v11798_v9  ;;  %v6499_v3 = vadd.f32 %v6475_v31, %v6312_v44  ;;  %v4811_v44 = vadd.s32 896, %v12890_v56 }
 0x5bd   : > { %v11884_v18 = vpop.permute.xlu1 %5653  ;;  %v6319_v7 = vadd.f32 %v6271_v55, %v11725_v2  ;;  %v6320_v53 = vadd.f32 %v6272_v30, %v6127_v34  ;;  %v6521_v2 = vld [vmem:[%s12306_s4 + $0x8] sm:$0xf]  ;;  %v12981_v34 = vld [vmem:[#allocation104_spill] sm:$0xff]  ;;  %v4810_v31 = vadd.s32 768, %v12890_v56  ;;  %v12983_v56 = vld [vmem:[#allocation39_spill] sm:$0xff] }
 0x5be   : > { %6529 = vperm.xlu1 %7172, %v6521_v2   ;;  %v5273_v17 = vsel %vm5251_vm2, %v12951_v37, %v12983_v56  ;;  %v4859_v2 = vld [vmem:[#allocation3 + $0xc8] sm:$0x3] }
 0x5bf   : > { %v6506_v41 = vadd.f32 %v6482_v59, %v6319_v7  ;;  %v6507_v48 = vadd.f32 %v6483_v36, %v6320_v53  ;;  %v11896_v29 = vpop.permute.xlu0 %5778  ;;  %v4857_v59 = vld [vmem:[#allocation3 + $0xb8] sm:$0x3]  ;;  %v4819_v7 = vand.u32 31, %v4811_v44  ;;  %v12986_v44 = vld [vmem:[#allocation51_spill] sm:$0xff]  ;;  %v5321_v37 = vsel %vm11731_vm13, %v5273_v17, 0.0 }
 0x5c1   : > { %v11894_v26 = vpop.permute.xlu1 %5671  ;;  %v7116_v10 = vpack.c.bf16 %v6506_v41, %v6498_v32  ;;  %v7114_v61 = vpack.c.bf16 %v6507_v48, %v6499_v3  ;;  %v4818_v3 = vand.u32 31, %v4810_v31  ;;  %v4881_v41 = vsel %vm11727_vm0, %v4857_v59, 0.0 }
 0x5c2   : > { %vm11929_vm9 = vcmp.gt.s32.totalorder %v4819_v7, 0  ;;  %v4923_v31 = vmul.f32 %v12920_v12, %v4881_v41  ;;  %v5357_v41 = vmul.f32 %v12932_v6, %v5321_v37  ;;  %vm11961_vm4 = vcmp.lt.s32.totalorder %v4819_v7, 31 }
 0x5c3   : > { %7115 = vmatprep.subr.bf16.mxu1 %v7114_v61  ;;  %v11900_v47 = vpop.permute.xlu0 %5796  ;;  %vm11936_vm12 = vcmp.gt.s32.totalorder %v4818_v3, 0  ;;  %v4883_v9 = vsel %vm11929_vm9, %v4859_v2, 0.0 }
 0x5c4   : > { %7117 = vmatpush1.bf16.msra.mxu1 %v7116_v10  ;;  %v11966_v2 = vmul.f32 %v12920_v12, %v4883_v9 }
 0x5c5   : > { %v11898_v40 = vpop.permute.xlu1 %5436 }
 0x5c6   : > { %12980 = vst [vmem:[#allocation57_spill] sm:$0xff] %v11898_v40  ;;  %v13000_v40 = vld [vmem:[#allocation4_spill] sm:$0xff] }
 0x5c7   : > { %v5998_v28 = vpop.permute.xlu0 %5997 }
 0x5c8   : > { %v6026_v32 = vsel %vm6005_vm14, %v12981_v34, %v5998_v28 }
 0x5c9   : > { %v11902_v35 = vpop.permute.xlu1 %5967  ;;  %v6074_v4 = vsel %vm11536_vm15, %v6026_v32, 0.0  ;;  %v4858_v32 = vld [vmem:[#allocation3 + $0xc0] sm:$0x3]  ;;  %vm11957_vm15 = vcmp.lt.s32.totalorder %v4818_v3, 31  ;;  %v4866_v3 = vsel %vm11936_vm12, %v4842_v5, 0.0 }
 0x5ca   : > { %v6110_v55 = vmul.f32 %v12941_v58, %v6074_v4  ;;  %v12989_v4 = vld [vmem:[#allocation65_spill] sm:$0xff]  ;;  %v4882_v60 = vsel %vm11936_vm12, %v4858_v32, 0.0 }
 0x5cb   : > { %v11916_v36 = vpop.permute.xlu0 %5651 }
 0x5cc   : > { %v11918_v53 = vadd.f32 %v6110_v55, %v5947_v8  ;;  %v5119_v8 = vsel %vm5097_vm6, %v12956_v13, %v12986_v44  ;;  %v5460_v55 = vsel %vm5438_vm5, %v12960_v24, %v12989_v4 }
 0x5cd   : > { %v11914_v30 = vpop.permute.xlu1 %5985  ;;  %v5167_v13 = vadd.f32 %v5119_v8, %v4923_v31  ;;  %v5508_v17 = vsel %vm11727_vm0, %v5460_v55, 0.0  ;;  %v12995_v8 = vld [vmem:[#allocation31_spill] sm:$0xff]  ;;  %v11974_v31 = vmul.f32 %v12920_v12, %v4882_v60  ;;  %v4867_v60 = vsel %vm11929_vm9, %v4843_v33, 0.0  ;;  %v13001_v33 = vld [vmem:[#allocation36_spill] sm:$0xff] }
 0x5ce   : > { %v11971_v32 = vsel %vm5251_vm2, %v12983_v56, %v12995_v8  ;;  %v11985_v9 = vsel %vm5251_vm2, %v12995_v8, %v12997_v42  ;;  %v5544_v54 = vmul.f32 %v12863_v0, %v5508_v17  ;;  %v12998_v56 = vld [vmem:[#allocation54_spill] sm:$0xff]  ;;  %v5840_v42 = vsel %vm5818_vm7, %v11774_v57, %v13000_v40  ;;  %v13002_v8 = vld [vmem:[#allocation59_spill] sm:$0xff] }
 0x5cf   : > { %v11927_v10 = vpop.permute.xlu0 %5669  ;;  %v5381_v37 = vadd.f32 %v5357_v41, %v5167_v13  ;;  %v5258_v12 = vsel %vm5251_vm2, %v12948_v16, %v12998_v56  ;;  %v7202_v13 = vld [vmem:[#allocation3 + $0x78] sm:$0xff]  ;;  %v12999_v41 = vld [vmem:[#allocation89_spill] sm:$0xff]  ;;  %v6027_v17 = vsel %vm6005_vm14, %v5998_v28, %v11865_v23  ;;  %v5322_v16 = vsel %vm11957_vm15, %v11971_v32, 0.0  ;;  %v13004_v23 = vld [vmem:[#allocation34_spill] sm:$0xff] }
 0x5d0   : > { %v4874_v5 = vsel %vm11936_vm12, %v7202_v13, 0.0  ;;  %v12009_v0 = vsel %vm5438_vm5, %v13002_v8, %v13001_v33  ;;  %v13003_v13 = vld [vmem:[#allocation37_spill] sm:$0xff]  ;;  %v5713_v57 = vsel %vm5691_vm8, %v11850_v15, %v11741_v25  ;;  %v5323_v28 = vsel %vm11961_vm4, %v11985_v9, 0.0  ;;  %v13005_v40 = vld [vmem:[#allocation62_spill] sm:$0xff]  ;;  %v13011_v25 = vld [vmem:[#allocation60_spill] sm:$0xff] }
 0x5d1   : > { %v11922_v48 = vpop.permute.xlu1 %6379  ;;  %v5121_v32 = vsel %vm5097_vm6, %v13005_v40, %v13004_v23  ;;  %v5306_v33 = vsel %vm11957_vm15, %v5258_v12, 0.0  ;;  %v5568_v4 = vadd.f32 %v5544_v54, %v5381_v37  ;;  %v5888_v15 = vsel %vm11731_vm13, %v5840_v42, 0.0  ;;  %v13009_v42 = vld [vmem:[#allocation87_spill] sm:$0xff] }
 0x5d2   : > { %12982 = vst [vmem:[#allocation103_spill] sm:$0xff] %v11922_v48  ;;  %v6075_v9 = vsel %vm11727_vm0, %v6027_v17, 0.0  ;;  %v5120_v23 = vsel %vm5097_vm6, %v12986_v44, %v13005_v40  ;;  %v5494_v54 = vsel %vm11929_vm9, %v12009_v0, 0.0  ;;  %v5445_v39 = vsel %vm5438_vm5, %v12957_v38, %v13002_v8  ;;  %v13008_v44 = vld [vmem:[#allocation16_spill] sm:$0xff]  ;;  %v13010_v17 = vld [vmem:[#allocation9_spill] sm:$0xff] }
 0x5d3   : > { %v11950_v27 = vpop.permute.xlu0 %5434  ;;  %v5761_v12 = vadd.f32 %v5713_v57, %v5568_v4  ;;  %v5112_v4 = vsel %vm5097_vm6, %v12955_v63, %v13009_v42  ;;  %v5924_v57 = vmul.f32 %v12870_v43, %v5888_v15  ;;  %v6111_v38 = vmul.f32 %v12941_v58, %v6075_v9  ;;  %v13012_v63 = vld [vmem:[#allocation43_spill] sm:$0xff]  ;;  %v13016_v58 = vld [vmem:[#allocation6_spill] sm:$0xff] }
 0x5d4   : > { %12990 = vst [vmem:[#allocation97_spill] sm:$0xff] %v11950_v27 }
 0x5d5   : > { %v11946_v59 = vpop.permute.xlu1 %6252 }
 0x5d7   : > { %v11978_v55 = vpop.permute.xlu0 %5965 }
 0x5d9   : > { %v11980_v7 = vpop.permute.xlu1 %5816 }
 0x5da   : > { %12996 = vst [vmem:[#allocation114_spill] sm:$0xff] %v11980_v7  ;;  %v4875_v7 = vsel %vm11929_vm9, %v12999_v41, 0.0  ;;  %v5259_v41 = vsel %vm5251_vm2, %v12998_v56, %v13003_v13  ;;  %v4916_v56 = vmul.f32 %v12784_v21, %v4874_v5 }
 0x5db   : > { %v12025_v27 = vpop.permute.xlu0 %5983  ;;  %v4917_v13 = vmul.f32 %v12784_v21, %v4875_v7  ;;  %v5307_v37 = vsel %vm11961_vm4, %v5259_v41, 0.0  ;;  %v5342_v21 = vmul.f32 %v12807_v45, %v5306_v33  ;;  %v13007_v7 = vld [vmem:[#allocation15_spill] sm:$0xff]  ;;  %v5113_v41 = vsel %vm5097_vm6, %v13009_v42, %v13010_v17 }
 0x5dc   : > { %v5266_v40 = vsel %vm5251_vm2, %v12952_v14, %v13007_v7  ;;  %v5267_v0 = vsel %vm5251_vm2, %v13007_v7, %v13008_v44  ;;  %v4908_v33 = vmul.f32 %v10849_v11, %v4866_v3  ;;  %v4909_v14 = vmul.f32 %v10849_v11, %v4867_v60  ;;  %v13014_v60 = vld [vmem:[#allocation27_spill] sm:$0xff] }
 0x5dd   : > { %v12041_v5 = vpop.permute.xlu1 %6347  ;;  %v5315_v9 = vsel %vm11961_vm4, %v5267_v0, 0.0  ;;  %v5948_v3 = vadd.f32 %v5924_v57, %v5761_v12  ;;  %v5314_v11 = vsel %vm11957_vm15, %v5266_v40, 0.0  ;;  %v5161_v0 = vadd.f32 %v5113_v41, %v4917_v13 }
 0x5de   : > { %13006 = vst [vmem:[#allocation111_spill] sm:$0xff] %v12041_v5  ;;  %v13013_v5 = vld [vmem:[#allocation50_spill] sm:$0xff]  ;;  %v5343_v13 = vmul.f32 %v12807_v45, %v5307_v37  ;;  %v5351_v41 = vmul.f32 %v12787_v1, %v5315_v9  ;;  %v5359_v45 = vmul.f32 %v12932_v6, %v5323_v28  ;;  %v5169_v37 = vadd.f32 %v5121_v32, %v11966_v2  ;;  %v13020_v28 = vld [vmem:[#allocation45_spill] sm:$0xff] }
 0x5df   : > { %v6378_v8 = vpop.permute.xlu0 %6377  ;;  %v5105_v20 = vsel %vm5097_vm6, %v13013_v5, %v13012_v63  ;;  %v5104_v15 = vsel %vm5097_vm6, %v12954_v22, %v13013_v5  ;;  %v5160_v5 = vadd.f32 %v5112_v4, %v4916_v56  ;;  %v6135_v12 = vadd.f32 %v6111_v38, %v5948_v3  ;;  %v13019_v2 = vld [vmem:[#allocation102_spill] sm:$0xff]  ;;  %v13021_v32 = vld [vmem:[#allocation101_spill] sm:$0xff] }
 0x5e0   : > { %v6406_v7 = vsel %vm6385_vm10, %v13011_v25, %v6378_v8  ;;  %v6407_v44 = vsel %vm6385_vm10, %v6378_v8, %v11922_v48  ;;  %v13015_v25 = vld [vmem:[#allocation76_spill] sm:$0xff]  ;;  %v5152_v40 = vadd.f32 %v5104_v15, %v4908_v33  ;;  %v5153_v48 = vadd.f32 %v5105_v20, %v4909_v14 }
 0x5e1   : > { %v5454_v42 = vsel %vm5438_vm5, %v13015_v25, %v13014_v60  ;;  %v6454_v17 = vsel %vm11560_vm1, %v6406_v7, 0.0  ;;  %v6455_v8 = vsel %vm11731_vm13, %v6407_v44, 0.0  ;;  %v5453_v22 = vsel %vm5438_vm5, %v12958_v50, %v13015_v25  ;;  %v12087_v63 = vpop.permute.xlu1 %6365 }
 0x5e2   : > { %v6490_v7 = vmul.f32 %v13017_v49, %v6454_v17  ;;  %v6491_v44 = vmul.f32 %v13017_v49, %v6455_v8  ;;  %v5493_v4 = vsel %vm11936_vm12, %v5445_v39, 0.0  ;;  %v5350_v20 = vmul.f32 %v12787_v1, %v5314_v11 }
 0x5e3   : > { %v6251_v57 = vpop.permute.xlu0 %6250  ;;  %v5501_v38 = vsel %vm11936_vm12, %v5453_v22, 0.0  ;;  %v5168_v39 = vadd.f32 %v5120_v23, %v11974_v31  ;;  %v5375_v1 = vadd.f32 %v5351_v41, %v5161_v0  ;;  %v5366_v9 = vadd.f32 %v5342_v21, %v5152_v40  ;;  %v13022_v21 = vld [vmem:[#allocation96_spill] sm:$0xff] }
 0x5e4   : > { %v6279_v60 = vsel %vm6258_vm11, %v13016_v58, %v6251_v57  ;;  %v6280_v52 = vsel %vm6258_vm11, %v6251_v57, %v11946_v59  ;;  %v5502_v58 = vsel %vm11929_vm9, %v5454_v42, 0.0  ;;  %v5374_v3 = vadd.f32 %v5350_v20, %v5160_v5  ;;  %v13018_v42 = vld [vmem:[#allocation20_spill] sm:$0xff] }
 0x5e5   : > { %v6327_v50 = vadd.f32 %v6279_v60, %v11918_v53  ;;  %v6328_v56 = vadd.f32 %v6280_v52, %v6135_v12  ;;  %v5358_v53 = vmul.f32 %v12932_v6, %v5322_v16  ;;  %v5367_v11 = vadd.f32 %v5343_v13, %v5153_v48  ;;  %v12112_v25 = vpop.permute.xlu1 %5689  ;;  %v13024_v0 = vld [vmem:[#allocation108_spill] sm:$0xff] }
 0x5e6   : > { %v5530_v17 = vmul.f32 %v13018_v42, %v5494_v54  ;;  %v5529_v8 = vmul.f32 %v13018_v42, %v5493_v4  ;;  %v5538_v16 = vmul.f32 %v12967_v19, %v5502_v58  ;;  %v5537_v6 = vmul.f32 %v12967_v19, %v5501_v38  ;;  %v13027_v58 = vld [vmem:[#allocation90_spill] sm:$0xff]  ;;  %v13029_v38 = vld [vmem:[#allocation40_spill] sm:$0xff] }
 0x5e7   : > { %v6514_v33 = vadd.f32 %v6490_v7, %v6327_v50  ;;  %v6515_v14 = vadd.f32 %v6491_v44, %v6328_v56  ;;  %v12105_v15 = vpop.permute.xlu0 %5814  ;;  %v5825_v31 = vsel %vm5818_vm7, %v13019_v2, %v11896_v29  ;;  %v5826_v48 = vsel %vm5818_vm7, %v11896_v29, %v13020_v28 }
 0x5e8   : > { %v5833_v23 = vsel %vm5818_vm7, %v13021_v32, %v11900_v47  ;;  %v5834_v54 = vsel %vm5818_vm7, %v11900_v47, %v11844_v46  ;;  %vm13023_vm2 = vcmask 146432   ;;  %v12133_v22 = vadd.f32 %v5359_v45, %v5169_v37  ;;  %v13035_v32 = vld [vmem:[#allocation24_spill] sm:$0xff] }
 0x5e9   : > { %6995 = vmatprep.subr.msk.mxu1 %vm6539_vm3, %v6515_v14  ;;  %v12135_v5 = vadd.f32 %v5358_v53, %v5168_v39  ;;  %v5698_v29 = vsel %vm5691_vm8, %v13024_v0, %v11916_v36  ;;  %v5699_v12 = vsel %vm5691_vm8, %v11916_v36, %v11884_v18  ;;  %v13025_v57 = vmov 0.0   ;;  %v13026_v36 = vld [vmem:[#allocation94_spill] sm:$0xff]  ;;  %v6221_v41 = vpop.permute.xlu1 %6220  ;;  %vm13028_vm6 = vmmov %vm13023_vm2  ;;  %v13031_v39 = vld [vmem:[#allocation97_spill] sm:$0xff] }
 0x5ea   : > { %6996 = vmatpush1.msk.msra.mxu1 %vm6539_vm3, %v6514_v33  ;;  %v5553_v40 = vadd.f32 %v5529_v8, %v5366_v9  ;;  %v5554_v46 = vadd.f32 %v5530_v17, %v5367_v11  ;;  %v5561_v47 = vadd.f32 %v5537_v6, %v5374_v3  ;;  %v5562_v60 = vadd.f32 %v5538_v16, %v5375_v1  ;;  %v13032_v3 = vld [vmem:[#allocation65_spill] sm:$0xff] }
 0x5eb   : > { %6997 = vmatmul.mubr.msk.f32.vlgmr.msra.gmra.mrb[18].mxu1 %vm13023_vm2, %v13022_v21  ;;  %v6346_v19 = vpop.permute.xlu0 %6345  ;;  %v5873_v52 = vsel %vm11957_vm15, %v5825_v31, 0.0  ;;  %v5874_v7 = vsel %vm11961_vm4, %v5826_v48, 0.0  ;;  %v5881_v44 = vsel %vm11957_vm15, %v5833_v23, 0.0  ;;  %v5882_v50 = vsel %vm11961_vm4, %v5834_v54, 0.0  ;;  %v13033_v9 = vld [vmem:[#allocation57_spill] sm:$0xff]  ;;  %v13036_v21 = vld [vmem:[#allocation112_spill] sm:$0xff] }
 0x5ec   : > { %6788 = vmatprep.mubr.f32.mxu1 %v13025_v57  ;;  %v5746_v56 = vadd.f32 %v5698_v29, %v5553_v40  ;;  %v5747_v18 = vadd.f32 %v5699_v12, %v5554_v46  ;;  %v6012_v13 = vsel %vm6005_vm14, %v13026_v36, %v11978_v55  ;;  %v6013_v4 = vsel %vm6005_vm14, %v11978_v55, %v11902_v35  ;;  %v13030_v55 = vld [vmem:[#allocation22_spill] sm:$0xff]  ;;  %v13037_v29 = vld [vmem:[#allocation111_spill] sm:$0xff]  ;;  %v13038_v46 = vld [vmem:[#allocation100_spill] sm:$0xff] }
 0x5ed   : > { %v5706_v33 = vsel %vm5691_vm8, %v13029_v38, %v11927_v10  ;;  %v5707_v14 = vsel %vm5691_vm8, %v11927_v10, %v11894_v26  ;;  %v6020_v53 = vsel %vm6005_vm14, %v12971_v62, %v12025_v27  ;;  %v6021_v35 = vsel %vm6005_vm14, %v12025_v27, %v11914_v30  ;;  %v13034_v10 = vld [vmem:[#allocation23_spill] sm:$0xff]  ;;  %v6239_v40 = vpop.permute.xlu1 %6238  ;;  %v13041_v38 = vld [vmem:[#allocation18_spill] sm:$0xff] }
 0x5ee   : > { %v5909_v45 = vmul.f32 %v13030_v55, %v5873_v52  ;;  %v5910_v37 = vmul.f32 %v13030_v55, %v5874_v7  ;;  %v5461_v1 = vsel %vm5438_vm5, %v13032_v3, %v13031_v39  ;;  %v5462_v26 = vsel %vm5438_vm5, %v13031_v39, %v13033_v9  ;;  %v13039_v52 = vld [vmem:[#allocation68_spill] sm:$0xff]  ;;  %vm13051_vm5 = vmmov %vm13023_vm2 }
 0x5ef   : > { %v6364_v20 = vpop.permute.xlu0 %6363  ;;  %6998 = vmatmul.mubr.msk.f32.gmra.mrb[20].mxu1 %vm13028_vm6, %v13027_v58  ;;  %v5917_v62 = vmul.f32 %v13034_v10, %v5881_v44  ;;  %v5918_v11 = vmul.f32 %v13034_v10, %v5882_v50  ;;  %v6060_v27 = vsel %vm11936_vm12, %v6012_v13, 0.0  ;;  %v6061_v30 = vsel %vm11929_vm9, %v6013_v4, 0.0  ;;  %v13042_v55 = vld [vmem:[#allocation4_spill] sm:$0xff] }
 0x5f0   : > { %6859 = vmatprep.mubr.f32.mxu1 %v13025_v57  ;;  %v5754_v42 = vadd.f32 %v5706_v33, %v5561_v47  ;;  %v5755_v17 = vadd.f32 %v5707_v14, %v5562_v60  ;;  %v6068_v8 = vsel %vm11936_vm12, %v6020_v53, 0.0  ;;  %v6069_v16 = vsel %vm11929_vm9, %v6021_v35, 0.0  ;;  %v13044_v9 = vld [vmem:[#allocation92_spill] sm:$0xff] }
 0x5f1   : > { %v5933_v2 = vadd.f32 %v5909_v45, %v5746_v56  ;;  %v5934_v31 = vadd.f32 %v5910_v37, %v5747_v18  ;;  %v5509_v28 = vsel %vm11936_vm12, %v5461_v1, 0.0  ;;  %v5510_v48 = vsel %vm11929_vm9, %v5462_v26, 0.0  ;;  %v13040_v18 = vld [vmem:[#allocation19_spill] sm:$0xff]  ;;  %v13043_v37 = vld [vmem:[#allocation114_spill] sm:$0xff] }
 0x5f2   : > { %v6096_v23 = vmul.f32 %v13035_v32, %v6060_v27  ;;  %v6097_v54 = vmul.f32 %v13035_v32, %v6061_v30  ;;  %v6392_v0 = vsel %vm6385_vm10, %v13036_v21, %v6346_v19  ;;  %v6393_v12 = vsel %vm6385_vm10, %v6346_v19, %v13037_v29  ;;  %v6004_v27 = vpop.permute.xlu1 %6003  ;;  %v13045_v30 = vld [vmem:[#allocation93_spill] sm:$0xff] }
 0x5f3   : > { %v5688_v6 = vpop.permute.xlu0 %5687  ;;  %v6104_v47 = vmul.f32 %v13038_v46, %v6068_v8  ;;  %v6105_v60 = vmul.f32 %v13038_v46, %v6069_v16  ;;  %v6400_v7 = vsel %vm6385_vm10, %v13039_v52, %v6364_v20  ;;  %v6401_v44 = vsel %vm6385_vm10, %v6364_v20, %v12087_v63  ;;  %v13046_v8 = vld [vmem:[#allocation35_spill] sm:$0xff] }
 0x5f4   : > { %v5941_v50 = vadd.f32 %v5917_v62, %v5754_v42  ;;  %v5942_v56 = vadd.f32 %v5918_v11, %v5755_v17  ;;  %v5545_v36 = vmul.f32 %v13040_v18, %v5509_v28  ;;  %v5546_v13 = vmul.f32 %v13040_v18, %v5510_v48 }
 0x5f5   : > { %v6440_v19 = vsel %vm11957_vm15, %v6392_v0, 0.0  ;;  %v6441_v58 = vsel %vm11961_vm4, %v6393_v12, 0.0  ;;  %v6448_v63 = vsel %vm11957_vm15, %v6400_v7, 0.0  ;;  %v6449_v20 = vsel %vm11961_vm4, %v6401_v44, 0.0 }
 0x5f6   : > { %v6120_v53 = vadd.f32 %v6096_v23, %v5933_v2  ;;  %v6121_v35 = vadd.f32 %v6097_v54, %v5934_v31  ;;  %v5841_v45 = vsel %vm5818_vm7, %v13042_v55, %v12105_v15  ;;  %v5842_v39 = vsel %vm5818_vm7, %v12105_v15, %v13043_v37  ;;  %v13047_v15 = vld [vmem:[#allocation67_spill] sm:$0xff]  ;;  %vm13052_vm7 = vmmov %vm13023_vm2 }
 0x5f7   : > { %v6219_v4 = vpop.permute.xlu0 %6218  ;;  %v6128_v3 = vadd.f32 %v6104_v47, %v5941_v50  ;;  %v6129_v1 = vadd.f32 %v6105_v60, %v5942_v56  ;;  %v6477_v26 = vmul.f32 %v13044_v9, %v6441_v58  ;;  %v6484_v42 = vmul.f32 %v13045_v30, %v6448_v63 }
 0x5f8   : > { %v6265_v33 = vsel %vm6258_vm11, %v13041_v38, %v6219_v4  ;;  %v6266_v14 = vsel %vm6258_vm11, %v6219_v4, %v6221_v41  ;;  %v6476_v41 = vmul.f32 %v13044_v9, %v6440_v19  ;;  %v6485_v17 = vmul.f32 %v13045_v30, %v6449_v20  ;;  %v13050_v38 = vld [vmem:[#allocation103_spill] sm:$0xff] }
 0x5f9   : > { %v6313_v10 = vadd.f32 %v6265_v33, %v6120_v53  ;;  %v6314_v62 = vadd.f32 %v6266_v14, %v6121_v35  ;;  %v5714_v31 = vsel %vm5691_vm8, %v13047_v15, %v5688_v6  ;;  %v5715_v28 = vsel %vm5691_vm8, %v5688_v6, %v12112_v25  ;;  %v13048_v25 = vld [vmem:[#allocation38_spill] sm:$0xff] }
 0x5fa   : > { %v5889_v23 = vsel %vm11957_vm15, %v5841_v45, 0.0  ;;  %v5890_v54 = vsel %vm11961_vm4, %v5842_v39, 0.0  ;;  %v5569_v21 = vadd.f32 %v5545_v36, %v12135_v5  ;;  %v5570_v0 = vadd.f32 %v5546_v13, %v12133_v22  ;;  %v6384_v22 = vpop.permute.xlu1 %6383  ;;  %v13049_v13 = vld [vmem:[#allocation110_spill] sm:$0xff] }
 0x5fb   : > { %v6237_v11 = vpop.permute.xlu0 %6236  ;;  %v6500_v29 = vadd.f32 %v6476_v41, %v6313_v10  ;;  %v6501_v12 = vadd.f32 %v6477_v26, %v6314_v62  ;;  %v5925_v18 = vmul.f32 %v12870_v43, %v5889_v23  ;;  %v5926_v36 = vmul.f32 %v12870_v43, %v5890_v54 }
 0x5fc   : > { %v6273_v16 = vsel %vm6258_vm11, %v13046_v8, %v6237_v11  ;;  %v6274_v2 = vsel %vm6258_vm11, %v6237_v11, %v6239_v40  ;;  %v5762_v60 = vadd.f32 %v5714_v31, %v5569_v21  ;;  %v5763_v52 = vadd.f32 %v5715_v28, %v5570_v0 }
 0x5fd   : > { %v6321_v48 = vadd.f32 %v6273_v16, %v6128_v3  ;;  %v6322_v32 = vadd.f32 %v6274_v2, %v6129_v1 }
 0x5fe   : > { %v5949_v61 = vadd.f32 %v5925_v18, %v5762_v60  ;;  %v5950_v14 = vadd.f32 %v5926_v36, %v5763_v52  ;;  %v6257_v20 = vpop.permute.xlu1 %6256 }
 0x5ff   : > { %v6508_v40 = vadd.f32 %v6484_v42, %v6321_v48  ;;  %v6509_v46 = vadd.f32 %v6485_v17, %v6322_v32  ;;  %v6002_v47 = vpop.permute.xlu0 %6001 }
 0x600   : > { %v6028_v6 = vsel %vm6005_vm14, %v13048_v25, %v6002_v47  ;;  %v6029_v7 = vsel %vm6005_vm14, %v6002_v47, %v6004_v27 }
 0x601   : > { %v7120_v44 = vpack.c.bf16 %v6508_v40, %v6500_v29  ;;  %v6076_v50 = vsel %vm11936_vm12, %v6028_v6, 0.0  ;;  %v6077_v5 = vsel %vm11929_vm9, %v6029_v7, 0.0  ;;  %v7118_v56 = vpack.c.bf16 %v6509_v46, %v6501_v12 }
 0x602   : > { %v6112_v4 = vmul.f32 %v13049_v13, %v6076_v50  ;;  %v6113_v19 = vmul.f32 %v13049_v13, %v6077_v5 }
 0x603   : > { %7119 = vmatprep.subr.bf16.mxu1 %v7118_v56  ;;  %v6382_v58 = vpop.permute.xlu0 %6381 }
 0x604   : > { %v6408_v33 = vsel %vm6385_vm10, %v13050_v38, %v6382_v58  ;;  %v6409_v34 = vsel %vm6385_vm10, %v6382_v58, %v6384_v22  ;;  %7121 = vmatpush1.bf16.msra.mxu1 %v7120_v44  ;;  %v6136_v53 = vadd.f32 %v6112_v4, %v5949_v61  ;;  %v6137_v35 = vadd.f32 %v6113_v19, %v5950_v14 }
 0x605   : > { %v6456_v63 = vsel %vm11957_vm15, %v6408_v33, 0.0  ;;  %v6457_v43 = vsel %vm11961_vm4, %v6409_v34, 0.0 }
 0x606   : > { %v6492_v39 = vmul.f32 %v13017_v49, %v6456_v63  ;;  %v6493_v3 = vmul.f32 %v13017_v49, %v6457_v43 }
 0x607   : > { %v6255_v55 = vpop.permute.xlu0 %6254 }
 0x608   : > { %v6281_v45 = vsel %vm6258_vm11, %v11946_v59, %v6255_v55  ;;  %v6282_v37 = vsel %vm6258_vm11, %v6255_v55, %v6257_v20  ;;  %v7204_v59 = vld [vmem:[%s12305_s3 + $0x8] sm:$0xf] }
 0x609   : > { %v6329_v1 = vadd.f32 %v6281_v45, %v6136_v53  ;;  %v6330_v24 = vadd.f32 %v6282_v37, %v6137_v35 }
 0x60b   : > { %v6516_v9 = vadd.f32 %v6492_v39, %v6329_v1  ;;  %v6517_v41 = vadd.f32 %v6493_v3, %v6330_v24  ;;  %v6525_v49 = vpop.permute.xlu0 %6524 }
 0x60d   : > { %6999 = vmatprep.subr.msk.mxu1 %vm6539_vm3, %v6517_v41 }
 0x60e   : > { %7000 = vmatpush1.msk.msra.mxu1 %vm6539_vm3, %v6516_v9 }
 0x60f   : > { %7001 = vmatmul.mubr.msk.f32.vlgmr.msra.gmra.mrb[22].mxu1 %vm13051_vm5, %v7203_v51 }
 0x610   : > { %6865 = vmatprep.mubr.f32.mxu1 %v13025_v57 }
 0x613   : > { %7002 = vmatmul.mubr.msk.f32.gmra.mrb[24].mxu1 %vm13052_vm7, %v7204_v59 }
 0x63d   : > { %v6530_v27 = vpop.permute.xlu1 %6529 }
 0x641   : > { %v6630_v26 = vpop.f32.mrb[10].mxu1 }
 0x642   : > { %v6631_v10 = vadd.f32 %v6630_v26, %v6525_v49  ;;  %v6632_v57 = vpop.f32.mrb[11].mxu1 }
 0x643   : > { %v6633_v62 = vadd.f32 %v6632_v57, %v6525_v49 }
 0x644   : > { %6872 = vst [vmem:[%s12281_s21] sm:$0xff] %v6631_v10 }
 0x645   : > { %6873 = vst [vmem:[%s12281_s21 + $0x8] sm:$0xff] %v6633_v62  ;;  %v6636_v11 = vpop.f32.mrb[12].mxu1 }
 0x646   : > { %v6638_v30 = vpop.f32.mrb[13].mxu1  ;;  %v6637_v42 = vadd.f32 %v6636_v11, %v6530_v27 }
 0x647   : > { %v6639_v17 = vadd.f32 %v6638_v30, %v6530_v27 }
 0x648   : > { %6880 = vst [vmem:[%s12281_s21 + $0x40] sm:$0xf] %v6637_v42 }
 0x649   : > { %6881 = vst [vmem:[%s12281_s21 + $0x48] sm:$0xf] %v6639_v17 }
 0x67e   : > { %v6707_v8 = vpop.f32.mrb[14].mxu1 }
 0x67f   : > { %v6708_v16 = vadd.f32 %v6707_v8, %v6525_v49  ;;  %v6709_v2 = vpop.f32.mrb[15].mxu1 }
 0x680   : > { %v6710_v15 = vadd.f32 %v6709_v2, %v6525_v49 }
 0x681   : > { %6874 = vst [vmem:[%s12281_s21 + $0x10] sm:$0xff] %v6708_v16 }
 0x682   : > { %6875 = vst [vmem:[%s12281_s21 + $0x18] sm:$0xff] %v6710_v15  ;;  %v6713_v31 = vpop.f32.mrb[16].mxu1 }
 0x683   : > { %v6715_v28 = vpop.f32.mrb[17].mxu1  ;;  %v6714_v48 = vadd.f32 %v6713_v31, %v6530_v27 }
 0x684   : > { %v6716_v32 = vadd.f32 %v6715_v28, %v6530_v27 }
 0x685   : > { %6882 = vst [vmem:[%s12281_s21 + $0x50] sm:$0xf] %v6714_v48 }
 0x686   : > { %6883 = vst [vmem:[%s12281_s21 + $0x58] sm:$0xf] %v6716_v32 }
 0x6be   : > { %v6784_v23 = vpop.f32.mrb[18].mxu1 }
 0x6bf   : > { %v6785_v54 = vadd.f32 %v6784_v23, %v6525_v49  ;;  %v6786_v21 = vpop.f32.mrb[19].mxu1 }
 0x6c0   : > { %v6787_v0 = vadd.f32 %v6786_v21, %v6525_v49 }
 0x6c1   : > { %6876 = vst [vmem:[%s12281_s21 + $0x20] sm:$0xff] %v6785_v54 }
 0x6c2   : > { %6877 = vst [vmem:[%s12281_s21 + $0x28] sm:$0xff] %v6787_v0  ;;  %v6790_v29 = vpop.f32.mrb[20].mxu1 }
 0x6c3   : > { %v6791_v12 = vadd.f32 %v6790_v29, %v6530_v27  ;;  %v6792_v40 = vpop.f32.mrb[21].mxu1 }
 0x6c4   : > { %v6793_v46 = vadd.f32 %v6792_v40, %v6530_v27 }
 0x6c5   : > { %6884 = vst [vmem:[%s12281_s21 + $0x60] sm:$0xf] %v6791_v12 }
 0x6c6   : > { %6885 = vst [vmem:[%s12281_s21 + $0x68] sm:$0xf] %v6793_v46 }
 0x6e2   : > { %v6861_v47 = vpop.f32.mrb[22].mxu1 }
 0x6e3   : > { %v6862_v60 = vadd.f32 %v6861_v47, %v6525_v49  ;;  %v6863_v52 = vpop.f32.mrb[23].mxu1 }
 0x6e4   : > { %v6864_v25 = vadd.f32 %v6863_v52, %v6525_v49 }
 0x6e5   : > { %6878 = vst [vmem:[%s12281_s21 + $0x30] sm:$0xff] %v6862_v60 }
 0x6e6   : > { %6879 = vst [vmem:[%s12281_s21 + $0x38] sm:$0xff] %v6864_v25  ;;  %v6867_v6 = vpop.f32.mrb[24].mxu1 }
 0x6e7   : > { %v6868_v7 = vadd.f32 %v6867_v6, %v6530_v27  ;;  %v6869_v44 = vpop.f32.mrb[25].mxu1 }
 0x6e8   : > { %v6870_v50 = vadd.f32 %v6869_v44, %v6530_v27 }
 0x6e9   : > { %6886 = vst [vmem:[%s12281_s21 + $0x70] sm:$0xf] %v6868_v7 }
 0x6ea   : > { %6887 = vst [vmem:[%s12281_s21 + $0x78] sm:$0xf] %v6870_v50 }
 0x6eb PF: > { %s15_s18 = sadd.s32 1, %s7211_s18  }
 0x6ec   : > { %p12_p4 = scmp.ge.s32.totalorder %s15_s18, 4  }
 0x6ee   :  { %14 = sbr.rel (!%p12_p4) target bundleno = 1 (0x1), region = 70 }

</bundles_post_ra>
